<compile_context>
chip_gen: v5e
topology: v5e:2x2
jax: 0.10.0
libtpu: 0.0.40
codegen_flags: <defaults>
</compile_context>

<pallas_src>
import jax
import jax.numpy as jnp
from jax import lax
from jax.experimental import pallas as pl
from jax.experimental.pallas import tpu as pltpu


# ---------------------------------------------------------------------------
# Fused kernel: upconv -> interleave -> concat(bridge) -> conv3x3+ReLU x2
# ---------------------------------------------------------------------------
def _fused_up_block_kernel(x_ref, crop_ref, wup_ref, bup_ref, w1_ref, b1_ref,
                           w2_ref, b2_ref, o_ref, catp_ref, midp_ref):
    # x_ref:    (1, H,  W,  Cin)    input of the transposed conv
    # crop_ref: (1, Ho, Wo, Cbr)    center-cropped bridge (Ho=2H, Wo=2W)
    # wup_ref:  (Cin, 4*Cout)       ConvTranspose2d weight, cols ordered (ky,kx,co)
    # bup_ref:  (1, 4*Cout)
    # w1_ref:   (9*Ccat, Cmid)      conv1 weight, rows ordered (dy,dx,cin)
    # b1_ref:   (1, Cmid)
    # w2_ref:   (9*Cmid, Cmid)      conv2 weight, rows ordered (dy,dx,cin)
    # b2_ref:   (1, Cmid)
    # o_ref:    (1, Ho, Wo, Cmid)
    # catp_ref: (Ho+2, Wo+2, Ccat)  zero-halo scratch for conv1 input
    # midp_ref: (Ho+2, Wo+2, Cmid)  zero-halo scratch for conv2 input
    _, H, W, Cin = x_ref.shape
    _, Ho, Wo, Cmid = o_ref.shape
    Cbr = crop_ref.shape[3]
    Cout = Cmid
    Ccat = Cout + Cbr

    # --- re-zero only the 1-pixel halo (the interior is fully rewritten
    #     below every step; halo must be written per step so that each core
    #     is self-contained under megacore scheduling). ---
    catp_ref[0:1, :, :] = jnp.zeros((1, Wo + 2, Ccat), jnp.float32)
    catp_ref[Ho + 1:Ho + 2, :, :] = jnp.zeros((1, Wo + 2, Ccat), jnp.float32)
    catp_ref[:, 0:1, :] = jnp.zeros((Ho + 2, 1, Ccat), jnp.float32)
    catp_ref[:, Wo + 1:Wo + 2, :] = jnp.zeros((Ho + 2, 1, Ccat), jnp.float32)
    midp_ref[0:1, :, :] = jnp.zeros((1, Wo + 2, Cmid), jnp.float32)
    midp_ref[Ho + 1:Ho + 2, :, :] = jnp.zeros((1, Wo + 2, Cmid), jnp.float32)
    midp_ref[:, 0:1, :] = jnp.zeros((Ho + 2, 1, Cmid), jnp.float32)
    midp_ref[:, Wo + 1:Wo + 2, :] = jnp.zeros((Ho + 2, 1, Cmid), jnp.float32)

    # --- ConvTranspose2d(k=2, s=2): one matmul over all 4 taps, K = Cin ---
    # up[n, 2i+ky, 2j+kx, co] = b[co] + sum_ci x[n,i,j,ci] * W[ci,co,ky,kx]
    xf = x_ref[0].reshape(H * W, Cin)
    yu = jnp.dot(xf, wup_ref[...], preferred_element_type=jnp.float32) + bup_ref[...]

    # re-interleave taps (in registers, no HBM/XLA transpose):
    #   up[2i+ky, 2j+kx, :] = yu[i*W+j, (2*ky+kx)*Cout : (2*ky+kx+1)*Cout]
    kx_sel = lax.broadcasted_iota(jnp.int32, (H, W, 2, Cout), 2) == 0
    rows = []
    for ky in range(2):
        t0 = yu[:, (2 * ky + 0) * Cout:(2 * ky + 1) * Cout].reshape(H, W, 1, Cout)
        t1 = yu[:, (2 * ky + 1) * Cout:(2 * ky + 2) * Cout].reshape(H, W, 1, Cout)
        rows.append(jnp.where(kx_sel, t0, t1).reshape(H, Wo, Cout))   # kx interleave
    up = jnp.concatenate([rows[0][:, None], rows[1][:, None]], axis=1)
    up = up.reshape(Ho, Wo, Cout)                                      # ky interleave

    # --- channel concat with cropped bridge; stage into padded scratch ---
    cat = jnp.concatenate([up, crop_ref[0].astype(jnp.float32)], axis=-1)
    catp_ref[1:1 + Ho, 1:1 + Wo, :] = cat

    # --- conv1 (3x3, pad=1) + ReLU: single im2col matmul, K = 9*Ccat ---
    catp = catp_ref[...]
    p1 = jnp.concatenate(
        [catp[dy:dy + Ho, dx:dx + Wo, :].reshape(Ho * Wo, Ccat)
         for dy in range(3) for dx in range(3)], axis=-1)              # (Ho*Wo, 9*Ccat)
    h1 = jnp.maximum(
        jnp.dot(p1, w1_ref[...], preferred_element_type=jnp.float32) + b1_ref[...],
        0.0)

    midp_ref[1:1 + Ho, 1:1 + Wo, :] = h1.reshape(Ho, Wo, Cmid)

    # --- conv2 (3x3, pad=1) + ReLU: single im2col matmul, K = 9*Cmid ---
    midp = midp_ref[...]
    p2 = jnp.concatenate(
        [midp[dy:dy + Ho, dx:dx + Wo, :].reshape(Ho * Wo, Cmid)
         for dy in range(3) for dx in range(3)], axis=-1)              # (Ho*Wo, 9*Cmid)
    h2 = jnp.maximum(
        jnp.dot(p2, w2_ref[...], preferred_element_type=jnp.float32) + b2_ref[...],
        0.0)

    # Dropout2d(p=0.15) is identity in eval mode.
    # TODO(synk): training-mode channel dropout (PyTorch RNG) not reproduced.
    o_ref[0] = h2.reshape(Ho, Wo, Cmid).astype(o_ref.dtype)


# ---------------------------------------------------------------------------
# UNetUpBlock.forward
# ---------------------------------------------------------------------------
def unet_up_block_forward(params, x_nchw, bridge_nchw):
    N, Cin, H, W = x_nchw.shape
    Cout = params["up_w"].shape[1]
    Cmid = params["w1"].shape[0]
    Ho, Wo = 2 * H, 2 * W

    # center_crop(bridge, (Ho, Wo)) done on NCHW so XLA fuses the slice into
    # the layout transpose (no standalone HBM copy of the crop).
    dy = (bridge_nchw.shape[2] - Ho) // 2
    dx = (bridge_nchw.shape[3] - Wo) // 2
    crop_nchw = bridge_nchw[:, :, dy:dy + Ho, dx:dx + Wo]
    Cbr = crop_nchw.shape[1]
    Ccat = Cout + Cbr

    x = jnp.transpose(x_nchw, (0, 2, 3, 1))          # NHWC
    crop = jnp.transpose(crop_nchw, (0, 2, 3, 1))    # NHWC

    # Weight/bias prep (tiny, layout-only, done once per call).
    # ConvTranspose2d weight (Cin,Cout,2,2) -> (Cin, ky,kx,Cout) -> (Cin, 4*Cout)
    wup = jnp.transpose(params["up_w"], (0, 2, 3, 1)).reshape(Cin, 4 * Cout)
    bup = jnp.tile(params["up_b"], 4).reshape(1, 4 * Cout)
    # Conv2d weights (Cout,Cin,3,3) -> (dy,dx,Cin,Cout) -> (9*Cin, Cout)
    w1 = jnp.transpose(params["w1"], (2, 3, 1, 0)).reshape(9 * Ccat, Cmid)
    b1 = params["b1"].reshape(1, Cmid)
    w2 = jnp.transpose(params["w2"], (2, 3, 1, 0)).reshape(9 * Cmid, Cmid)
    b2 = params["b2"].reshape(1, Cmid)

    out_nhwc = pl.pallas_call(
        _fused_up_block_kernel,
        out_shape=jax.ShapeDtypeStruct((N, Ho, Wo, Cmid), x.dtype),
        grid=(N,),
        in_specs=[
            pl.BlockSpec((1, H, W, Cin), lambda n: (n, 0, 0, 0)),
            pl.BlockSpec((1, Ho, Wo, Cbr), lambda n: (n, 0, 0, 0)),
            pl.BlockSpec((Cin, 4 * Cout), lambda n: (0, 0)),
            pl.BlockSpec((1, 4 * Cout), lambda n: (0, 0)),
            pl.BlockSpec((9 * Ccat, Cmid), lambda n: (0, 0)),
            pl.BlockSpec((1, Cmid), lambda n: (0, 0)),
            pl.BlockSpec((9 * Cmid, Cmid), lambda n: (0, 0)),
            pl.BlockSpec((1, Cmid), lambda n: (0, 0)),
        ],
        out_specs=pl.BlockSpec((1, Ho, Wo, Cmid), lambda n: (n, 0, 0, 0)),
        scratch_shapes=[
            pltpu.VMEM((Ho + 2, Wo + 2, Ccat), jnp.float32),
            pltpu.VMEM((Ho + 2, Wo + 2, Cmid), jnp.float32),
        ],
        compiler_params=pltpu.CompilerParams(
            dimension_semantics=("parallel",),   # batch axis -> both TCs on v7x
            vmem_limit_bytes=48 * 1024 * 1024,
        ),
    )(x, crop, wup, bup, w1, b1, w2, b2)

    return jnp.transpose(out_nhwc, (0, 3, 1, 2))     # back to NCHW


# ---------------------------------------------------------------------------
# Pure-JAX (lax) NCHW reference, mirroring the PyTorch module in eval mode.
# ---------------------------------------------------------------------------
def torch_ref_forward(params, x, bridge):
    w_t = params["up_w"]                                          # (Cin, Cout, 2, 2)
    w = jnp.transpose(w_t[:, :, ::-1, ::-1], (1, 0, 2, 3))        # (Cout, Cin, 2, 2)
    up = lax.conv_general_dilated(
        x, w, window_strides=(1, 1), padding=((1, 1), (1, 1)),
        lhs_dilation=(2, 2), dimension_numbers=("NCHW", "OIHW", "NCHW"),
        precision=lax.Precision.HIGHEST,
    ) + params["up_b"][None, :, None, None]

    th, tw = up.shape[2], up.shape[3]
    dy = (bridge.shape[2] - th) // 2
    dx = (bridge.shape[3] - tw) // 2
    crop = bridge[:, :, dy:dy + th, dx:dx + tw]
    out = jnp.concatenate([up, crop], axis=1)

    def conv3x3(v, w, b):
        return lax.conv_general_dilated(
            v, w, (1, 1), ((1, 1), (1, 1)),
            dimension_numbers=("NCHW", "OIHW", "NCHW"),
            precision=lax.Precision.HIGHEST,
        ) + b[None, :, None, None]

    out = jnp.maximum(conv3x3(out, params["w1"], params["b1"]), 0.0)
    out = jnp.maximum(conv3x3(out, params["w2"], params["b2"]), 0.0)
    return out


if __name__ == "__main__":
    IN_SIZE, OUT_SIZE = 8, 4          # UNetUpBlock(in_size=8, out_size=4, 'upconv', True, False)
    N, H, W = 2, 8, 8                 # x spatial 8x8 -> upsampled 16x16
    BH, BW = 20, 20                   # bridge larger so center_crop is exercised

    key = jax.random.PRNGKey(0)
    ks = jax.random.split(key, 8)
    x = jax.random.normal(ks[0], (N, IN_SIZE, H, W), jnp.float32)
    bridge = jax.random.normal(ks[1], (N, IN_SIZE - OUT_SIZE, BH, BW), jnp.float32)

    params = {
        # ConvTranspose2d(in_size, out_size, 2, 2): weight (Cin, Cout, 2, 2)
        "up_w": 0.2 * jax.random.normal(ks[2], (IN_SIZE, OUT_SIZE, 2, 2), jnp.float32),
        "up_b": 0.1 * jax.random.normal(ks[3], (OUT_SIZE,), jnp.float32),
        # Conv2d(in_size, out_size, 3): weight (Cout, Cin, 3, 3)
        "w1": 0.2 * jax.random.normal(ks[4], (OUT_SIZE, IN_SIZE, 3, 3), jnp.float32),
        "b1": 0.1 * jax.random.normal(ks[5], (OUT_SIZE,), jnp.float32),
        # Conv2d(out_size, out_size, 3): weight (Cout, Cout, 3, 3)
        "w2": 0.2 * jax.random.normal(ks[6], (OUT_SIZE, OUT_SIZE, 3, 3), jnp.float32),
        "b2": 0.1 * jax.random.normal(ks[7], (OUT_SIZE,), jnp.float32),
    }

    out = jax.jit(unet_up_block_forward)(params, x, bridge)
    out = jax.block_until_ready(out)

    assert out.shape == (N, OUT_SIZE, 2 * H, 2 * W), out.shape
    ref = torch_ref_forward(params, x, bridge)
    max_err = float(jnp.max(jnp.abs(out - ref)))
    assert max_err < 2e-3, f"max abs err {max_err}"

    print("KERNEL_OK")
</pallas_src>

<mosaic_0001>
module attributes {stable_mosaic.version = 11 : i64} {
  func.func @_fused_up_block_kernel(%arg0: i32, %arg1: memref<1x8x8x8xf32, #tpu.memory_space<vmem>>, %arg2: memref<1x16x16x4xf32, #tpu.memory_space<vmem>>, %arg3: memref<8x16xf32, #tpu.memory_space<vmem>>, %arg4: memref<1x16xf32, #tpu.memory_space<vmem>>, %arg5: memref<72x4xf32, #tpu.memory_space<vmem>>, %arg6: memref<1x4xf32, #tpu.memory_space<vmem>>, %arg7: memref<36x4xf32, #tpu.memory_space<vmem>>, %arg8: memref<1x4xf32, #tpu.memory_space<vmem>>, %arg9: memref<1x16x16x4xf32, #tpu.memory_space<vmem>>, %arg10: memref<18x18x8xf32, #tpu.memory_space<vmem>>, %arg11: memref<18x18x4xf32, #tpu.memory_space<vmem>>) attributes {dimension_semantics = [#tpu.dimension_semantics<parallel>], iteration_bounds = array<i64: 2>, scalar_prefetch = 0 : i64, scratch_operands = 2 : i64, tpu.core_type = #tpu.core_type<tc>, window_params = [{transform_indices = @transform_0, window_bounds = array<i64: 1, 8, 8, 8>}, {transform_indices = @transform_1, window_bounds = array<i64: 1, 16, 16, 4>}, {pipeline_mode = #tpu.pipeline_mode<synchronous>, transform_indices = @transform_2, window_bounds = array<i64: 8, 16>}, {pipeline_mode = #tpu.pipeline_mode<synchronous>, transform_indices = @transform_3, window_bounds = array<i64: 1, 16>}, {pipeline_mode = #tpu.pipeline_mode<synchronous>, transform_indices = @transform_4, window_bounds = array<i64: 72, 4>}, {pipeline_mode = #tpu.pipeline_mode<synchronous>, transform_indices = @transform_5, window_bounds = array<i64: 1, 4>}, {pipeline_mode = #tpu.pipeline_mode<synchronous>, transform_indices = @transform_6, window_bounds = array<i64: 36, 4>}, {pipeline_mode = #tpu.pipeline_mode<synchronous>, transform_indices = @transform_7, window_bounds = array<i64: 1, 4>}, {transform_indices = @transform_8, window_bounds = array<i64: 1, 16, 16, 4>}]} {
    %cst = arith.constant 0.000000e+00 : f32
    %0 = vector.broadcast %cst : f32 to vector<1x18x8xf32>
    %c0 = arith.constant 0 : index
    %c0_0 = arith.constant 0 : index
    %c0_1 = arith.constant 0 : index
    %1 = vector.load %arg10[%c0, %c0_0, %c0_1] : memref<18x18x8xf32, #tpu.memory_space<vmem>>, vector<1x18x8xf32>
    tpu.vector_store %arg10[%c0, %c0_0, %c0_1], %0 {strides = array<i32>} : memref<18x18x8xf32, #tpu.memory_space<vmem>>, vector<1x18x8xf32>,
    %cst_2 = arith.constant 0.000000e+00 : f32
    %2 = vector.broadcast %cst_2 : f32 to vector<1x18x8xf32>
    %c17 = arith.constant 17 : index
    %c0_3 = arith.constant 0 : index
    %c0_4 = arith.constant 0 : index
    %3 = vector.load %arg10[%c17, %c0_3, %c0_4] : memref<18x18x8xf32, #tpu.memory_space<vmem>>, vector<1x18x8xf32>
    tpu.vector_store %arg10[%c17, %c0_3, %c0_4], %2 {strides = array<i32>} : memref<18x18x8xf32, #tpu.memory_space<vmem>>, vector<1x18x8xf32>,
    %cst_5 = arith.constant 0.000000e+00 : f32
    %4 = vector.broadcast %cst_5 : f32 to vector<18x1x8xf32>
    %c0_6 = arith.constant 0 : index
    %c0_7 = arith.constant 0 : index
    %c0_8 = arith.constant 0 : index
    %5 = vector.load %arg10[%c0_6, %c0_7, %c0_8] : memref<18x18x8xf32, #tpu.memory_space<vmem>>, vector<18x1x8xf32>
    tpu.vector_store %arg10[%c0_6, %c0_7, %c0_8], %4 {strides = array<i32>} : memref<18x18x8xf32, #tpu.memory_space<vmem>>, vector<18x1x8xf32>,
    %cst_9 = arith.constant 0.000000e+00 : f32
    %6 = vector.broadcast %cst_9 : f32 to vector<18x1x8xf32>
    %c0_10 = arith.constant 0 : index
    %c17_11 = arith.constant 17 : index
    %c0_12 = arith.constant 0 : index
    %7 = vector.load %arg10[%c0_10, %c17_11, %c0_12] : memref<18x18x8xf32, #tpu.memory_space<vmem>>, vector<18x1x8xf32>
    tpu.vector_store %arg10[%c0_10, %c17_11, %c0_12], %6 {strides = array<i32>} : memref<18x18x8xf32, #tpu.memory_space<vmem>>, vector<18x1x8xf32>,
    %cst_13 = arith.constant 0.000000e+00 : f32
    %8 = vector.broadcast %cst_13 : f32 to vector<1x18x4xf32>
    %c0_14 = arith.constant 0 : index
    %c0_15 = arith.constant 0 : index
    %c0_16 = arith.constant 0 : index
    %9 = vector.load %arg11[%c0_14, %c0_15, %c0_16] : memref<18x18x4xf32, #tpu.memory_space<vmem>>, vector<1x18x4xf32>
    tpu.vector_store %arg11[%c0_14, %c0_15, %c0_16], %8 {strides = array<i32>} : memref<18x18x4xf32, #tpu.memory_space<vmem>>, vector<1x18x4xf32>,
    %cst_17 = arith.constant 0.000000e+00 : f32
    %10 = vector.broadcast %cst_17 : f32 to vector<1x18x4xf32>
    %c17_18 = arith.constant 17 : index
    %c0_19 = arith.constant 0 : index
    %c0_20 = arith.constant 0 : index
    %11 = vector.load %arg11[%c17_18, %c0_19, %c0_20] : memref<18x18x4xf32, #tpu.memory_space<vmem>>, vector<1x18x4xf32>
    tpu.vector_store %arg11[%c17_18, %c0_19, %c0_20], %10 {strides = array<i32>} : memref<18x18x4xf32, #tpu.memory_space<vmem>>, vector<1x18x4xf32>,
    %cst_21 = arith.constant 0.000000e+00 : f32
    %12 = vector.broadcast %cst_21 : f32 to vector<18x1x4xf32>
    %c0_22 = arith.constant 0 : index
    %c0_23 = arith.constant 0 : index
    %c0_24 = arith.constant 0 : index
    %13 = vector.load %arg11[%c0_22, %c0_23, %c0_24] : memref<18x18x4xf32, #tpu.memory_space<vmem>>, vector<18x1x4xf32>
    tpu.vector_store %arg11[%c0_22, %c0_23, %c0_24], %12 {strides = array<i32>} : memref<18x18x4xf32, #tpu.memory_space<vmem>>, vector<18x1x4xf32>,
    %cst_25 = arith.constant 0.000000e+00 : f32
    %14 = vector.broadcast %cst_25 : f32 to vector<18x1x4xf32>
    %c0_26 = arith.constant 0 : index
    %c17_27 = arith.constant 17 : index
    %c0_28 = arith.constant 0 : index
    %15 = vector.load %arg11[%c0_26, %c17_27, %c0_28] : memref<18x18x4xf32, #tpu.memory_space<vmem>>, vector<18x1x4xf32>
    tpu.vector_store %arg11[%c0_26, %c17_27, %c0_28], %14 {strides = array<i32>} : memref<18x18x4xf32, #tpu.memory_space<vmem>>, vector<18x1x4xf32>,
    %c0_29 = arith.constant 0 : index
    %c0_30 = arith.constant 0 : index
    %c0_31 = arith.constant 0 : index
    %c0_32 = arith.constant 0 : index
    %16 = vector.load %arg1[%c0_29, %c0_30, %c0_31, %c0_32] : memref<1x8x8x8xf32, #tpu.memory_space<vmem>>, vector<1x8x8x8xf32>
    %17 = vector.shape_cast %16 : vector<1x8x8x8xf32> to vector<8x8x8xf32>
    %18 = vector.shape_cast %17 : vector<8x8x8xf32> to vector<64x8xf32>
    %c0_33 = arith.constant 0 : index
    %c0_34 = arith.constant 0 : index
    %19 = vector.load %arg3[%c0_33, %c0_34] : memref<8x16xf32, #tpu.memory_space<vmem>>, vector<8x16xf32>
    %cst_35 = arith.constant dense<0.000000e+00> : vector<64x16xf32>
    %20 = tpu.matmul %18, %19, %cst_35 {dimension_numbers = #tpu.dot_dimension_numbers<[1], [0], [0], [1], [0, 0, 1, 1], [], []>} : vector<64x8xf32>, vector<8x16xf32>, vector<64x16xf32> -> vector<64x16xf32>
    %c0_36 = arith.constant 0 : index
    %c0_37 = arith.constant 0 : index
    %21 = vector.load %arg4[%c0_36, %c0_37] : memref<1x16xf32, #tpu.memory_space<vmem>>, vector<1x16xf32>
    %22 = vector.broadcast %21 : vector<1x16xf32> to vector<64x16xf32>
    %23 = arith.addf %20, %22 : vector<64x16xf32>
    %24 = tpu.iota {dimensions = array<i32: 2>} : vector<8x8x2x4xi32>
    %c0_i32 = arith.constant 0 : i32
    %25 = vector.broadcast %c0_i32 : i32 to vector<8x8x2x4xi32>
    %26 = arith.cmpi eq, %24, %25 : vector<8x8x2x4xi32>
    %27 = vector.extract_strided_slice %23 {offsets = [0, 0], sizes = [64, 4], strides = [1, 1]} : vector<64x16xf32> to vector<64x4xf32>
    %28 = vector.shape_cast %27 : vector<64x4xf32> to vector<8x8x1x4xf32>
    %29 = vector.extract_strided_slice %23 {offsets = [0, 4], sizes = [64, 4], strides = [1, 1]} : vector<64x16xf32> to vector<64x4xf32>
    %30 = vector.shape_cast %29 : vector<64x4xf32> to vector<8x8x1x4xf32>
    %31 = vector.shape_cast %28 : vector<8x8x1x4xf32> to vector<8x8x1x4xf32>
    %32 = vector.broadcast %31 : vector<8x8x1x4xf32> to vector<8x8x2x4xf32>
    %33 = vector.shape_cast %30 : vector<8x8x1x4xf32> to vector<8x8x1x4xf32>
    %34 = vector.broadcast %33 : vector<8x8x1x4xf32> to vector<8x8x2x4xf32>
    %35 = arith.select %26, %32, %34 : vector<8x8x2x4xi1>, vector<8x8x2x4xf32>
    %36 = vector.shape_cast %35 : vector<8x8x2x4xf32> to vector<8x16x4xf32>
    %37 = vector.extract_strided_slice %23 {offsets = [0, 8], sizes = [64, 4], strides = [1, 1]} : vector<64x16xf32> to vector<64x4xf32>
    %38 = vector.shape_cast %37 : vector<64x4xf32> to vector<8x8x1x4xf32>
    %39 = vector.extract_strided_slice %23 {offsets = [0, 12], sizes = [64, 4], strides = [1, 1]} : vector<64x16xf32> to vector<64x4xf32>
    %40 = vector.shape_cast %39 : vector<64x4xf32> to vector<8x8x1x4xf32>
    %41 = vector.shape_cast %38 : vector<8x8x1x4xf32> to vector<8x8x1x4xf32>
    %42 = vector.broadcast %41 : vector<8x8x1x4xf32> to vector<8x8x2x4xf32>
    %43 = vector.shape_cast %40 : vector<8x8x1x4xf32> to vector<8x8x1x4xf32>
    %44 = vector.broadcast %43 : vector<8x8x1x4xf32> to vector<8x8x2x4xf32>
    %45 = arith.select %26, %42, %44 : vector<8x8x2x4xi1>, vector<8x8x2x4xf32>
    %46 = vector.shape_cast %45 : vector<8x8x2x4xf32> to vector<8x16x4xf32>
    %47 = vector.shape_cast %36 : vector<8x16x4xf32> to vector<8x1x16x4xf32>
    %48 = vector.shape_cast %46 : vector<8x16x4xf32> to vector<8x1x16x4xf32>
    %49 = tpu.concatenate %47, %48 in 1 : vector<8x1x16x4xf32>, vector<8x1x16x4xf32> -> vector<8x2x16x4xf32>
    %50 = vector.shape_cast %49 : vector<8x2x16x4xf32> to vector<16x16x4xf32>
    %c0_38 = arith.constant 0 : index
    %c0_39 = arith.constant 0 : index
    %c0_40 = arith.constant 0 : index
    %c0_41 = arith.constant 0 : index
    %51 = vector.load %arg2[%c0_38, %c0_39, %c0_40, %c0_41] : memref<1x16x16x4xf32, #tpu.memory_space<vmem>>, vector<1x16x16x4xf32>
    %52 = vector.shape_cast %51 : vector<1x16x16x4xf32> to vector<16x16x4xf32>
    %53 = tpu.concatenate %50, %52 in 2 : vector<16x16x4xf32>, vector<16x16x4xf32> -> vector<16x16x8xf32>
    %c1 = arith.constant 1 : index
    %c1_42 = arith.constant 1 : index
    %c0_43 = arith.constant 0 : index
    %54 = vector.load %arg10[%c1, %c1_42, %c0_43] : memref<18x18x8xf32, #tpu.memory_space<vmem>>, vector<16x16x8xf32>
    tpu.vector_store %arg10[%c1, %c1_42, %c0_43], %53 {strides = array<i32>} : memref<18x18x8xf32, #tpu.memory_space<vmem>>, vector<16x16x8xf32>,
    %c0_44 = arith.constant 0 : index
    %c0_45 = arith.constant 0 : index
    %c0_46 = arith.constant 0 : index
    %55 = vector.load %arg10[%c0_44, %c0_45, %c0_46] : memref<18x18x8xf32, #tpu.memory_space<vmem>>, vector<18x18x8xf32>
    %56 = vector.extract_strided_slice %55 {offsets = [0, 0, 0], sizes = [16, 16, 8], strides = [1, 1, 1]} : vector<18x18x8xf32> to vector<16x16x8xf32>
    %57 = vector.shape_cast %56 : vector<16x16x8xf32> to vector<256x8xf32>
    %58 = vector.extract_strided_slice %55 {offsets = [0, 1, 0], sizes = [16, 16, 8], strides = [1, 1, 1]} : vector<18x18x8xf32> to vector<16x16x8xf32>
    %59 = vector.shape_cast %58 : vector<16x16x8xf32> to vector<256x8xf32>
    %60 = vector.extract_strided_slice %55 {offsets = [0, 2, 0], sizes = [16, 16, 8], strides = [1, 1, 1]} : vector<18x18x8xf32> to vector<16x16x8xf32>
    %61 = vector.shape_cast %60 : vector<16x16x8xf32> to vector<256x8xf32>
    %62 = vector.extract_strided_slice %55 {offsets = [1, 0, 0], sizes = [16, 16, 8], strides = [1, 1, 1]} : vector<18x18x8xf32> to vector<16x16x8xf32>
    %63 = vector.shape_cast %62 : vector<16x16x8xf32> to vector<256x8xf32>
    %64 = vector.extract_strided_slice %55 {offsets = [1, 1, 0], sizes = [16, 16, 8], strides = [1, 1, 1]} : vector<18x18x8xf32> to vector<16x16x8xf32>
    %65 = vector.shape_cast %64 : vector<16x16x8xf32> to vector<256x8xf32>
    %66 = vector.extract_strided_slice %55 {offsets = [1, 2, 0], sizes = [16, 16, 8], strides = [1, 1, 1]} : vector<18x18x8xf32> to vector<16x16x8xf32>
    %67 = vector.shape_cast %66 : vector<16x16x8xf32> to vector<256x8xf32>
    %68 = vector.extract_strided_slice %55 {offsets = [2, 0, 0], sizes = [16, 16, 8], strides = [1, 1, 1]} : vector<18x18x8xf32> to vector<16x16x8xf32>
    %69 = vector.shape_cast %68 : vector<16x16x8xf32> to vector<256x8xf32>
    %70 = vector.extract_strided_slice %55 {offsets = [2, 1, 0], sizes = [16, 16, 8], strides = [1, 1, 1]} : vector<18x18x8xf32> to vector<16x16x8xf32>
    %71 = vector.shape_cast %70 : vector<16x16x8xf32> to vector<256x8xf32>
    %72 = vector.extract_strided_slice %55 {offsets = [2, 2, 0], sizes = [16, 16, 8], strides = [1, 1, 1]} : vector<18x18x8xf32> to vector<16x16x8xf32>
    %73 = vector.shape_cast %72 : vector<16x16x8xf32> to vector<256x8xf32>
    %74 = tpu.concatenate %57, %59, %61, %63, %65, %67, %69, %71, %73 in 1 : vector<256x8xf32>, vector<256x8xf32>, vector<256x8xf32>, vector<256x8xf32>, vector<256x8xf32>, vector<256x8xf32>, vector<256x8xf32>, vector<256x8xf32>, vector<256x8xf32> -> vector<256x72xf32>
    %c0_47 = arith.constant 0 : index
    %c0_48 = arith.constant 0 : index
    %75 = vector.load %arg5[%c0_47, %c0_48] : memref<72x4xf32, #tpu.memory_space<vmem>>, vector<72x4xf32>
    %cst_49 = arith.constant dense<0.000000e+00> : vector<256x4xf32>
    %76 = tpu.matmul %74, %75, %cst_49 {dimension_numbers = #tpu.dot_dimension_numbers<[1], [0], [0], [1], [0, 0, 1, 1], [], []>} : vector<256x72xf32>, vector<72x4xf32>, vector<256x4xf32> -> vector<256x4xf32>
    %c0_50 = arith.constant 0 : index
    %c0_51 = arith.constant 0 : index
    %77 = vector.load %arg6[%c0_50, %c0_51] : memref<1x4xf32, #tpu.memory_space<vmem>>, vector<1x4xf32>
    %78 = vector.broadcast %77 : vector<1x4xf32> to vector<256x4xf32>
    %79 = arith.addf %76, %78 : vector<256x4xf32>
    %cst_52 = arith.constant 0.000000e+00 : f32
    %80 = vector.broadcast %cst_52 : f32 to vector<256x4xf32>
    %81 = arith.maximumf %79, %80 : vector<256x4xf32>
    %82 = vector.shape_cast %81 : vector<256x4xf32> to vector<16x16x4xf32>
    %c1_53 = arith.constant 1 : index
    %c1_54 = arith.constant 1 : index
    %c0_55 = arith.constant 0 : index
    %83 = vector.load %arg11[%c1_53, %c1_54, %c0_55] : memref<18x18x4xf32, #tpu.memory_space<vmem>>, vector<16x16x4xf32>
    tpu.vector_store %arg11[%c1_53, %c1_54, %c0_55], %82 {strides = array<i32>} : memref<18x18x4xf32, #tpu.memory_space<vmem>>, vector<16x16x4xf32>,
    %c0_56 = arith.constant 0 : index
    %c0_57 = arith.constant 0 : index
    %c0_58 = arith.constant 0 : index
    %84 = vector.load %arg11[%c0_56, %c0_57, %c0_58] : memref<18x18x4xf32, #tpu.memory_space<vmem>>, vector<18x18x4xf32>
    %85 = vector.extract_strided_slice %84 {offsets = [0, 0, 0], sizes = [16, 16, 4], strides = [1, 1, 1]} : vector<18x18x4xf32> to vector<16x16x4xf32>
    %86 = vector.shape_cast %85 : vector<16x16x4xf32> to vector<256x4xf32>
    %87 = vector.extract_strided_slice %84 {offsets = [0, 1, 0], sizes = [16, 16, 4], strides = [1, 1, 1]} : vector<18x18x4xf32> to vector<16x16x4xf32>
    %88 = vector.shape_cast %87 : vector<16x16x4xf32> to vector<256x4xf32>
    %89 = vector.extract_strided_slice %84 {offsets = [0, 2, 0], sizes = [16, 16, 4], strides = [1, 1, 1]} : vector<18x18x4xf32> to vector<16x16x4xf32>
    %90 = vector.shape_cast %89 : vector<16x16x4xf32> to vector<256x4xf32>
    %91 = vector.extract_strided_slice %84 {offsets = [1, 0, 0], sizes = [16, 16, 4], strides = [1, 1, 1]} : vector<18x18x4xf32> to vector<16x16x4xf32>
    %92 = vector.shape_cast %91 : vector<16x16x4xf32> to vector<256x4xf32>
    %93 = vector.extract_strided_slice %84 {offsets = [1, 1, 0], sizes = [16, 16, 4], strides = [1, 1, 1]} : vector<18x18x4xf32> to vector<16x16x4xf32>
    %94 = vector.shape_cast %93 : vector<16x16x4xf32> to vector<256x4xf32>
    %95 = vector.extract_strided_slice %84 {offsets = [1, 2, 0], sizes = [16, 16, 4], strides = [1, 1, 1]} : vector<18x18x4xf32> to vector<16x16x4xf32>
    %96 = vector.shape_cast %95 : vector<16x16x4xf32> to vector<256x4xf32>
    %97 = vector.extract_strided_slice %84 {offsets = [2, 0, 0], sizes = [16, 16, 4], strides = [1, 1, 1]} : vector<18x18x4xf32> to vector<16x16x4xf32>
    %98 = vector.shape_cast %97 : vector<16x16x4xf32> to vector<256x4xf32>
    %99 = vector.extract_strided_slice %84 {offsets = [2, 1, 0], sizes = [16, 16, 4], strides = [1, 1, 1]} : vector<18x18x4xf32> to vector<16x16x4xf32>
    %100 = vector.shape_cast %99 : vector<16x16x4xf32> to vector<256x4xf32>
    %101 = vector.extract_strided_slice %84 {offsets = [2, 2, 0], sizes = [16, 16, 4], strides = [1, 1, 1]} : vector<18x18x4xf32> to vector<16x16x4xf32>
    %102 = vector.shape_cast %101 : vector<16x16x4xf32> to vector<256x4xf32>
    %103 = tpu.concatenate %86, %88, %90, %92, %94, %96, %98, %100, %102 in 1 : vector<256x4xf32>, vector<256x4xf32>, vector<256x4xf32>, vector<256x4xf32>, vector<256x4xf32>, vector<256x4xf32>, vector<256x4xf32>, vector<256x4xf32>, vector<256x4xf32> -> vector<256x36xf32>
    %c0_59 = arith.constant 0 : index
    %c0_60 = arith.constant 0 : index
    %104 = vector.load %arg7[%c0_59, %c0_60] : memref<36x4xf32, #tpu.memory_space<vmem>>, vector<36x4xf32>
    %cst_61 = arith.constant dense<0.000000e+00> : vector<256x4xf32>
    %105 = tpu.matmul %103, %104, %cst_61 {dimension_numbers = #tpu.dot_dimension_numbers<[1], [0], [0], [1], [0, 0, 1, 1], [], []>} : vector<256x36xf32>, vector<36x4xf32>, vector<256x4xf32> -> vector<256x4xf32>
    %c0_62 = arith.constant 0 : index
    %c0_63 = arith.constant 0 : index
    %106 = vector.load %arg8[%c0_62, %c0_63] : memref<1x4xf32, #tpu.memory_space<vmem>>, vector<1x4xf32>
    %107 = vector.broadcast %106 : vector<1x4xf32> to vector<256x4xf32>
    %108 = arith.addf %105, %107 : vector<256x4xf32>
    %cst_64 = arith.constant 0.000000e+00 : f32
    %109 = vector.broadcast %cst_64 : f32 to vector<256x4xf32>
    %110 = arith.maximumf %108, %109 : vector<256x4xf32>
    %111 = vector.shape_cast %110 : vector<256x4xf32> to vector<16x16x4xf32>
    %c0_65 = arith.constant 0 : index
    %c0_66 = arith.constant 0 : index
    %c0_67 = arith.constant 0 : index
    %c0_68 = arith.constant 0 : index
    %112 = vector.load %arg9[%c0_65, %c0_66, %c0_67, %c0_68] : memref<1x16x16x4xf32, #tpu.memory_space<vmem>>, vector<1x16x16x4xf32>
    %113 = vector.shape_cast %112 : vector<1x16x16x4xf32> to vector<16x16x4xf32>
    %114 = vector.shape_cast %111 : vector<16x16x4xf32> to vector<1x16x16x4xf32>
    tpu.vector_store %arg9[%c0_65, %c0_66, %c0_67, %c0_68], %114 {strides = array<i32>} : memref<1x16x16x4xf32, #tpu.memory_space<vmem>>, vector<1x16x16x4xf32>,
    return
  }
  func.func @transform_0(%arg0: i32) -> (i32, i32, i32, i32) {
    %c0_i32 = arith.constant 0 : i32
    %c0_i32_0 = arith.constant 0 : i32
    %c0_i32_1 = arith.constant 0 : i32
    %c0_i32_2 = arith.constant 0 : i32
    return %arg0, %c0_i32, %c0_i32_0, %c0_i32_1 : i32, i32, i32, i32
  }
  func.func @transform_1(%arg0: i32) -> (i32, i32, i32, i32) {
    %c0_i32 = arith.constant 0 : i32
    %c0_i32_0 = arith.constant 0 : i32
    %c0_i32_1 = arith.constant 0 : i32
    %c0_i32_2 = arith.constant 0 : i32
    return %arg0, %c0_i32, %c0_i32_0, %c0_i32_1 : i32, i32, i32, i32
  }
  func.func @transform_2(%arg0: i32) -> (i32, i32) {
    %c0_i32 = arith.constant 0 : i32
    %c0_i32_0 = arith.constant 0 : i32
    %c0_i32_1 = arith.constant 0 : i32
    return %c0_i32, %c0_i32_0 : i32, i32
  }
  func.func @transform_3(%arg0: i32) -> (i32, i32) {
    %c0_i32 = arith.constant 0 : i32
    %c0_i32_0 = arith.constant 0 : i32
    %c0_i32_1 = arith.constant 0 : i32
    return %c0_i32, %c0_i32_0 : i32, i32
  }
  func.func @transform_4(%arg0: i32) -> (i32, i32) {
    %c0_i32 = arith.constant 0 : i32
    %c0_i32_0 = arith.constant 0 : i32
    %c0_i32_1 = arith.constant 0 : i32
    return %c0_i32, %c0_i32_0 : i32, i32
  }
  func.func @transform_5(%arg0: i32) -> (i32, i32) {
    %c0_i32 = arith.constant 0 : i32
    %c0_i32_0 = arith.constant 0 : i32
    %c0_i32_1 = arith.constant 0 : i32
    return %c0_i32, %c0_i32_0 : i32, i32
  }
  func.func @transform_6(%arg0: i32) -> (i32, i32) {
    %c0_i32 = arith.constant 0 : i32
    %c0_i32_0 = arith.constant 0 : i32
    %c0_i32_1 = arith.constant 0 : i32
    return %c0_i32, %c0_i32_0 : i32, i32
  }
  func.func @transform_7(%arg0: i32) -> (i32, i32) {
    %c0_i32 = arith.constant 0 : i32
    %c0_i32_0 = arith.constant 0 : i32
    %c0_i32_1 = arith.constant 0 : i32
    return %c0_i32, %c0_i32_0 : i32, i32
  }
  func.func @transform_8(%arg0: i32) -> (i32, i32, i32, i32) {
    %c0_i32 = arith.constant 0 : i32
    %c0_i32_0 = arith.constant 0 : i32
    %c0_i32_1 = arith.constant 0 : i32
    %c0_i32_2 = arith.constant 0 : i32
    return %arg0, %c0_i32, %c0_i32_0, %c0_i32_1 : i32, i32, i32, i32
  }
}

</mosaic_0001>

<bundles_post_ra>
// kernel: tile.9
= control target key start
LH: loop header
LB: loop body
LE: loop exit
PB: predicated region body
PF: predicated region fallthrough
CT: control target
= control target key end

     0   :  { %s37_s8 = smov 4   ;;  %s38_s9 = smov 8   ;;  %vm7_vm0 = vcmask 31744   ;;  %vm13_vm1 = vcmask 130144   ;;  %vm19_vm2 = vcmask 97344   ;;  %vm25_vm3 = vcmask 64544   ;;  %s55_s0 = inlined_call_operand.vmem [shape: f32[4,4], index: 0, kind: input, shape index: {}]   ;;  %s56_s1 = inlined_call_operand.vmem [shape: f32[1,16], index: 1, kind: output, shape index: {}]  }
   0x1   :  { %v4_v0 = vld [vmem:[%s55_s0] sm:$0xf]  ;;  %s36_s0 = smov 12  }
   0x2   :  { %5 = vst [vmem:[#allocation1] sm:$0xf] %v4_v0 }
   0x9   :  { %v10_v1 = vld [vmem:[#allocation1 + $0x3] sm:$0x1]   ;;  %v22_v2 = vld [vmem:[#allocation1 + $0x1] sm:$0x1]   ;;  %v16_v3 = vld [vmem:[#allocation1 + $0x2] sm:$0x1]  }
   0xa   :  { %11 = vrot.lane.b32.xlu0 %v10_v1, %s36_s0  ;;  %23 = vrot.lane.b32.xlu1 %v22_v2, %s37_s8  ;;  %v6_v4 = vld [vmem:[#allocation1] sm:$0x1]  }
   0xb   :  { %8 = vst.msk [vmem:[#allocation0] sm:$0x1] %vm7_vm0, %v6_v4  }
  0x12   :  { %17 = vrot.lane.b32.xlu0 %v16_v3, %s38_s9 }
  0x7c   :  { %v12_v5 = vpop.permute.xlu0 %11   ;;  %v24_v6 = vpop.permute.xlu1 %23  }
  0x7d   :  { %14 = vst.msk [vmem:[#allocation0] sm:$0x1] %vm13_vm1, %v12_v5  }
  0x84   :  { %v18_v7 = vpop.permute.xlu0 %17  }
  0x85   :  { %20 = vst.msk [vmem:[#allocation0] sm:$0x1] %vm19_vm2, %v18_v7  }
  0x86   :  { %26 = vst.msk [vmem:[#allocation0] sm:$0x1] %vm25_vm3, %v24_v6  }
  0x8d   :  { %v29_v8 = vld [vmem:[#allocation0] sm:$0x1] }
  0x8e   :  { %32 = vst [vmem:[%s56_s1] sm:$0x1] %v29_v8 }

// kernel: tile.8
= control target key start
LH: loop header
LB: loop body
LE: loop exit
PB: predicated region body
PF: predicated region fallthrough
CT: control target
= control target key end

     0   :  { %2 = vsyncpa [#allocation1], 0  ;;  %s48_s8 = smov [#allocation0]   ;;  %s65_s0 = inlined_call_operand.hbm [shape: f32[4], index: 0, kind: input, shape index: {}]   ;;  %s66_s1 = inlined_call_operand.vmem [shape: f32[4,4], index: 1, kind: output, shape index: {}]  }
   0x1   :  { %s8_s0 = sshll.u32 %s65_s0, 4  ;;  %s10_s9 = sshll.u32 %s48_s8, 4  ;;  %s9_s0 = int_to_ptr.hbm [resolvable:$true] %s8_s0  ;;  %s11_s9 = int_to_ptr.vmem [resolvable:$true] %s10_s9 }
   0x2   :  { %13 = dma.hbm_to_vmem [thread:$0]  %s9_s0, 16, %s11_s9, [#allocation1]  }
   0x3   :  { %46 = dma.done.wait [#allocation1], 16  }
   0x4   :  { %47 = vsyncadd [#allocation1], 4294967280  ;;  %v18_v0 = vld [vmem:[#allocation0] ss:$0 sm:$0xff] }
   0x5   :  { %19 = vst [vmem:[%s66_s1] sm:$0xf] %v18_v0 }
   0x6   :  { %20 = vsyncpa [#allocation1], 1 }

// kernel: unet_up_block_forward.1
= control target key start
LH: loop header
LB: loop body
LE: loop exit
PB: predicated region body
PF: predicated region fallthrough
CT: control target
= control target key end

     0   :  { %s5105_s27 = smov 0   ;;  %s10390_s0 = inlined_call_operand.vmem [shape: f32[2,8,8,8], index: 0, kind: input, shape index: {}]   ;;  %s10391_s1 = inlined_call_operand.vmem [shape: f32[2,16,16,4], index: 1, kind: input, shape index: {}]   ;;  %s10392_s2 = inlined_call_operand.vmem [shape: f32[8,16], index: 2, kind: input, shape index: {}]   ;;  %s10393_s3 = inlined_call_operand.vmem [shape: f32[1,16], index: 3, kind: input, shape index: {}]   ;;  %s10394_s4 = inlined_call_operand.vmem [shape: f32[72,4], index: 4, kind: input, shape index: {}]   ;;  %s10395_s5 = inlined_call_operand.vmem [shape: f32[1,4], index: 5, kind: input, shape index: {}]   ;;  %s10396_s6 = inlined_call_operand.vmem [shape: f32[36,4], index: 6, kind: input, shape index: {}]   ;;  %s10397_s7 = inlined_call_operand.vmem [shape: f32[1,4], index: 7, kind: input, shape index: {}]   ;;  %s10398_s8 = inlined_call_operand.vmem [shape: f32[2,16,16,4], index: 8, kind: output, shape index: {}]  }
   0x1 LB: > { %s4841_s28 = sadd.s32 4294967295, %s5043_s27   ;;  %p4845_p0 = scmp.ge.s32.totalorder %s5043_s27, 1  ;;  %s5043_s27 = sphi %s5105_s27, %s18_s27  }
   0x2   : > { %p272_p1 = scmp.lt.s32.totalorder %s5043_s27, 3 }
   0x4   : > { %p273_p2 = pnand %p4845_p0, %p272_p1 }
   0x6   : > { %276 = sbr.rel (%p273_p2) target bundleno = 2494 (0x9be), region = 52 }
   0xb   : > { %v426_v0 = vld [vmem:[%s10392_s2] sm:$0xff]  ;;  %p311_p3 = scmp.lt.s32.totalorder %s4841_s28, 1  ;;  %vm326_vm0 = vcmask 64512   ;;  %s5045_s15 = smov 124   ;;  %vm372_vm2 = vcmask 31744   ;;  %vm335_vm3 = vcmask 57344  }
   0xc   : > { %470 = vmatpush.msra.mxu0 %v426_v0  ;;  %4930 = vmatpush.msra.mxu3 %v426_v0  ;;  %v5133_v9 = vld [vmem:[%s10393_s3] ss:$0 sm:$0xff]  ;;  %s5046_s16 = smov 120   ;;  %s5047_s21 = smov 4   ;;  %vm1665_vm4 = vcmask 1046528   ;;  %vm329_vm5 = vcmask 58368  }
   0xd   : > { %s11461_s28 = smov (!%p311_p3, %s4841_s28), 1  ;;  %s5049_s22 = smov 8   ;;  %vm1746_vm6 = vcmask 1045504   ;;  %vm2686_vm7 = vcmask 195584   ;;  %vm2653_vm8 = vcmask 130048   ;;  %vm2719_vm9 = vcmask 261120  }
   0xe   : > { %s4927_s9 = sshll.u32 %s11461_s28, 6  ;;  %s4928_s17 = sshll.u32 %s11461_s28, 8  ;;  %vm2785_vm10 = vcmask 392192   ;;  %vm2752_vm11 = vcmask 326656   ;;  %vm2818_vm12 = vcmask 457728   ;;  %vm2897_vm13 = vcmask 588800  }
   0xf   : > { %s315_s12 = scalar_lea.vmem %s10390_s0, %s4927_s9  ;;  %s6013_s20 = scalar_lea.vmem %s10391_s1, %s4928_s17  ;;  %vm2851_vm14 = vcmask 523264   ;;  %vm381_vm15 = vcmask 24576  }
  0x10   : > { %v418_v1 = vld [vmem:[%s315_s12] sm:$0xff]  ;;  %v424_v2 = vld [vmem:[%s315_s12 + $0x30] sm:$0xff]  ;;  %v419_v3 = vld [vmem:[%s315_s12 + $0x8] sm:$0xff]  ;;  %s5050_s23 = smov 16   ;;  %s5051_s24 = smov 24  }
  0x11   : > { %4852 = vmatmul.msk.f32.vlgmr.msra.gmra.mxu0 %vm326_vm0, %v418_v1  ;;  %4858 = vmatmul.msk.f32.vlgmr.msra.gmra.mxu3 %vm326_vm0, %v424_v2  ;;  %v425_v4 = vld [vmem:[%s315_s12 + $0x38] sm:$0xff]  ;;  %v420_v5 = vld [vmem:[%s315_s12 + $0x10] sm:$0xff]  ;;  %v422_v7 = vld [vmem:[%s315_s12 + $0x20] sm:$0xff]  ;;  %s5052_s25 = smov 32   ;;  %s5053_s26 = smov 40  }
  0x12   : > { %v421_v6 = vld [vmem:[%s315_s12 + $0x18] sm:$0xff]  ;;  %v423_v8 = vld [vmem:[%s315_s12 + $0x28] sm:$0xff]  ;;  %s5054_s29 = smov 48   ;;  %s5055_s30 = smov 56  }
  0x13   : > { %s5056_s9 = smov 64  }
  0x19   : > { %4853 = vmatmul.msk.f32.gmra.mxu0 %vm326_vm0, %v419_v3  ;;  %4859 = vmatmul.msk.f32.gmra.mxu3 %vm326_vm0, %v425_v4 }
  0x21   : > { %4854 = vmatmul.msk.f32.gmra.mxu0 %vm326_vm0, %v420_v5 }
  0x29   : > { %4855 = vmatmul.msk.f32.gmra.mxu0 %vm326_vm0, %v421_v6 }
  0x31   : > { %4856 = vmatmul.msk.f32.gmra.mxu0 %vm326_vm0, %v422_v7 }
  0x39   : > { %4857 = vmatmul.msk.f32.gmra.mxu0 %vm326_vm0, %v423_v8 }
  0x8e   : > { %v472_v10 = vpop.f32.mrf.mxu0 }
  0x8f   : > { %v5136_v11 = vadd.f32 %v5133_v9, %v472_v10 }
  0x91   : > { %v563_v12 = vperm.slane %v5136_v11, 0  ;;  %v510_v13 = vrot.slane %v5136_v11, 4  ;;  %v508_v14 = vrot.slane %v5136_v11, 2  ;;  %v507_v17 = vrot.slane %v5136_v11, 1 }
  0x92   : > { %v511_v18 = vrot.slane %v5136_v11, 5  ;;  %v509_v19 = vrot.slane %v5136_v11, 3  ;;  %v512_v25 = vrot.slane %v5136_v11, 6  ;;  %v513_v27 = vrot.slane %v5136_v11, 7 }
  0x93   : > { %691 = vrot.lane.b32.xlu0 %v563_v12, %s5045_s15  ;;  %v5144_v15 = vperm.slane %v510_v13, 0  ;;  %v5146_v16 = vperm.slane %v508_v14, 0  ;;  %v5155_v20 = vperm.slane %v507_v17, 0 }
  0x94   : > { %v5159_v22 = vperm.slane %v511_v18, 0  ;;  %v5161_v23 = vperm.slane %v509_v19, 0  ;;  %v490_v26 = vpop.f32.mrf.mxu3  ;;  %v5172_v28 = vperm.slane %v512_v25, 0  ;;  %v5180_v31 = vperm.slane %v513_v27, 0 }
  0x95   : > { %699 = vrot.lane.b32.xlu2 %v5144_v15, %s5045_s15  ;;  %695 = vrot.lane.b32.xlu1 %v5146_v16, %s5045_s15  ;;  %v5176_v30 = vadd.f32 %v5133_v9, %v490_v26  ;;  %v496_v27 = vlaneseq }
  0x96   : > { %v475_v21 = vpop.f32.mrf.mxu0 }
  0x97   : > { %v5168_v24 = vadd.f32 %v5133_v9, %v475_v21  ;;  %v550_v32 = vrot.slane %v5176_v30, 2  ;;  %v549_v33 = vrot.slane %v5176_v30, 1  ;;  %v10400_v34 = vperm.slane %v5176_v30, 0 }
  0x98   : > { %v551_v37 = vrot.slane %v5176_v30, 3  ;;  %v553_v38 = vrot.slane %v5176_v30, 5  ;;  %v552_v39 = vrot.slane %v5176_v30, 4  ;;  %v554_v43 = vrot.slane %v5176_v30, 6 }
  0x99   : > { %v10404_v29 = vperm.slane %v5168_v24, 0  ;;  %v5190_v35 = vperm.slane %v550_v32, 0  ;;  %v5192_v36 = vperm.slane %v549_v33, 0  ;;  %v516_v44 = vrot.slane %v5168_v24, 3 }
  0x9a   : > { %v5204_v40 = vperm.slane %v551_v37, 0  ;;  %v5208_v41 = vperm.slane %v553_v38, 0  ;;  %v5210_v42 = vperm.slane %v552_v39, 0  ;;  %v555_v45 = vrot.slane %v5176_v30, 7 }
  0x9b   : > { %693 = vrot.lane.b32.xlu0 %v5155_v20, %s5045_s15  ;;  %10608 = vst [vmem:[#allocation4_spill] sm:$0xff] %v5190_v35  ;;  %v5219_v46 = vperm.slane %v554_v43, 0  ;;  %v5221_v47 = vperm.slane %v516_v44, 0  ;;  %v514_v49 = vrot.slane %v5168_v24, 1  ;;  %v519_v51 = vrot.slane %v5168_v24, 6 }
  0x9c   : > { %10609 = vst [vmem:[#allocation5_spill] sm:$0xff] %v5204_v40  ;;  %v5225_v48 = vperm.slane %v555_v45, 0  ;;  %v515_v52 = vrot.slane %v5168_v24, 2  ;;  %v493_v53 = vpop.f32.mrf.mxu3  ;;  %v517_v57 = vrot.slane %v5168_v24, 4  ;;  %v518_v58 = vrot.slane %v5168_v24, 5 }
  0x9d   : > { %701 = vrot.lane.b32.xlu2 %v5159_v22, %s5045_s15  ;;  %697 = vrot.lane.b32.xlu1 %v5161_v23, %s5045_s15  ;;  %10610 = vst [vmem:[#allocation6_spill] sm:$0xff] %v5208_v41  ;;  %v5232_v50 = vperm.slane %v514_v49, 0  ;;  %v5238_v54 = vperm.slane %v519_v51, 0  ;;  %v5247_v56 = vadd.f32 %v5133_v9, %v493_v53  ;;  %v520_v0 = vrot.slane %v5168_v24, 7 }
  0x9e   : > { %10611 = vst [vmem:[#allocation7_spill] sm:$0xff] %v5210_v42  ;;  %v5240_v55 = vperm.slane %v515_v52, 0  ;;  %v5251_v59 = vperm.slane %v517_v57, 0  ;;  %v478_v61 = vpop.f32.mrf.mxu0  ;;  %v5256_v62 = vperm.slane %v518_v58, 0  ;;  %v5315_v38 = vshrl.u32 %v496_v27, 7 }
  0x9f   : > { %10612 = vst [vmem:[#allocation8_spill] sm:$0xff] %v5219_v46  ;;  %v10399_v60 = vperm.slane %v5247_v56, 0  ;;  %v5264_v63 = vadd.f32 %v5133_v9, %v478_v61  ;;  %v558_v1 = vrot.slane %v5247_v56, 3  ;;  %v5268_v2 = vperm.slane %v520_v0, 0 }
  0xa0   : > { %10613 = vst [vmem:[#allocation9_spill] sm:$0xff] %v5225_v48  ;;  %v556_v5 = vrot.slane %v5247_v56, 1  ;;  %v561_v7 = vrot.slane %v5247_v56, 6  ;;  %v557_v8 = vrot.slane %v5247_v56, 2  ;;  %v559_v14 = vrot.slane %v5247_v56, 4 }
  0xa1   : > { %10614 = vst [vmem:[#allocation10_spill] sm:$0xff] %v5247_v56  ;;  %v5270_v3 = vperm.slane %v558_v1, 0  ;;  %v10403_v4 = vperm.slane %v5264_v63, 0  ;;  %v521_v17 = vrot.slane %v5264_v63, 1  ;;  %v560_v18 = vrot.slane %v5247_v56, 5 }
  0xa2   : > { %v5281_v6 = vperm.slane %v556_v5, 0  ;;  %v5287_v10 = vperm.slane %v561_v7, 0  ;;  %v5289_v13 = vperm.slane %v557_v8, 0  ;;  %v5298_v19 = vperm.slane %v559_v14, 0 }
  0xa3   : > { %703 = vrot.lane.b32.xlu0 %v5172_v28, %s5045_s15  ;;  %10615 = vst [vmem:[#allocation11_spill] sm:$0xff] %v5270_v3  ;;  %v5302_v21 = vperm.slane %v521_v17, 0  ;;  %v5304_v25 = vperm.slane %v560_v18, 0  ;;  %v562_v26 = vrot.slane %v5247_v56, 7  ;;  %v524_v32 = vrot.slane %v5264_v63, 4 }
  0xa4   : > { %10616 = vst [vmem:[#allocation12_spill] sm:$0xff] %v5281_v6  ;;  %v523_v33 = vrot.slane %v5264_v63, 3  ;;  %v522_v44 = vrot.slane %v5264_v63, 2  ;;  %vm498_vm1 = vcmp.eq.s32.totalorder %v5315_v38, 0  ;;  %v527_v51 = vrot.slane %v5264_v63, 7 }
  0xa5   : > { %707 = vrot.lane.b32.xlu2 %v10404_v29, %s5045_s15  ;;  %705 = vrot.lane.b32.xlu1 %v5180_v31, %s5045_s15  ;;  %10617 = vst [vmem:[#allocation13_spill] sm:$0xff] %v5287_v10  ;;  %v5313_v37 = vperm.slane %v562_v26, 0  ;;  %v5319_v39 = vperm.slane %v524_v32, 0  ;;  %v526_v52 = vrot.slane %v5264_v63, 6 }
  0xa6   : > { %10618 = vst [vmem:[#allocation14_spill] sm:$0xff] %v5289_v13  ;;  %v5321_v43 = vperm.slane %v523_v33, 0  ;;  %v481_v45 = vpop.f32.mrf.mxu0  ;;  %v5336_v57 = vperm.slane %v522_v44, 0  ;;  %v5344_v61 = vperm.slane %v527_v51, 0 }
  0xa7   : > { %10619 = vst [vmem:[#allocation15_spill] sm:$0xff] %v5298_v19  ;;  %v5339_v58 = vadd.f32 %v5133_v9, %v481_v45  ;;  %v5346_v0 = vperm.slane %v526_v52, 0 }
  0xa8   : > { %10620 = vst [vmem:[#allocation16_spill] sm:$0xff] %v5304_v25 }
  0xa9   : > { %10621 = vst [vmem:[#allocation17_spill] sm:$0xff] %v5313_v37  ;;  %v529_v1 = vrot.slane %v5339_v58, 2  ;;  %v528_v5 = vrot.slane %v5339_v58, 1  ;;  %v532_v27 = vrot.slane %v5339_v58, 5  ;;  %v531_v32 = vrot.slane %v5339_v58, 4 }
  0xaa   : > { %v530_v52 = vrot.slane %v5339_v58, 3 }
  0xab   : > { %787 = vrot.lane.b32.xlu0 %v10400_v34, %s5045_s15  ;;  %v5357_v14 = vperm.slane %v529_v1, 0  ;;  %v5359_v17 = vperm.slane %v528_v5, 0  ;;  %v5381_v44 = vperm.slane %v532_v27, 0  ;;  %v5383_v45 = vperm.slane %v531_v32, 0 }
  0xac   : > { %v5408_v32 = vperm.slane %v530_v52, 0 }
  0xad   : > { %791 = vrot.lane.b32.xlu2 %v5190_v35, %s5045_s15  ;;  %789 = vrot.lane.b32.xlu1 %v5192_v36, %s5045_s15 }
  0xae   : > { %v484_v33 = vpop.f32.mrf.mxu0 }
  0xaf   : > { %v5390_v51 = vadd.f32 %v5133_v9, %v484_v33  ;;  %v533_v33 = vrot.slane %v5339_v58, 6 }
  0xb1   : > { %v10401_v11 = vperm.slane %v5390_v51, 0  ;;  %v536_v52 = vrot.slane %v5390_v51, 2  ;;  %v540_v29 = vrot.slane %v5390_v51, 6 }
  0xb3   : > { %793 = vrot.lane.b32.xlu0 %v5204_v40, %s5045_s15 }
  0xb5   : > { %797 = vrot.lane.b32.xlu2 %v5208_v41, %s5045_s15  ;;  %795 = vrot.lane.b32.xlu1 %v5210_v42, %s5045_s15 }
  0xbb   : > { %799 = vrot.lane.b32.xlu0 %v5219_v46, %s5045_s15 }
  0xbd   : > { %713 = vrot.lane.b32.xlu2 %v5221_v47, %s5045_s15  ;;  %801 = vrot.lane.b32.xlu1 %v5225_v48, %s5045_s15 }
  0xc3   : > { %709 = vrot.lane.b32.xlu0 %v5232_v50, %s5045_s15 }
  0xc5   : > { %719 = vrot.lane.b32.xlu2 %v5238_v54, %s5045_s15  ;;  %711 = vrot.lane.b32.xlu1 %v5240_v55, %s5045_s15 }
  0xcb   : > { %715 = vrot.lane.b32.xlu0 %v5251_v59, %s5045_s15 }
  0xcd   : > { %803 = vrot.lane.b32.xlu2 %v10399_v60, %s5045_s15  ;;  %717 = vrot.lane.b32.xlu1 %v5256_v62, %s5045_s15 }
  0xd3   : > { %721 = vrot.lane.b32.xlu0 %v5268_v2, %s5045_s15 }
  0xd5   : > { %809 = vrot.lane.b32.xlu2 %v5270_v3, %s5045_s15  ;;  %723 = vrot.lane.b32.xlu1 %v10403_v4, %s5045_s15  ;;  %v5441_v4 = vperm.slane %v536_v52, 0 }
  0xdb   : > { %805 = vrot.lane.b32.xlu0 %v5281_v6, %s5045_s15  ;;  %v541_v6 = vrot.slane %v5390_v51, 7 }
  0xdd   : > { %815 = vrot.lane.b32.xlu2 %v5287_v10, %s5045_s15  ;;  %807 = vrot.lane.b32.xlu1 %v5289_v13, %s5045_s15  ;;  %v5508_v46 = vperm.slane %v541_v6, 0 }
  0xe3   : > { %811 = vrot.lane.b32.xlu0 %v5298_v19, %s5045_s15 }
  0xe5   : > { %725 = vrot.lane.b32.xlu2 %v5302_v21, %s5045_s15  ;;  %813 = vrot.lane.b32.xlu1 %v5304_v25, %s5045_s15 }
  0xeb   : > { %817 = vrot.lane.b32.xlu0 %v5313_v37, %s5045_s15  ;;  %v539_v37 = vrot.slane %v5390_v51, 5 }
  0xed   : > { %731 = vrot.lane.b32.xlu2 %v5319_v39, %s5045_s15  ;;  %729 = vrot.lane.b32.xlu1 %v5321_v43, %s5045_s15 }
  0xef   : > { %v700_v49 = vpop.permute.xlu2 %699 }
  0xf0   : > { %v5334_v53 = vsel %vm498_vm1, %v5144_v15, %v700_v49  ;;  %v525_v15 = vrot.slane %v5264_v63, 5 }
  0xf1   : > { %1179 = vst [vmem:[#allocation1 + $0x20] ss:$4 sm:$0xff] %v5334_v53 }
  0xf2   : > { %v5355_v8 = vperm.slane %v525_v15, 0 }
  0xf3   : > { %727 = vrot.lane.b32.xlu0 %v5336_v57, %s5045_s15 }
  0xf5   : > { %737 = vrot.lane.b32.xlu2 %v5344_v61, %s5045_s15  ;;  %735 = vrot.lane.b32.xlu1 %v5346_v0, %s5045_s15 }
  0xf7   : > { %v702_v7 = vpop.permute.xlu2 %701 }
  0xf8   : > { %v5364_v18 = vsel %vm498_vm1, %v5159_v22, %v702_v7  ;;  %v10402_v22 = vperm.slane %v5339_v58, 0  ;;  %v534_v7 = vrot.slane %v5339_v58, 7 }
  0xf9   : > { %1181 = vst [vmem:[#allocation1 + $0x21] ss:$4 sm:$0xff] %v5364_v18 }
  0xfb   : > { %733 = vrot.lane.b32.xlu0 %v5355_v8, %s5045_s15 }
  0xfd   : > { %743 = vrot.lane.b32.xlu2 %v5357_v14, %s5045_s15  ;;  %741 = vrot.lane.b32.xlu1 %v5359_v17, %s5045_s15 }
  0xff   : > { %v5373_v26 = vpop.permute.xlu2 %707 }
 0x103   : > { %739 = vrot.lane.b32.xlu0 %v10402_v22, %s5045_s15 }
 0x105   : > { %v692_v49 = vpop.permute.xlu0 %691  ;;  %749 = vrot.lane.b32.xlu2 %v5381_v44, %s5045_s15  ;;  %747 = vrot.lane.b32.xlu1 %v5383_v45, %s5045_s15 }
 0x106   : > { %v5397_v15 = vsel %vm498_vm1, %v563_v12, %v692_v49  ;;  %v5414_v12 = vperm.slane %v534_v7, 0  ;;  %v537_v49 = vrot.slane %v5390_v51, 3 }
 0x107   : > { %v5399_v1 = vpop.permute.xlu2 %791  ;;  %v696_v5 = vpop.permute.xlu1 %695  ;;  %1171 = vst [vmem:[#allocation1] ss:$4 sm:$0xff] %v5397_v15 }
 0x108   : > { %10622 = vst [vmem:[#allocation18_spill] sm:$0xff] %v5399_v1  ;;  %v5406_v27 = vsel %vm498_vm1, %v5146_v16, %v696_v5  ;;  %v5439_v22 = vperm.slane %v537_v49, 0 }
 0x109   : > { %1175 = vst [vmem:[#allocation1 + $0x2] ss:$4 sm:$0xff] %v5406_v27 }
 0x10b   : > { %745 = vrot.lane.b32.xlu0 %v5408_v32, %s5045_s15 }
 0x10d   : > { %755 = vrot.lane.b32.xlu2 %v10401_v11, %s5045_s15  ;;  %753 = vrot.lane.b32.xlu1 %v5414_v12, %s5045_s15  ;;  %v694_v16 = vpop.permute.xlu0 %693  ;;  %v5437_v11 = vperm.slane %v533_v33, 0 }
 0x10e   : > { %v5427_v5 = vsel %vm498_vm1, %v5155_v20, %v694_v16  ;;  %v535_v20 = vrot.slane %v5390_v51, 1 }
 0x10f   : > { %v5429_v7 = vpop.permute.xlu2 %797  ;;  %v698_v60 = vpop.permute.xlu1 %697  ;;  %1173 = vst [vmem:[#allocation1 + $0x1] ss:$4 sm:$0xff] %v5427_v5 }
 0x110   : > { %10623 = vst [vmem:[#allocation19_spill] sm:$0xff] %v5429_v7  ;;  %v5435_v34 = vsel %vm498_vm1, %v5161_v23, %v698_v60  ;;  %v487_v60 = vpop.f32.mrf.mxu0  ;;  %v5458_v52 = vperm.slane %v535_v20, 0  ;;  %v5473_v20 = vperm.slane %v539_v37, 0 }
 0x111   : > { %1177 = vst [vmem:[#allocation1 + $0x3] ss:$4 sm:$0xff] %v5435_v34  ;;  %v5467_v19 = vadd.f32 %v5133_v9, %v487_v60 }
 0x113   : > { %751 = vrot.lane.b32.xlu0 %v5437_v11, %s5045_s15  ;;  %v542_v9 = vrot.slane %v5467_v19, 1  ;;  %v10416_v25 = vperm.slane %v5467_v19, 0 }
 0x115   : > { %761 = vrot.lane.b32.xlu2 %v5439_v22, %s5045_s15  ;;  %759 = vrot.lane.b32.xlu1 %v5441_v4, %s5045_s15  ;;  %v704_v23 = vpop.permute.xlu0 %703  ;;  %v5489_v37 = vperm.slane %v542_v9, 0  ;;  %v544_v9 = vrot.slane %v5467_v19, 3 }
 0x116   : > { %v5454_v16 = vsel %vm498_vm1, %v5172_v28, %v704_v23  ;;  %v5471_v28 = vperm.slane %v540_v29, 0 }
 0x117   : > { %v5456_v33 = vpop.permute.xlu2 %713  ;;  %v706_v49 = vpop.permute.xlu1 %705  ;;  %1183 = vst [vmem:[#allocation1 + $0x22] ss:$4 sm:$0xff] %v5454_v16  ;;  %v5512_v41 = vperm.slane %v544_v9, 0  ;;  %v547_v9 = vrot.slane %v5467_v19, 6 }
 0x118   : > { %v890_v10 = vsel %vm498_vm1, %v5180_v31, %v706_v49  ;;  %v538_v31 = vrot.slane %v5390_v51, 4 }
 0x119   : > { %1185 = vst [vmem:[#allocation1 + $0x23] ss:$4 sm:$0xff] %v890_v10  ;;  %v5535_v42 = vperm.slane %v547_v9, 0 }
 0x11a   : > { %v5487_v29 = vperm.slane %v538_v31, 0  ;;  %v545_v31 = vrot.slane %v5467_v19, 4 }
 0x11b   : > { %757 = vrot.lane.b32.xlu0 %v5458_v52, %s5045_s15 }
 0x11c   : > { %v5510_v48 = vperm.slane %v545_v31, 0  ;;  %v548_v31 = vrot.slane %v5467_v19, 7 }
 0x11d   : > { %767 = vrot.lane.b32.xlu2 %v5471_v28, %s5045_s15  ;;  %765 = vrot.lane.b32.xlu1 %v5473_v20, %s5045_s15  ;;  %v5479_v23 = vpop.permute.xlu0 %787 }
 0x11f   : > { %v5483_v60 = vpop.permute.xlu2 %719  ;;  %v5485_v49 = vpop.permute.xlu1 %789 }
 0x123   : > { %763 = vrot.lane.b32.xlu0 %v5487_v29, %s5045_s15 }
 0x125   : > { %773 = vrot.lane.b32.xlu2 %v5489_v37, %s5045_s15  ;;  %771 = vrot.lane.b32.xlu1 %v10416_v25, %s5045_s15  ;;  %v5499_v3 = vpop.permute.xlu0 %793 }
 0x126   : > { %10624 = vst [vmem:[#allocation20_spill] sm:$0xff] %v5499_v3  ;;  %v5533_v3 = vperm.slane %v548_v31, 0 }
 0x127   : > { %v5504_v13 = vpop.permute.xlu2 %803  ;;  %v5506_v56 = vpop.permute.xlu1 %795 }
 0x128   : > { %10625 = vst [vmem:[#allocation21_spill] sm:$0xff] %v5504_v13  ;;  %v543_v13 = vrot.slane %v5467_v19, 2 }
 0x129   : > { %10626 = vst [vmem:[#allocation22_spill] sm:$0xff] %v5506_v56 }
 0x12a   : > { %v5529_v40 = vperm.slane %v543_v13, 0 }
 0x12b   : > { %769 = vrot.lane.b32.xlu0 %v5508_v46, %s5045_s15 }
 0x12d   : > { %779 = vrot.lane.b32.xlu2 %v5510_v48, %s5045_s15  ;;  %777 = vrot.lane.b32.xlu1 %v5512_v41, %s5045_s15  ;;  %v5520_v25 = vpop.permute.xlu0 %799 }
 0x12e   : > { %10627 = vst [vmem:[#allocation23_spill] sm:$0xff] %v5520_v25  ;;  %v546_v25 = vrot.slane %v5467_v19, 5 }
 0x12f   : > { %v5523_v7 = vpop.permute.xlu2 %809  ;;  %v5525_v6 = vpop.permute.xlu1 %801 }
 0x130   : > { %10628 = vst [vmem:[#allocation24_spill] sm:$0xff] %v5523_v7  ;;  %v5544_v56 = vperm.slane %v546_v25, 0 }
 0x131   : > { %10629 = vst [vmem:[#allocation25_spill] sm:$0xff] %v5525_v6 }
 0x133   : > { %775 = vrot.lane.b32.xlu0 %v5529_v40, %s5045_s15 }
 0x135   : > { %785 = vrot.lane.b32.xlu2 %v5533_v3, %s5045_s15  ;;  %783 = vrot.lane.b32.xlu1 %v5535_v42, %s5045_s15  ;;  %v710_v7 = vpop.permute.xlu0 %709 }
 0x137   : > { %v5542_v6 = vpop.permute.xlu2 %815  ;;  %v712_v13 = vpop.permute.xlu1 %711 }
 0x138   : > { %10630 = vst [vmem:[#allocation26_spill] sm:$0xff] %v5542_v6 }
 0x13b   : > { %781 = vrot.lane.b32.xlu0 %v5544_v56, %s5045_s15 }
 0x13d   : > { %1011 = vrot.lane.b32.xlu1 %v5397_v15, %s5046_s16  ;;  %1013 = vrot.lane.b32.xlu2 %v5427_v5, %s5046_s16  ;;  %v716_v31 = vpop.permute.xlu0 %715 }
 0x13f   : > { %v726_v9 = vpop.permute.xlu2 %725  ;;  %v718_v35 = vpop.permute.xlu1 %717 }
 0x143   : > { %1015 = vrot.lane.b32.xlu0 %v5406_v27, %s5046_s16 }
 0x145   : > { %1017 = vrot.lane.b32.xlu1 %v5435_v34, %s5046_s16  ;;  %1019 = vrot.lane.b32.xlu2 %v5334_v53, %s5046_s16  ;;  %v722_v25 = vpop.permute.xlu0 %721  ;;  %v10631_v34 = vperm.slane %v5168_v24, 0 }
 0x147   : > { %v732_v6 = vpop.permute.xlu2 %731  ;;  %v724_v1 = vpop.permute.xlu1 %723  ;;  %v5572_v53 = vsel %vm498_vm1, %v10631_v34, %v5373_v26 }
 0x14b   : > { %1021 = vrot.lane.b32.xlu0 %v5364_v18, %s5046_s16  ;;  %v5584_v18 = vsel %vm498_vm1, %v5232_v50, %v710_v7  ;;  %v5605_v50 = vsel %vm498_vm1, %v5256_v62, %v718_v35  ;;  %v5610_v7 = vsel %vm498_vm1, %v5251_v59, %v716_v31  ;;  %v5622_v35 = vsel %vm498_vm1, %v5238_v54, %v5483_v60 }
 0x14c   : > { %v10632_v59 = vperm.slane %v5264_v63, 0  ;;  %v5635_v31 = vsel %vm498_vm1, %v5268_v2, %v722_v25  ;;  %v5644_v63 = vsel %vm498_vm1, %v5302_v21, %v726_v9 }
 0x14d   : > { %1025 = vrot.lane.b32.xlu2 %v890_v10, %s5046_s16  ;;  %1023 = vrot.lane.b32.xlu1 %v5454_v16, %s5046_s16  ;;  %v5563_v15 = vpop.permute.xlu0 %805  ;;  %v5579_v10 = vsel %vm498_vm1, %v5240_v55, %v712_v13  ;;  %v5598_v55 = vsel %vm498_vm1, %v5221_v47, %v5456_v33 }
 0x14e   : > { %v5630_v62 = vsel %vm498_vm1, %v10632_v59, %v724_v1  ;;  %v5665_v59 = vsel %vm498_vm1, %v5319_v39, %v732_v6 }
 0x14f   : > { %v738_v27 = vpop.permute.xlu2 %737  ;;  %v5565_v5 = vpop.permute.xlu1 %807 }
 0x153   : > { %1027 = vrot.lane.b32.xlu0 %v5572_v53, %s5046_s16 }
 0x155   : > { %1031 = vrot.lane.b32.xlu2 %v5579_v10, %s5046_s16  ;;  %1029 = vrot.lane.b32.xlu1 %v5584_v18, %s5046_s16  ;;  %v5590_v24 = vpop.permute.xlu0 %811 }
 0x157   : > { %v744_v26 = vpop.permute.xlu2 %743  ;;  %v5592_v16 = vpop.permute.xlu1 %813 }
 0x15b   : > { %1033 = vrot.lane.b32.xlu0 %v5598_v55, %s5046_s16 }
 0x15d   : > { %1037 = vrot.lane.b32.xlu2 %v5605_v50, %s5046_s16  ;;  %1035 = vrot.lane.b32.xlu1 %v5610_v7, %s5046_s16  ;;  %v5616_v47 = vpop.permute.xlu0 %817 }
 0x15f   : > { %v750_v33 = vpop.permute.xlu2 %749  ;;  %v730_v13 = vpop.permute.xlu1 %729 }
 0x160   : > { %v5651_v2 = vsel %vm498_vm1, %v5321_v43, %v730_v13 }
 0x163   : > { %1039 = vrot.lane.b32.xlu0 %v5622_v35, %s5046_s16 }
 0x165   : > { %1043 = vrot.lane.b32.xlu2 %v5630_v62, %s5046_s16  ;;  %1041 = vrot.lane.b32.xlu1 %v5635_v31, %s5046_s16  ;;  %v728_v54 = vpop.permute.xlu0 %727 }
 0x166   : > { %v5656_v1 = vsel %vm498_vm1, %v5336_v57, %v728_v54  ;;  %v5686_v54 = vsel %vm498_vm1, %v5344_v61, %v738_v27 }
 0x167   : > { %v756_v60 = vpop.permute.xlu2 %755  ;;  %v736_v34 = vpop.permute.xlu1 %735 }
 0x168   : > { %v5672_v43 = vsel %vm498_vm1, %v5346_v0, %v736_v34 }
 0x16b   : > { %1045 = vrot.lane.b32.xlu0 %v5644_v63, %s5046_s16 }
 0x16d   : > { %1049 = vrot.lane.b32.xlu2 %v5651_v2, %s5046_s16  ;;  %1047 = vrot.lane.b32.xlu1 %v5656_v1, %s5046_s16  ;;  %v734_v21 = vpop.permute.xlu0 %733 }
 0x16e   : > { %v5677_v57 = vsel %vm498_vm1, %v5355_v8, %v734_v21  ;;  %v10633_v8 = vperm.slane %v5339_v58, 0 }
 0x16f   : > { %v762_v9 = vpop.permute.xlu2 %761  ;;  %v742_v25 = vpop.permute.xlu1 %741 }
 0x170   : > { %v5693_v0 = vsel %vm498_vm1, %v5359_v17, %v742_v25  ;;  %v5708_v17 = vsel %vm498_vm1, %v5357_v14, %v744_v26 }
 0x173   : > { %1051 = vrot.lane.b32.xlu0 %v5665_v59, %s5046_s16 }
 0x175   : > { %1055 = vrot.lane.b32.xlu2 %v5672_v43, %s5046_s16  ;;  %1053 = vrot.lane.b32.xlu1 %v5677_v57, %s5046_s16  ;;  %v740_v39 = vpop.permute.xlu0 %739 }
 0x176   : > { %v5699_v34 = vsel %vm498_vm1, %v10633_v8, %v740_v39  ;;  %v5729_v8 = vsel %vm498_vm1, %v5381_v44, %v750_v33 }
 0x177   : > { %v768_v6 = vpop.permute.xlu2 %767  ;;  %v748_v13 = vpop.permute.xlu1 %747 }
 0x178   : > { %v5715_v58 = vsel %vm498_vm1, %v5383_v45, %v748_v13 }
 0x17b   : > { %1057 = vrot.lane.b32.xlu0 %v5686_v54, %s5046_s16 }
 0x17d   : > { %1061 = vrot.lane.b32.xlu2 %v5693_v0, %s5046_s16  ;;  %1059 = vrot.lane.b32.xlu1 %v5699_v34, %s5046_s16  ;;  %v746_v61 = vpop.permute.xlu0 %745 }
 0x17e   : > { %v5720_v25 = vsel %vm498_vm1, %v5408_v32, %v746_v61  ;;  %v10634_v61 = vperm.slane %v5390_v51, 0 }
 0x17f   : > { %v774_v27 = vpop.permute.xlu2 %773  ;;  %v754_v21 = vpop.permute.xlu1 %753 }
 0x180   : > { %v5736_v45 = vsel %vm498_vm1, %v5414_v12, %v754_v21  ;;  %v5751_v12 = vsel %vm498_vm1, %v10634_v61, %v756_v60  ;;  %v5769_v60 = vld.sshfl [vmem:[#allocation1] sm:$0xff pattern:$0x73625140] }
 0x183   : > { %1063 = vrot.lane.b32.xlu0 %v5708_v17, %s5046_s16 }
 0x185   : > { %1067 = vrot.lane.b32.xlu2 %v5715_v58, %s5046_s16  ;;  %1065 = vrot.lane.b32.xlu1 %v5720_v25, %s5046_s16  ;;  %v752_v14 = vpop.permute.xlu0 %751 }
 0x186   : > { %v5741_v32 = vsel %vm498_vm1, %v5437_v11, %v752_v14 }
 0x187   : > { %v780_v26 = vpop.permute.xlu2 %779  ;;  %v760_v39 = vpop.permute.xlu1 %759 }
 0x188   : > { %v5758_v11 = vsel %vm498_vm1, %v5441_v4, %v760_v39  ;;  %v5774_v4 = vsel %vm498_vm1, %v5439_v22, %v762_v9  ;;  %v5792_v9 = vld.sshfl [vmem:[#allocation1 + $0x20] sm:$0xff pattern:$0x73625140] }
 0x18b   : > { %1069 = vrot.lane.b32.xlu0 %v5729_v8, %s5046_s16 }
 0x18d   : > { %1073 = vrot.lane.b32.xlu2 %v5736_v45, %s5046_s16  ;;  %1071 = vrot.lane.b32.xlu1 %v5741_v32, %s5046_s16  ;;  %v758_v44 = vpop.permute.xlu0 %757 }
 0x18e   : > { %v5763_v21 = vsel %vm498_vm1, %v5458_v52, %v758_v44 }
 0x18f   : > { %v786_v33 = vpop.permute.xlu2 %785  ;;  %v766_v13 = vpop.permute.xlu1 %765 }
 0x190   : > { %v5781_v52 = vsel %vm498_vm1, %v5473_v20, %v766_v13  ;;  %v5797_v20 = vsel %vm498_vm1, %v5471_v28, %v768_v6 }
 0x193   : > { %1075 = vrot.lane.b32.xlu0 %v5751_v12, %s5046_s16 }
 0x195   : > { %1079 = vrot.lane.b32.xlu2 %v5758_v11, %s5046_s16  ;;  %1077 = vrot.lane.b32.xlu1 %v5763_v21, %s5046_s16  ;;  %v764_v51 = vpop.permute.xlu0 %763 }
 0x196   : > { %v5786_v39 = vsel %vm498_vm1, %v5487_v29, %v764_v51  ;;  %v10635_v29 = vperm.slane %v5467_v19, 0  ;;  %v5819_v19 = vsel %vm498_vm1, %v5489_v37, %v774_v27 }
 0x197   : > { %v772_v14 = vpop.permute.xlu1 %771  ;;  %v1014_v61 = vpop.permute.xlu2 %1013 }
 0x198   : > { %1189 = vst [vmem:[#allocation1 + $0x1] ss:$4 sm:$0xff] %v1014_v61  ;;  %v5805_v13 = vsel %vm498_vm1, %v10635_v29, %v772_v14 }
 0x19b   : > { %1081 = vrot.lane.b32.xlu0 %v5774_v4, %s5046_s16 }
 0x19d   : > { %1085 = vrot.lane.b32.xlu2 %v5781_v52, %s5046_s16  ;;  %1083 = vrot.lane.b32.xlu1 %v5786_v39, %s5046_s16  ;;  %v770_v22 = vpop.permute.xlu0 %769 }
 0x19e   : > { %v5810_v51 = vsel %vm498_vm1, %v5508_v46, %v770_v22 }
 0x19f   : > { %v778_v44 = vpop.permute.xlu1 %777  ;;  %v1020_v61 = vpop.permute.xlu2 %1019 }
 0x1a0   : > { %1192 = vst [vmem:[#allocation1 + $0x20] ss:$4 sm:$0xff] %v1020_v61  ;;  %v5826_v46 = vsel %vm498_vm1, %v5512_v41, %v778_v44  ;;  %v5840_v41 = vsel %vm498_vm1, %v5510_v48, %v780_v26 }
 0x1a3   : > { %1087 = vrot.lane.b32.xlu0 %v5797_v20, %s5046_s16 }
 0x1a5   : > { %1091 = vrot.lane.b32.xlu2 %v5805_v13, %s5046_s16  ;;  %1089 = vrot.lane.b32.xlu1 %v5810_v51, %s5046_s16  ;;  %v776_v28 = vpop.permute.xlu0 %775 }
 0x1a6   : > { %v5831_v14 = vsel %vm498_vm1, %v5529_v40, %v776_v28  ;;  %v10636_v28 = vperm.slane %v5176_v30, 0  ;;  %v10638_v30 = vld [vmem:[#allocation18_spill] sm:$0xff] }
 0x1a7   : > { %v784_v6 = vpop.permute.xlu1 %783  ;;  %v1026_v61 = vpop.permute.xlu2 %1025 }
 0x1a8   : > { %1195 = vst [vmem:[#allocation1 + $0x23] ss:$4 sm:$0xff] %v1026_v61  ;;  %v5847_v40 = vsel %vm498_vm1, %v5535_v42, %v784_v6  ;;  %v5861_v42 = vsel %vm498_vm1, %v5533_v3, %v786_v33  ;;  %v5876_v6 = vsel %vm498_vm1, %v10636_v28, %v5479_v23  ;;  %v10639_v23 = vld [vmem:[#allocation4_spill] sm:$0xff] }
 0x1ab   : > { %1093 = vrot.lane.b32.xlu0 %v5819_v19, %s5046_s16 }
 0x1ad   : > { %1097 = vrot.lane.b32.xlu2 %v5826_v46, %s5046_s16  ;;  %1095 = vrot.lane.b32.xlu1 %v5831_v14, %s5046_s16  ;;  %v782_v37 = vpop.permute.xlu0 %781 }
 0x1ae   : > { %v5852_v44 = vsel %vm498_vm1, %v5544_v56, %v782_v37  ;;  %v5869_v56 = vsel %vm498_vm1, %v5192_v36, %v5485_v49  ;;  %v5893_v49 = vsel %vm498_vm1, %v10639_v23, %v10638_v30  ;;  %v10640_v37 = vld [vmem:[#allocation22_spill] sm:$0xff] }
 0x1af   : > { %v1012_v27 = vpop.permute.xlu1 %1011  ;;  %v1032_v22 = vpop.permute.xlu2 %1031  ;;  %v10646_v30 = vld [vmem:[#allocation6_spill] sm:$0xff] }
 0x1b0   : > { %1188 = vst [vmem:[#allocation1] ss:$4 sm:$0xff] %v1012_v27  ;;  %v10641_v27 = vld [vmem:[#allocation7_spill] sm:$0xff] }
 0x1b3   : > { %1099 = vrot.lane.b32.xlu0 %v5840_v41, %s5046_s16 }
 0x1b5   : > { %1103 = vrot.lane.b32.xlu2 %v5847_v40, %s5046_s16  ;;  %1101 = vrot.lane.b32.xlu1 %v5852_v44, %s5046_s16  ;;  %v1016_v48 = vpop.permute.xlu0 %1015 }
 0x1b6   : > { %1190 = vst [vmem:[#allocation1 + $0x2] ss:$4 sm:$0xff] %v1016_v48 }
 0x1b7   : > { %v1018_v26 = vpop.permute.xlu1 %1017  ;;  %v1038_v29 = vpop.permute.xlu2 %1037 }
 0x1b8   : > { %1191 = vst [vmem:[#allocation1 + $0x3] ss:$4 sm:$0xff] %v1018_v26 }
 0x1bb   : > { %1105 = vrot.lane.b32.xlu0 %v5861_v42, %s5046_s16 }
 0x1bd   : > { %1109 = vrot.lane.b32.xlu2 %v5869_v56, %s5046_s16  ;;  %1107 = vrot.lane.b32.xlu1 %v5876_v6, %s5046_s16  ;;  %v1022_v3 = vpop.permute.xlu0 %1021 }
 0x1be   : > { %1193 = vst [vmem:[#allocation1 + $0x21] ss:$4 sm:$0xff] %v1022_v3 }
 0x1bf   : > { %v5882_v33 = vld.sshfl [vmem:[#allocation1] sm:$0xff pattern:$0x73625140]  ;;  %v5884_v61 = vpop.permute.xlu2 %1043  ;;  %v1024_v36 = vpop.permute.xlu1 %1023 }
 0x1c0   : > { %10637 = vst [vmem:[#allocation27_spill] sm:$0xff] %v5882_v33  ;;  %v10650_v33 = vld [vmem:[#allocation8_spill] sm:$0xff] }
 0x1c1   : > { %1198 = vst [vmem:[#allocation1] ss:$4 sm:$0xff] %v5572_v53  ;;  %v5902_v53 = vsel %vm498_vm1, %v10641_v27, %v10640_v37  ;;  %v10647_v27 = vld [vmem:[#allocation25_spill] sm:$0xff] }
 0x1c2   : > { %1199 = vst [vmem:[#allocation1 + $0x1] ss:$4 sm:$0xff] %v5584_v18  ;;  %v10642_v18 = vld [vmem:[#allocation20_spill] sm:$0xff] }
 0x1c3   : > { %1200 = vst [vmem:[#allocation1 + $0x2] ss:$4 sm:$0xff] %v5579_v10  ;;  %1111 = vrot.lane.b32.xlu0 %v5893_v49, %s5046_s16  ;;  %v10643_v10 = vld [vmem:[#allocation5_spill] sm:$0xff] }
 0x1c4   : > { %1201 = vst [vmem:[#allocation1 + $0x3] ss:$4 sm:$0xff] %v5598_v55  ;;  %v5908_v48 = vsel %vm498_vm1, %v10643_v10, %v10642_v18  ;;  %v10648_v18 = vld [vmem:[#allocation9_spill] sm:$0xff] }
 0x1c5   : > { %1194 = vst [vmem:[#allocation1 + $0x22] ss:$4 sm:$0xff] %v1024_v36  ;;  %1115 = vrot.lane.b32.xlu2 %v5902_v53, %s5046_s16  ;;  %1113 = vrot.lane.b32.xlu1 %v5908_v48, %s5046_s16  ;;  %v1028_v55 = vpop.permute.xlu0 %1027  ;;  %v10645_v36 = vld [vmem:[#allocation19_spill] sm:$0xff]  ;;  %v5931_v10 = vsel %vm498_vm1, %v10648_v18, %v10647_v27 }
 0x1c6   : > { %v5920_v23 = vsel %vm498_vm1, %v10646_v30, %v10645_v36 }
 0x1c7   : > { %v1050_v26 = vpop.permute.xlu2 %1049  ;;  %v1030_v28 = vpop.permute.xlu1 %1029 }
 0x1cb   : > { %v5914_v3 = vld.sshfl [vmem:[#allocation1] sm:$0xff pattern:$0x73625140]  ;;  %1117 = vrot.lane.b32.xlu0 %v5920_v23, %s5046_s16 }
 0x1cc   : > { %10644 = vst [vmem:[#allocation18_spill] sm:$0xff] %v5914_v3  ;;  %v5922_v37 = vld.sshfl [vmem:[#allocation1 + $0x20] sm:$0xff pattern:$0x73625140] }
 0x1cd   : > { %1210 = vst [vmem:[#allocation1 + $0x2] ss:$4 sm:$0xff] %v1032_v22  ;;  %v10649_v3 = vld [vmem:[#allocation23_spill] sm:$0xff]  ;;  %1121 = vrot.lane.b32.xlu2 %v5931_v10, %s5046_s16 }
 0x1ce   : > { %1202 = vst [vmem:[#allocation1 + $0x20] ss:$4 sm:$0xff] %v5610_v7  ;;  %v5937_v36 = vsel %vm498_vm1, %v10650_v33, %v10649_v3  ;;  %v1034_v7 = vpop.permute.xlu0 %1033  ;;  %v10651_v33 = vld [vmem:[#allocation21_spill] sm:$0xff]  ;;  %v10652_v3 = vld [vmem:[#allocation10_spill] sm:$0xff] }
 0x1cf   : > { %1203 = vst [vmem:[#allocation1 + $0x21] ss:$4 sm:$0xff] %v5605_v50  ;;  %1119 = vrot.lane.b32.xlu1 %v5937_v36, %s5046_s16  ;;  %v5946_v22 = vpop.permute.xlu2 %1055  ;;  %v1036_v30 = vpop.permute.xlu1 %1035  ;;  %v10653_v50 = vperm.slane %v10652_v3, 0 }
 0x1d0   : > { %1204 = vst [vmem:[#allocation1 + $0x22] ss:$4 sm:$0xff] %v5622_v35  ;;  %v10654_v35 = vld [vmem:[#allocation14_spill] sm:$0xff] }
 0x1d1   : > { %1205 = vst [vmem:[#allocation1 + $0x23] ss:$4 sm:$0xff] %v5635_v31  ;;  %v5953_v27 = vsel %vm498_vm1, %v10653_v50, %v10651_v33  ;;  %v5961_v31 = vsel %vm498_vm1, %v10654_v35, %v5565_v5  ;;  %v10657_v50 = vld [vmem:[#allocation11_spill] sm:$0xff] }
 0x1d2   : > { %1208 = vst [vmem:[#allocation1] ss:$4 sm:$0xff] %v1028_v55  ;;  %v10655_v55 = vld [vmem:[#allocation12_spill] sm:$0xff] }
 0x1d3   : > { %1209 = vst [vmem:[#allocation1 + $0x1] ss:$4 sm:$0xff] %v1030_v28  ;;  %1123 = vrot.lane.b32.xlu0 %v5953_v27, %s5046_s16  ;;  %v5967_v28 = vsel %vm498_vm1, %v10655_v55, %v5563_v15  ;;  %v10656_v15 = vld [vmem:[#allocation24_spill] sm:$0xff] }
 0x1d4   : > { %1211 = vst [vmem:[#allocation1 + $0x3] ss:$4 sm:$0xff] %v1034_v7  ;;  %v5984_v35 = vsel %vm498_vm1, %v10657_v50, %v10656_v15  ;;  %v1139_v15 = vld [vmem:[%s6013_s20] sm:$0xff]  ;;  %v10662_v50 = vld [vmem:[#allocation17_spill] sm:$0xff] }
 0x1d5   : > { %1127 = vrot.lane.b32.xlu2 %v5961_v31, %s5046_s16 }
 0x1d6   : > { %v1040_v18 = vpop.permute.xlu0 %1039 }
 0x1d7   : > { %1125 = vrot.lane.b32.xlu1 %v5967_v28, %s5046_s16  ;;  %v5975_v33 = vpop.permute.xlu2 %1061  ;;  %v1042_v5 = vpop.permute.xlu1 %1041 }
 0x1d8   : > { %v5973_v7 = vld.sshfl [vmem:[#allocation1 + $0x20] sm:$0xff pattern:$0x73625140] }
 0x1d9   : > { %1213 = vst [vmem:[#allocation1 + $0x21] ss:$4 sm:$0xff] %v1038_v29  ;;  %v10658_v29 = vld [vmem:[#allocation16_spill] sm:$0xff] }
 0x1da   : > { %1212 = vst [vmem:[#allocation1 + $0x20] ss:$4 sm:$0xff] %v1036_v30  ;;  %v5995_v30 = vsel %vm498_vm1, %v10658_v29, %v5592_v16  ;;  %v6032_v29 = vsel %vm498_vm1, %v10662_v50, %v5616_v47  ;;  %v1140_v47 = vld [vmem:[%s6013_s20 + $0x8] sm:$0xff]  ;;  %v1143_v50 = vld [vmem:[%s6013_s20 + $0x20] sm:$0xff] }
 0x1db   : > { %v5977_v3 = vld.sshfl [vmem:[#allocation1] sm:$0xff pattern:$0x73625140]  ;;  %1214 = vst [vmem:[#allocation1 + $0x22] ss:$4 sm:$0xff] %v1040_v18  ;;  %1129 = vrot.lane.b32.xlu0 %v5984_v35, %s5046_s16 }
 0x1dc   : > { %1218 = vst [vmem:[#allocation1] ss:$4 sm:$0xff] %v5630_v62  ;;  %v10659_v62 = vld [vmem:[#allocation15_spill] sm:$0xff] }
 0x1dd   : > { %1219 = vst [vmem:[#allocation1 + $0x1] ss:$4 sm:$0xff] %v5644_v63  ;;  %v6001_v55 = vsel %vm498_vm1, %v10659_v62, %v5590_v24  ;;  %1133 = vrot.lane.b32.xlu2 %v5995_v30, %s5046_s16 }
 0x1de   : > { %1220 = vst [vmem:[#allocation1 + $0x2] ss:$4 sm:$0xff] %v5656_v1  ;;  %v1046_v63 = vpop.permute.xlu0 %1045  ;;  %v10660_v1 = vld [vmem:[#allocation26_spill] sm:$0xff] }
 0x1df   : > { %1221 = vst [vmem:[#allocation1 + $0x3] ss:$4 sm:$0xff] %v5651_v2  ;;  %1131 = vrot.lane.b32.xlu1 %v6001_v55, %s5046_s16  ;;  %v6015_v16 = vpop.permute.xlu2 %1067  ;;  %v1048_v24 = vpop.permute.xlu1 %1047  ;;  %v10661_v2 = vld [vmem:[#allocation13_spill] sm:$0xff] }
 0x1e0   : > { %1215 = vst [vmem:[#allocation1 + $0x23] ss:$4 sm:$0xff] %v1042_v5  ;;  %v6021_v18 = vsel %vm498_vm1, %v10661_v2, %v10660_v1  ;;  %vm375_vm1 = vcmask 25600  }
 0x1e1   : > { %10663 = vst [vmem:[#allocation4_spill] sm:$0xff] %v6032_v29 }
 0x1e3   : > { %1135 = vrot.lane.b32.xlu0 %v6021_v18, %s5046_s16 }
 0x1e5   : > { %1402 = vrot.lane.b32.xlu2 %v1139_v15, %s5047_s21  ;;  %v1141_v15 = vld [vmem:[%s6013_s20 + $0x10] sm:$0xff] }
 0x1e6   : > { %v6026_v5 = vld.sshfl [vmem:[#allocation1] sm:$0xff pattern:$0x73625140]  ;;  %v1052_v1 = vpop.permute.xlu0 %1051 }
 0x1e7   : > { %1231 = vst [vmem:[#allocation1 + $0x3] ss:$4 sm:$0xff] %v1050_v26  ;;  %v6034_v62 = vld.sshfl [vmem:[#allocation1 + $0x20] sm:$0xff pattern:$0x73625140]  ;;  %1137 = vrot.lane.b32.xlu1 %v6032_v29, %s5046_s16  ;;  %v6041_v2 = vpop.permute.xlu2 %1073  ;;  %v1054_v38 = vpop.permute.xlu1 %1053  ;;  %v1142_v26 = vld [vmem:[%s6013_s20 + $0x18] sm:$0xff] }
 0x1e8   : > { %1228 = vst [vmem:[#allocation1] ss:$4 sm:$0xff] %v5884_v61 }
 0x1e9   : > { %1222 = vst [vmem:[#allocation1 + $0x20] ss:$4 sm:$0xff] %v5665_v59 }
 0x1ea   : > { %1223 = vst [vmem:[#allocation1 + $0x21] ss:$4 sm:$0xff] %v5677_v57 }
 0x1eb   : > { %1224 = vst [vmem:[#allocation1 + $0x22] ss:$4 sm:$0xff] %v5672_v43  ;;  %1404 = vrot.lane.b32.xlu0 %v1140_v47, %s5047_s21  ;;  %v1145_v43 = vld [vmem:[%s6013_s20 + $0x30] sm:$0xff] }
 0x1ec   : > { %1225 = vst [vmem:[#allocation1 + $0x23] ss:$4 sm:$0xff] %v5686_v54  ;;  %v1144_v54 = vld [vmem:[%s6013_s20 + $0x28] sm:$0xff] }
 0x1ed   : > { %1229 = vst [vmem:[#allocation1 + $0x1] ss:$4 sm:$0xff] %v1046_v63  ;;  %1408 = vrot.lane.b32.xlu2 %v1142_v26, %s5047_s21 }
 0x1ee   : > { %1230 = vst [vmem:[#allocation1 + $0x2] ss:$4 sm:$0xff] %v1048_v24  ;;  %v1058_v59 = vpop.permute.xlu0 %1057 }
 0x1ef   : > { %1406 = vrot.lane.b32.xlu1 %v1141_v15, %s5047_s21  ;;  %v6052_v61 = vpop.permute.xlu2 %1079  ;;  %v1060_v57 = vpop.permute.xlu1 %1059 }
 0x1f3   : > { %v6055_v29 = vld.sshfl [vmem:[#allocation1 + $0x20] sm:$0xff pattern:$0x73625140]  ;;  %1410 = vrot.lane.b32.xlu0 %v1143_v50, %s5047_s21 }
 0x1f4   : > { %1234 = vst [vmem:[#allocation1 + $0x22] ss:$4 sm:$0xff] %v5946_v22  ;;  %v1151_v50 = vld [vmem:[%s6013_s20 + $0x60] sm:$0xff] }
 0x1f5   : > { %v6060_v63 = vld.sshfl [vmem:[#allocation1] sm:$0xff pattern:$0x73625140]  ;;  %1232 = vst [vmem:[#allocation1 + $0x20] ss:$4 sm:$0xff] %v1052_v1  ;;  %1414 = vrot.lane.b32.xlu2 %v1145_v43, %s5047_s21  ;;  %v1146_v1 = vld [vmem:[%s6013_s20 + $0x38] sm:$0xff] }
 0x1f6   : > { %1240 = vst [vmem:[#allocation1 + $0x2] ss:$4 sm:$0xff] %v5708_v17  ;;  %v1064_v24 = vpop.permute.xlu0 %1063  ;;  %v1148_v17 = vld [vmem:[%s6013_s20 + $0x48] sm:$0xff]  ;;  %v1150_v43 = vld [vmem:[%s6013_s20 + $0x58] sm:$0xff] }
 0x1f7   : > { %1238 = vst [vmem:[#allocation1] ss:$4 sm:$0xff] %v5699_v34  ;;  %1412 = vrot.lane.b32.xlu1 %v1144_v54, %s5047_s21  ;;  %v6069_v22 = vpop.permute.xlu2 %1085  ;;  %v1066_v47 = vpop.permute.xlu1 %1065  ;;  %v1147_v34 = vld [vmem:[%s6013_s20 + $0x40] sm:$0xff]  ;;  %v1152_v54 = vld [vmem:[%s6013_s20 + $0x68] sm:$0xff] }
 0x1f8   : > { %1239 = vst [vmem:[#allocation1 + $0x1] ss:$4 sm:$0xff] %v5693_v0 }
 0x1f9   : > { %1241 = vst [vmem:[#allocation1 + $0x3] ss:$4 sm:$0xff] %v5720_v25 }
 0x1fa   : > { %1233 = vst [vmem:[#allocation1 + $0x21] ss:$4 sm:$0xff] %v1054_v38 }
 0x1fb   : > { %1235 = vst [vmem:[#allocation1 + $0x23] ss:$4 sm:$0xff] %v1058_v59  ;;  %1416 = vrot.lane.b32.xlu0 %v1146_v1, %s5047_s21  ;;  %v1149_v59 = vld [vmem:[%s6013_s20 + $0x50] sm:$0xff] }
 0x1fc   : > { %v1153_v1 = vld [vmem:[%s6013_s20 + $0x70] sm:$0xff] }
 0x1fd   : > { %1420 = vrot.lane.b32.xlu2 %v1148_v17, %s5047_s21 }
 0x1fe   : > { %v1070_v0 = vpop.permute.xlu0 %1069 }
 0x1ff   : > { %1418 = vrot.lane.b32.xlu1 %v1147_v34, %s5047_s21  ;;  %v6079_v25 = vpop.permute.xlu2 %1091  ;;  %v1072_v15 = vpop.permute.xlu1 %1071  ;;  %v1156_v34 = vld [vmem:[%s6013_s20 + $0x88] sm:$0xff] }
 0x200   : > { %v6077_v26 = vld.sshfl [vmem:[#allocation1] sm:$0xff pattern:$0x73625140] }
 0x201   : > { %1248 = vst [vmem:[#allocation1] ss:$4 sm:$0xff] %v1060_v57 }
 0x202   : > { %v6081_v38 = vld.sshfl [vmem:[#allocation1 + $0x20] sm:$0xff pattern:$0x73625140]  ;;  %1249 = vst [vmem:[#allocation1 + $0x1] ss:$4 sm:$0xff] %v5975_v33 }
 0x203   : > { %1242 = vst [vmem:[#allocation1 + $0x20] ss:$4 sm:$0xff] %v5715_v58  ;;  %1422 = vrot.lane.b32.xlu0 %v1149_v59, %s5047_s21 }
 0x204   : > { %1243 = vst [vmem:[#allocation1 + $0x21] ss:$4 sm:$0xff] %v5729_v8  ;;  %v1154_v8 = vld [vmem:[%s6013_s20 + $0x78] sm:$0xff] }
 0x205   : > { %1244 = vst [vmem:[#allocation1 + $0x22] ss:$4 sm:$0xff] %v5741_v32  ;;  %1426 = vrot.lane.b32.xlu2 %v1151_v50, %s5047_s21  ;;  %v1158_v50 = vld [vmem:[%s6013_s20 + $0x98] sm:$0xff] }
 0x206   : > { %1245 = vst [vmem:[#allocation1 + $0x23] ss:$4 sm:$0xff] %v5736_v45  ;;  %v1076_v33 = vpop.permute.xlu0 %1075 }
 0x207   : > { %1250 = vst [vmem:[#allocation1 + $0x2] ss:$4 sm:$0xff] %v1064_v24  ;;  %1424 = vrot.lane.b32.xlu1 %v1150_v43, %s5047_s21  ;;  %v6094_v57 = vpop.permute.xlu2 %1097  ;;  %v1078_v58 = vpop.permute.xlu1 %1077 }
 0x208   : > { %1251 = vst [vmem:[#allocation1 + $0x3] ss:$4 sm:$0xff] %v1066_v47 }
 0x20b   : > { %1428 = vrot.lane.b32.xlu0 %v1152_v54, %s5047_s21  ;;  %v1163_v54 = vld [vmem:[%s6013_s20 + $0xc0] sm:$0xff] }
 0x20d   : > { %v6099_v17 = vld.sshfl [vmem:[#allocation1 + $0x20] sm:$0xff pattern:$0x73625140]  ;;  %1432 = vrot.lane.b32.xlu2 %v1154_v8, %s5047_s21  ;;  %v1162_v8 = vld [vmem:[%s6013_s20 + $0xb8] sm:$0xff] }
 0x20e   : > { %1255 = vst [vmem:[#allocation1 + $0x23] ss:$4 sm:$0xff] %v6041_v2  ;;  %v1082_v32 = vpop.permute.xlu0 %1081  ;;  %v1155_v2 = vld [vmem:[%s6013_s20 + $0x80] sm:$0xff] }
 0x20f   : > { %1252 = vst [vmem:[#allocation1 + $0x20] ss:$4 sm:$0xff] %v6015_v16  ;;  %v6104_v45 = vld.sshfl [vmem:[#allocation1] sm:$0xff pattern:$0x73625140]  ;;  %1430 = vrot.lane.b32.xlu1 %v1153_v1, %s5047_s21  ;;  %v6110_v24 = vpop.permute.xlu2 %1103  ;;  %v1084_v47 = vpop.permute.xlu1 %1083  ;;  %v1157_v16 = vld [vmem:[%s6013_s20 + $0x90] sm:$0xff] }
 0x210   : > { %1261 = vst [vmem:[#allocation1 + $0x3] ss:$4 sm:$0xff] %v5774_v4 }
 0x211   : > { %1258 = vst [vmem:[#allocation1] ss:$4 sm:$0xff] %v5751_v12 }
 0x212   : > { %1259 = vst [vmem:[#allocation1 + $0x1] ss:$4 sm:$0xff] %v5763_v21 }
 0x213   : > { %1260 = vst [vmem:[#allocation1 + $0x2] ss:$4 sm:$0xff] %v5758_v11  ;;  %1434 = vrot.lane.b32.xlu0 %v1155_v2, %s5047_s21  ;;  %v1160_v11 = vld [vmem:[%s6013_s20 + $0xa8] sm:$0xff]  ;;  %v1166_v2 = vld [vmem:[%s6013_s20 + $0xd8] sm:$0xff] }
 0x214   : > { %1253 = vst [vmem:[#allocation1 + $0x21] ss:$4 sm:$0xff] %v1070_v0 }
 0x215   : > { %1254 = vst [vmem:[#allocation1 + $0x22] ss:$4 sm:$0xff] %v1072_v15  ;;  %1438 = vrot.lane.b32.xlu2 %v1157_v16, %s5047_s21  ;;  %v1159_v15 = vld [vmem:[%s6013_s20 + $0xa0] sm:$0xff]  ;;  %v1165_v16 = vld [vmem:[%s6013_s20 + $0xd0] sm:$0xff] }
 0x216   : > { %v1088_v12 = vpop.permute.xlu0 %1087 }
 0x217   : > { %1436 = vrot.lane.b32.xlu1 %v1156_v34, %s5047_s21  ;;  %v6120_v4 = vpop.permute.xlu2 %1109  ;;  %v1090_v59 = vpop.permute.xlu1 %1089 }
 0x21a   : > { %v6122_v21 = vld.sshfl [vmem:[#allocation1] sm:$0xff pattern:$0x73625140] }
 0x21b   : > { %1268 = vst [vmem:[#allocation1] ss:$4 sm:$0xff] %v1076_v33  ;;  %1440 = vrot.lane.b32.xlu0 %v1158_v50, %s5047_s21  ;;  %v1168_v50 = vld [vmem:[%s6013_s20 + $0xe8] sm:$0xff] }
 0x21c   : > { %v6126_v0 = vld.sshfl [vmem:[#allocation1 + $0x20] sm:$0xff pattern:$0x73625140]  ;;  %1270 = vst [vmem:[#allocation1 + $0x2] ss:$4 sm:$0xff] %v6052_v61 }
 0x21d   : > { %1264 = vst [vmem:[#allocation1 + $0x22] ss:$4 sm:$0xff] %v5797_v20  ;;  %1444 = vrot.lane.b32.xlu2 %v1160_v11, %s5047_s21  ;;  %v1161_v20 = vld [vmem:[%s6013_s20 + $0xb0] sm:$0xff] }
 0x21e   : > { %1262 = vst [vmem:[#allocation1 + $0x20] ss:$4 sm:$0xff] %v5786_v39  ;;  %v1094_v43 = vpop.permute.xlu0 %1093 }
 0x21f   : > { %1263 = vst [vmem:[#allocation1 + $0x21] ss:$4 sm:$0xff] %v5781_v52  ;;  %1442 = vrot.lane.b32.xlu1 %v1159_v15, %s5047_s21  ;;  %v6137_v33 = vpop.permute.xlu2 %1115  ;;  %v1096_v61 = vpop.permute.xlu1 %1095 }
 0x220   : > { %1265 = vst [vmem:[#allocation1 + $0x23] ss:$4 sm:$0xff] %v5810_v51 }
 0x221   : > { %1269 = vst [vmem:[#allocation1 + $0x1] ss:$4 sm:$0xff] %v1078_v58 }
 0x222   : > { %1271 = vst [vmem:[#allocation1 + $0x3] ss:$4 sm:$0xff] %v1082_v32  ;;  %v1164_v32 = vld [vmem:[%s6013_s20 + $0xc8] sm:$0xff] }
 0x223   : > { %1446 = vrot.lane.b32.xlu0 %v1161_v20, %s5047_s21 }
 0x225   : > { %1450 = vrot.lane.b32.xlu2 %v1163_v54, %s5047_s21 }
 0x226   : > { %v1100_v39 = vpop.permute.xlu0 %1099 }
 0x227   : > { %v6143_v52 = vld.sshfl [vmem:[#allocation1 + $0x20] sm:$0xff pattern:$0x73625140]  ;;  %1448 = vrot.lane.b32.xlu1 %v1162_v8, %s5047_s21  ;;  %v6150_v58 = vpop.permute.xlu2 %1121  ;;  %v1102_v1 = vpop.permute.xlu1 %1101 }
 0x228   : > { %1272 = vst [vmem:[#allocation1 + $0x20] ss:$4 sm:$0xff] %v1084_v47 }
 0x229   : > { %v6147_v51 = vld.sshfl [vmem:[#allocation1] sm:$0xff pattern:$0x73625140]  ;;  %1273 = vst [vmem:[#allocation1 + $0x21] ss:$4 sm:$0xff] %v6069_v22 }
 0x22a   : > { %1278 = vst [vmem:[#allocation1] ss:$4 sm:$0xff] %v5805_v13 }
 0x22b   : > { %1279 = vst [vmem:[#allocation1 + $0x1] ss:$4 sm:$0xff] %v5819_v19  ;;  %1452 = vrot.lane.b32.xlu0 %v1164_v32, %s5047_s21  ;;  %v1167_v19 = vld [vmem:[%s6013_s20 + $0xe0] sm:$0xff] }
 0x22c   : > { %1280 = vst [vmem:[#allocation1 + $0x2] ss:$4 sm:$0xff] %v5831_v14  ;;  %v1169_v14 = vld [vmem:[%s6013_s20 + $0xf0] sm:$0xff] }
 0x22d   : > { %1281 = vst [vmem:[#allocation1 + $0x3] ss:$4 sm:$0xff] %v5826_v46  ;;  %1456 = vrot.lane.b32.xlu2 %v1166_v2, %s5047_s21 }
 0x22e   : > { %1274 = vst [vmem:[#allocation1 + $0x22] ss:$4 sm:$0xff] %v1088_v12  ;;  %v1106_v13 = vpop.permute.xlu0 %1105 }
 0x22f   : > { %1275 = vst [vmem:[#allocation1 + $0x23] ss:$4 sm:$0xff] %v1090_v59  ;;  %1454 = vrot.lane.b32.xlu1 %v1165_v16, %s5047_s21  ;;  %v6162_v22 = vpop.permute.xlu2 %1127  ;;  %v6164_v47 = vpop.permute.xlu1 %1107 }
 0x233   : > { %1458 = vrot.lane.b32.xlu0 %v1167_v19, %s5047_s21  ;;  %v10664_v19 = vld [vmem:[#allocation27_spill] sm:$0xff] }
 0x234   : > { %v6167_v34 = vld.sshfl [vmem:[#allocation1] sm:$0xff pattern:$0x73625140] }
 0x235   : > { %1291 = vst [vmem:[#allocation1 + $0x3] ss:$4 sm:$0xff] %v6094_v57  ;;  %1462 = vrot.lane.b32.xlu2 %v1169_v14, %s5047_s21 }
 0x236   : > { %1288 = vst [vmem:[#allocation1] ss:$4 sm:$0xff] %v6079_v25  ;;  %v6174_v46 = vld.sshfl [vmem:[#allocation1 + $0x20] sm:$0xff pattern:$0x73625140]  ;;  %v6179_v12 = vpop.permute.xlu0 %1111  ;;  %v1170_v25 = vld [vmem:[%s6013_s20 + $0xf8] sm:$0xff] }
 0x237   : > { %1285 = vst [vmem:[#allocation1 + $0x23] ss:$4 sm:$0xff] %v5861_v42  ;;  %1460 = vrot.lane.b32.xlu1 %v1168_v50, %s5047_s21  ;;  %v6183_v59 = vpop.permute.xlu2 %1133  ;;  %v6185_v57 = vpop.permute.xlu1 %1113 }
 0x238   : > { %1282 = vst [vmem:[#allocation1 + $0x20] ss:$4 sm:$0xff] %v5840_v41  ;;  %v10424_v41 = vmov 0.0  }
 0x239   : > { %1283 = vst [vmem:[#allocation1 + $0x21] ss:$4 sm:$0xff] %v5852_v44 }
 0x23a   : > { %1284 = vst [vmem:[#allocation1 + $0x22] ss:$4 sm:$0xff] %v5847_v40 }
 0x23b   : > { %1289 = vst [vmem:[#allocation1 + $0x1] ss:$4 sm:$0xff] %v1094_v43  ;;  %1464 = vrot.lane.b32.xlu0 %v1170_v25, %s5047_s21 }
 0x23c   : > { %1290 = vst [vmem:[#allocation1 + $0x2] ss:$4 sm:$0xff] %v1096_v61 }
 0x23d   : > { %327 = vst.msk [vmem:[#allocation2] sm:$0xff] %vm326_vm0, %v10424_v41 }
 0x23e   : > { %v6190_v42 = vpop.permute.xlu0 %1117  ;;  %328 = vst.msk [vmem:[#allocation2 + $0x8] sm:$0xff] %vm326_vm0, %v10424_v41 }
 0x23f   : > { %v1403_v15 = vpop.permute.xlu2 %1402  ;;  %336 = vst.msk [vmem:[#allocation2] sm:$0x1] %vm335_vm3, %v10424_v41 }
 0x240   : > { %v1498_v40 = vsel %vm372_vm2, %v5769_v60, %v1403_v15  ;;  %332 = vst.msk [vmem:[#allocation2 + $0x198] sm:$0xff] %vm326_vm0, %v10424_v41 }
 0x241   : > { %v6192_v11 = vld.sshfl [vmem:[#allocation1 + $0x20] sm:$0xff pattern:$0x73625140]  ;;  %v6194_v20 = vpop.permute.xlu1 %1119  ;;  %1531 = vst.msk [vmem:[#allocation2 + $0x19] sm:$0xff] %vm326_vm0, %v1498_v40 }
 0x242   : > { %1292 = vst [vmem:[#allocation1 + $0x20] ss:$4 sm:$0xff] %v1100_v39 }
 0x243   : > { %v6198_v44 = vld.sshfl [vmem:[#allocation1] sm:$0xff pattern:$0x73625140]  ;;  %1294 = vst [vmem:[#allocation1 + $0x22] ss:$4 sm:$0xff] %v6110_v24 }
 0x244   : > { %1298 = vst [vmem:[#allocation1] ss:$4 sm:$0xff] %v5876_v6 }
 0x245   : > { %1299 = vst [vmem:[#allocation1 + $0x1] ss:$4 sm:$0xff] %v5869_v56  ;;  %v6236_v24 = vld [vmem:[#allocation2 + $0x8] sm:$0xff] }
 0x246   : > { %1300 = vst [vmem:[#allocation1 + $0x2] ss:$4 sm:$0xff] %v5893_v49  ;;  %v6207_v43 = vpop.permute.xlu0 %1123  ;;  %v6239_v8 = vld [vmem:[#allocation2] sm:$0xff]  ;;  %v10422_v39 = vrot.slane %v6236_v24, 1 }
 0x247   : > { %1301 = vst [vmem:[#allocation1 + $0x3] ss:$4 sm:$0xff] %v5908_v48  ;;  %v1409_v61 = vpop.permute.xlu2 %1408 }
 0x248   : > { %1293 = vst [vmem:[#allocation1 + $0x21] ss:$4 sm:$0xff] %v1102_v1  ;;  %v1501_v6 = vsel %vm372_vm2, %v5922_v37, %v1409_v61 }
 0x249   : > { %1295 = vst [vmem:[#allocation1 + $0x23] ss:$4 sm:$0xff] %v1106_v13  ;;  %v6209_v54 = vpop.permute.xlu1 %1125 }
 0x24a   : > { %1534 = vst.msk [vmem:[#allocation2 + $0x39] sm:$0xff] %vm326_vm0, %v1501_v6 }
 0x24b   : > { %333 = vst.msk [vmem:[#allocation2 + $0x1a0] sm:$0xff] %vm326_vm0, %v10424_v41 }
 0x24c   : > { %337 = vst.msk [vmem:[#allocation2 + $0x18] sm:$0x1] %vm335_vm3, %v10424_v41 }
 0x24d   : > { %338 = vst.msk [vmem:[#allocation2 + $0x30] sm:$0x1] %vm335_vm3, %v10424_v41 }
 0x24e   : > { %v6221_v60 = vpop.permute.xlu0 %1129  ;;  %339 = vst.msk [vmem:[#allocation2 + $0x48] sm:$0x1] %vm335_vm3, %v10424_v41 }
 0x24f   : > { %v1415_v49 = vpop.permute.xlu2 %1414  ;;  %340 = vst.msk [vmem:[#allocation2 + $0x60] sm:$0x1] %vm335_vm3, %v10424_v41 }
 0x250   : > { %v6225_v56 = vld.sshfl [vmem:[#allocation1 + $0x20] sm:$0xff pattern:$0x73625140]  ;;  %v1504_v37 = vsel %vm372_vm2, %v5977_v3, %v1415_v49  ;;  %341 = vst.msk [vmem:[#allocation2 + $0x78] sm:$0x1] %vm335_vm3, %v10424_v41 }
 0x251   : > { %1305 = vst [vmem:[#allocation1 + $0x23] ss:$4 sm:$0xff] %v5931_v10  ;;  %v6230_v48 = vpop.permute.xlu1 %1131  ;;  %v1666_v10 = vrot.slane %v6239_v8, 1 }
 0x252   : > { %1302 = vst [vmem:[#allocation1 + $0x20] ss:$4 sm:$0xff] %v5902_v53 }
 0x253   : > { %1303 = vst [vmem:[#allocation1 + $0x21] ss:$4 sm:$0xff] %v5920_v23  ;;  %v1668_v23 = vsel %vm1665_vm4, %v1666_v10, %v10422_v39 }
 0x254   : > { %1304 = vst [vmem:[#allocation1 + $0x22] ss:$4 sm:$0xff] %v5937_v36  ;;  %1853 = vrot.lane.b32.xlu1 %v1668_v23, %s5049_s22 }
 0x255   : > { %1537 = vst.msk [vmem:[#allocation2 + $0x61] sm:$0xff] %vm326_vm0, %v1504_v37 }
 0x256   : > { %v6246_v53 = vpop.permute.xlu0 %1135  ;;  %342 = vst.msk [vmem:[#allocation2 + $0x90] sm:$0x1] %vm335_vm3, %v10424_v41 }
 0x257   : > { %v1421_v36 = vpop.permute.xlu2 %1420  ;;  %343 = vst.msk [vmem:[#allocation2 + $0xa8] sm:$0x1] %vm335_vm3, %v10424_v41 }
 0x258   : > { %v1507_v1 = vsel %vm372_vm2, %v6055_v29, %v1421_v36  ;;  %344 = vst.msk [vmem:[#allocation2 + $0xc0] sm:$0x1] %vm335_vm3, %v10424_v41 }
 0x259   : > { %v6256_v3 = vpop.permute.xlu1 %1137  ;;  %1540 = vst.msk [vmem:[#allocation2 + $0x81] sm:$0xff] %vm326_vm0, %v1507_v1 }
 0x25a   : > { %345 = vst.msk [vmem:[#allocation2 + $0xd8] sm:$0x1] %vm335_vm3, %v10424_v41 }
 0x25b   : > { %346 = vst.msk [vmem:[#allocation2 + $0xf0] sm:$0x1] %vm335_vm3, %v10424_v41 }
 0x25c   : > { %347 = vst.msk [vmem:[#allocation2 + $0x108] sm:$0x1] %vm335_vm3, %v10424_v41 }
 0x25d   : > { %348 = vst.msk [vmem:[#allocation2 + $0x120] sm:$0x1] %vm335_vm3, %v10424_v41 }
 0x25e   : > { %v1405_v32 = vpop.permute.xlu0 %1404  ;;  %349 = vst.msk [vmem:[#allocation2 + $0x138] sm:$0x1] %vm335_vm3, %v10424_v41 }
 0x25f   : > { %v1499_v29 = vsel %vm372_vm2, %v5792_v9, %v1405_v32  ;;  %v1427_v2 = vpop.permute.xlu2 %1426  ;;  %350 = vst.msk [vmem:[#allocation2 + $0x150] sm:$0x1] %vm335_vm3, %v10424_v41  ;;  %v6292_v9 = vld [vmem:[#allocation2 + $0x18] sm:$0xff] }
 0x260   : > { %1532 = vst.msk [vmem:[#allocation2 + $0x21] sm:$0xff] %vm326_vm0, %v1499_v29  ;;  %v1510_v13 = vsel %vm372_vm2, %v6077_v26, %v1427_v2  ;;  %v1671_v61 = vrot.slane %v6292_v9, 1 }
 0x261   : > { %v1407_v16 = vpop.permute.xlu1 %1406  ;;  %1543 = vst.msk [vmem:[#allocation2 + $0xa9] sm:$0xff] %vm326_vm0, %v1510_v13 }
 0x262   : > { %v1500_v14 = vsel %vm372_vm2, %v10664_v19, %v1407_v16  ;;  %351 = vst.msk [vmem:[#allocation2 + $0x168] sm:$0x1] %vm335_vm3, %v10424_v41 }
 0x263   : > { %1533 = vst.msk [vmem:[#allocation2 + $0x31] sm:$0xff] %vm326_vm0, %v1500_v14 }
 0x264   : > { %352 = vst.msk [vmem:[#allocation2 + $0x180] sm:$0x1] %vm335_vm3, %v10424_v41 }
 0x265   : > { %355 = vst.msk [vmem:[#allocation2 + $0x29] sm:$0x1] %vm335_vm3, %v10424_v41 }
 0x266   : > { %v1411_v26 = vpop.permute.xlu0 %1410  ;;  %356 = vst.msk [vmem:[#allocation2 + $0x41] sm:$0x1] %vm335_vm3, %v10424_v41 }
 0x267   : > { %v1433_v50 = vpop.permute.xlu2 %1432  ;;  %v6298_v25 = vld [vmem:[#allocation2 + $0x20] sm:$0xff]  ;;  %357 = vst.msk [vmem:[#allocation2 + $0x59] sm:$0x1] %vm335_vm3, %v10424_v41 }
 0x268   : > { %v1672_v40 = vrot.slane %v6298_v25, 1  ;;  %358 = vst.msk [vmem:[#allocation2 + $0x71] sm:$0x1] %vm335_vm3, %v10424_v41 }
 0x269   : > { %v1413_v15 = vpop.permute.xlu1 %1412  ;;  %359 = vst.msk [vmem:[#allocation2 + $0x89] sm:$0x1] %vm335_vm3, %v10424_v41 }
 0x26a   : > { %v6309_v6 = vsel %vm1665_vm4, %v1671_v61, %v1672_v40  ;;  %v6315_v49 = vld [vmem:[#allocation2 + $0x38] sm:$0xff]  ;;  %360 = vst.msk [vmem:[#allocation2 + $0xa1] sm:$0x1] %vm335_vm3, %v10424_v41  ;;  %v10666_v61 = vld [vmem:[#allocation18_spill] sm:$0xff] }
 0x26b   : > { %1857 = vrot.lane.b32.xlu0 %v6309_v6, %s5049_s22  ;;  %361 = vst.msk [vmem:[#allocation2 + $0xb9] sm:$0x1] %vm335_vm3, %v10424_v41  ;;  %v10421_v10 = vrot.slane %v6315_v49, 1 }
 0x26c   : > { %362 = vst.msk [vmem:[#allocation2 + $0xd1] sm:$0x1] %vm335_vm3, %v10424_v41  ;;  %v6323_v37 = vld [vmem:[#allocation2 + $0x28] sm:$0x3] }
 0x26d   : > { %363 = vst.msk [vmem:[#allocation2 + $0xe9] sm:$0x1] %vm335_vm3, %v10424_v41  ;;  %v1674_v23 = vrot.slane %v6323_v37, 1  ;;  %v6329_v1 = vld [vmem:[#allocation2 + $0x40] sm:$0x3] }
 0x26e   : > { %v1417_v36 = vpop.permute.xlu0 %1416  ;;  %364 = vst.msk [vmem:[#allocation2 + $0x101] sm:$0x1] %vm335_vm3, %v10424_v41  ;;  %v1679_v2 = vrot.slane %v6329_v1, 1 }
 0x26f   : > { %v1439_v32 = vpop.permute.xlu2 %1438  ;;  %365 = vst.msk [vmem:[#allocation2 + $0x119] sm:$0x1] %vm335_vm3, %v10424_v41  ;;  %v6337_v16 = vsel %vm1665_vm4, %v1672_v40, %v1674_v23  ;;  %v1502_v23 = vsel %vm372_vm2, %v10666_v61, %v1411_v26  ;;  %v1505_v26 = vsel %vm372_vm2, %v6034_v62, %v1417_v36  ;;  %v6398_v36 = vld [vmem:[#allocation2 + $0x30] sm:$0xff] }
 0x270   : > { %10665 = vst [vmem:[#allocation22_spill] sm:$0xff] %v6337_v16  ;;  %1859 = vrot.lane.b32.xlu1 %v6337_v16, %s5049_s22  ;;  %v6346_v13 = vsel %vm1665_vm4, %v10421_v10, %v1679_v2  ;;  %v1513_v2 = vsel %vm372_vm2, %v6126_v0, %v1433_v50  ;;  %v1503_v10 = vsel %vm372_vm2, %v5973_v7, %v1413_v15 }
 0x271   : > { %v1419_v29 = vpop.permute.xlu1 %1418  ;;  %366 = vst.msk [vmem:[#allocation2 + $0x131] sm:$0x1] %vm335_vm3, %v10424_v41  ;;  %v1516_v16 = vsel %vm372_vm2, %v6147_v51, %v1439_v32 }
 0x272   : > { %367 = vst.msk [vmem:[#allocation2 + $0x149] sm:$0x1] %vm335_vm3, %v10424_v41  ;;  %v1506_v0 = vsel %vm372_vm2, %v6026_v5, %v1419_v29  ;;  %v1306_v29 = vld.sshfl [vmem:[#allocation1] sm:$0xff pattern:$0x73625140] }
 0x273   : > { %1863 = vrot.lane.b32.xlu0 %v6346_v13, %s5049_s22  ;;  %368 = vst.msk [vmem:[#allocation2 + $0x161] sm:$0x1] %vm335_vm3, %v10424_v41 }
 0x274   : > { %369 = vst.msk [vmem:[#allocation2 + $0x179] sm:$0x1] %vm335_vm3, %v10424_v41 }
 0x275   : > { %370 = vst.msk [vmem:[#allocation2 + $0x191] sm:$0x1] %vm335_vm3, %v10424_v41 }
 0x276   : > { %373 = vst.msk [vmem:[#allocation3] sm:$0xff] %vm372_vm2, %v10424_v41  ;;  %v1423_v19 = vpop.permute.xlu0 %1422 }
 0x277   : > { %374 = vst.msk [vmem:[#allocation3 + $0x8] sm:$0xff] %vm372_vm2, %v10424_v41  ;;  %v1445_v40 = vpop.permute.xlu2 %1444  ;;  %v1508_v7 = vsel %vm372_vm2, %v6060_v63, %v1423_v19 }
 0x278   : > { %378 = vst.msk [vmem:[#allocation3 + $0x198] sm:$0xff] %vm372_vm2, %v10424_v41  ;;  %v1519_v15 = vsel %vm372_vm2, %v6192_v11, %v1445_v40 }
 0x279   : > { %v1425_v14 = vpop.permute.xlu1 %1424  ;;  %379 = vst.msk [vmem:[#allocation3 + $0x1a0] sm:$0xff] %vm372_vm2, %v10424_v41 }
 0x27a   : > { %330 = vst.msk [vmem:[#allocation2 + $0x10] sm:$0x3] %vm329_vm5, %v10424_v41  ;;  %v1509_v5 = vsel %vm372_vm2, %v6081_v38, %v1425_v14  ;;  %v1676_v38 = vrot.slane %v6398_v36, 1  ;;  %v6416_v14 = vld [vmem:[#allocation2 + $0x60] sm:$0xff] }
 0x27b   : > { %354 = vst.msk [vmem:[#allocation2 + $0x11] sm:$0x1] %vm335_vm3, %v10424_v41 }
 0x27c   : > { %334 = vst.msk [vmem:[#allocation2 + $0x1a8] sm:$0x3] %vm329_vm5, %v10424_v41  ;;  %vm4357_vm5 = vcmask 162816  }
 0x27d   : > { %353 = vst.msk [vmem:[#allocation2 + $0x198] sm:$0x1] %vm335_vm3, %v10424_v41 }
 0x27e   : > { %1535 = vst.msk [vmem:[#allocation2 + $0x49] sm:$0xff] %vm326_vm0, %v1502_v23  ;;  %v1429_v39 = vpop.permute.xlu0 %1428 }
 0x27f   : > { %371 = vst.msk [vmem:[#allocation2 + $0x1a9] sm:$0x1] %vm335_vm3, %v10424_v41  ;;  %v1451_v51 = vpop.permute.xlu2 %1450  ;;  %v1511_v63 = vsel %vm372_vm2, %v6099_v17, %v1429_v39  ;;  %vm4292_vm3 = vcmask 97280  }
 0x280   : > { %1546 = vst.msk [vmem:[#allocation2 + $0xc9] sm:$0xff] %vm326_vm0, %v1513_v2 }
 0x281   : > { %v1431_v61 = vpop.permute.xlu1 %1430  ;;  %1536 = vst.msk [vmem:[#allocation2 + $0x51] sm:$0xff] %vm326_vm0, %v1503_v10  ;;  %v10667_v10 = vrot.slane %v6236_v24, 1 }
 0x282   : > { %v6389_v50 = vld [vmem:[#allocation2 + $0x10] sm:$0x3]  ;;  %1538 = vst.msk [vmem:[#allocation2 + $0x69] sm:$0xff] %vm326_vm0, %v1505_v26  ;;  %v1686_v26 = vrot.slane %v6416_v14, 1 }
 0x283   : > { %v1669_v62 = vrot.slane %v6389_v50, 1  ;;  %1549 = vst.msk [vmem:[#allocation2 + $0xf1] sm:$0xff] %vm326_vm0, %v1516_v16  ;;  %v1522_v16 = vsel %vm372_vm2, %v1306_v29, %v1451_v51  ;;  %v1512_v51 = vsel %vm372_vm2, %v6104_v45, %v1431_v61  ;;  %v6457_v45 = vld.sshfl [vmem:[#allocation1 + $0x20] sm:$0xff pattern:$0x73625140] }
 0x284   : > { %1539 = vst.msk [vmem:[#allocation2 + $0x79] sm:$0xff] %vm326_vm0, %v1506_v0 }
 0x285   : > { %v1670_v32 = vsel %vm1665_vm4, %v10667_v10, %v1669_v62  ;;  %1541 = vst.msk [vmem:[#allocation2 + $0x91] sm:$0xff] %vm326_vm0, %v1508_v7  ;;  %v6410_v11 = vld [vmem:[#allocation2 + $0x48] sm:$0xff]  ;;  %v10668_v7 = vrot.slane %v6315_v49, 1 }
 0x286   : > { %1855 = vrot.lane.b32.xlu2 %v1670_v32, %s5049_s22  ;;  %1552 = vst.msk [vmem:[#allocation2 + $0x111] sm:$0xff] %vm326_vm0, %v1519_v15  ;;  %v1435_v19 = vpop.permute.xlu0 %1434  ;;  %v1681_v39 = vrot.slane %v6410_v11, 1 }
 0x287   : > { %1542 = vst.msk [vmem:[#allocation2 + $0x99] sm:$0xff] %vm326_vm0, %v1509_v5  ;;  %v6432_v62 = vsel %vm1665_vm4, %v1676_v38, %v10668_v7  ;;  %v1514_v32 = vsel %vm372_vm2, %v6122_v21, %v1435_v19  ;;  %v6464_v21 = vld [vmem:[#allocation2 + $0x88] sm:$0x3] }
 0x288   : > { %v6418_v23 = vld [vmem:[#allocation2 + $0x50] sm:$0xff]  ;;  %1544 = vst.msk [vmem:[#allocation2 + $0xb1] sm:$0xff] %vm326_vm0, %v1511_v63  ;;  %v6440_v5 = vld [vmem:[#allocation2 + $0x58] sm:$0x3]  ;;  %v1694_v19 = vrot.slane %v6464_v21, 1 }
 0x289   : > { %v1437_v40 = vpop.permute.xlu1 %1436  ;;  %v1682_v17 = vrot.slane %v6418_v23, 1  ;;  %v6423_v2 = vld [vmem:[#allocation2 + $0x68] sm:$0xff]  ;;  %1555 = vst.msk [vmem:[#allocation2 + $0x139] sm:$0xff] %vm326_vm0, %v1522_v16  ;;  %v6447_v10 = vld [vmem:[#allocation2 + $0x70] sm:$0x3] }
 0x28a   : > { %v1687_v0 = vrot.slane %v6423_v2, 1  ;;  %1308 = vst [vmem:[#allocation1] ss:$4 sm:$0xff] %v6164_v47  ;;  %v1689_v63 = vrot.slane %v6447_v10, 1 }
 0x28b   : > { %v6435_v15 = vsel %vm1665_vm4, %v1681_v39, %v1682_v17  ;;  %1309 = vst [vmem:[#allocation1 + $0x1] ss:$4 sm:$0xff] %v6120_v4  ;;  %v6454_v4 = vld [vmem:[#allocation2 + $0x80] sm:$0xff] }
 0x28c   : > { %10669 = vst [vmem:[#allocation7_spill] sm:$0xff] %v6435_v15  ;;  %1865 = vrot.lane.b32.xlu1 %v6435_v15, %s5049_s22  ;;  %v6445_v47 = vsel %vm1665_vm4, %v1686_v26, %v1687_v0  ;;  %v1692_v16 = vrot.slane %v6454_v4, 1  ;;  %v6482_v7 = vsel %vm1665_vm4, %v1687_v0, %v1689_v63  ;;  %v1457_v63 = vpop.permute.xlu2 %1456 }
 0x28d   : > { %1310 = vst [vmem:[#allocation1 + $0x2] ss:$4 sm:$0xff] %v6179_v12  ;;  %1869 = vrot.lane.b32.xlu0 %v6445_v47, %s5049_s22  ;;  %v1684_v12 = vrot.slane %v6440_v5, 1 }
 0x28e   : > { %1311 = vst [vmem:[#allocation1 + $0x3] ss:$4 sm:$0xff] %v6185_v57  ;;  %1861 = vrot.lane.b32.xlu2 %v6432_v62, %s5049_s22  ;;  %v1441_v61 = vpop.permute.xlu0 %1440  ;;  %v1515_v57 = vsel %vm372_vm2, %v6143_v52, %v1437_v40  ;;  %v6473_v38 = vld [vmem:[#allocation2 + $0x98] sm:$0xff]  ;;  %v6500_v40 = vld [vmem:[#allocation2 + $0xa8] sm:$0xff] }
 0x28f   : > { %1545 = vst.msk [vmem:[#allocation2 + $0xc1] sm:$0xff] %vm326_vm0, %v1512_v51  ;;  %v1517_v39 = vsel %vm372_vm2, %v6174_v46, %v1441_v61  ;;  %v6479_v26 = vsel %vm1665_vm4, %v1682_v17, %v1684_v12  ;;  %v6487_v52 = vld [vmem:[#allocation2 + $0x78] sm:$0xff] }
 0x290   : > { %1547 = vst.msk [vmem:[#allocation2 + $0xd9] sm:$0xff] %vm326_vm0, %v1514_v32  ;;  %v1691_v51 = vrot.slane %v6487_v52, 1 }
 0x291   : > { %v1443_v29 = vpop.permute.xlu1 %1442  ;;  %1312 = vst [vmem:[#allocation1 + $0x20] ss:$4 sm:$0xff] %v6137_v33  ;;  %v6485_v33 = vld [vmem:[#allocation2 + $0xb0] sm:$0xff] }
 0x292   : > { %1313 = vst [vmem:[#allocation1 + $0x21] ss:$4 sm:$0xff] %v6190_v42  ;;  %v6492_v42 = vsel %vm1665_vm4, %v1692_v16, %v1694_v19  ;;  %v1702_v17 = vrot.slane %v6485_v33, 1  ;;  %v1518_v61 = vsel %vm372_vm2, %v6167_v34, %v1443_v29  ;;  %v6527_v29 = vld [vmem:[#allocation2 + $0xa0] sm:$0x3] }
 0x293   : > { %1314 = vst [vmem:[#allocation1 + $0x22] ss:$4 sm:$0xff] %v6194_v20  ;;  %v6494_v20 = vld [vmem:[#allocation2 + $0x90] sm:$0xff] }
 0x294   : > { %10670 = vst [vmem:[#allocation20_spill] sm:$0xff] %v6482_v7  ;;  %1871 = vrot.lane.b32.xlu1 %v6482_v7, %s5049_s22  ;;  %v1696_v32 = vrot.slane %v6494_v20, 1  ;;  %v1463_v41 = vpop.permute.xlu2 %1462 }
 0x295   : > { %1315 = vst [vmem:[#allocation1 + $0x23] ss:$4 sm:$0xff] %v6150_v58  ;;  %v1316_v46 = vld.sshfl [vmem:[#allocation1] sm:$0xff pattern:$0x73625140]  ;;  %1875 = vrot.lane.b32.xlu0 %v6492_v42, %s5049_s22  ;;  %v1697_v58 = vrot.slane %v6473_v38, 1 }
 0x296   : > { %10671 = vst [vmem:[#allocation5_spill] sm:$0xff] %v6492_v42  ;;  %1867 = vrot.lane.b32.xlu2 %v6479_v26, %s5049_s22  ;;  %v1447_v0 = vpop.permute.xlu0 %1446 }
 0x297   : > { %1548 = vst.msk [vmem:[#allocation2 + $0xe1] sm:$0xff] %vm326_vm0, %v1515_v57  ;;  %v1701_v57 = vrot.slane %v6500_v40, 1  ;;  %v6515_v19 = vsel %vm1665_vm4, %v1696_v32, %v1697_v58  ;;  %v10674_v32 = vld [vmem:[#allocation4_spill] sm:$0xff] }
 0x298   : > { %1550 = vst.msk [vmem:[#allocation2 + $0xf9] sm:$0xff] %vm326_vm0, %v1517_v39 }
 0x299   : > { %1318 = vst [vmem:[#allocation1] ss:$4 sm:$0xff] %v5953_v27  ;;  %v1449_v12 = vpop.permute.xlu1 %1448  ;;  %v6519_v39 = vsel %vm1665_vm4, %v1701_v57, %v1702_v17 }
 0x29a   : > { %1319 = vst [vmem:[#allocation1 + $0x1] ss:$4 sm:$0xff] %v5967_v28  ;;  %v6523_v28 = vsel %vm1665_vm4, %v1691_v51, %v1692_v16  ;;  %v1520_v16 = vsel %vm372_vm2, %v6198_v44, %v1447_v0  ;;  %v1699_v51 = vrot.slane %v6527_v29, 1  ;;  %v1521_v0 = vsel %vm372_vm2, %v6225_v56, %v1449_v12 }
 0x29b   : > { %1320 = vst [vmem:[#allocation1 + $0x2] ss:$4 sm:$0xff] %v5961_v31  ;;  %v6532_v31 = vld [vmem:[#allocation2 + $0xb8] sm:$0x3] }
 0x29c   : > { %10672 = vst [vmem:[#allocation19_spill] sm:$0xff] %v6515_v19  ;;  %v1317_v27 = vld.sshfl [vmem:[#allocation1 + $0x20] sm:$0xff pattern:$0x73625140]  ;;  %1877 = vrot.lane.b32.xlu1 %v6515_v19, %s5049_s22 }
 0x29d   : > { %1321 = vst [vmem:[#allocation1 + $0x3] ss:$4 sm:$0xff] %v5984_v35  ;;  %v1525_v34 = vsel %vm372_vm2, %v1317_v27, %v1457_v63  ;;  %1881 = vrot.lane.b32.xlu0 %v6519_v39, %s5049_s22  ;;  %v6537_v35 = vld [vmem:[#allocation2 + $0xc8] sm:$0xff] }
 0x29e   : > { %10673 = vst [vmem:[#allocation6_spill] sm:$0xff] %v6519_v39  ;;  %1873 = vrot.lane.b32.xlu2 %v6523_v28, %s5049_s22  ;;  %v1707_v57 = vrot.slane %v6537_v35, 1  ;;  %v6554_v44 = vld [vmem:[#allocation2 + $0xe0] sm:$0xff] }
 0x29f   : > { %1551 = vst.msk [vmem:[#allocation2 + $0x109] sm:$0xff] %vm326_vm0, %v1518_v61  ;;  %v6547_v61 = vld [vmem:[#allocation2 + $0xd0] sm:$0x3] }
 0x2a0   : > { %1322 = vst [vmem:[#allocation1 + $0x20] ss:$4 sm:$0xff] %v6001_v55  ;;  %v1453_v55 = vpop.permute.xlu0 %1452 }
 0x2a1   : > { %1558 = vst.msk [vmem:[#allocation2 + $0x159] sm:$0xff] %vm326_vm0, %v1525_v34  ;;  %v1455_v63 = vpop.permute.xlu1 %1454  ;;  %v6559_v34 = vsel %vm1665_vm4, %v1697_v58, %v1699_v51  ;;  %v6577_v58 = vld [vmem:[#allocation2 + $0xd8] sm:$0xff] }
 0x2a2   : > { %1323 = vst [vmem:[#allocation1 + $0x21] ss:$4 sm:$0xff] %v5995_v30  ;;  %v1704_v30 = vrot.slane %v6532_v31, 1 }
 0x2a3   : > { %1324 = vst [vmem:[#allocation1 + $0x22] ss:$4 sm:$0xff] %v6021_v18  ;;  %v1709_v18 = vrot.slane %v6547_v61, 1 }
 0x2a4   : > { %1325 = vst [vmem:[#allocation1 + $0x23] ss:$4 sm:$0xff] %v10674_v32  ;;  %v1326_v27 = vld.sshfl [vmem:[#allocation1] sm:$0xff pattern:$0x73625140]  ;;  %v6562_v32 = vsel %vm1665_vm4, %v1702_v17, %v1704_v30  ;;  %v1524_v17 = vsel %vm372_vm2, %v1316_v46, %v1455_v63  ;;  %v1711_v46 = vrot.slane %v6577_v58, 1 }
 0x2a5   : > { %1553 = vst.msk [vmem:[#allocation2 + $0x121] sm:$0xff] %vm326_vm0, %v1520_v16  ;;  %v6565_v16 = vld [vmem:[#allocation2 + $0xf8] sm:$0xff]  ;;  %1883 = vrot.lane.b32.xlu1 %v6562_v32, %s5049_s22  ;;  %v6575_v56 = vsel %vm1665_vm4, %v1707_v57, %v1709_v18 }
 0x2a6   : > { %1328 = vst [vmem:[#allocation1] ss:$4 sm:$0xff] %v6207_v43  ;;  %v1523_v43 = vsel %vm372_vm2, %v6457_v45, %v1453_v55  ;;  %1887 = vrot.lane.b32.xlu0 %v6575_v56, %s5049_s22  ;;  %v6584_v45 = vld [vmem:[#allocation2 + $0xf0] sm:$0xff]  ;;  %1879 = vrot.lane.b32.xlu2 %v6559_v34, %s5049_s22 }
 0x2a7   : > { %1329 = vst [vmem:[#allocation1 + $0x1] ss:$4 sm:$0xff] %v6209_v54  ;;  %v6569_v54 = vld [vmem:[#allocation2 + $0xc0] sm:$0xff]  ;;  %v1716_v18 = vrot.slane %v6584_v45, 1 }
 0x2a8   : > { %10675 = vst [vmem:[#allocation25_spill] sm:$0xff] %v6559_v34  ;;  %v1459_v12 = vpop.permute.xlu0 %1458  ;;  %v1706_v55 = vrot.slane %v6569_v54, 1 }
 0x2a9   : > { %10676 = vst [vmem:[#allocation9_spill] sm:$0xff] %v6562_v32  ;;  %v1526_v51 = vsel %vm372_vm2, %v1326_v27, %v1459_v12  ;;  %v1461_v30 = vpop.permute.xlu1 %1460 }
 0x2aa   : > { %1330 = vst [vmem:[#allocation1 + $0x2] ss:$4 sm:$0xff] %v6162_v22  ;;  %v1712_v22 = vrot.slane %v6554_v44, 1  ;;  %v6606_v27 = vsel %vm1665_vm4, %v1706_v55, %v1707_v57  ;;  %v6627_v57 = vld [vmem:[#allocation2 + $0x118] sm:$0x3] }
 0x2ab   : > { %1331 = vst [vmem:[#allocation1 + $0x3] ss:$4 sm:$0xff] %v6221_v60  ;;  %v1717_v60 = vrot.slane %v6565_v16, 1  ;;  %v1327_v63 = vld.sshfl [vmem:[#allocation1 + $0x20] sm:$0xff pattern:$0x73625140] }
 0x2ac   : > { %10677 = vst [vmem:[#allocation23_spill] sm:$0xff] %v6575_v56  ;;  %v1724_v55 = vrot.slane %v6627_v57, 1 }
 0x2ad   : > { %1554 = vst.msk [vmem:[#allocation2 + $0x129] sm:$0xff] %vm326_vm0, %v1521_v0  ;;  %v1527_v0 = vsel %vm372_vm2, %v1327_v63, %v1461_v30  ;;  %v6602_v32 = vsel %vm1665_vm4, %v1716_v18, %v1717_v60 }
 0x2ae   : > { %1556 = vst.msk [vmem:[#allocation2 + $0x141] sm:$0xff] %vm326_vm0, %v1523_v43  ;;  %v6598_v43 = vsel %vm1665_vm4, %v1711_v46, %v1712_v22  ;;  %v6614_v46 = vld [vmem:[#allocation2 + $0x100] sm:$0x3]  ;;  %1893 = vrot.lane.b32.xlu0 %v6602_v32, %s5049_s22  ;;  %1885 = vrot.lane.b32.xlu2 %v6606_v27, %s5049_s22 }
 0x2af   : > { %1557 = vst.msk [vmem:[#allocation2 + $0x151] sm:$0xff] %vm326_vm0, %v1524_v17  ;;  %1889 = vrot.lane.b32.xlu1 %v6598_v43, %s5049_s22 }
 0x2b0   : > { %1559 = vst.msk [vmem:[#allocation2 + $0x169] sm:$0xff] %vm326_vm0, %v1526_v51  ;;  %v6610_v51 = vld [vmem:[#allocation2 + $0xe8] sm:$0x3] }
 0x2b1   : > { %10678 = vst [vmem:[#allocation8_spill] sm:$0xff] %v6598_v43  ;;  %v6648_v43 = vld [vmem:[#allocation2 + $0x120] sm:$0xff] }
 0x2b2   : > { %1560 = vst.msk [vmem:[#allocation2 + $0x171] sm:$0xff] %vm326_vm0, %v1527_v0  ;;  %v1336_v17 = vld.sshfl [vmem:[#allocation1] sm:$0xff pattern:$0x73625140] }
 0x2b3   : > { %10679 = vst [vmem:[#allocation21_spill] sm:$0xff] %v6602_v32  ;;  %v1528_v12 = vsel %vm372_vm2, %v1336_v17, %v1463_v41  ;;  %v1719_v41 = vrot.slane %v6614_v46, 1  ;;  %v6641_v17 = vld [vmem:[#allocation2 + $0x108] sm:$0xff]  ;;  %v1726_v32 = vrot.slane %v6648_v43, 1 }
 0x2b4   : > { %1332 = vst [vmem:[#allocation1 + $0x20] ss:$4 sm:$0xff] %v6230_v48  ;;  %v6620_v48 = vld [vmem:[#allocation2 + $0x110] sm:$0xff]  ;;  %v6631_v30 = vld [vmem:[#allocation2 + $0x128] sm:$0xff] }
 0x2b5   : > { %10680 = vst [vmem:[#allocation10_spill] sm:$0xff] %v6606_v27  ;;  %v6637_v18 = vsel %vm1665_vm4, %v1717_v60, %v1719_v41  ;;  %v6639_v0 = vld [vmem:[#allocation2 + $0x140] sm:$0xff]  ;;  %v6653_v60 = vld [vmem:[#allocation2 + $0x138] sm:$0xff]  ;;  %v6672_v27 = vld [vmem:[#allocation2 + $0x130] sm:$0x3] }
 0x2b6   : > { %1333 = vst [vmem:[#allocation1 + $0x21] ss:$4 sm:$0xff] %v6183_v59  ;;  %v1714_v59 = vrot.slane %v6610_v51, 1  ;;  %v1732_v41 = vrot.slane %v6639_v0, 1  ;;  %v6698_v7 = vld [vmem:[#allocation2 + $0x150] sm:$0xff] }
 0x2b7   : > { %1334 = vst [vmem:[#allocation1 + $0x22] ss:$4 sm:$0xff] %v6246_v53  ;;  %v1722_v53 = vrot.slane %v6620_v48, 1  ;;  %1895 = vrot.lane.b32.xlu1 %v6637_v18, %s5049_s22  ;;  %v6705_v34 = vld [vmem:[#allocation2 + $0x168] sm:$0xff] }
 0x2b8   : > { %1561 = vst.msk [vmem:[#allocation2 + $0x181] sm:$0xff] %vm326_vm0, %v1528_v12  ;;  %v6634_v63 = vsel %vm1665_vm4, %v1712_v22, %v1714_v59  ;;  %v1727_v22 = vrot.slane %v6631_v30, 1 }
 0x2b9   : > { %1335 = vst [vmem:[#allocation1 + $0x23] ss:$4 sm:$0xff] %v6256_v3  ;;  %v1465_v3 = vpop.permute.xlu0 %1464  ;;  %v6646_v12 = vsel %vm1665_vm4, %v1722_v53, %v1724_v55  ;;  %1891 = vrot.lane.b32.xlu2 %v6634_v63, %s5049_s22  ;;  %v1721_v55 = vrot.slane %v6641_v17, 1  ;;  %v6723_v15 = vld [vmem:[#allocation2 + $0x178] sm:$0x3] }
 0x2ba   : > { %10681 = vst [vmem:[#allocation14_spill] sm:$0xff] %v6634_v63  ;;  %1899 = vrot.lane.b32.xlu0 %v6646_v12, %s5049_s22  ;;  %v6664_v56 = vsel %vm1665_vm4, %v1726_v32, %v1727_v22  ;;  %v1729_v32 = vrot.slane %v6672_v27, 1 }
 0x2bb   : > { %10682 = vst [vmem:[#allocation12_spill] sm:$0xff] %v6637_v18  ;;  %v6670_v63 = vsel %vm1665_vm4, %v1721_v55, %v1722_v53 }
 0x2bc   : > { %10683 = vst [vmem:[#allocation24_spill] sm:$0xff] %v6646_v12  ;;  %v1731_v12 = vrot.slane %v6653_v60, 1  ;;  %v6693_v39 = vsel %vm1665_vm4, %v1727_v22, %v1729_v32  ;;  %v1747_v22 = vrot.slane %v6239_v8, 2  ;;  %v1736_v32 = vrot.slane %v6698_v7, 1 }
 0x2bd   : > { %10684 = vst [vmem:[#allocation11_spill] sm:$0xff] %v6664_v56  ;;  %v1744_v8 = vrot.slane %v6723_v15, 1 }
 0x2be   : > { %v6667_v19 = vsel %vm1665_vm4, %v1731_v12, %v1732_v41  ;;  %10686 = vst [vmem:[#allocation15_spill] sm:$0xff] %v6670_v63  ;;  %v6686_v12 = vld [vmem:[#allocation2 + $0x160] sm:$0x3] }
 0x2bf   : > { %10685 = vst [vmem:[#allocation16_spill] sm:$0xff] %v6667_v19  ;;  %1901 = vrot.lane.b32.xlu1 %v6664_v56, %s5049_s22  ;;  %v1739_v55 = vrot.slane %v6686_v12, 1  ;;  %v6690_v56 = vld [vmem:[#allocation2 + $0x170] sm:$0xff] }
 0x2c0   : > { %v1337_v59 = vld.sshfl [vmem:[#allocation1 + $0x20] sm:$0xff pattern:$0x73625140]  ;;  %v1742_v42 = vrot.slane %v6690_v56, 1 }
 0x2c1   : > { %v1529_v18 = vsel %vm372_vm2, %v1337_v59, %v1465_v3  ;;  %v6676_v3 = vld [vmem:[#allocation2 + $0x148] sm:$0x3]  ;;  %1897 = vrot.lane.b32.xlu2 %v6670_v63, %s5049_s22 }
 0x2c2   : > { %1562 = vst.msk [vmem:[#allocation2 + $0x189] sm:$0xff] %vm326_vm0, %v1529_v18  ;;  %1905 = vrot.lane.b32.xlu0 %v6667_v19, %s5049_s22  ;;  %v6680_v18 = vld [vmem:[#allocation2 + $0x158] sm:$0xff]  ;;  %v1734_v53 = vrot.slane %v6676_v3, 1 }
 0x2c3   : > { %v1737_v59 = vrot.slane %v6680_v18, 1 }
 0x2c4   : > { %v6696_v19 = vsel %vm1665_vm4, %v1732_v41, %v1734_v53  ;;  %v1748_v41 = vrot.slane %v6236_v24, 2  ;;  %v1741_v53 = vrot.slane %v6705_v34, 1  ;;  %v1750_v24 = vrot.slane %v6389_v50, 2 }
 0x2c5   : > { %10687 = vst [vmem:[#allocation26_spill] sm:$0xff] %v6696_v19  ;;  %v6703_v63 = vsel %vm1665_vm4, %v1737_v59, %v1739_v55  ;;  %v1758_v50 = vrot.slane %v6315_v49, 2 }
 0x2c6   : > { %10688 = vst [vmem:[#allocation13_spill] sm:$0xff] %v6703_v63  ;;  %v6717_v55 = vsel %vm1665_vm4, %v1741_v53, %v1742_v42  ;;  %v6736_v53 = vsel %vm1665_vm4, %v1742_v42, %v1744_v8  ;;  %v1762_v42 = vrot.slane %v6410_v11, 2 }
 0x2c7   : > { %1907 = vrot.lane.b32.xlu1 %v6696_v19, %s5049_s22  ;;  %10689 = vst [vmem:[#allocation17_spill] sm:$0xff] %v6717_v55  ;;  %v1749_v19 = vsel %vm1746_vm6, %v1747_v22, %v1748_v41  ;;  %v1753_v22 = vrot.slane %v6298_v25, 2 }
 0x2c8   : > { %10691 = vst [vmem:[#allocation18_spill] sm:$0xff] %v6736_v53 }
 0x2c9   : > { %1903 = vrot.lane.b32.xlu2 %v6693_v39, %s5049_s22 }
 0x2ca   : > { %1911 = vrot.lane.b32.xlu0 %v6703_v63, %s5049_s22  ;;  %v6721_v63 = vsel %vm1665_vm4, %v1736_v32, %v1737_v59  ;;  %v1755_v59 = vrot.slane %v6323_v37, 2  ;;  %v1751_v32 = vsel %vm1746_vm6, %v1748_v41, %v1750_v24  ;;  %v1757_v37 = vrot.slane %v6398_v36, 2 }
 0x2cb   : > { %10690 = vst [vmem:[#allocation27_spill] sm:$0xff] %v6721_v63  ;;  %v1763_v41 = vrot.slane %v6418_v23, 2  ;;  %v1752_v24 = vrot.slane %v6292_v9, 2 }
 0x2cc   : > { %v6752_v8 = vsel %vm1746_vm6, %v1757_v37, %v1758_v50  ;;  %v1768_v37 = vrot.slane %v6423_v2, 2 }
 0x2cd   : > { %10693 = vst [vmem:[#allocation28_spill] sm:$0xff] %v6752_v8 }
 0x2cf   : > { %1913 = vrot.lane.b32.xlu1 %v6717_v55, %s5049_s22 }
 0x2d1   : > { %1909 = vrot.lane.b32.xlu2 %v6721_v63, %s5049_s22 }
 0x2d2   : > { %1949 = vrot.lane.b32.xlu0 %v1749_v19, %s5050_s23  ;;  %v6740_v19 = vsel %vm1746_vm6, %v1753_v22, %v1755_v59  ;;  %v6757_v59 = vsel %vm1746_vm6, %v1762_v42, %v1763_v41  ;;  %v1760_v42 = vrot.slane %v6329_v1, 2  ;;  %v1773_v1 = vrot.slane %v6454_v4, 2 }
 0x2d3   : > { %10692 = vst [vmem:[#allocation4_spill] sm:$0xff] %v6740_v19 }
 0x2d4   : > { %10694 = vst [vmem:[#allocation29_spill] sm:$0xff] %v6757_v59 }
 0x2d7   : > { %1951 = vrot.lane.b32.xlu1 %v1751_v32, %s5050_s23  ;;  %v6760_v32 = vsel %vm1746_vm6, %v1752_v24, %v1753_v22  ;;  %v6781_v24 = vsel %vm1746_vm6, %v1758_v50, %v1760_v42 }
 0x2d9   : > { %1915 = vrot.lane.b32.xlu2 %v6736_v53, %s5049_s22 }
 0x2da   : > { %1955 = vrot.lane.b32.xlu0 %v6740_v19, %s5050_s23  ;;  %v1765_v19 = vrot.slane %v6440_v5, 2  ;;  %v1772_v5 = vrot.slane %v6487_v52, 2 }
 0x2dc   : > { %v6773_v53 = vsel %vm1746_vm6, %v1763_v41, %v1765_v19  ;;  %v1778_v19 = vrot.slane %v6473_v38, 2  ;;  %v1777_v41 = vrot.slane %v6494_v20, 2  ;;  %v6795_v50 = vsel %vm1746_vm6, %v1772_v5, %v1773_v1 }
 0x2dd   : > { %10696 = vst [vmem:[#allocation31_spill] sm:$0xff] %v6773_v53  ;;  %v6797_v42 = vpop.permute.xlu0 %1857  ;;  %v1780_v5 = vrot.slane %v6527_v29, 2 }
 0x2de   : > { %10699 = vst [vmem:[#allocation34_spill] sm:$0xff] %v6795_v50 }
 0x2df   : > { %1957 = vrot.lane.b32.xlu1 %v6752_v8, %s5050_s23  ;;  %v1770_v8 = vrot.slane %v6447_v10, 2  ;;  %10700 = vst [vmem:[#allocation35_spill] sm:$0xff] %v6797_v42 }
 0x2e0   : > { %v6767_v55 = vpop.permute.xlu2 %1855 }
 0x2e1   : > { %1953 = vrot.lane.b32.xlu2 %v6760_v32, %s5050_s23  ;;  %10695 = vst [vmem:[#allocation30_spill] sm:$0xff] %v6767_v55  ;;  %v6778_v22 = vsel %vm1746_vm6, %v1768_v37, %v1770_v8  ;;  %v1767_v8 = vrot.slane %v6416_v14, 2  ;;  %v6799_v55 = vpop.permute.xlu1 %1853 }
 0x2e2   : > { %1961 = vrot.lane.b32.xlu0 %v6757_v59, %s5050_s23  ;;  %10697 = vst [vmem:[#allocation32_spill] sm:$0xff] %v6778_v22 }
 0x2e3   : > { %10701 = vst [vmem:[#allocation36_spill] sm:$0xff] %v6799_v55  ;;  %v1783_v55 = vrot.slane %v6485_v33, 2 }
 0x2e5   : > { %v6832_v29 = vpop.permute.xlu0 %1863 }
 0x2e6   : > { %10707 = vst [vmem:[#allocation42_spill] sm:$0xff] %v6832_v29 }
 0x2e7   : > { %1963 = vrot.lane.b32.xlu1 %v6773_v53, %s5050_s23  ;;  %v6804_v53 = vsel %vm1746_vm6, %v1777_v41, %v1778_v19  ;;  %v1775_v41 = vrot.slane %v6464_v21, 2 }
 0x2e8   : > { %v6789_v10 = vpop.permute.xlu2 %1861  ;;  %10702 = vst [vmem:[#allocation37_spill] sm:$0xff] %v6804_v53 }
 0x2e9   : > { %1959 = vrot.lane.b32.xlu2 %v6781_v24, %s5050_s23  ;;  %10698 = vst [vmem:[#allocation33_spill] sm:$0xff] %v6789_v10  ;;  %v6807_v10 = vsel %vm1746_vm6, %v1767_v8, %v1768_v37  ;;  %v6828_v8 = vsel %vm1746_vm6, %v1773_v1, %v1775_v41  ;;  %v6836_v21 = vpop.permute.xlu1 %1859  ;;  %v1792_v1 = vrot.slane %v6577_v58, 2  ;;  %v1782_v41 = vrot.slane %v6500_v40, 2 }
 0x2ea   : > { %1967 = vrot.lane.b32.xlu0 %v6778_v22, %s5050_s23  ;;  %10703 = vst [vmem:[#allocation38_spill] sm:$0xff] %v6807_v10  ;;  %v6820_v22 = vsel %vm1746_vm6, %v1778_v19, %v1780_v5  ;;  %v1787_v19 = vrot.slane %v6569_v54, 2 }
 0x2eb   : > { %10705 = vst [vmem:[#allocation40_spill] sm:$0xff] %v6820_v22 }
 0x2ec   : > { %10708 = vst [vmem:[#allocation43_spill] sm:$0xff] %v6836_v21  ;;  %v6854_v21 = vsel %vm1746_vm6, %v1782_v41, %v1783_v55 }
 0x2ed   : > { %10712 = vst [vmem:[#allocation47_spill] sm:$0xff] %v6854_v21 }
 0x2ef   : > { %1969 = vrot.lane.b32.xlu1 %v6795_v50, %s5050_s23  ;;  %v1785_v50 = vrot.slane %v6532_v31, 2  ;;  %v1788_v31 = vrot.slane %v6537_v35, 2 }
 0x2f0   : > { %v6814_v42 = vpop.permute.xlu2 %1867 }
 0x2f1   : > { %1965 = vrot.lane.b32.xlu2 %v6807_v10, %s5050_s23  ;;  %10704 = vst [vmem:[#allocation39_spill] sm:$0xff] %v6814_v42  ;;  %v6825_v37 = vsel %vm1746_vm6, %v1783_v55, %v1785_v50  ;;  %v1793_v50 = vrot.slane %v6554_v44, 2  ;;  %v6846_v42 = vsel %vm1746_vm6, %v1787_v19, %v1788_v31  ;;  %v1795_v19 = vrot.slane %v6610_v51, 2 }
 0x2f2   : > { %1973 = vrot.lane.b32.xlu0 %v6804_v53, %s5050_s23  ;;  %10706 = vst [vmem:[#allocation41_spill] sm:$0xff] %v6825_v37  ;;  %v1790_v55 = vrot.slane %v6547_v61, 2  ;;  %v1803_v61 = vrot.slane %v6620_v48, 2 }
 0x2f3   : > { %10710 = vst [vmem:[#allocation45_spill] sm:$0xff] %v6846_v42  ;;  %v6851_v29 = vsel %vm1746_vm6, %v1792_v1, %v1793_v50  ;;  %v1798_v1 = vrot.slane %v6565_v16, 2  ;;  %v6871_v41 = vsel %vm1746_vm6, %v1793_v50, %v1795_v19  ;;  %v1802_v50 = vrot.slane %v6641_v17, 2 }
 0x2f4   : > { %10711 = vst [vmem:[#allocation46_spill] sm:$0xff] %v6851_v29  ;;  %v6879_v51 = vsel %vm1746_vm6, %v1788_v31, %v1790_v55  ;;  %v1807_v31 = vrot.slane %v6648_v43, 2  ;;  %v1797_v55 = vrot.slane %v6584_v45, 2 }
 0x2f5   : > { %10716 = vst [vmem:[#allocation51_spill] sm:$0xff] %v6871_v41 }
 0x2f7   : > { %1975 = vrot.lane.b32.xlu1 %v6820_v22, %s5050_s23 }
 0x2f8   : > { %v6840_v5 = vpop.permute.xlu2 %1873 }
 0x2f9   : > { %1971 = vrot.lane.b32.xlu2 %v6828_v8, %s5050_s23  ;;  %10709 = vst [vmem:[#allocation44_spill] sm:$0xff] %v6840_v5 }
 0x2fa   : > { %1979 = vrot.lane.b32.xlu0 %v6825_v37, %s5050_s23 }
 0x2fe   : > { %v6860_v5 = vpop.permute.xlu1 %1865 }
 0x2ff   : > { %1981 = vrot.lane.b32.xlu1 %v6846_v42, %s5050_s23  ;;  %10713 = vst [vmem:[#allocation48_spill] sm:$0xff] %v6860_v5  ;;  %v6863_v22 = vpop.permute.xlu0 %1869  ;;  %v1800_v42 = vrot.slane %v6614_v46, 2 }
 0x300   : > { %10714 = vst [vmem:[#allocation49_spill] sm:$0xff] %v6863_v22  ;;  %v6865_v37 = vpop.permute.xlu2 %1879  ;;  %v6897_v22 = vsel %vm1746_vm6, %v1802_v50, %v1803_v61  ;;  %v1810_v50 = vrot.slane %v6672_v27, 2 }
 0x301   : > { %1977 = vrot.lane.b32.xlu2 %v6854_v21, %s5050_s23  ;;  %10715 = vst [vmem:[#allocation50_spill] sm:$0xff] %v6865_v37  ;;  %v6876_v5 = vsel %vm1746_vm6, %v1798_v1, %v1800_v42  ;;  %v1808_v42 = vrot.slane %v6631_v30, 2 }
 0x302   : > { %1985 = vrot.lane.b32.xlu0 %v6851_v29, %s5050_s23  ;;  %10717 = vst [vmem:[#allocation52_spill] sm:$0xff] %v6876_v5 }
 0x303   : > { %10721 = vst [vmem:[#allocation56_spill] sm:$0xff] %v6897_v22 }
 0x306   : > { %v6885_v46 = vpop.permute.xlu1 %1871 }
 0x307   : > { %1987 = vrot.lane.b32.xlu1 %v6871_v41, %s5050_s23  ;;  %10718 = vst [vmem:[#allocation53_spill] sm:$0xff] %v6885_v46  ;;  %v6889_v19 = vpop.permute.xlu0 %1875  ;;  %v6902_v46 = vsel %vm1746_vm6, %v1807_v31, %v1808_v42  ;;  %v6905_v41 = vsel %vm1746_vm6, %v1797_v55, %v1798_v1  ;;  %v1813_v31 = vrot.slane %v6639_v0, 2  ;;  %v1805_v1 = vrot.slane %v6627_v57, 2 }
 0x308   : > { %10719 = vst [vmem:[#allocation54_spill] sm:$0xff] %v6889_v19  ;;  %v6891_v37 = vpop.permute.xlu2 %1885  ;;  %v6922_v55 = vsel %vm1746_vm6, %v1808_v42, %v1810_v50  ;;  %v1818_v57 = vrot.slane %v6680_v18, 2  ;;  %v1817_v42 = vrot.slane %v6698_v7, 2 }
 0x309   : > { %1983 = vrot.lane.b32.xlu2 %v6879_v51, %s5050_s23  ;;  %10720 = vst [vmem:[#allocation55_spill] sm:$0xff] %v6891_v37  ;;  %v6930_v27 = vsel %vm1746_vm6, %v1803_v61, %v1805_v1  ;;  %v1822_v61 = vrot.slane %v6705_v34, 2  ;;  %v1812_v1 = vrot.slane %v6653_v60, 2 }
 0x30a   : > { %1991 = vrot.lane.b32.xlu0 %v6876_v5, %s5050_s23  ;;  %10722 = vst [vmem:[#allocation57_spill] sm:$0xff] %v6902_v46 }
 0x30b   : > { %10723 = vst [vmem:[#allocation58_spill] sm:$0xff] %v6905_v41 }
 0x30c   : > { %10727 = vst [vmem:[#allocation62_spill] sm:$0xff] %v6922_v55 }
 0x30e   : > { %v6911_v37 = vpop.permute.xlu1 %1877 }
 0x30f   : > { %1993 = vrot.lane.b32.xlu1 %v6897_v22, %s5050_s23  ;;  %10724 = vst [vmem:[#allocation59_spill] sm:$0xff] %v6911_v37  ;;  %v6914_v19 = vpop.permute.xlu0 %1881  ;;  %v1815_v22 = vrot.slane %v6676_v3, 2 }
 0x310   : > { %10725 = vst [vmem:[#allocation60_spill] sm:$0xff] %v6914_v19 }
 0x311   : > { %1989 = vrot.lane.b32.xlu2 %v6905_v41, %s5050_s23  ;;  %v6927_v37 = vsel %vm1746_vm6, %v1813_v31, %v1815_v22  ;;  %v1823_v22 = vrot.slane %v6690_v56, 2 }
 0x312   : > { %1997 = vrot.lane.b32.xlu0 %v6902_v46, %s5050_s23  ;;  %10728 = vst [vmem:[#allocation63_spill] sm:$0xff] %v6927_v37 }
 0x313   : > { %v6916_v5 = vpop.permute.xlu2 %1891 }
 0x314   : > { %10726 = vst [vmem:[#allocation61_spill] sm:$0xff] %v6916_v5  ;;  %v6948_v5 = vsel %vm1746_vm6, %v1817_v42, %v1818_v57  ;;  %v1825_v42 = vrot.slane %v6723_v15, 2 }
 0x315   : > { %10732 = vst [vmem:[#allocation67_spill] sm:$0xff] %v6948_v5 }
 0x317   : > { %1999 = vrot.lane.b32.xlu1 %v6922_v55, %s5050_s23  ;;  %v6936_v3 = vpop.permute.xlu1 %1883  ;;  %v6956_v55 = vsel %vm1746_vm6, %v1812_v1, %v1813_v31 }
 0x318   : > { %10729 = vst [vmem:[#allocation64_spill] sm:$0xff] %v6936_v3  ;;  %v6940_v50 = vpop.permute.xlu0 %1887  ;;  %v6953_v3 = vsel %vm1746_vm6, %v1822_v61, %v1823_v22  ;;  %v1820_v61 = vrot.slane %v6686_v12, 2 }
 0x319   : > { %1995 = vrot.lane.b32.xlu2 %v6930_v27, %s5050_s23  ;;  %10730 = vst [vmem:[#allocation65_spill] sm:$0xff] %v6940_v50 }
 0x31a   : > { %2003 = vrot.lane.b32.xlu0 %v6927_v37, %s5050_s23  ;;  %10733 = vst [vmem:[#allocation68_spill] sm:$0xff] %v6956_v55  ;;  %v6976_v31 = vsel %vm1746_vm6, %v1818_v57, %v1820_v61 }
 0x31b   : > { %v6942_v19 = vpop.permute.xlu2 %1897  ;;  %10737 = vst [vmem:[#allocation72_spill] sm:$0xff] %v6976_v31 }
 0x31c   : > { %10731 = vst [vmem:[#allocation66_spill] sm:$0xff] %v6942_v19 }
 0x31f   : > { %2005 = vrot.lane.b32.xlu1 %v6948_v5, %s5050_s23  ;;  %v6971_v5 = vsel %vm1746_vm6, %v1823_v22, %v1825_v42 }
 0x320   : > { %v6965_v50 = vpop.permute.xlu0 %1893 }
 0x321   : > { %2001 = vrot.lane.b32.xlu2 %v6956_v55, %s5050_s23  ;;  %v6962_v19 = vpop.permute.xlu1 %1889  ;;  %10735 = vst [vmem:[#allocation70_spill] sm:$0xff] %v6965_v50 }
 0x322   : > { %2009 = vrot.lane.b32.xlu0 %v6953_v3, %s5050_s23  ;;  %10734 = vst [vmem:[#allocation69_spill] sm:$0xff] %v6962_v19  ;;  %v10796_v19 = vld [vmem:[#allocation9_spill] sm:$0xff] }
 0x323   : > { %v6967_v37 = vpop.permute.xlu2 %1903 }
 0x324   : > { %10736 = vst [vmem:[#allocation71_spill] sm:$0xff] %v6967_v37 }
 0x327   : > { %2011 = vrot.lane.b32.xlu1 %v6971_v5, %s5050_s23 }
 0x329   : > { %2007 = vrot.lane.b32.xlu2 %v6976_v31, %s5050_s23  ;;  %v6982_v15 = vpop.permute.xlu1 %1895 }
 0x32a   : > { %2047 = vrot.lane.b32.xlu0 %v6298_v25, %s5051_s24  ;;  %10738 = vst [vmem:[#allocation73_spill] sm:$0xff] %v6982_v15  ;;  %v10784_v15 = vld [vmem:[#allocation20_spill] sm:$0xff] }
 0x32b   : > { %v6986_v12 = vpop.permute.xlu2 %1909 }
 0x32c   : > { %v6984_v1 = vpop.permute.xlu0 %1899  ;;  %10740 = vst [vmem:[#allocation75_spill] sm:$0xff] %v6986_v12 }
 0x32d   : > { %10739 = vst [vmem:[#allocation74_spill] sm:$0xff] %v6984_v1 }
 0x32f   : > { %2049 = vrot.lane.b32.xlu1 %v6398_v36, %s5051_s24 }
 0x331   : > { %2045 = vrot.lane.b32.xlu2 %v6292_v9, %s5051_s24  ;;  %v6994_v57 = vpop.permute.xlu1 %1901 }
 0x332   : > { %2053 = vrot.lane.b32.xlu0 %v6410_v11, %s5051_s24  ;;  %10741 = vst [vmem:[#allocation76_spill] sm:$0xff] %v6994_v57 }
 0x333   : > { %v6998_v22 = vpop.permute.xlu2 %1915 }
 0x334   : > { %v6996_v25 = vpop.permute.xlu0 %1905  ;;  %10743 = vst [vmem:[#allocation78_spill] sm:$0xff] %v6998_v22 }
 0x335   : > { %10742 = vst [vmem:[#allocation77_spill] sm:$0xff] %v6996_v25 }
 0x337   : > { %2055 = vrot.lane.b32.xlu1 %v6418_v23, %s5051_s24 }
 0x339   : > { %2051 = vrot.lane.b32.xlu2 %v6315_v49, %s5051_s24  ;;  %v7006_v36 = vpop.permute.xlu1 %1907 }
 0x33a   : > { %2059 = vrot.lane.b32.xlu0 %v6423_v2, %s5051_s24  ;;  %10744 = vst [vmem:[#allocation79_spill] sm:$0xff] %v7006_v36 }
 0x33b   : > { %v7010_v9 = vpop.permute.xlu2 %1953 }
 0x33c   : > { %v7008_v11 = vpop.permute.xlu0 %1911  ;;  %10746 = vst [vmem:[#allocation81_spill] sm:$0xff] %v7010_v9 }
 0x33d   : > { %10745 = vst [vmem:[#allocation80_spill] sm:$0xff] %v7008_v11 }
 0x33f   : > { %2061 = vrot.lane.b32.xlu1 %v6487_v52, %s5051_s24 }
 0x341   : > { %2057 = vrot.lane.b32.xlu2 %v6416_v14, %s5051_s24  ;;  %v7018_v23 = vpop.permute.xlu1 %1913 }
 0x342   : > { %2065 = vrot.lane.b32.xlu0 %v6494_v20, %s5051_s24  ;;  %10747 = vst [vmem:[#allocation82_spill] sm:$0xff] %v7018_v23 }
 0x343   : > { %v7022_v49 = vpop.permute.xlu2 %1959 }
 0x344   : > { %v7020_v2 = vpop.permute.xlu0 %1949  ;;  %10749 = vst [vmem:[#allocation84_spill] sm:$0xff] %v7022_v49 }
 0x345   : > { %10748 = vst [vmem:[#allocation83_spill] sm:$0xff] %v7020_v2 }
 0x347   : > { %2067 = vrot.lane.b32.xlu1 %v6473_v38, %s5051_s24 }
 0x349   : > { %2063 = vrot.lane.b32.xlu2 %v6454_v4, %s5051_s24  ;;  %v7030_v52 = vpop.permute.xlu1 %1951 }
 0x34a   : > { %2071 = vrot.lane.b32.xlu0 %v6485_v33, %s5051_s24  ;;  %10750 = vst [vmem:[#allocation85_spill] sm:$0xff] %v7030_v52 }
 0x34b   : > { %v7034_v14 = vpop.permute.xlu2 %1965 }
 0x34c   : > { %v7032_v20 = vpop.permute.xlu0 %1955  ;;  %10752 = vst [vmem:[#allocation87_spill] sm:$0xff] %v7034_v14 }
 0x34d   : > { %10751 = vst [vmem:[#allocation86_spill] sm:$0xff] %v7032_v20 }
 0x34f   : > { %2073 = vrot.lane.b32.xlu1 %v6569_v54, %s5051_s24 }
 0x351   : > { %2069 = vrot.lane.b32.xlu2 %v6500_v40, %s5051_s24  ;;  %v7042_v38 = vpop.permute.xlu1 %1957 }
 0x352   : > { %2077 = vrot.lane.b32.xlu0 %v6577_v58, %s5051_s24  ;;  %10753 = vst [vmem:[#allocation88_spill] sm:$0xff] %v7042_v38 }
 0x353   : > { %v7046_v4 = vpop.permute.xlu2 %1971 }
 0x354   : > { %v7044_v33 = vpop.permute.xlu0 %1961  ;;  %10755 = vst [vmem:[#allocation90_spill] sm:$0xff] %v7046_v4 }
 0x355   : > { %10754 = vst [vmem:[#allocation89_spill] sm:$0xff] %v7044_v33 }
 0x357   : > { %2079 = vrot.lane.b32.xlu1 %v6554_v44, %s5051_s24 }
 0x359   : > { %2075 = vrot.lane.b32.xlu2 %v6537_v35, %s5051_s24  ;;  %v7054_v42 = vpop.permute.xlu1 %1963 }
 0x35a   : > { %2083 = vrot.lane.b32.xlu0 %v6565_v16, %s5051_s24  ;;  %10756 = vst [vmem:[#allocation91_spill] sm:$0xff] %v7054_v42 }
 0x35b   : > { %v7058_v40 = vpop.permute.xlu2 %1977 }
 0x35c   : > { %v7056_v61 = vpop.permute.xlu0 %1967  ;;  %10758 = vst [vmem:[#allocation93_spill] sm:$0xff] %v7058_v40 }
 0x35d   : > { %10757 = vst [vmem:[#allocation92_spill] sm:$0xff] %v7056_v61 }
 0x35f   : > { %2085 = vrot.lane.b32.xlu1 %v6641_v17, %s5051_s24 }
 0x361   : > { %2081 = vrot.lane.b32.xlu2 %v6584_v45, %s5051_s24  ;;  %v7066_v22 = vpop.permute.xlu1 %1969 }
 0x362   : > { %2089 = vrot.lane.b32.xlu0 %v6648_v43, %s5051_s24  ;;  %10759 = vst [vmem:[#allocation94_spill] sm:$0xff] %v7066_v22 }
 0x363   : > { %v7070_v11 = vpop.permute.xlu2 %1983 }
 0x364   : > { %v7068_v23 = vpop.permute.xlu0 %1973  ;;  %10761 = vst [vmem:[#allocation96_spill] sm:$0xff] %v7070_v11 }
 0x365   : > { %10760 = vst [vmem:[#allocation95_spill] sm:$0xff] %v7068_v23 }
 0x367   : > { %2091 = vrot.lane.b32.xlu1 %v6631_v30, %s5051_s24 }
 0x369   : > { %2087 = vrot.lane.b32.xlu2 %v6620_v48, %s5051_s24  ;;  %v7078_v12 = vpop.permute.xlu1 %1975 }
 0x36a   : > { %2095 = vrot.lane.b32.xlu0 %v6639_v0, %s5051_s24  ;;  %10762 = vst [vmem:[#allocation97_spill] sm:$0xff] %v7078_v12 }
 0x36b   : > { %v7082_v40 = vpop.permute.xlu2 %1989 }
 0x36c   : > { %v7080_v36 = vpop.permute.xlu0 %1979  ;;  %10764 = vst [vmem:[#allocation99_spill] sm:$0xff] %v7082_v40 }
 0x36d   : > { %10763 = vst [vmem:[#allocation98_spill] sm:$0xff] %v7080_v36  ;;  %v7098_v36 = vld [vmem:[#allocation2 + $0x188] sm:$0xff] }
 0x36f   : > { %2097 = vrot.lane.b32.xlu1 %v6698_v7, %s5051_s24 }
 0x371   : > { %2093 = vrot.lane.b32.xlu2 %v6653_v60, %s5051_s24  ;;  %v7090_v25 = vpop.permute.xlu1 %1981 }
 0x372   : > { %2101 = vrot.lane.b32.xlu0 %v6705_v34, %s5051_s24  ;;  %10765 = vst [vmem:[#allocation100_spill] sm:$0xff] %v7090_v25 }
 0x373   : > { %v7094_v23 = vpop.permute.xlu2 %1995 }
 0x374   : > { %v7092_v37 = vpop.permute.xlu0 %1985  ;;  %10767 = vst [vmem:[#allocation102_spill] sm:$0xff] %v7094_v23  ;;  %v7112_v23 = vld [vmem:[#allocation2 + $0x180] sm:$0xff] }
 0x375   : > { %10766 = vst [vmem:[#allocation101_spill] sm:$0xff] %v7092_v37 }
 0x377   : > { %2103 = vrot.lane.b32.xlu1 %v6690_v56, %s5051_s24 }
 0x379   : > { %2099 = vrot.lane.b32.xlu2 %v6680_v18, %s5051_s24  ;;  %v7104_v12 = vpop.permute.xlu1 %1987 }
 0x37a   : > { %2107 = vrot.lane.b32.xlu0 %v7098_v36, %s5051_s24  ;;  %10768 = vst [vmem:[#allocation103_spill] sm:$0xff] %v7104_v12  ;;  %v10790_v12 = vld [vmem:[#allocation19_spill] sm:$0xff] }
 0x37b   : > { %v7108_v25 = vpop.permute.xlu2 %2001 }
 0x37c   : > { %v7106_v57 = vpop.permute.xlu0 %1991  ;;  %10770 = vst [vmem:[#allocation105_spill] sm:$0xff] %v7108_v25 }
 0x37d   : > { %10769 = vst [vmem:[#allocation104_spill] sm:$0xff] %v7106_v57 }
 0x37f   : > { %2141 = vrot.lane.b32.xlu1 %v6309_v6, %s5052_s25  ;;  %v10774_v6 = vld [vmem:[#allocation22_spill] sm:$0xff] }
 0x381   : > { %2105 = vrot.lane.b32.xlu2 %v7112_v23, %s5051_s24  ;;  %v7118_v4 = vpop.permute.xlu1 %1993 }
 0x382   : > { %2145 = vrot.lane.b32.xlu0 %v6432_v62, %s5052_s25  ;;  %10771 = vst [vmem:[#allocation106_spill] sm:$0xff] %v7118_v4 }
 0x383   : > { %v7122_v22 = vpop.permute.xlu2 %2007 }
 0x384   : > { %v7120_v1 = vpop.permute.xlu0 %1997  ;;  %10773 = vst [vmem:[#allocation108_spill] sm:$0xff] %v7122_v22  ;;  %v10778_v22 = vld [vmem:[#allocation7_spill] sm:$0xff] }
 0x385   : > { %10772 = vst [vmem:[#allocation107_spill] sm:$0xff] %v7120_v1 }
 0x387   : > { %2147 = vrot.lane.b32.xlu1 %v6346_v13, %s5052_s25 }
 0x389   : > { %2143 = vrot.lane.b32.xlu2 %v10774_v6, %s5052_s25  ;;  %v7130_v25 = vpop.permute.xlu1 %1999 }
 0x38a   : > { %2151 = vrot.lane.b32.xlu0 %v6479_v26, %s5052_s25  ;;  %10775 = vst [vmem:[#allocation22_spill] sm:$0xff] %v7130_v25  ;;  %v10782_v25 = vld [vmem:[#allocation5_spill] sm:$0xff] }
 0x38b   : > { %v7134_v61 = vpop.permute.xlu2 %2045 }
 0x38c   : > { %v7132_v57 = vpop.permute.xlu0 %2003  ;;  %10777 = vst [vmem:[#allocation110_spill] sm:$0xff] %v7134_v61 }
 0x38d   : > { %10776 = vst [vmem:[#allocation109_spill] sm:$0xff] %v7132_v57  ;;  %v10783_v57 = vld [vmem:[#allocation25_spill] sm:$0xff] }
 0x38f   : > { %2153 = vrot.lane.b32.xlu1 %v6445_v47, %s5052_s25 }
 0x391   : > { %2149 = vrot.lane.b32.xlu2 %v10778_v22, %s5052_s25  ;;  %v7142_v1 = vpop.permute.xlu1 %2005 }
 0x392   : > { %2157 = vrot.lane.b32.xlu0 %v6523_v28, %s5052_s25  ;;  %10779 = vst [vmem:[#allocation7_spill] sm:$0xff] %v7142_v1  ;;  %v10788_v1 = vld [vmem:[#allocation6_spill] sm:$0xff] }
 0x393   : > { %v7146_v6 = vpop.permute.xlu2 %2051 }
 0x394   : > { %v7144_v4 = vpop.permute.xlu0 %2009  ;;  %10781 = vst [vmem:[#allocation112_spill] sm:$0xff] %v7146_v6  ;;  %v10800_v6 = vld [vmem:[#allocation21_spill] sm:$0xff] }
 0x395   : > { %10780 = vst [vmem:[#allocation111_spill] sm:$0xff] %v7144_v4  ;;  %v10789_v4 = vld [vmem:[#allocation10_spill] sm:$0xff] }
 0x397   : > { %2159 = vrot.lane.b32.xlu1 %v10782_v25, %s5052_s25 }
 0x399   : > { %2155 = vrot.lane.b32.xlu2 %v10784_v15, %s5052_s25  ;;  %v7154_v40 = vpop.permute.xlu1 %2011 }
 0x39a   : > { %2163 = vrot.lane.b32.xlu0 %v10783_v57, %s5052_s25  ;;  %10785 = vst [vmem:[#allocation5_spill] sm:$0xff] %v7154_v40  ;;  %v10794_v40 = vld [vmem:[#allocation23_spill] sm:$0xff] }
 0x39b   : > { %v7158_v50 = vpop.permute.xlu2 %2057 }
 0x39c   : > { %v7156_v14 = vpop.permute.xlu0 %2047  ;;  %10787 = vst [vmem:[#allocation20_spill] sm:$0xff] %v7158_v50  ;;  %v10795_v50 = vld [vmem:[#allocation14_spill] sm:$0xff] }
 0x39d   : > { %10786 = vst [vmem:[#allocation25_spill] sm:$0xff] %v7156_v14 }
 0x39f   : > { %2165 = vrot.lane.b32.xlu1 %v10788_v1, %s5052_s25 }
 0x3a1   : > { %2161 = vrot.lane.b32.xlu2 %v10790_v12, %s5052_s25  ;;  %v7166_v42 = vpop.permute.xlu1 %2049 }
 0x3a2   : > { %2169 = vrot.lane.b32.xlu0 %v10789_v4, %s5052_s25  ;;  %10791 = vst [vmem:[#allocation6_spill] sm:$0xff] %v7166_v42 }
 0x3a3   : > { %v7170_v33 = vpop.permute.xlu2 %2063 }
 0x3a4   : > { %v7168_v37 = vpop.permute.xlu0 %2053  ;;  %10793 = vst [vmem:[#allocation19_spill] sm:$0xff] %v7170_v33  ;;  %v10801_v33 = vld [vmem:[#allocation15_spill] sm:$0xff] }
 0x3a5   : > { %10792 = vst [vmem:[#allocation10_spill] sm:$0xff] %v7168_v37  ;;  %v10802_v37 = vld [vmem:[#allocation8_spill] sm:$0xff] }
 0x3a7   : > { %2171 = vrot.lane.b32.xlu1 %v10794_v40, %s5052_s25 }
 0x3a9   : > { %2167 = vrot.lane.b32.xlu2 %v10796_v19, %s5052_s25  ;;  %v7178_v49 = vpop.permute.xlu1 %2055 }
 0x3aa   : > { %2175 = vrot.lane.b32.xlu0 %v10795_v50, %s5052_s25  ;;  %10797 = vst [vmem:[#allocation23_spill] sm:$0xff] %v7178_v49  ;;  %v10806_v49 = vld [vmem:[#allocation24_spill] sm:$0xff] }
 0x3ab   : > { %v7182_v38 = vpop.permute.xlu2 %2069 }
 0x3ac   : > { %v7180_v11 = vpop.permute.xlu0 %2059  ;;  %10799 = vst [vmem:[#allocation9_spill] sm:$0xff] %v7182_v38  ;;  %v10807_v38 = vld [vmem:[#allocation12_spill] sm:$0xff] }
 0x3ad   : > { %10798 = vst [vmem:[#allocation14_spill] sm:$0xff] %v7180_v11 }
 0x3af   : > { %2177 = vrot.lane.b32.xlu1 %v10800_v6, %s5052_s25 }
 0x3b1   : > { %2173 = vrot.lane.b32.xlu2 %v10802_v37, %s5052_s25  ;;  %v7190_v20 = vpop.permute.xlu1 %2061 }
 0x3b2   : > { %2181 = vrot.lane.b32.xlu0 %v10801_v33, %s5052_s25  ;;  %10803 = vst [vmem:[#allocation21_spill] sm:$0xff] %v7190_v20  ;;  %v10811_v20 = vld [vmem:[#allocation16_spill] sm:$0xff] }
 0x3b3   : > { %v7194_v9 = vpop.permute.xlu2 %2075 }
 0x3b4   : > { %v7192_v42 = vpop.permute.xlu0 %2065  ;;  %10805 = vst [vmem:[#allocation8_spill] sm:$0xff] %v7194_v9  ;;  %v10812_v9 = vld [vmem:[#allocation11_spill] sm:$0xff] }
 0x3b5   : > { %10804 = vst [vmem:[#allocation15_spill] sm:$0xff] %v7192_v42 }
 0x3b7   : > { %2183 = vrot.lane.b32.xlu1 %v10806_v49, %s5052_s25 }
 0x3b9   : > { %2179 = vrot.lane.b32.xlu2 %v10807_v38, %s5052_s25  ;;  %v7202_v11 = vpop.permute.xlu1 %2067 }
 0x3ba   : > { %2187 = vrot.lane.b32.xlu0 %v6693_v39, %s5052_s25  ;;  %10808 = vst [vmem:[#allocation12_spill] sm:$0xff] %v7202_v11  ;;  %v10816_v11 = vld [vmem:[#allocation13_spill] sm:$0xff] }
 0x3bb   : > { %v7206_v52 = vpop.permute.xlu2 %2081 }
 0x3bc   : > { %v7204_v14 = vpop.permute.xlu0 %2071  ;;  %10810 = vst [vmem:[#allocation114_spill] sm:$0xff] %v7206_v52  ;;  %v10818_v52 = vld [vmem:[#allocation26_spill] sm:$0xff] }
 0x3bd   : > { %10809 = vst [vmem:[#allocation113_spill] sm:$0xff] %v7204_v14  ;;  %v10817_v14 = vld [vmem:[#allocation18_spill] sm:$0xff] }
 0x3bf   : > { %2189 = vrot.lane.b32.xlu1 %v10811_v20, %s5052_s25 }
 0x3c1   : > { %2185 = vrot.lane.b32.xlu2 %v10812_v9, %s5052_s25  ;;  %v7214_v42 = vpop.permute.xlu1 %2073 }
 0x3c2   : > { %2193 = vrot.lane.b32.xlu0 %v6721_v63, %s5052_s25  ;;  %10813 = vst [vmem:[#allocation11_spill] sm:$0xff] %v7214_v42  ;;  %v1831_v63 = vrot.slane %v7098_v36, 1 }
 0x3c3   : > { %v7218_v2 = vpop.permute.xlu2 %2087 }
 0x3c4   : > { %v7216_v61 = vpop.permute.xlu0 %2077  ;;  %10815 = vst [vmem:[#allocation116_spill] sm:$0xff] %v7218_v2 }
 0x3c5   : > { %10814 = vst [vmem:[#allocation115_spill] sm:$0xff] %v7216_v61  ;;  %v1830_v61 = vrot.slane %v7112_v23, 1 }
 0x3c7   : > { %2195 = vrot.lane.b32.xlu1 %v10816_v11, %s5052_s25  ;;  %v7235_v2 = vsel %vm1665_vm4, %v1830_v61, %v1831_v63  ;;  %v7243_v11 = vld [vmem:[#allocation2 + $0x190] sm:$0x3] }
 0x3c8   : > { %10822 = vst [vmem:[#allocation120_spill] sm:$0xff] %v7235_v2  ;;  %v1833_v61 = vrot.slane %v7243_v11, 1 }
 0x3c9   : > { %2191 = vrot.lane.b32.xlu2 %v10818_v52, %s5052_s25  ;;  %v7226_v20 = vpop.permute.xlu1 %2079  ;;  %v10827_v52 = vld [vmem:[#allocation4_spill] sm:$0xff] }
 0x3ca   : > { %2199 = vrot.lane.b32.xlu0 %v10817_v14, %s5052_s25  ;;  %10819 = vst [vmem:[#allocation117_spill] sm:$0xff] %v7226_v20  ;;  %v10823_v20 = vld [vmem:[#allocation17_spill] sm:$0xff] }
 0x3cb   : > { %v7231_v42 = vpop.permute.xlu2 %2093 }
 0x3cc   : > { %v7229_v49 = vpop.permute.xlu0 %2083  ;;  %10821 = vst [vmem:[#allocation119_spill] sm:$0xff] %v7231_v42 }
 0x3cd   : > { %10820 = vst [vmem:[#allocation118_spill] sm:$0xff] %v7229_v49 }
 0x3cf   : > { %2201 = vrot.lane.b32.xlu1 %v7235_v2, %s5052_s25  ;;  %v7255_v2 = vsel %vm1665_vm4, %v1831_v63, %v1833_v61  ;;  %v10831_v63 = vld [vmem:[#allocation28_spill] sm:$0xff] }
 0x3d1   : > { %2197 = vrot.lane.b32.xlu2 %v10823_v20, %s5052_s25  ;;  %v7245_v49 = vpop.permute.xlu1 %2085 }
 0x3d2   : > { %2237 = vrot.lane.b32.xlu0 %v6760_v32, %s5053_s26  ;;  %10824 = vst [vmem:[#allocation17_spill] sm:$0xff] %v7245_v49 }
 0x3d3   : > { %v7249_v14 = vpop.permute.xlu2 %2099 }
 0x3d4   : > { %v7247_v42 = vpop.permute.xlu0 %2089  ;;  %10826 = vst [vmem:[#allocation122_spill] sm:$0xff] %v7249_v14 }
 0x3d5   : > { %10825 = vst [vmem:[#allocation121_spill] sm:$0xff] %v7247_v42 }
 0x3d7   : > { %2239 = vrot.lane.b32.xlu1 %v10827_v52, %s5053_s26 }
 0x3d9   : > { %2203 = vrot.lane.b32.xlu2 %v7255_v2, %s5052_s25  ;;  %v7261_v32 = vpop.permute.xlu1 %2091 }
 0x3da   : > { %2243 = vrot.lane.b32.xlu0 %v6781_v24, %s5053_s26  ;;  %10828 = vst [vmem:[#allocation4_spill] sm:$0xff] %v7261_v32  ;;  %v10835_v32 = vld [vmem:[#allocation32_spill] sm:$0xff] }
 0x3db   : > { %v7265_v42 = vpop.permute.xlu2 %2105 }
 0x3dc   : > { %v7263_v49 = vpop.permute.xlu0 %2095  ;;  %10830 = vst [vmem:[#allocation124_spill] sm:$0xff] %v7265_v42  ;;  %v10836_v42 = vld [vmem:[#allocation31_spill] sm:$0xff] }
 0x3dd   : > { %10829 = vst [vmem:[#allocation123_spill] sm:$0xff] %v7263_v49 }
 0x3df   : > { %2245 = vrot.lane.b32.xlu1 %v6757_v59, %s5053_s26 }
 0x3e1   : > { %2241 = vrot.lane.b32.xlu2 %v10831_v63, %s5053_s26  ;;  %v7273_v52 = vpop.permute.xlu1 %2097 }
 0x3e2   : > { %2249 = vrot.lane.b32.xlu0 %v6807_v10, %s5053_s26  ;;  %10832 = vst [vmem:[#allocation28_spill] sm:$0xff] %v7273_v52 }
 0x3e3   : > { %v7277_v14 = vpop.permute.xlu2 %2143 }
 0x3e4   : > { %v7275_v61 = vpop.permute.xlu0 %2101  ;;  %10834 = vst [vmem:[#allocation126_spill] sm:$0xff] %v7277_v14 }
 0x3e5   : > { %10833 = vst [vmem:[#allocation125_spill] sm:$0xff] %v7275_v61  ;;  %v10840_v61 = vld [vmem:[#allocation34_spill] sm:$0xff] }
 0x3e7   : > { %2251 = vrot.lane.b32.xlu1 %v10835_v32, %s5053_s26 }
 0x3e9   : > { %2247 = vrot.lane.b32.xlu2 %v10836_v42, %s5053_s26  ;;  %v7285_v49 = vpop.permute.xlu1 %2103 }
 0x3ea   : > { %2255 = vrot.lane.b32.xlu0 %v6828_v8, %s5053_s26  ;;  %10837 = vst [vmem:[#allocation31_spill] sm:$0xff] %v7285_v49  ;;  %v10844_v49 = vld [vmem:[#allocation41_spill] sm:$0xff] }
 0x3eb   : > { %v7289_v10 = vpop.permute.xlu2 %2149 }
 0x3ec   : > { %v7287_v59 = vpop.permute.xlu0 %2107  ;;  %10839 = vst [vmem:[#allocation128_spill] sm:$0xff] %v7289_v10 }
 0x3ed   : > { %10838 = vst [vmem:[#allocation127_spill] sm:$0xff] %v7287_v59  ;;  %v10845_v59 = vld [vmem:[#allocation40_spill] sm:$0xff] }
 0x3ef   : > { %2257 = vrot.lane.b32.xlu1 %v6804_v53, %s5053_s26 }
 0x3f1   : > { %2253 = vrot.lane.b32.xlu2 %v10840_v61, %s5053_s26  ;;  %v7297_v52 = vpop.permute.xlu1 %2141 }
 0x3f2   : > { %2261 = vrot.lane.b32.xlu0 %v6854_v21, %s5053_s26  ;;  %10841 = vst [vmem:[#allocation34_spill] sm:$0xff] %v7297_v52 }
 0x3f3   : > { %v7301_v32 = vpop.permute.xlu2 %2155 }
 0x3f4   : > { %v7299_v14 = vpop.permute.xlu0 %2145  ;;  %10843 = vst [vmem:[#allocation130_spill] sm:$0xff] %v7301_v32  ;;  %v10849_v32 = vld [vmem:[#allocation45_spill] sm:$0xff] }
 0x3f5   : > { %10842 = vst [vmem:[#allocation129_spill] sm:$0xff] %v7299_v14 }
 0x3f7   : > { %2263 = vrot.lane.b32.xlu1 %v10844_v49, %s5053_s26 }
 0x3f9   : > { %2259 = vrot.lane.b32.xlu2 %v10845_v59, %s5053_s26  ;;  %v7309_v10 = vpop.permute.xlu1 %2147 }
 0x3fa   : > { %2267 = vrot.lane.b32.xlu0 %v6879_v51, %s5053_s26  ;;  %10846 = vst [vmem:[#allocation40_spill] sm:$0xff] %v7309_v10  ;;  %v10853_v10 = vld [vmem:[#allocation52_spill] sm:$0xff] }
 0x3fb   : > { %v7313_v21 = vpop.permute.xlu2 %2161 }
 0x3fc   : > { %v7311_v53 = vpop.permute.xlu0 %2151  ;;  %10848 = vst [vmem:[#allocation132_spill] sm:$0xff] %v7313_v21  ;;  %v10854_v21 = vld [vmem:[#allocation51_spill] sm:$0xff] }
 0x3fd   : > { %10847 = vst [vmem:[#allocation131_spill] sm:$0xff] %v7311_v53 }
 0x3ff   : > { %2269 = vrot.lane.b32.xlu1 %v6851_v29, %s5053_s26 }
 0x401   : > { %2265 = vrot.lane.b32.xlu2 %v10849_v32, %s5053_s26  ;;  %v7321_v14 = vpop.permute.xlu1 %2153 }
 0x402   : > { %2273 = vrot.lane.b32.xlu0 %v6905_v41, %s5053_s26  ;;  %10850 = vst [vmem:[#allocation45_spill] sm:$0xff] %v7321_v14 }
 0x403   : > { %v7325_v49 = vpop.permute.xlu2 %2167 }
 0x404   : > { %v7323_v52 = vpop.permute.xlu0 %2157  ;;  %10852 = vst [vmem:[#allocation134_spill] sm:$0xff] %v7325_v49  ;;  %v10858_v49 = vld [vmem:[#allocation56_spill] sm:$0xff] }
 0x405   : > { %10851 = vst [vmem:[#allocation133_spill] sm:$0xff] %v7323_v52 }
 0x407   : > { %2275 = vrot.lane.b32.xlu1 %v10853_v10, %s5053_s26 }
 0x409   : > { %2271 = vrot.lane.b32.xlu2 %v10854_v21, %s5053_s26  ;;  %v7333_v53 = vpop.permute.xlu1 %2159 }
 0x40a   : > { %2279 = vrot.lane.b32.xlu0 %v6930_v27, %s5053_s26  ;;  %10855 = vst [vmem:[#allocation51_spill] sm:$0xff] %v7333_v53  ;;  %v10862_v53 = vld [vmem:[#allocation63_spill] sm:$0xff] }
 0x40b   : > { %v7337_v41 = vpop.permute.xlu2 %2173 }
 0x40c   : > { %v7335_v29 = vpop.permute.xlu0 %2163  ;;  %10857 = vst [vmem:[#allocation136_spill] sm:$0xff] %v7337_v41  ;;  %v10863_v41 = vld [vmem:[#allocation62_spill] sm:$0xff] }
 0x40d   : > { %10856 = vst [vmem:[#allocation135_spill] sm:$0xff] %v7335_v29 }
 0x40f   : > { %2281 = vrot.lane.b32.xlu1 %v6902_v46, %s5053_s26 }
 0x411   : > { %2277 = vrot.lane.b32.xlu2 %v10858_v49, %s5053_s26  ;;  %v7345_v52 = vpop.permute.xlu1 %2165 }
 0x412   : > { %2285 = vrot.lane.b32.xlu0 %v6956_v55, %s5053_s26  ;;  %10859 = vst [vmem:[#allocation56_spill] sm:$0xff] %v7345_v52  ;;  %v1836_v55 = vrot.slane %v7098_v36, 2 }
 0x413   : > { %v7349_v10 = vpop.permute.xlu2 %2179 }
 0x414   : > { %v7347_v14 = vpop.permute.xlu0 %2169  ;;  %10861 = vst [vmem:[#allocation138_spill] sm:$0xff] %v7349_v10 }
 0x415   : > { %10860 = vst [vmem:[#allocation137_spill] sm:$0xff] %v7347_v14  ;;  %v1835_v14 = vrot.slane %v7112_v23, 2 }
 0x417   : > { %2287 = vrot.lane.b32.xlu1 %v10862_v53, %s5053_s26  ;;  %v7368_v10 = vsel %vm1746_vm6, %v1835_v14, %v1836_v55  ;;  %v10867_v53 = vld [vmem:[#allocation67_spill] sm:$0xff] }
 0x418   : > { %v7386_v14 = vld [vmem:[#allocation2 + $0x38] sm:$0xff] }
 0x419   : > { %2283 = vrot.lane.b32.xlu2 %v10863_v41, %s5053_s26  ;;  %v7357_v29 = vpop.permute.xlu1 %2171  ;;  %10871 = vst [vmem:[#allocation144_spill] sm:$0xff] %v7386_v14 }
 0x41a   : > { %2291 = vrot.lane.b32.xlu0 %v6976_v31, %s5053_s26  ;;  %10864 = vst [vmem:[#allocation139_spill] sm:$0xff] %v7357_v29 }
 0x41b   : > { %v7362_v52 = vpop.permute.xlu2 %2185 }
 0x41c   : > { %v7359_v46 = vpop.permute.xlu0 %2175  ;;  %10866 = vst [vmem:[#allocation141_spill] sm:$0xff] %v7362_v52 }
 0x41d   : > { %10865 = vst [vmem:[#allocation140_spill] sm:$0xff] %v7359_v46  ;;  %v1838_v46 = vrot.slane %v7243_v11, 2 }
 0x41f   : > { %2293 = vrot.lane.b32.xlu1 %v6953_v3, %s5053_s26  ;;  %v7382_v41 = vsel %vm1746_vm6, %v1836_v55, %v1838_v46  ;;  %v7398_v46 = vld [vmem:[#allocation2 + $0x48] sm:$0xff]  ;;  %v7402_v55 = vld [vmem:[#allocation2 + $0x60] sm:$0xff] }
 0x420   : > { %10875 = vst [vmem:[#allocation148_spill] sm:$0xff] %v7398_v46 }
 0x421   : > { %2289 = vrot.lane.b32.xlu2 %v10867_v53, %s5053_s26  ;;  %v7374_v29 = vpop.permute.xlu1 %2177  ;;  %10876 = vst [vmem:[#allocation149_spill] sm:$0xff] %v7402_v55 }
 0x422   : > { %2297 = vrot.lane.b32.xlu0 %v7368_v10, %s5053_s26  ;;  %10868 = vst [vmem:[#allocation67_spill] sm:$0xff] %v7374_v29  ;;  %v7406_v29 = vld [vmem:[#allocation2 + $0x30] sm:$0xff] }
 0x423   : > { %v7379_v52 = vpop.permute.xlu2 %2191  ;;  %10877 = vst [vmem:[#allocation150_spill] sm:$0xff] %v7406_v29 }
 0x424   : > { %v7377_v31 = vpop.permute.xlu0 %2181  ;;  %10870 = vst [vmem:[#allocation143_spill] sm:$0xff] %v7379_v52 }
 0x425   : > { %10869 = vst [vmem:[#allocation142_spill] sm:$0xff] %v7377_v31 }
 0x427   : > { %2299 = vrot.lane.b32.xlu1 %v7382_v41, %s5053_s26 }
 0x429   : > { %2295 = vrot.lane.b32.xlu2 %v6971_v5, %s5053_s26  ;;  %v7392_v11 = vpop.permute.xlu1 %2183 }
 0x42a   : > { %2335 = vrot.lane.b32.xlu0 %v7386_v14, %s5054_s29  ;;  %10872 = vst [vmem:[#allocation145_spill] sm:$0xff] %v7392_v11  ;;  %v7416_v14 = vld [vmem:[#allocation2 + $0x68] sm:$0xff] }
 0x42b   : > { %v7396_v52 = vpop.permute.xlu2 %2197  ;;  %10881 = vst [vmem:[#allocation154_spill] sm:$0xff] %v7416_v14 }
 0x42c   : > { %v7394_v31 = vpop.permute.xlu0 %2187  ;;  %10874 = vst [vmem:[#allocation147_spill] sm:$0xff] %v7396_v52 }
 0x42d   : > { %10873 = vst [vmem:[#allocation146_spill] sm:$0xff] %v7394_v31 }
 0x42f   : > { %2337 = vrot.lane.b32.xlu1 %v7398_v46, %s5054_s29  ;;  %v7420_v46 = vld [vmem:[#allocation2 + $0x80] sm:$0xff] }
 0x430   : > { %10882 = vst [vmem:[#allocation155_spill] sm:$0xff] %v7420_v46 }
 0x431   : > { %2333 = vrot.lane.b32.xlu2 %v7406_v29, %s5054_s29  ;;  %v7410_v11 = vpop.permute.xlu1 %2189  ;;  %v7434_v29 = vld [vmem:[#allocation2 + $0x90] sm:$0xff] }
 0x432   : > { %2341 = vrot.lane.b32.xlu0 %v7402_v55, %s5054_s29  ;;  %10878 = vst [vmem:[#allocation151_spill] sm:$0xff] %v7410_v11  ;;  %v7424_v55 = vld [vmem:[#allocation2 + $0x50] sm:$0xff] }
 0x433   : > { %v7414_v52 = vpop.permute.xlu2 %2203  ;;  %10883 = vst [vmem:[#allocation156_spill] sm:$0xff] %v7424_v55 }
 0x434   : > { %v7412_v31 = vpop.permute.xlu0 %2193  ;;  %10880 = vst [vmem:[#allocation153_spill] sm:$0xff] %v7414_v52 }
 0x435   : > { %10879 = vst [vmem:[#allocation152_spill] sm:$0xff] %v7412_v31 }
 0x436   : > { %10887 = vst [vmem:[#allocation160_spill] sm:$0xff] %v7434_v29 }
 0x437   : > { %2343 = vrot.lane.b32.xlu1 %v7416_v14, %s5054_s29  ;;  %v7438_v14 = vld [vmem:[#allocation2 + $0xa8] sm:$0xff] }
 0x438   : > { %10888 = vst [vmem:[#allocation161_spill] sm:$0xff] %v7438_v14 }
 0x439   : > { %2339 = vrot.lane.b32.xlu2 %v7424_v55, %s5054_s29  ;;  %v7428_v11 = vpop.permute.xlu1 %2195 }
 0x43a   : > { %2347 = vrot.lane.b32.xlu0 %v7420_v46, %s5054_s29  ;;  %10884 = vst [vmem:[#allocation157_spill] sm:$0xff] %v7428_v11  ;;  %v7442_v46 = vld [vmem:[#allocation2 + $0x78] sm:$0xff] }
 0x43b   : > { %v7432_v52 = vpop.permute.xlu2 %2241  ;;  %10889 = vst [vmem:[#allocation162_spill] sm:$0xff] %v7442_v46 }
 0x43c   : > { %v7430_v31 = vpop.permute.xlu0 %2199  ;;  %10886 = vst [vmem:[#allocation159_spill] sm:$0xff] %v7432_v52  ;;  %v7452_v52 = vld [vmem:[#allocation2 + $0xb0] sm:$0xff] }
 0x43d   : > { %10885 = vst [vmem:[#allocation158_spill] sm:$0xff] %v7430_v31 }
 0x43e   : > { %10891 = vst [vmem:[#allocation164_spill] sm:$0xff] %v7452_v52 }
 0x43f   : > { %2349 = vrot.lane.b32.xlu1 %v7434_v29, %s5054_s29 }
 0x441   : > { %2345 = vrot.lane.b32.xlu2 %v7442_v46, %s5054_s29  ;;  %v7446_v11 = vpop.permute.xlu1 %2201 }
 0x442   : > { %2353 = vrot.lane.b32.xlu0 %v7438_v14, %s5054_s29  ;;  %10890 = vst [vmem:[#allocation163_spill] sm:$0xff] %v7446_v11  ;;  %v7458_v14 = vld [vmem:[#allocation2 + $0x98] sm:$0xff] }
 0x443   : > { %v7450_v55 = vpop.permute.xlu2 %2247  ;;  %10892 = vst [vmem:[#allocation165_spill] sm:$0xff] %v7458_v14 }
 0x444   : > { %v7448_v31 = vpop.permute.xlu0 %2237 }
 0x447   : > { %2355 = vrot.lane.b32.xlu1 %v7452_v52, %s5054_s29 }
 0x449   : > { %2351 = vrot.lane.b32.xlu2 %v7458_v14, %s5054_s29  ;;  %v7462_v29 = vpop.permute.xlu1 %2239 }
 0x44a   : > { %2359 = vrot.lane.b32.xlu0 %v6537_v35, %s5054_s29 }
 0x44b   : > { %v7466_v46 = vpop.permute.xlu2 %2253 }
 0x44c   : > { %v7464_v11 = vpop.permute.xlu0 %2243 }
 0x44f   : > { %2361 = vrot.lane.b32.xlu1 %v6577_v58, %s5054_s29 }
 0x451   : > { %2357 = vrot.lane.b32.xlu2 %v6569_v54, %s5054_s29  ;;  %v7474_v35 = vpop.permute.xlu1 %2245 }
 0x452   : > { %2365 = vrot.lane.b32.xlu0 %v6584_v45, %s5054_s29 }
 0x453   : > { %v7478_v14 = vpop.permute.xlu2 %2259 }
 0x454   : > { %v7476_v52 = vpop.permute.xlu0 %2249 }
 0x457   : > { %2367 = vrot.lane.b32.xlu1 %v6565_v16, %s5054_s29 }
 0x459   : > { %2363 = vrot.lane.b32.xlu2 %v6554_v44, %s5054_s29  ;;  %v7486_v58 = vpop.permute.xlu1 %2251 }
 0x45a   : > { %2371 = vrot.lane.b32.xlu0 %v6620_v48, %s5054_s29 }
 0x45b   : > { %v7490_v54 = vpop.permute.xlu2 %2265 }
 0x45c   : > { %v7488_v45 = vpop.permute.xlu0 %2255  ;;  %10893 = vst [vmem:[#allocation166_spill] sm:$0xff] %v7490_v54  ;;  %v7528_v54 = vld [vmem:[#allocation2 + $0x1a0] sm:$0xff] }
 0x45f   : > { %2373 = vrot.lane.b32.xlu1 %v6648_v43, %s5054_s29 }
 0x461   : > { %2369 = vrot.lane.b32.xlu2 %v6641_v17, %s5054_s29  ;;  %v7498_v16 = vpop.permute.xlu1 %2257 }
 0x462   : > { %2377 = vrot.lane.b32.xlu0 %v6653_v60, %s5054_s29 }
 0x463   : > { %v7502_v44 = vpop.permute.xlu2 %2271 }
 0x464   : > { %v7500_v48 = vpop.permute.xlu0 %2261 }
 0x465   : > { %10894 = vst [vmem:[#allocation167_spill] sm:$0xff] %v7500_v48 }
 0x467   : > { %2379 = vrot.lane.b32.xlu1 %v6639_v0, %s5054_s29 }
 0x469   : > { %2375 = vrot.lane.b32.xlu2 %v6631_v30, %s5054_s29  ;;  %v7510_v43 = vpop.permute.xlu1 %2263 }
 0x46a   : > { %2383 = vrot.lane.b32.xlu0 %v6680_v18, %s5054_s29  ;;  %10895 = vst [vmem:[#allocation168_spill] sm:$0xff] %v7510_v43 }
 0x46b   : > { %v7514_v17 = vpop.permute.xlu2 %2277 }
 0x46c   : > { %v7512_v60 = vpop.permute.xlu0 %2267 }
 0x46d   : > { %10896 = vst [vmem:[#allocation169_spill] sm:$0xff] %v7512_v60 }
 0x46f   : > { %2385 = vrot.lane.b32.xlu1 %v6705_v34, %s5054_s29 }
 0x471   : > { %2381 = vrot.lane.b32.xlu2 %v6698_v7, %s5054_s29  ;;  %v7522_v0 = vpop.permute.xlu1 %2269 }
 0x472   : > { %2389 = vrot.lane.b32.xlu0 %v7112_v23, %s5054_s29  ;;  %10897 = vst [vmem:[#allocation170_spill] sm:$0xff] %v7522_v0  ;;  %v7542_v0 = vld [vmem:[#allocation2 + $0x198] sm:$0xff] }
 0x473   : > { %v7526_v30 = vpop.permute.xlu2 %2283 }
 0x474   : > { %v7524_v18 = vpop.permute.xlu0 %2273 }
 0x477   : > { %2391 = vrot.lane.b32.xlu1 %v7098_v36, %s5054_s29 }
 0x479   : > { %2387 = vrot.lane.b32.xlu2 %v6690_v56, %s5054_s29  ;;  %v7536_v34 = vpop.permute.xlu1 %2275 }
 0x47a   : > { %2395 = vrot.lane.b32.xlu0 %v7528_v54, %s5054_s29 }
 0x47b   : > { %v7540_v23 = vpop.permute.xlu2 %2289 }
 0x47c   : > { %v7538_v7 = vpop.permute.xlu0 %2279  ;;  %10898 = vst [vmem:[#allocation171_spill] sm:$0xff] %v7540_v23 }
 0x47f   : > { %2429 = vrot.lane.b32.xlu1 %v6432_v62, %s5055_s30 }
 0x481   : > { %2393 = vrot.lane.b32.xlu2 %v7542_v0, %s5054_s29  ;;  %v7550_v36 = vpop.permute.xlu1 %2281 }
 0x482   : > { %2433 = vrot.lane.b32.xlu0 %v10778_v22, %s5055_s30 }
 0x483   : > { %v7554_v60 = vpop.permute.xlu2 %2295 }
 0x484   : > { %v7552_v56 = vpop.permute.xlu0 %2285  ;;  %10900 = vst [vmem:[#allocation173_spill] sm:$0xff] %v7554_v60 }
 0x485   : > { %10899 = vst [vmem:[#allocation172_spill] sm:$0xff] %v7552_v56 }
 0x487   : > { %2435 = vrot.lane.b32.xlu1 %v6479_v26, %s5055_s30 }
 0x489   : > { %2431 = vrot.lane.b32.xlu2 %v6346_v13, %s5055_s30  ;;  %v7562_v62 = vpop.permute.xlu1 %2287 }
 0x48a   : > { %2439 = vrot.lane.b32.xlu0 %v10784_v15, %s5055_s30  ;;  %10901 = vst [vmem:[#allocation174_spill] sm:$0xff] %v7562_v62 }
 0x48b   : > { %v7566_v23 = vpop.permute.xlu2 %2333 }
 0x48c   : > { %v7564_v22 = vpop.permute.xlu0 %2291 }
 0x48d   : > { %10902 = vst [vmem:[#allocation175_spill] sm:$0xff] %v7564_v22  ;;  %v10912_v22 = vld [vmem:[#allocation27_spill] sm:$0xff] }
 0x48f   : > { %2441 = vrot.lane.b32.xlu1 %v6523_v28, %s5055_s30 }
 0x491   : > { %2437 = vrot.lane.b32.xlu2 %v6445_v47, %s5055_s30  ;;  %v7574_v26 = vpop.permute.xlu1 %2293 }
 0x492   : > { %2445 = vrot.lane.b32.xlu0 %v10790_v12, %s5055_s30  ;;  %10903 = vst [vmem:[#allocation176_spill] sm:$0xff] %v7574_v26 }
 0x493   : > { %v7578_v13 = vpop.permute.xlu2 %2339 }
 0x494   : > { %v7576_v15 = vpop.permute.xlu0 %2297 }
 0x495   : > { %10904 = vst [vmem:[#allocation177_spill] sm:$0xff] %v7576_v15  ;;  %v1844_v15 = vrot.slane %v7528_v54, 1 }
 0x497   : > { %2447 = vrot.lane.b32.xlu1 %v10783_v57, %s5055_s30 }
 0x499   : > { %2443 = vrot.lane.b32.xlu2 %v10782_v25, %s5055_s30  ;;  %v7586_v28 = vpop.permute.xlu1 %2299 }
 0x49a   : > { %2451 = vrot.lane.b32.xlu0 %v10796_v19, %s5055_s30  ;;  %10905 = vst [vmem:[#allocation178_spill] sm:$0xff] %v7586_v28  ;;  %v1843_v28 = vrot.slane %v7542_v0, 1 }
 0x49b   : > { %v7590_v47 = vpop.permute.xlu2 %2345 }
 0x49c   : > { %v7588_v12 = vpop.permute.xlu0 %2335  ;;  %v1845_v60 = vsel %vm1665_vm4, %v1843_v28, %v1844_v15  ;;  %v10916_v28 = vld [vmem:[#allocation18_spill] sm:$0xff] }
 0x49f   : > { %2453 = vrot.lane.b32.xlu1 %v10789_v4, %s5055_s30 }
 0x4a1   : > { %2449 = vrot.lane.b32.xlu2 %v10788_v1, %s5055_s30  ;;  %v7598_v57 = vpop.permute.xlu1 %2337 }
 0x4a2   : > { %2457 = vrot.lane.b32.xlu0 %v10802_v37, %s5055_s30 }
 0x4a3   : > { %v7602_v25 = vpop.permute.xlu2 %2351 }
 0x4a4   : > { %v7600_v19 = vpop.permute.xlu0 %2341 }
 0x4a7   : > { %2459 = vrot.lane.b32.xlu1 %v10795_v50, %s5055_s30 }
 0x4a9   : > { %2455 = vrot.lane.b32.xlu2 %v10794_v40, %s5055_s30  ;;  %v7610_v4 = vpop.permute.xlu1 %2343 }
 0x4aa   : > { %2463 = vrot.lane.b32.xlu0 %v10807_v38, %s5055_s30 }
 0x4ab   : > { %v7614_v1 = vpop.permute.xlu2 %2357 }
 0x4ac   : > { %v7612_v37 = vpop.permute.xlu0 %2347  ;;  %10906 = vst [vmem:[#allocation179_spill] sm:$0xff] %v7614_v1  ;;  %v10924_v1 = vld [vmem:[#allocation38_spill] sm:$0xff] }
 0x4af   : > { %2465 = vrot.lane.b32.xlu1 %v10801_v33, %s5055_s30  ;;  %v10908_v33 = vld [vmem:[#allocation26_spill] sm:$0xff] }
 0x4b1   : > { %2461 = vrot.lane.b32.xlu2 %v10800_v6, %s5055_s30  ;;  %v7622_v50 = vpop.permute.xlu1 %2349 }
 0x4b2   : > { %2469 = vrot.lane.b32.xlu0 %v10812_v9, %s5055_s30  ;;  %v10909_v9 = vld [vmem:[#allocation24_spill] sm:$0xff] }
 0x4b3   : > { %v7626_v40 = vpop.permute.xlu2 %2363 }
 0x4b4   : > { %v7624_v38 = vpop.permute.xlu0 %2353  ;;  %10907 = vst [vmem:[#allocation180_spill] sm:$0xff] %v7626_v40 }
 0x4b7   : > { %2471 = vrot.lane.b32.xlu1 %v6693_v39, %s5055_s30  ;;  %v10913_v39 = vld [vmem:[#allocation16_spill] sm:$0xff] }
 0x4b9   : > { %2467 = vrot.lane.b32.xlu2 %v10909_v9, %s5055_s30  ;;  %v7636_v6 = vpop.permute.xlu1 %2355 }
 0x4ba   : > { %2475 = vrot.lane.b32.xlu0 %v10908_v33, %s5055_s30  ;;  %10910 = vst [vmem:[#allocation26_spill] sm:$0xff] %v7636_v6  ;;  %v10958_v6 = vld [vmem:[#allocation110_spill] sm:$0xff] }
 0x4bb   : > { %v7641_v40 = vpop.permute.xlu2 %2369 }
 0x4bc   : > { %v7639_v26 = vpop.permute.xlu0 %2359 }
 0x4bd   : > { %10911 = vst [vmem:[#allocation24_spill] sm:$0xff] %v7639_v26 }
 0x4bf   : > { %2477 = vrot.lane.b32.xlu1 %v10912_v22, %s5055_s30  ;;  %v10917_v22 = vld [vmem:[#allocation13_spill] sm:$0xff] }
 0x4c1   : > { %2473 = vrot.lane.b32.xlu2 %v10913_v39, %s5055_s30  ;;  %v7649_v33 = vpop.permute.xlu1 %2361 }
 0x4c2   : > { %2481 = vrot.lane.b32.xlu0 %v10823_v20, %s5055_s30  ;;  %10914 = vst [vmem:[#allocation27_spill] sm:$0xff] %v7649_v33  ;;  %v7667_v33 = vld [vmem:[#allocation2 + $0x1a8] sm:$0x3] }
 0x4c3   : > { %v7653_v62 = vpop.permute.xlu2 %2375 }
 0x4c4   : > { %v7651_v9 = vpop.permute.xlu0 %2365 }
 0x4c5   : > { %10915 = vst [vmem:[#allocation16_spill] sm:$0xff] %v7651_v9 }
 0x4c7   : > { %2483 = vrot.lane.b32.xlu1 %v10916_v28, %s5055_s30  ;;  %v10919_v28 = vld [vmem:[#allocation120_spill] sm:$0xff] }
 0x4c9   : > { %2479 = vrot.lane.b32.xlu2 %v10917_v22, %s5055_s30  ;;  %v7661_v26 = vpop.permute.xlu1 %2367  ;;  %v1846_v22 = vrot.slane %v7667_v33, 1 }
 0x4ca   : > { %2487 = vrot.lane.b32.xlu0 %v7255_v2, %s5055_s30 }
 0x4cb   : > { %v7665_v39 = vpop.permute.xlu2 %2381 }
 0x4cc   : > { %v7663_v20 = vpop.permute.xlu0 %2371  ;;  %10918 = vst [vmem:[#allocation18_spill] sm:$0xff] %v7665_v39  ;;  %v1847_v39 = vsel %vm1665_vm4, %v1844_v15, %v1846_v22  ;;  %v10925_v15 = vld [vmem:[#allocation29_spill] sm:$0xff] }
 0x4cf   : > { %2489 = vrot.lane.b32.xlu1 %v1845_v60, %s5055_s30 }
 0x4d1   : > { %2485 = vrot.lane.b32.xlu2 %v10919_v28, %s5055_s30  ;;  %v7674_v2 = vpop.permute.xlu1 %2373 }
 0x4d2   : > { %2525 = vrot.lane.b32.xlu0 %v10831_v63, %s5056_s9 }
 0x4d3   : > { %v7679_v43 = vpop.permute.xlu2 %2387 }
 0x4d4   : > { %v7677_v9 = vpop.permute.xlu0 %2377  ;;  %10920 = vst [vmem:[#allocation13_spill] sm:$0xff] %v7679_v43 }
 0x4d7   : > { %2527 = vrot.lane.b32.xlu1 %v6781_v24, %s5056_s9 }
 0x4d9   : > { %2491 = vrot.lane.b32.xlu2 %v1847_v39, %s5055_s30  ;;  %v7687_v63 = vpop.permute.xlu1 %2379 }
 0x4da   : > { %2531 = vrot.lane.b32.xlu0 %v10836_v42, %s5056_s9  ;;  %10921 = vst [vmem:[#allocation120_spill] sm:$0xff] %v7687_v63 }
 0x4db   : > { %v7691_v28 = vpop.permute.xlu2 %2393 }
 0x4dc   : > { %v7689_v60 = vpop.permute.xlu0 %2383  ;;  %10923 = vst [vmem:[#allocation182_spill] sm:$0xff] %v7691_v28  ;;  %v10931_v28 = vld [vmem:[#allocation47_spill] sm:$0xff] }
 0x4dd   : > { %10922 = vst [vmem:[#allocation181_spill] sm:$0xff] %v7689_v60  ;;  %v1849_v60 = vrot.slane %v7528_v54, 2  ;;  %v10942_v54 = vld [vmem:[#allocation57_spill] sm:$0xff] }
 0x4df   : > { %2533 = vrot.lane.b32.xlu1 %v10924_v1, %s5056_s9  ;;  %v10928_v1 = vld [vmem:[#allocation32_spill] sm:$0xff] }
 0x4e1   : > { %2529 = vrot.lane.b32.xlu2 %v10925_v15, %s5056_s9  ;;  %v7699_v24 = vpop.permute.xlu1 %2385 }
 0x4e2   : > { %2537 = vrot.lane.b32.xlu0 %v10840_v61, %s5056_s9  ;;  %10926 = vst [vmem:[#allocation38_spill] sm:$0xff] %v7699_v24  ;;  %v1848_v24 = vrot.slane %v7542_v0, 2 }
 0x4e3   : > { %v7703_v39 = vpop.permute.xlu2 %2431 }
 0x4e4   : > { %v7701_v42 = vpop.permute.xlu0 %2389 }
 0x4e5   : > { %10927 = vst [vmem:[#allocation29_spill] sm:$0xff] %v7701_v42 }
 0x4e7   : > { %2539 = vrot.lane.b32.xlu1 %v6828_v8, %s5056_s9  ;;  %v10932_v8 = vld [vmem:[#allocation37_spill] sm:$0xff] }
 0x4e9   : > { %2535 = vrot.lane.b32.xlu2 %v10928_v1, %s5056_s9  ;;  %v7711_v22 = vpop.permute.xlu1 %2391 }
 0x4ea   : > { %2543 = vrot.lane.b32.xlu0 %v10845_v59, %s5056_s9  ;;  %10929 = vst [vmem:[#allocation32_spill] sm:$0xff] %v7711_v22  ;;  %v10934_v22 = vld [vmem:[#allocation58_spill] sm:$0xff] }
 0x4eb   : > { %v7715_v15 = vpop.permute.xlu2 %2437 }
 0x4ec   : > { %v7713_v61 = vpop.permute.xlu0 %2395 }
 0x4ed   : > { %10930 = vst [vmem:[#allocation183_spill] sm:$0xff] %v7713_v61 }
 0x4ef   : > { %2545 = vrot.lane.b32.xlu1 %v10931_v28, %s5056_s9  ;;  %v10933_v28 = vld [vmem:[#allocation41_spill] sm:$0xff] }
 0x4f1   : > { %2541 = vrot.lane.b32.xlu2 %v10932_v8, %s5056_s9  ;;  %v7723_v42 = vpop.permute.xlu1 %2429 }
 0x4f2   : > { %2549 = vrot.lane.b32.xlu0 %v10849_v32, %s5056_s9 }
 0x4f3   : > { %v7727_v1 = vpop.permute.xlu2 %2443 }
 0x4f4   : > { %v7725_v59 = vpop.permute.xlu0 %2433 }
 0x4f7   : > { %2551 = vrot.lane.b32.xlu1 %v6879_v51, %s5056_s9  ;;  %v10935_v51 = vld [vmem:[#allocation46_spill] sm:$0xff] }
 0x4f9   : > { %2547 = vrot.lane.b32.xlu2 %v10933_v28, %s5056_s9  ;;  %v7735_v61 = vpop.permute.xlu1 %2435 }
 0x4fa   : > { %2555 = vrot.lane.b32.xlu0 %v10854_v21, %s5056_s9 }
 0x4fb   : > { %v7739_v8 = vpop.permute.xlu2 %2449 }
 0x4fc   : > { %v7737_v32 = vpop.permute.xlu0 %2439 }
 0x4ff   : > { %2557 = vrot.lane.b32.xlu1 %v10934_v22, %s5056_s9  ;;  %v10937_v22 = vld [vmem:[#allocation62_spill] sm:$0xff] }
 0x501   : > { %2553 = vrot.lane.b32.xlu2 %v10935_v51, %s5056_s9  ;;  %v7747_v43 = vpop.permute.xlu1 %2441 }
 0x502   : > { %2561 = vrot.lane.b32.xlu0 %v10858_v49, %s5056_s9  ;;  %v10938_v49 = vld [vmem:[#allocation52_spill] sm:$0xff] }
 0x503   : > { %v7751_v28 = vpop.permute.xlu2 %2455 }
 0x504   : > { %v7749_v21 = vpop.permute.xlu0 %2445  ;;  %10936 = vst [vmem:[#allocation47_spill] sm:$0xff] %v7751_v28  ;;  %v1850_v28 = vsel %vm1746_vm6, %v1848_v24, %v1849_v60  ;;  %v10946_v24 = vld [vmem:[#allocation63_spill] sm:$0xff] }
 0x507   : > { %2563 = vrot.lane.b32.xlu1 %v6930_v27, %s5056_s9  ;;  %v10941_v27 = vld [vmem:[#allocation68_spill] sm:$0xff] }
 0x509   : > { %2559 = vrot.lane.b32.xlu2 %v10938_v49, %s5056_s9  ;;  %v7761_v51 = vpop.permute.xlu1 %2447 }
 0x50a   : > { %2567 = vrot.lane.b32.xlu0 %v10937_v22, %s5056_s9 }
 0x50b   : > { %v7765_v48 = vpop.permute.xlu2 %2461 }
 0x50c   : > { %v7763_v56 = vpop.permute.xlu0 %2451  ;;  %10940 = vst [vmem:[#allocation41_spill] sm:$0xff] %v7765_v48  ;;  %v2892_v48 = vld [vmem:[%s10394_s4 + $0x40] sm:$0xff] }
 0x50d   : > { %10939 = vst [vmem:[#allocation37_spill] sm:$0xff] %v7763_v56  ;;  %v10945_v56 = vld [vmem:[#allocation72_spill] sm:$0xff]  ;;  %3001 = vmatpush.msra.mxu1 %v2892_v48  ;;  %4931 = vmatpush.msrb.mxu3 %v2892_v48  ;;  %v2891_v48 = vld [vmem:[%s10394_s4 + $0x38] sm:$0xff] }
 0x50f   : > { %2569 = vrot.lane.b32.xlu1 %v10941_v27, %s5056_s9  ;;  %3002 = vmatpush.msra.mxu1 %v2891_v48 }
 0x510   : > { %4932 = vmatpush.msrb.mxu3 %v2891_v48 }
 0x511   : > { %2565 = vrot.lane.b32.xlu2 %v10942_v54, %s5056_s9  ;;  %v7774_v0 = vpop.permute.xlu1 %2453 }
 0x512   : > { %2573 = vrot.lane.b32.xlu0 %v10867_v53, %s5056_s9  ;;  %10943 = vst [vmem:[#allocation58_spill] sm:$0xff] %v7774_v0  ;;  %v4988_v0 = vld [vmem:[#allocation2] sm:$0xff] }
 0x513   : > { %v7778_v49 = vpop.permute.xlu2 %2467 }
 0x514   : > { %v7776_v22 = vpop.permute.xlu0 %2457 }
 0x515   : > { %10944 = vst [vmem:[#allocation46_spill] sm:$0xff] %v7776_v22 }
 0x517   : > { %2575 = vrot.lane.b32.xlu1 %v10945_v56, %s5056_s9 }
 0x519   : > { %2571 = vrot.lane.b32.xlu2 %v10946_v24, %s5056_s9  ;;  %v7786_v27 = vpop.permute.xlu1 %2459 }
 0x51a   : > { %2579 = vrot.lane.b32.xlu0 %v6971_v5, %s5056_s9  ;;  %10947 = vst [vmem:[#allocation62_spill] sm:$0xff] %v7786_v27  ;;  %v1851_v5 = vrot.slane %v7667_v33, 2  ;;  %v2888_v33 = vld [vmem:[%s10394_s4 + $0x20] sm:$0xff] }
 0x51b   : > { %v7790_v54 = vpop.permute.xlu2 %2473 }
 0x51c   : > { %v7788_v53 = vpop.permute.xlu0 %2463 }
 0x51f   : > { %2581 = vrot.lane.b32.xlu1 %v7368_v10, %s5056_s9  ;;  %v2890_v10 = vld [vmem:[%s10394_s4 + $0x30] sm:$0xff] }
 0x520   : > { %3003 = vmatpush.msra.mxu1 %v2890_v10  ;;  %4933 = vmatpush.msrb.mxu3 %v2890_v10  ;;  %v2887_v10 = vld [vmem:[%s10394_s4 + $0x18] sm:$0xff] }
 0x521   : > { %2577 = vrot.lane.b32.xlu2 %v6953_v3, %s5056_s9  ;;  %v7801_v56 = vpop.permute.xlu1 %2465  ;;  %v2889_v3 = vld [vmem:[%s10394_s4 + $0x28] sm:$0xff] }
 0x522   : > { %2585 = vrot.lane.b32.xlu0 %v1850_v28, %s5056_s9  ;;  %v1852_v28 = vsel %vm1746_vm6, %v1849_v60, %v1851_v5  ;;  %3004 = vmatpush.msra.mxu1 %v2889_v3 }
 0x523   : > { %v7805_v27 = vpop.permute.xlu2 %2479  ;;  %4934 = vmatpush.msrb.mxu3 %v2889_v3  ;;  %v2884_v3 = vld [vmem:[%s10394_s4] sm:$0xff] }
 0x524   : > { %v7803_v24 = vpop.permute.xlu0 %2469  ;;  %10948 = vst [vmem:[#allocation52_spill] sm:$0xff] %v7805_v27  ;;  %3005 = vmatpush.msra.mxu1 %v2888_v33 }
 0x525   : > { %4935 = vmatpush.msrb.mxu3 %v2888_v33 }
 0x526   : > { %3006 = vmatpush.msra.mxu1 %v2887_v10 }
 0x527   : > { %2587 = vrot.lane.b32.xlu1 %v1852_v28, %s5056_s9  ;;  %v2886_v28 = vld [vmem:[%s10394_s4 + $0x10] sm:$0xff]  ;;  %4936 = vmatpush.msrb.mxu3 %v2887_v10 }
 0x528   : > { %3007 = vmatpush.msra.mxu1 %v2886_v28 }
 0x529   : > { %2583 = vrot.lane.b32.xlu2 %v7382_v41, %s5056_s9  ;;  %v7823_v60 = vpop.permute.xlu1 %2471  ;;  %v2885_v41 = vld [vmem:[%s10394_s4 + $0x8] sm:$0xff]  ;;  %4937 = vmatpush.msrb.mxu3 %v2886_v28 }
 0x52a   : > { %3008 = vmatpush.msra.mxu1 %v2885_v41 }
 0x52b   : > { %v7827_v48 = vpop.permute.xlu2 %2485  ;;  %4938 = vmatpush.msrb.mxu3 %v2885_v41  ;;  %v10957_v41 = vld [vmem:[#allocation83_spill] sm:$0xff] }
 0x52c   : > { %v7825_v5 = vpop.permute.xlu0 %2475  ;;  %10950 = vst [vmem:[#allocation57_spill] sm:$0xff] %v7827_v48  ;;  %3009 = vmatpush.msra.mxu1 %v2884_v3 }
 0x52d   : > { %10949 = vst [vmem:[#allocation68_spill] sm:$0xff] %v7825_v5  ;;  %4939 = vmatpush.msrb.mxu3 %v2884_v3  ;;  %v10956_v5 = vld [vmem:[#allocation36_spill] sm:$0xff]  ;;  %v10959_v3 = vld [vmem:[#allocation34_spill] sm:$0xff] }
 0x52e   : > { %v2621_v63 = vsel %vm326_vm0, %v4988_v0, %v10956_v5 }
 0x531   : > { %v7841_v33 = vpop.permute.xlu1 %2477 }
 0x532   : > { %10951 = vst [vmem:[#allocation72_spill] sm:$0xff] %v7841_v33  ;;  %v2654_v33 = vsel %vm2653_vm8, %v2621_v63, %v10957_v41  ;;  %v10961_v41 = vld [vmem:[#allocation30_spill] sm:$0xff] }
 0x533   : > { %v7845_v22 = vpop.permute.xlu2 %2491 }
 0x534   : > { %v7843_v48 = vpop.permute.xlu0 %2481  ;;  %10953 = vst [vmem:[#allocation184_spill] sm:$0xff] %v7845_v22 }
 0x535   : > { %10952 = vst [vmem:[#allocation63_spill] sm:$0xff] %v7843_v48  ;;  %v2687_v48 = vsel %vm2686_vm7, %v2654_v33, %v10958_v6  ;;  %v4989_v33 = vld [vmem:[#allocation2 + $0x8] sm:$0xff] }
 0x536   : > { %v2720_v22 = vsel %vm2719_vm9, %v2687_v48, %v10959_v3 }
 0x539   : > { %v7847_v10 = vpop.permute.xlu1 %2483 }
 0x53a   : > { %10954 = vst [vmem:[#allocation185_spill] sm:$0xff] %v7847_v10 }
 0x53b   : > { %v2530_v28 = vpop.permute.xlu2 %2529 }
 0x53c   : > { %v7849_v27 = vpop.permute.xlu0 %2487 }
 0x53d   : > { %10955 = vst [vmem:[#allocation186_spill] sm:$0xff] %v7849_v27  ;;  %v2753_v27 = vsel %vm2752_vm11, %v2720_v22, %v7448_v31  ;;  %v2622_v31 = vsel %vm326_vm0, %v4989_v33, %v10961_v41 }
 0x53e   : > { %v2786_v10 = vsel %vm2785_vm10, %v2753_v27, %v7566_v23  ;;  %v10962_v23 = vld [vmem:[#allocation85_spill] sm:$0xff] }
 0x53f   : > { %v2819_v63 = vsel %vm2818_vm12, %v2786_v10, %v7723_v42  ;;  %v2655_v22 = vsel %vm2653_vm8, %v2622_v31, %v10962_v23  ;;  %v10963_v27 = vld [vmem:[#allocation25_spill] sm:$0xff]  ;;  %v4990_v23 = vld [vmem:[#allocation2 + $0x18] sm:$0xff] }
 0x540   : > { %v2688_v3 = vsel %vm2686_vm7, %v2655_v22, %v10963_v27  ;;  %v10965_v22 = vld [vmem:[#allocation35_spill] sm:$0xff] }
 0x541   : > { %v7863_v0 = vpop.permute.xlu1 %2489  ;;  %v2623_v27 = vsel %vm326_vm0, %v4990_v23, %v10965_v22 }
 0x542   : > { %10960 = vst [vmem:[#allocation36_spill] sm:$0xff] %v7863_v0  ;;  %v10964_v0 = vld [vmem:[#allocation126_spill] sm:$0xff] }
 0x543   : > { %v7867_v5 = vpop.permute.xlu2 %2535  ;;  %v2721_v42 = vsel %vm2719_vm9, %v2688_v3, %v10964_v0  ;;  %v10966_v0 = vld [vmem:[#allocation81_spill] sm:$0xff]  ;;  %v10967_v3 = vld [vmem:[#allocation6_spill] sm:$0xff] }
 0x544   : > { %v2526_v6 = vpop.permute.xlu0 %2525  ;;  %v2754_v10 = vsel %vm2752_vm11, %v2721_v42, %v7462_v29  ;;  %v2656_v29 = vsel %vm2653_vm8, %v2623_v27, %v10966_v0  ;;  %v10968_v42 = vld [vmem:[#allocation129_spill] sm:$0xff]  ;;  %v4991_v0 = vld [vmem:[#allocation2 + $0x20] sm:$0xff] }
 0x545   : > { %v2852_v48 = vsel %vm2851_vm14, %v2819_v63, %v2526_v6  ;;  %v2787_v63 = vsel %vm2785_vm10, %v2754_v10, %v7588_v12  ;;  %v2689_v12 = vsel %vm2686_vm7, %v2656_v29, %v10967_v3  ;;  %v10969_v10 = vld [vmem:[#allocation159_spill] sm:$0xff] }
 0x546   : > { %4860 = vmatmul.msk.f32.vlgmr.msra.gmra.mxu1 %vm2897_vm13, %v2852_v48  ;;  %v2820_v33 = vsel %vm2818_vm12, %v2787_v63, %v7703_v39  ;;  %v2722_v39 = vsel %vm2719_vm9, %v2689_v12, %v10968_v42  ;;  %v10970_v29 = vld [vmem:[#allocation43_spill] sm:$0xff]  ;;  %v10971_v12 = vld [vmem:[#allocation86_spill] sm:$0xff] }
 0x547   : > { %v2755_v63 = vsel %vm2752_vm11, %v2722_v39, %v10969_v10  ;;  %v2624_v3 = vsel %vm326_vm0, %v4991_v0, %v10970_v29  ;;  %v10973_v10 = vld [vmem:[#allocation40_spill] sm:$0xff] }
 0x548   : > { %v2657_v42 = vsel %vm2653_vm8, %v2624_v3, %v10971_v12  ;;  %v10975_v3 = vld [vmem:[#allocation33_spill] sm:$0xff]  ;;  %v10976_v12 = vld [vmem:[#allocation150_spill] sm:$0xff] }
 0x549   : > { %v2528_v6 = vpop.permute.xlu1 %2527 }
 0x54a   : > { %v2853_v31 = vsel %vm2851_vm14, %v2820_v33, %v2528_v6  ;;  %v2788_v6 = vsel %vm2785_vm10, %v2755_v63, %v7598_v57  ;;  %v10972_v57 = vld [vmem:[#allocation112_spill] sm:$0xff] }
 0x54b   : > { %v7885_v41 = vpop.permute.xlu2 %2541  ;;  %v2821_v23 = vsel %vm2818_vm12, %v2788_v6, %v7725_v59  ;;  %v2690_v39 = vsel %vm2686_vm7, %v2657_v42, %v10972_v57  ;;  %v2625_v42 = vsel %vm326_vm0, %v10976_v12, %v10975_v3  ;;  %v10977_v57 = vld [vmem:[#allocation65_spill] sm:$0xff] }
 0x54c   : > { %v2532_v48 = vpop.permute.xlu0 %2531  ;;  %v2854_v27 = vsel %vm2851_vm14, %v2821_v23, %v2530_v28  ;;  %v2723_v59 = vsel %vm2719_vm9, %v2690_v39, %v10973_v10  ;;  %v10978_v39 = vld [vmem:[#allocation88_spill] sm:$0xff] }
 0x54d   : > { %v2756_v63 = vsel %vm2752_vm11, %v2723_v59, %v7464_v11  ;;  %v4992_v11 = vld [vmem:[#allocation2 + $0xc8] sm:$0xff]  ;;  %v2658_v10 = vsel %vm2653_vm8, %v2625_v42, %v10978_v39 }
 0x54e   : > { %4861 = vmatmul.msk.f32.gmra.mxu1 %vm2897_vm13, %v2853_v31  ;;  %v2789_v28 = vsel %vm2785_vm10, %v2756_v63, %v7578_v13  ;;  %v2638_v13 = vsel %vm326_vm0, %v4992_v11, %v10977_v57  ;;  %v10980_v63 = vld [vmem:[#allocation10_spill] sm:$0xff] }
 0x54f   : > { %v2822_v23 = vsel %vm2818_vm12, %v2789_v28, %v7735_v61  ;;  %v10979_v61 = vld [vmem:[#allocation96_spill] sm:$0xff]  ;;  %v2691_v28 = vsel %vm2686_vm7, %v2658_v10, %v10980_v63 }
 0x550   : > { %v2855_v29 = vsel %vm2851_vm14, %v2822_v23, %v2532_v48  ;;  %v2671_v59 = vsel %vm2653_vm8, %v2638_v13, %v10979_v61  ;;  %v10981_v48 = vld [vmem:[#allocation117_spill] sm:$0xff]  ;;  %v10985_v63 = vld [vmem:[#allocation144_spill] sm:$0xff] }
 0x551   : > { %v2534_v33 = vpop.permute.xlu1 %2533  ;;  %v2704_v23 = vsel %vm2686_vm7, %v2671_v59, %v10981_v48 }
 0x553   : > { %v7905_v22 = vpop.permute.xlu2 %2547 }
 0x554   : > { %v7903_v31 = vpop.permute.xlu0 %2537 }
 0x556   : > { %4862 = vmatmul.msk.f32.gmra.mxu1 %vm2897_vm13, %v2854_v27 }
 0x559   : > { %v7921_v6 = vpop.permute.xlu1 %2539 }
 0x55b   : > { %v7927_v0 = vpop.permute.xlu2 %2553 }
 0x55c   : > { %v7925_v27 = vpop.permute.xlu0 %2543  ;;  %10974 = vst [vmem:[#allocation83_spill] sm:$0xff] %v7927_v0  ;;  %v10982_v0 = vld [vmem:[#allocation128_spill] sm:$0xff] }
 0x55d   : > { %v2724_v3 = vsel %vm2719_vm9, %v2691_v28, %v10982_v0 }
 0x55e   : > { %4863 = vmatmul.msk.f32.gmra.mxu1 %vm2897_vm13, %v2855_v29  ;;  %v10983_v29 = vld [vmem:[#allocation140_spill] sm:$0xff]  ;;  %v2757_v11 = vsel %vm2752_vm11, %v2724_v3, %v7474_v35 }
 0x55f   : > { %v2737_v12 = vsel %vm2719_vm9, %v2704_v23, %v10983_v29  ;;  %v2790_v57 = vsel %vm2785_vm10, %v2757_v11, %v7600_v19 }
 0x560   : > { %v2770_v42 = vsel %vm2752_vm11, %v2737_v12, %v7502_v44  ;;  %v2823_v0 = vsel %vm2818_vm12, %v2790_v57, %v7715_v15  ;;  %v10984_v44 = vld [vmem:[#allocation42_spill] sm:$0xff]  ;;  %v10987_v15 = vld [vmem:[#allocation23_spill] sm:$0xff] }
 0x561   : > { %v7954_v13 = vpop.permute.xlu1 %2545  ;;  %v2803_v39 = vsel %vm2785_vm10, %v2770_v42, %v7661_v26  ;;  %v2856_v59 = vsel %vm2851_vm14, %v2823_v0, %v2534_v33  ;;  %v2626_v19 = vsel %vm326_vm0, %v10985_v63, %v10984_v44  ;;  %v10986_v26 = vld [vmem:[#allocation84_spill] sm:$0xff]  ;;  %v10993_v63 = vld [vmem:[#allocation101_spill] sm:$0xff] }
 0x562   : > { %v2836_v61 = vsel %vm2818_vm12, %v2803_v39, %v7788_v53  ;;  %v2659_v48 = vsel %vm2653_vm8, %v2626_v19, %v10986_v26  ;;  %v10988_v53 = vld [vmem:[#allocation131_spill] sm:$0xff]  ;;  %v10989_v39 = vld [vmem:[#allocation48_spill] sm:$0xff] }
 0x563   : > { %v2560_v35 = vpop.permute.xlu2 %2559  ;;  %v2692_v23 = vsel %vm2686_vm7, %v2659_v48, %v10987_v15  ;;  %v10990_v0 = vld [vmem:[#allocation148_spill] sm:$0xff]  ;;  %v10996_v48 = vld [vmem:[#allocation45_spill] sm:$0xff] }
 0x564   : > { %v7960_v10 = vpop.permute.xlu0 %2549  ;;  %v2869_v28 = vsel %vm2851_vm14, %v2836_v61, %v2560_v35  ;;  %v2725_v3 = vsel %vm2719_vm9, %v2692_v23, %v10988_v53  ;;  %v2627_v61 = vsel %vm326_vm0, %v10990_v0, %v10989_v39  ;;  %v4993_v35 = vld [vmem:[#allocation2 + $0xd8] sm:$0xff]  ;;  %v10994_v19 = vld [vmem:[#allocation20_spill] sm:$0xff] }
 0x565   : > { %4877 = vmatmul.msk.f32.vlgmr.msrb.gmra.mxu3 %vm2897_vm13, %v2869_v28  ;;  %v2758_v33 = vsel %vm2752_vm11, %v2725_v3, %v7450_v55  ;;  %v10997_v23 = vld [vmem:[#allocation67_spill] sm:$0xff] }
 0x566   : > { %4864 = vmatmul.msk.f32.gmra.mxu1 %vm2897_vm13, %v2856_v59  ;;  %v2791_v29 = vsel %vm2785_vm10, %v2758_v33, %v7610_v4  ;;  %v10991_v59 = vld [vmem:[#allocation69_spill] sm:$0xff] }
 0x567   : > { %v2824_v11 = vsel %vm2818_vm12, %v2791_v29, %v7737_v32  ;;  %v2639_v55 = vsel %vm326_vm0, %v4993_v35, %v10991_v59  ;;  %v10992_v4 = vld [vmem:[#allocation89_spill] sm:$0xff]  ;;  %v10998_v35 = vld [vmem:[#allocation39_spill] sm:$0xff]  ;;  %v10999_v59 = vld [vmem:[#allocation156_spill] sm:$0xff] }
 0x568   : > { %v2857_v57 = vsel %vm2851_vm14, %v2824_v11, %v7867_v5  ;;  %v2660_v44 = vsel %vm2653_vm8, %v2627_v61, %v10992_v4  ;;  %v2672_v32 = vsel %vm2653_vm8, %v2639_v55, %v10993_v63  ;;  %v10995_v5 = vld [vmem:[#allocation114_spill] sm:$0xff]  ;;  %v4994_v55 = vld [vmem:[#allocation2 + $0xe0] sm:$0xff] }
 0x569   : > { %v7981_v12 = vpop.permute.xlu1 %2551  ;;  %v2693_v28 = vsel %vm2686_vm7, %v2660_v44, %v10994_v19  ;;  %v2705_v26 = vsel %vm2686_vm7, %v2672_v32, %v10995_v5  ;;  %v11002_v44 = vld [vmem:[#allocation103_spill] sm:$0xff]  ;;  %v11003_v63 = vld [vmem:[#allocation14_spill] sm:$0xff] }
 0x56a   : > { %v2726_v15 = vsel %vm2719_vm9, %v2693_v28, %v10996_v48  ;;  %v2738_v53 = vsel %vm2719_vm9, %v2705_v26, %v10997_v23  ;;  %v11004_v19 = vld [vmem:[#allocation118_spill] sm:$0xff] }
 0x56b   : > { %v2759_v3 = vsel %vm2752_vm11, %v2726_v15, %v7476_v52  ;;  %v2771_v33 = vsel %vm2752_vm11, %v2738_v53, %v7524_v18  ;;  %v11005_v5 = vld [vmem:[#allocation130_spill] sm:$0xff] }
 0x56c   : > { %v7985_v42 = vpop.permute.xlu0 %2555  ;;  %v2792_v29 = vsel %vm2785_vm10, %v2759_v3, %v7590_v47  ;;  %v2804_v11 = vsel %vm2785_vm10, %v2771_v33, %v7641_v40  ;;  %v2628_v47 = vsel %vm326_vm0, %v10999_v59, %v10998_v35  ;;  %v11000_v40 = vld [vmem:[#allocation61_spill] sm:$0xff]  ;;  %v11006_v48 = vld [vmem:[#allocation138_spill] sm:$0xff]  ;;  %v11011_v35 = vld [vmem:[#allocation99_spill] sm:$0xff] }
 0x56d   : > { %v2825_v39 = vsel %vm2818_vm12, %v2792_v29, %v7747_v43  ;;  %v2837_v0 = vsel %vm2818_vm12, %v2804_v11, %v7801_v56  ;;  %v2640_v4 = vsel %vm326_vm0, %v4994_v55, %v11000_v40  ;;  %v11001_v43 = vld [vmem:[#allocation91_spill] sm:$0xff]  ;;  %v11012_v59 = vld [vmem:[#allocation21_spill] sm:$0xff] }
 0x56e   : > { %4865 = vmatmul.msk.f32.gmra.mxu1 %vm2897_vm13, %v2857_v57  ;;  %v2858_v52 = vsel %vm2851_vm14, %v2825_v39, %v7903_v31  ;;  %v2661_v56 = vsel %vm2653_vm8, %v2628_v47, %v11001_v43  ;;  %v2673_v31 = vsel %vm2653_vm8, %v2640_v4, %v11002_v44  ;;  %v11013_v55 = vld [vmem:[#allocation17_spill] sm:$0xff] }
 0x56f   : > { %v2694_v32 = vsel %vm2686_vm7, %v2661_v56, %v11003_v63  ;;  %v2706_v28 = vsel %vm2686_vm7, %v2673_v31, %v11004_v19  ;;  %v11014_v4 = vld [vmem:[#allocation133_spill] sm:$0xff]  ;;  %v11015_v56 = vld [vmem:[#allocation142_spill] sm:$0xff] }
 0x570   : > { %v2727_v26 = vsel %vm2719_vm9, %v2694_v32, %v11005_v5  ;;  %v2739_v15 = vsel %vm2719_vm9, %v2706_v28, %v11006_v48  ;;  %v2566_v32 = vpop.permute.xlu2 %2565 }
 0x571   : > { %v8015_v57 = vpop.permute.xlu1 %2557  ;;  %v2760_v23 = vsel %vm2752_vm11, %v2727_v26, %v7486_v58  ;;  %v2772_v53 = vsel %vm2752_vm11, %v2739_v15, %v7536_v34  ;;  %v11008_v34 = vld [vmem:[#allocation149_spill] sm:$0xff] }
 0x572   : > { %v2793_v3 = vsel %vm2785_vm10, %v2760_v23, %v7612_v37  ;;  %v2805_v33 = vsel %vm2785_vm10, %v2772_v53, %v7663_v20  ;;  %v4995_v37 = vld [vmem:[#allocation2 + $0xf0] sm:$0xff]  ;;  %v11016_v15 = vld [vmem:[#allocation53_spill] sm:$0xff]  ;;  %v4996_v53 = vld [vmem:[#allocation2 + $0xf8] sm:$0xff] }
 0x573   : > { %v2826_v11 = vsel %vm2818_vm12, %v2793_v3, %v7727_v1  ;;  %v2838_v39 = vsel %vm2818_vm12, %v2805_v33, %v7778_v49  ;;  %v11010_v1 = vld [vmem:[#allocation87_spill] sm:$0xff] }
 0x574   : > { %v2562_v61 = vpop.permute.xlu0 %2561  ;;  %v11021_v33 = vld [vmem:[#allocation19_spill] sm:$0xff] }
 0x575   : > { %v2870_v18 = vsel %vm2851_vm14, %v2837_v0, %v2562_v61  ;;  %v2859_v0 = vsel %vm2851_vm14, %v2826_v11, %v7921_v6  ;;  %v11007_v61 = vld [vmem:[#allocation49_spill] sm:$0xff]  ;;  %v11022_v11 = vld [vmem:[#allocation116_spill] sm:$0xff] }
 0x576   : > { %4866 = vmatmul.msk.f32.gmra.mxu1 %vm2897_vm13, %v2858_v52  ;;  %4878 = vmatmul.msk.f32.gmra.mxu3 %vm2897_vm13, %v2870_v18  ;;  %v2629_v52 = vsel %vm326_vm0, %v11008_v34, %v11007_v61  ;;  %v11009_v18 = vld [vmem:[#allocation70_spill] sm:$0xff]  ;;  %v11024_v61 = vld [vmem:[#allocation145_spill] sm:$0xff] }
 0x577   : > { %v2641_v20 = vsel %vm326_vm0, %v4995_v37, %v11009_v18  ;;  %v2662_v49 = vsel %vm2653_vm8, %v2629_v52, %v11010_v1 }
 0x578   : > { %v2674_v6 = vsel %vm2653_vm8, %v2641_v20, %v11011_v35  ;;  %v2695_v47 = vsel %vm2686_vm7, %v2662_v49, %v11012_v59  ;;  %v11025_v59 = vld [vmem:[#allocation44_spill] sm:$0xff] }
 0x579   : > { %v2564_v29 = vpop.permute.xlu1 %2563  ;;  %v2707_v40 = vsel %vm2686_vm7, %v2674_v6, %v11013_v55  ;;  %v2728_v43 = vsel %vm2719_vm9, %v2695_v47, %v11014_v4  ;;  %v4997_v55 = vld [vmem:[#allocation2 + $0x108] sm:$0xff]  ;;  %v11030_v4 = vld [vmem:[#allocation15_spill] sm:$0xff] }
 0x57a   : > { %v2871_v58 = vsel %vm2851_vm14, %v2838_v39, %v2564_v29  ;;  %v2740_v44 = vsel %vm2719_vm9, %v2707_v40, %v11015_v56  ;;  %v2761_v31 = vsel %vm2752_vm11, %v2728_v43, %v7466_v46  ;;  %v11031_v56 = vld [vmem:[#allocation121_spill] sm:$0xff] }
 0x57b   : > { %v2773_v63 = vsel %vm2752_vm11, %v2740_v44, %v7514_v17  ;;  %v2794_v19 = vsel %vm2785_vm10, %v2761_v31, %v7622_v50  ;;  %v11017_v17 = vld [vmem:[#allocation154_spill] sm:$0xff]  ;;  %v11018_v50 = vld [vmem:[#allocation73_spill] sm:$0xff]  ;;  %v11032_v31 = vld [vmem:[#allocation132_spill] sm:$0xff] }
 0x57c   : > { %v2806_v28 = vsel %vm2785_vm10, %v2773_v63, %v7674_v2  ;;  %v2827_v5 = vsel %vm2818_vm12, %v2794_v19, %v7749_v21  ;;  %v2630_v23 = vsel %vm326_vm0, %v11017_v17, %v11016_v15  ;;  %v2642_v3 = vsel %vm326_vm0, %v4996_v53, %v11018_v50  ;;  %v11019_v2 = vld [vmem:[#allocation92_spill] sm:$0xff]  ;;  %v2568_v18 = vpop.permute.xlu0 %2567  ;;  %v11034_v53 = vld [vmem:[#allocation54_spill] sm:$0xff] }
 0x57d   : > { %v2839_v26 = vsel %vm2818_vm12, %v2806_v28, %v7803_v24  ;;  %v2860_v48 = vsel %vm2851_vm14, %v2827_v5, %v7885_v41  ;;  %v2663_v21 = vsel %vm2653_vm8, %v2630_v23, %v11019_v2  ;;  %v11020_v24 = vld [vmem:[#allocation104_spill] sm:$0xff] }
 0x57e   : > { %4867 = vmatmul.msk.f32.gmra.mxu1 %vm2897_vm13, %v2859_v0  ;;  %4879 = vmatmul.msk.f32.gmra.mxu3 %vm2897_vm13, %v2871_v58  ;;  %v2872_v46 = vsel %vm2851_vm14, %v2839_v26, %v2566_v32  ;;  %v2675_v41 = vsel %vm2653_vm8, %v2642_v3, %v11020_v24  ;;  %v2696_v29 = vsel %vm2686_vm7, %v2663_v21, %v11021_v33  ;;  %v11023_v0 = vld [vmem:[#allocation51_spill] sm:$0xff]  ;;  %v11033_v32 = vld [vmem:[#allocation141_spill] sm:$0xff]  ;;  %v4998_v3 = vld [vmem:[#allocation2 + $0x110] sm:$0xff] }
 0x57f   : > { %v2708_v39 = vsel %vm2686_vm7, %v2675_v41, %v11022_v11  ;;  %v2729_v58 = vsel %vm2719_vm9, %v2696_v29, %v11023_v0  ;;  %v11039_v21 = vld [vmem:[#allocation12_spill] sm:$0xff]  ;;  %v11041_v29 = vld [vmem:[#allocation135_spill] sm:$0xff] }
 0x580   : > { %v2741_v34 = vsel %vm2719_vm9, %v2708_v39, %v11024_v61  ;;  %v2762_v52 = vsel %vm2752_vm11, %v2729_v58, %v7488_v45  ;;  %v11040_v41 = vld [vmem:[#allocation4_spill] sm:$0xff]  ;;  %v11042_v39 = vld [vmem:[#allocation146_spill] sm:$0xff] }
 0x581   : > { %v2774_v37 = vsel %vm2752_vm11, %v2741_v34, %v7538_v7  ;;  %v2795_v20 = vsel %vm2785_vm10, %v2762_v52, %v7602_v25  ;;  %v11026_v7 = vld [vmem:[#allocation162_spill] sm:$0xff]  ;;  %v2570_v26 = vpop.permute.xlu1 %2569  ;;  %v2572_v34 = vpop.permute.xlu2 %2571 }
 0x582   : > { %v2807_v1 = vsel %vm2785_vm10, %v2774_v37, %v7653_v62  ;;  %v2828_v49 = vsel %vm2818_vm12, %v2795_v20, %v7761_v51  ;;  %v2631_v47 = vsel %vm326_vm0, %v11026_v7, %v11025_v59  ;;  %v11027_v25 = vld [vmem:[#allocation66_spill] sm:$0xff]  ;;  %v11047_v59 = vld [vmem:[#allocation59_spill] sm:$0xff] }
 0x583   : > { %v2840_v35 = vsel %vm2818_vm12, %v2807_v1, %v7823_v60  ;;  %v2861_v6 = vsel %vm2851_vm14, %v2828_v49, %v7925_v27  ;;  %v2643_v40 = vsel %vm326_vm0, %v4997_v55, %v11027_v25  ;;  %v11028_v62 = vld [vmem:[#allocation94_spill] sm:$0xff]  ;;  %v11045_v1 = vld [vmem:[#allocation37_spill] sm:$0xff]  ;;  %v11049_v55 = vld [vmem:[#allocation76_spill] sm:$0xff] }
 0x584   : > { %v2873_v45 = vsel %vm2851_vm14, %v2840_v35, %v2568_v18  ;;  %v2664_v51 = vsel %vm2653_vm8, %v2631_v47, %v11028_v62  ;;  %v11029_v60 = vld [vmem:[#allocation106_spill] sm:$0xff]  ;;  %v11044_v18 = vld [vmem:[#allocation120_spill] sm:$0xff] }
 0x585   : > { %v2676_v27 = vsel %vm2653_vm8, %v2643_v40, %v11029_v60  ;;  %v2697_v43 = vsel %vm2686_vm7, %v2664_v51, %v11030_v4  ;;  %v11043_v52 = vld [vmem:[#allocation26_spill] sm:$0xff]  ;;  %v11046_v35 = vld [vmem:[#allocation68_spill] sm:$0xff]  ;;  %v11050_v40 = vld [vmem:[#allocation95_spill] sm:$0xff] }
 0x586   : > { %4868 = vmatmul.msk.f32.gmra.mxu1 %vm2897_vm13, %v2860_v48  ;;  %4880 = vmatmul.msk.f32.gmra.mxu3 %vm2897_vm13, %v2872_v46  ;;  %v2709_v44 = vsel %vm2686_vm7, %v2676_v27, %v11031_v56  ;;  %v2730_v63 = vsel %vm2719_vm9, %v2697_v43, %v11032_v31  ;;  %v4999_v47 = vld [vmem:[#allocation2 + $0x120] sm:$0xff]  ;;  %v11051_v51 = vld [vmem:[#allocation107_spill] sm:$0xff]  ;;  %v11052_v60 = vld [vmem:[#allocation9_spill] sm:$0xff] }
 0x587   : > { %v2742_v19 = vsel %vm2719_vm9, %v2709_v44, %v11033_v32  ;;  %v2763_v28 = vsel %vm2752_vm11, %v2730_v63, %v7498_v16  ;;  %v2645_v25 = vsel %vm326_vm0, %v4999_v47, %v11049_v55  ;;  %v11053_v4 = vld [vmem:[#allocation119_spill] sm:$0xff]  ;;  %v11054_v56 = vld [vmem:[#allocation56_spill] sm:$0xff] }
 0x588   : > { %v2775_v5 = vsel %vm2752_vm11, %v2742_v19, %v7550_v36  ;;  %v2796_v48 = vsel %vm2785_vm10, %v2763_v28, %v7624_v38  ;;  %v11035_v36 = vld [vmem:[#allocation155_spill] sm:$0xff]  ;;  %v11036_v38 = vld [vmem:[#allocation74_spill] sm:$0xff]  ;;  %v11057_v28 = vld [vmem:[#allocation172_spill] sm:$0xff] }
 0x589   : > { %v2808_v46 = vsel %vm2785_vm10, %v2775_v5, %v7677_v9  ;;  %v2829_v15 = vsel %vm2818_vm12, %v2796_v48, %v7739_v8  ;;  %v2632_v50 = vsel %vm326_vm0, %v11035_v36, %v11034_v53  ;;  %v2644_v2 = vsel %vm326_vm0, %v4998_v3, %v11036_v38  ;;  %v11037_v9 = vld [vmem:[#allocation90_spill] sm:$0xff]  ;;  %v11055_v31 = vld [vmem:[#allocation151_spill] sm:$0xff]  ;;  %v11061_v53 = vld [vmem:[#allocation72_spill] sm:$0xff] }
 0x58a   : > { %v2841_v17 = vsel %vm2818_vm12, %v2808_v46, %v7790_v54  ;;  %v2862_v23 = vsel %vm2851_vm14, %v2829_v15, %v7954_v13  ;;  %v2665_v8 = vsel %vm2653_vm8, %v2632_v50, %v11037_v9  ;;  %v11038_v54 = vld [vmem:[#allocation102_spill] sm:$0xff]  ;;  %v11056_v32 = vld [vmem:[#allocation167_spill] sm:$0xff] }
 0x58b   : > { %v2874_v16 = vsel %vm2851_vm14, %v2841_v17, %v2570_v26  ;;  %v2677_v13 = vsel %vm2653_vm8, %v2644_v2, %v11038_v54  ;;  %v2698_v24 = vsel %vm2686_vm7, %v2665_v8, %v11039_v21  ;;  %v2574_v26 = vpop.permute.xlu0 %2573  ;;  %v11058_v48 = vld [vmem:[#allocation179_spill] sm:$0xff]  ;;  %v11059_v15 = vld [vmem:[#allocation18_spill] sm:$0xff]  ;;  %v11063_v2 = vld [vmem:[#allocation165_spill] sm:$0xff] }
 0x58c   : > { %v2710_v33 = vsel %vm2686_vm7, %v2677_v13, %v11040_v41  ;;  %v2731_v11 = vsel %vm2719_vm9, %v2698_v24, %v11041_v29  ;;  %v11062_v38 = vld [vmem:[#allocation50_spill] sm:$0xff]  ;;  %v5000_v8 = vld [vmem:[#allocation2 + $0x128] sm:$0xff]  ;;  %v11064_v54 = vld [vmem:[#allocation71_spill] sm:$0xff] }
 0x58d   : > { %v2743_v0 = vsel %vm2719_vm9, %v2710_v33, %v11042_v39  ;;  %v2764_v58 = vsel %vm2752_vm11, %v2731_v11, %v7478_v14  ;;  %v2634_v9 = vsel %vm326_vm0, %v11063_v2, %v11062_v38  ;;  %v2646_v13 = vsel %vm326_vm0, %v5000_v8, %v11064_v54  ;;  %v11065_v21 = vld [vmem:[#allocation97_spill] sm:$0xff]  ;;  %v11066_v41 = vld [vmem:[#allocation22_spill] sm:$0xff]  ;;  %v11068_v11 = vld [vmem:[#allocation123_spill] sm:$0xff] }
 0x58e   : > { %4869 = vmatmul.msk.f32.gmra.mxu1 %vm2897_vm13, %v2861_v6  ;;  %4881 = vmatmul.msk.f32.gmra.mxu3 %vm2897_vm13, %v2873_v45  ;;  %v2776_v61 = vsel %vm2752_vm11, %v2743_v0, %v7526_v30  ;;  %v2797_v37 = vsel %vm2785_vm10, %v2764_v58, %v11043_v52  ;;  %v11048_v30 = vld [vmem:[#allocation160_spill] sm:$0xff]  ;;  %v2667_v24 = vsel %vm2653_vm8, %v2634_v9, %v11065_v21  ;;  %v11067_v33 = vld [vmem:[#allocation113_spill] sm:$0xff]  ;;  %v11069_v0 = vld [vmem:[#allocation134_spill] sm:$0xff] }
 0x58f   : > { %v2809_v20 = vsel %vm2785_vm10, %v2776_v61, %v11044_v18  ;;  %v2830_v49 = vsel %vm2818_vm12, %v2797_v37, %v11045_v1  ;;  %v2633_v7 = vsel %vm326_vm0, %v11048_v30, %v11047_v59  ;;  %v2700_v29 = vsel %vm2686_vm7, %v2667_v24, %v11067_v33  ;;  %v11070_v61 = vld [vmem:[#allocation143_spill] sm:$0xff]  ;;  %v11071_v52 = vld [vmem:[#allocation168_spill] sm:$0xff]  ;;  %v11072_v18 = vld [vmem:[#allocation174_spill] sm:$0xff]  ;;  %v2576_v1 = vpop.permute.xlu1 %2575 }
 0x590   : > { %v2842_v6 = vsel %vm2818_vm12, %v2809_v20, %v11046_v35  ;;  %v2863_v45 = vsel %vm2851_vm14, %v2830_v49, %v7905_v22  ;;  %v2666_v62 = vsel %vm2653_vm8, %v2633_v7, %v11050_v40  ;;  %v2678_v22 = vsel %vm2653_vm8, %v2645_v25, %v11051_v51  ;;  %v11073_v49 = vld [vmem:[#allocation24_spill] sm:$0xff]  ;;  %v11078_v40 = vld [vmem:[#allocation161_spill] sm:$0xff]  ;;  %v5001_v51 = vld [vmem:[#allocation2 + $0x138] sm:$0xff] }
 0x591   : > { %v2875_v14 = vsel %vm2851_vm14, %v2842_v6, %v2572_v34  ;;  %v2699_v27 = vsel %vm2686_vm7, %v2666_v62, %v11052_v60  ;;  %v2711_v43 = vsel %vm2686_vm7, %v2678_v22, %v11053_v4  ;;  %v2733_v58 = vsel %vm2719_vm9, %v2700_v29, %v11069_v0  ;;  %v11074_v6 = vld [vmem:[#allocation181_spill] sm:$0xff]  ;;  %v11076_v30 = vld [vmem:[#allocation52_spill] sm:$0xff]  ;;  %v11092_v2 = vld [vmem:[#allocation63_spill] sm:$0xff] }
 0x592   : > { %v2732_v44 = vsel %vm2719_vm9, %v2699_v27, %v11054_v56  ;;  %v2744_v63 = vsel %vm2719_vm9, %v2711_v43, %v11055_v31  ;;  %v2766_v37 = vsel %vm2752_vm11, %v2733_v58, %v11071_v52  ;;  %v11077_v25 = vld [vmem:[#allocation60_spill] sm:$0xff]  ;;  %v11079_v22 = vld [vmem:[#allocation77_spill] sm:$0xff]  ;;  %v11082_v56 = vld [vmem:[#allocation11_spill] sm:$0xff] }
 0x593   : > { %v2765_v19 = vsel %vm2752_vm11, %v2732_v44, %v11056_v32  ;;  %v2777_v5 = vsel %vm2752_vm11, %v2744_v63, %v11057_v28  ;;  %v2799_v35 = vsel %vm2785_vm10, %v2766_v37, %v11073_v49  ;;  %v2635_v62 = vsel %vm326_vm0, %v11078_v40, %v11077_v25  ;;  %v11080_v27 = vld [vmem:[#allocation93_spill] sm:$0xff]  ;;  %v11083_v31 = vld [vmem:[#allocation28_spill] sm:$0xff]  ;;  %v8299_v8 = vld [vmem:[#allocation3 + $0x8] sm:$0xff] }
 0x594   : > { %v2798_v46 = vsel %vm2785_vm10, %v2765_v19, %v11058_v48  ;;  %v2810_v17 = vsel %vm2785_vm10, %v2777_v5, %v11059_v15  ;;  %v2647_v60 = vsel %vm326_vm0, %v5001_v51, %v11079_v22  ;;  %v2668_v4 = vsel %vm2653_vm8, %v2635_v62, %v11080_v27  ;;  %v11081_v43 = vld [vmem:[#allocation105_spill] sm:$0xff]  ;;  %v11085_v28 = vld [vmem:[#allocation152_spill] sm:$0xff]  ;;  %v11087_v48 = vld [vmem:[#allocation166_spill] sm:$0xff] }
 0x595   : > { %v2843_v36 = vsel %vm2818_vm12, %v2810_v17, %v11061_v53  ;;  %v2701_v44 = vsel %vm2686_vm7, %v2668_v4, %v11082_v56  ;;  %v11084_v32 = vld [vmem:[#allocation137_spill] sm:$0xff]  ;;  %v11088_v15 = vld [vmem:[#allocation171_spill] sm:$0xff]  ;;  %v11094_v24 = vld [vmem:[#allocation64_spill] sm:$0xff] }
 0x596   : > { %4870 = vmatmul.msk.f32.gmra.mxu1 %vm2897_vm13, %v2862_v23  ;;  %4882 = vmatmul.msk.f32.gmra.mxu3 %vm2897_vm13, %v2874_v16  ;;  %v11060_v23 = vld [vmem:[#allocation58_spill] sm:$0xff]  ;;  %v2876_v3 = vsel %vm2851_vm14, %v2843_v36, %v2574_v26  ;;  %v2734_v19 = vsel %vm2719_vm9, %v2701_v44, %v11084_v32  ;;  %v11086_v26 = vmov 0.0   ;;  %v11093_v54 = vld [vmem:[#allocation83_spill] sm:$0xff]  ;;  %v5002_v33 = vld [vmem:[#allocation2 + $0x140] sm:$0xff] }
 0x597   : > { %v2831_v16 = vsel %vm2818_vm12, %v2798_v46, %v11060_v23  ;;  %382 = vst.msk [vmem:[#allocation3] sm:$0x1] %vm381_vm15, %v11086_v26  ;;  %v2767_v46 = vsel %vm2752_vm11, %v2734_v19, %v11087_v48  ;;  %v2578_v23 = vpop.permute.xlu2 %2577  ;;  %v11090_v36 = vld [vmem:[#allocation38_spill] sm:$0xff]  ;;  %v11096_v29 = vld [vmem:[#allocation79_spill] sm:$0xff]  ;;  %v11098_v58 = vld [vmem:[#allocation109_spill] sm:$0xff] }
 0x598   : > { %v2864_v50 = vsel %vm2851_vm14, %v2831_v16, %v7960_v10  ;;  %v2679_v10 = vsel %vm2653_vm8, %v2646_v13, %v11066_v41  ;;  %383 = vst.msk [vmem:[#allocation3 + $0x18] sm:$0x1] %vm381_vm15, %v11086_v26  ;;  %v11089_v16 = vld [vmem:[#allocation27_spill] sm:$0xff]  ;;  %v11095_v41 = vld [vmem:[#allocation164_spill] sm:$0xff]  ;;  %v11106_v62 = vld [vmem:[#allocation13_spill] sm:$0xff] }
 0x599   : > { %v2712_v39 = vsel %vm2686_vm7, %v2679_v10, %v11068_v11  ;;  %v2800_v53 = vsel %vm2785_vm10, %v2767_v46, %v11089_v16  ;;  %384 = vst.msk [vmem:[#allocation3 + $0x30] sm:$0x1] %vm381_vm15, %v11086_v26  ;;  %v2636_v10 = vsel %vm326_vm0, %v11095_v41, %v11094_v24  ;;  %v2648_v11 = vsel %vm326_vm0, %v5002_v33, %v11096_v29  ;;  %v11099_v52 = vld [vmem:[#allocation8_spill] sm:$0xff]  ;;  %v11101_v49 = vld [vmem:[#allocation139_spill] sm:$0xff]  ;;  %v11108_v4 = vld [vmem:[#allocation185_spill] sm:$0xff] }
 0x59a   : > { %v2745_v34 = vsel %vm2719_vm9, %v2712_v39, %v11070_v61  ;;  %385 = vst.msk [vmem:[#allocation3 + $0x48] sm:$0x1] %vm381_vm15, %v11086_v26  ;;  %v11097_v39 = vld [vmem:[#allocation98_spill] sm:$0xff]  ;;  %v2681_v61 = vsel %vm2653_vm8, %v2648_v11, %v11098_v58  ;;  %v11105_v25 = vld [vmem:[#allocation180_spill] sm:$0xff]  ;;  %v11110_v19 = vld [vmem:[#allocation75_spill] sm:$0xff] }
 0x59b   : > { %v2778_v20 = vsel %vm2752_vm11, %v2745_v34, %v11072_v18  ;;  %386 = vst.msk [vmem:[#allocation3 + $0x60] sm:$0x1] %vm381_vm15, %v11086_v26  ;;  %v2669_v0 = vsel %vm2653_vm8, %v2636_v10, %v11097_v39  ;;  %v3275_v34 = vrot.slane %v8299_v8, 1  ;;  %v11100_v18 = vld [vmem:[#allocation122_spill] sm:$0xff]  ;;  %v5003_v44 = vld [vmem:[#allocation2 + $0xc0] sm:$0xff]  ;;  %v11112_v48 = vld [vmem:[#allocation7_spill] sm:$0xff] }
 0x59c   : > { %387 = vst.msk [vmem:[#allocation3 + $0x78] sm:$0x1] %vm381_vm15, %v11086_v26  ;;  %v2702_v37 = vsel %vm2686_vm7, %v2669_v0, %v11099_v52  ;;  %v5004_v32 = vld [vmem:[#allocation2 + $0x150] sm:$0xff]  ;;  %v11119_v24 = vld [vmem:[#allocation16_spill] sm:$0xff]  ;;  %v11120_v10 = vld [vmem:[#allocation29_spill] sm:$0xff] }
 0x59d   : > { %388 = vst.msk [vmem:[#allocation3 + $0x90] sm:$0x1] %vm381_vm15, %v11086_v26  ;;  %v11121_v11 = vld [vmem:[#allocation41_spill] sm:$0xff] }
 0x59e   : > { %4871 = vmatmul.msk.f32.gmra.mxu1 %vm2897_vm13, %v2863_v45  ;;  %4883 = vmatmul.msk.f32.gmra.mxu3 %vm2897_vm13, %v2875_v14  ;;  %v2811_v45 = vsel %vm2785_vm10, %v2778_v20, %v11074_v6  ;;  %v11075_v14 = vld [vmem:[#allocation47_spill] sm:$0xff]  ;;  %v2714_v20 = vsel %vm2686_vm7, %v2681_v61, %v11100_v18  ;;  %389 = vst.msk [vmem:[#allocation3 + $0xa8] sm:$0x1] %vm381_vm15, %v11086_v26  ;;  %v11102_v6 = vld [vmem:[#allocation157_spill] sm:$0xff] }
 0x59f   : > { %v2832_v59 = vsel %vm2818_vm12, %v2799_v35, %v11075_v14  ;;  %v2844_v7 = vsel %vm2818_vm12, %v2811_v45, %v11076_v30  ;;  %v2735_v35 = vsel %vm2719_vm9, %v2702_v37, %v11101_v49  ;;  %v2747_v45 = vsel %vm2719_vm9, %v2714_v20, %v11102_v6  ;;  %390 = vst.msk [vmem:[#allocation3 + $0xc0] sm:$0x1] %vm381_vm15, %v11086_v26  ;;  %v11122_v0 = vld [vmem:[#allocation57_spill] sm:$0xff]  ;;  %v5005_v18 = vld [vmem:[#allocation2 + $0x158] sm:$0xff]  ;;  %v11123_v20 = vld [vmem:[#allocation80_spill] sm:$0xff] }
 0x5a0   : > { %v2865_v47 = vsel %vm2851_vm14, %v2832_v59, %v7981_v12  ;;  %v2877_v55 = vsel %vm2851_vm14, %v2844_v7, %v2576_v1  ;;  %v2680_v12 = vsel %vm2653_vm8, %v2647_v60, %v11081_v43  ;;  %v8328_v1 = vld [vmem:[#allocation3] sm:$0xff]  ;;  %v11103_v59 = vld [vmem:[#allocation169_spill] sm:$0xff]  ;;  %v11104_v7 = vld [vmem:[#allocation175_spill] sm:$0xff]  ;;  %391 = vst.msk [vmem:[#allocation3 + $0xd8] sm:$0x1] %vm381_vm15, %v11086_v26  ;;  %v2650_v49 = vsel %vm326_vm0, %v5005_v18, %v11123_v20 }
 0x5a1   : > { %v2713_v63 = vsel %vm2686_vm7, %v2680_v12, %v11083_v31  ;;  %v3274_v14 = vrot.slane %v8328_v1, 1  ;;  %v2768_v30 = vsel %vm2752_vm11, %v2735_v35, %v11103_v59  ;;  %392 = vst.msk [vmem:[#allocation3 + $0xf0] sm:$0x1] %vm381_vm15, %v11086_v26  ;;  %v11107_v60 = vld [vmem:[#allocation62_spill] sm:$0xff]  ;;  %v11109_v31 = vld [vmem:[#allocation55_spill] sm:$0xff]  ;;  %v11124_v6 = vld [vmem:[#allocation108_spill] sm:$0xff] }
 0x5a2   : > { %v2746_v5 = vsel %vm2719_vm9, %v2713_v63, %v11085_v28  ;;  %v2801_v40 = vsel %vm2785_vm10, %v2768_v30, %v11105_v25  ;;  %393 = vst.msk [vmem:[#allocation3 + $0x108] sm:$0x1] %vm381_vm15, %v11086_v26  ;;  %v2637_v63 = vsel %vm326_vm0, %v5003_v44, %v11109_v31  ;;  %v2649_v28 = vsel %vm326_vm0, %v5004_v32, %v11110_v19  ;;  %v11126_v59 = vld [vmem:[#allocation158_spill] sm:$0xff]  ;;  %v11128_v25 = vld [vmem:[#allocation32_spill] sm:$0xff]  ;;  %v11131_v44 = vld [vmem:[#allocation111_spill] sm:$0xff] }
 0x5a3   : > { %v2779_v17 = vsel %vm2752_vm11, %v2746_v5, %v11088_v15  ;;  %v3276_v22 = vsel %vm1665_vm4, %v3274_v14, %v3275_v34  ;;  %v2834_v27 = vsel %vm2818_vm12, %v2801_v40, %v11107_v60  ;;  %394 = vst.msk [vmem:[#allocation3 + $0x120] sm:$0x1] %vm381_vm15, %v11086_v26  ;;  %v2682_v46 = vsel %vm2653_vm8, %v2649_v28, %v11112_v48  ;;  %v11113_v15 = vld [vmem:[#allocation115_spill] sm:$0xff] }
 0x5a4   : > { %3460 = vrot.lane.b32.xlu2 %v3276_v22, %s5047_s21  ;;  %v2867_v12 = vsel %vm2851_vm14, %v2834_v27, %v7985_v42  ;;  %395 = vst.msk [vmem:[#allocation3 + $0x138] sm:$0x1] %vm381_vm15, %v11086_v26  ;;  %v11111_v42 = vld [vmem:[#allocation100_spill] sm:$0xff]  ;;  %v11133_v19 = vld [vmem:[#allocation163_spill] sm:$0xff] }
 0x5a5   : > { %v2670_v5 = vsel %vm2653_vm8, %v2637_v63, %v11111_v42  ;;  %396 = vst.msk [vmem:[#allocation3 + $0x150] sm:$0x1] %vm381_vm15, %v11086_v26  ;;  %v11132_v63 = vld [vmem:[#allocation124_spill] sm:$0xff]  ;;  %v11134_v42 = vld [vmem:[#allocation177_spill] sm:$0xff] }
 0x5a6   : > { %4872 = vmatmul.msk.f32.gmra.mxu1 %vm2897_vm13, %v2864_v50  ;;  %4884 = vmatmul.msk.f32.gmra.mxu3 %vm2897_vm13, %v2876_v3  ;;  %v2812_v50 = vsel %vm2785_vm10, %v2779_v17, %v11090_v36  ;;  %v11091_v3 = vld [vmem:[#allocation46_spill] sm:$0xff]  ;;  %v2703_v17 = vsel %vm2686_vm7, %v2670_v5, %v11113_v15  ;;  %397 = vst.msk [vmem:[#allocation3 + $0x168] sm:$0x1] %vm381_vm15, %v11086_v26  ;;  %v11115_v36 = vld [vmem:[#allocation136_spill] sm:$0xff] }
 0x5a7   : > { %v2833_v38 = vsel %vm2818_vm12, %v2800_v53, %v11091_v3  ;;  %v2845_v9 = vsel %vm2818_vm12, %v2812_v50, %v11092_v2  ;;  %v8387_v53 = vld [vmem:[%s10395_s5] ss:$0 sm:$0xff]  ;;  %v2736_v50 = vsel %vm2719_vm9, %v2703_v17, %v11115_v36  ;;  %398 = vst.msk [vmem:[#allocation3 + $0x180] sm:$0x1] %vm381_vm15, %v11086_v26  ;;  %v11117_v2 = vld [vmem:[#allocation170_spill] sm:$0xff] }
 0x5a8   : > { %v2866_v13 = vsel %vm2851_vm14, %v2833_v38, %v11093_v54  ;;  %v2878_v21 = vsel %vm2851_vm14, %v2845_v9, %v2578_v23  ;;  %v11114_v23 = vld [vmem:[#allocation125_spill] sm:$0xff]  ;;  %v11116_v3 = vld [vmem:[#allocation147_spill] sm:$0xff]  ;;  %v2769_v9 = vsel %vm2752_vm11, %v2736_v50, %v11117_v2  ;;  %v11118_v54 = vld [vmem:[#allocation176_spill] sm:$0xff]  ;;  %399 = vst.msk [vmem:[#allocation3 + $0x198] sm:$0x1] %vm381_vm15, %v11086_v26 }
 0x5a9   : > { %v2715_v16 = vsel %vm2686_vm7, %v2682_v46, %v11114_v23  ;;  %v2802_v41 = vsel %vm2785_vm10, %v2769_v9, %v11119_v24  ;;  %401 = vst.msk [vmem:[#allocation3 + $0x29] sm:$0x1] %vm381_vm15, %v11086_v26  ;;  %v11135_v46 = vld [vmem:[#allocation182_spill] sm:$0xff]  ;;  %v11136_v23 = vld [vmem:[#allocation36_spill] sm:$0xff] }
 0x5aa   : > { %v2748_v38 = vsel %vm2719_vm9, %v2715_v16, %v11116_v3  ;;  %v2835_v39 = vsel %vm2818_vm12, %v2802_v41, %v11121_v11  ;;  %402 = vst.msk [vmem:[#allocation3 + $0x41] sm:$0x1] %vm381_vm15, %v11086_v26  ;;  %v11137_v2 = vld [vmem:[#allocation78_spill] sm:$0xff] }
 0x5ab   : > { %v2868_v52 = vsel %vm2851_vm14, %v2835_v39, %v8015_v57  ;;  %403 = vst.msk [vmem:[#allocation3 + $0x59] sm:$0x1] %vm381_vm15, %v11086_v26  ;;  %v2683_v57 = vsel %vm2653_vm8, %v2650_v49, %v11124_v6  ;;  %v11142_v49 = vld [vmem:[#allocation183_spill] sm:$0xff]  ;;  %v11143_v6 = vld [vmem:[#allocation184_spill] sm:$0xff] }
 0x5ac   : > { %404 = vst.msk [vmem:[#allocation3 + $0x71] sm:$0x1] %vm381_vm15, %v11086_v26 }
 0x5ad   : > { %405 = vst.msk [vmem:[#allocation3 + $0x89] sm:$0x1] %vm381_vm15, %v11086_v26 }
 0x5ae   : > { %4873 = vmatmul.msk.f32.gmra.mxu1 %vm2897_vm13, %v2865_v47  ;;  %4885 = vmatmul.msk.f32.gmra.mxu3 %vm2897_vm13, %v2877_v55  ;;  %v2780_v47 = vsel %vm2752_vm11, %v2747_v45, %v11104_v7  ;;  %v2580_v55 = vpop.permute.xlu0 %2579  ;;  %v11125_v45 = vld [vmem:[#allocation31_spill] sm:$0xff]  ;;  %406 = vst.msk [vmem:[#allocation3 + $0xa1] sm:$0x1] %vm381_vm15, %v11086_v26  ;;  %v11127_v7 = vld [vmem:[#allocation173_spill] sm:$0xff] }
 0x5af   : > { %v2813_v51 = vsel %vm2785_vm10, %v2780_v47, %v11106_v62  ;;  %v2716_v14 = vsel %vm2686_vm7, %v2683_v57, %v11125_v45  ;;  %407 = vst.msk [vmem:[#allocation3 + $0xb9] sm:$0x1] %vm381_vm15, %v11086_v26 }
 0x5b0   : > { %v2846_v43 = vsel %vm2818_vm12, %v2813_v51, %v11108_v4  ;;  %v2749_v30 = vsel %vm2719_vm9, %v2716_v14, %v11126_v59  ;;  %408 = vst.msk [vmem:[#allocation3 + $0xd1] sm:$0x1] %vm381_vm15, %v11086_v26  ;;  %v11129_v51 = vld [vmem:[#allocation186_spill] sm:$0xff]  ;;  %v5006_v4 = vld [vmem:[#allocation2 + $0x168] sm:$0xff] }
 0x5b1   : > { %v2879_v56 = vsel %vm2851_vm14, %v2846_v43, %v2580_v55  ;;  %v2782_v47 = vsel %vm2752_vm11, %v2749_v30, %v11127_v7  ;;  %v2584_v55 = vpop.permute.xlu2 %2583  ;;  %409 = vst.msk [vmem:[#allocation3 + $0xe9] sm:$0x1] %vm381_vm15, %v11086_v26  ;;  %v11130_v43 = vld [vmem:[#allocation82_spill] sm:$0xff] }
 0x5b2   : > { %v2815_v40 = vsel %vm2785_vm10, %v2782_v47, %v11128_v25  ;;  %410 = vst.msk [vmem:[#allocation3 + $0x101] sm:$0x1] %vm381_vm15, %v11086_v26 }
 0x5b3   : > { %v2848_v22 = vsel %vm2818_vm12, %v2815_v40, %v11129_v51  ;;  %411 = vst.msk [vmem:[#allocation3 + $0x119] sm:$0x1] %vm381_vm15, %v11086_v26 }
 0x5b4   : > { %v2881_v27 = vsel %vm2851_vm14, %v2848_v22, %v2584_v55  ;;  %412 = vst.msk [vmem:[#allocation3 + $0x131] sm:$0x1] %vm381_vm15, %v11086_v26 }
 0x5b5   : > { %413 = vst.msk [vmem:[#allocation3 + $0x149] sm:$0x1] %vm381_vm15, %v11086_v26 }
 0x5b6   : > { %4874 = vmatmul.msk.f32.gmra.mxu1 %vm2897_vm13, %v2866_v13  ;;  %4886 = vmatmul.msk.f32.gmra.mxu3 %vm2897_vm13, %v2878_v21  ;;  %v2781_v13 = vsel %vm2752_vm11, %v2748_v38, %v11118_v54  ;;  %v2582_v21 = vpop.permute.xlu1 %2581  ;;  %v2586_v48 = vpop.permute.xlu0 %2585  ;;  %414 = vst.msk [vmem:[#allocation3 + $0x161] sm:$0x1] %vm381_vm15, %v11086_v26  ;;  %v5007_v38 = vld [vmem:[#allocation2 + $0x170] sm:$0xff] }
 0x5b7   : > { %v2814_v33 = vsel %vm2785_vm10, %v2781_v13, %v11120_v10  ;;  %415 = vst.msk [vmem:[#allocation3 + $0x179] sm:$0x1] %vm381_vm15, %v11086_v26  ;;  %v2652_v9 = vsel %vm326_vm0, %v5007_v38, %v11137_v2  ;;  %v11138_v13 = vld [vmem:[#allocation5_spill] sm:$0xff]  ;;  %v11139_v10 = vld [vmem:[#allocation127_spill] sm:$0xff] }
 0x5b8   : > { %v2847_v58 = vsel %vm2818_vm12, %v2814_v33, %v11122_v0  ;;  %416 = vst.msk [vmem:[#allocation3 + $0x191] sm:$0x1] %vm381_vm15, %v11086_v26  ;;  %v11140_v0 = vld [vmem:[#allocation153_spill] sm:$0xff] }
 0x5b9   : > { %v2880_v37 = vsel %vm2851_vm14, %v2847_v58, %v2582_v21  ;;  %376 = vst.msk [vmem:[#allocation3 + $0x10] sm:$0x3] %vm375_vm1, %v11086_v26  ;;  %v2685_v21 = vsel %vm2653_vm8, %v2652_v9, %v11138_v13 }
 0x5ba   : > { %400 = vst.msk [vmem:[#allocation3 + $0x11] sm:$0x1] %vm381_vm15, %v11086_v26  ;;  %v2718_v33 = vsel %vm2686_vm7, %v2685_v21, %v11139_v10 }
 0x5bb   : > { %380 = vst.msk [vmem:[#allocation3 + $0x1a8] sm:$0x3] %vm375_vm1, %v11086_v26  ;;  %v2751_v58 = vsel %vm2719_vm9, %v2718_v33, %v11140_v0 }
 0x5bc   : > { %417 = vst.msk [vmem:[#allocation3 + $0x1a9] sm:$0x1] %vm381_vm15, %v11086_v26 }
 0x5be   : > { %4875 = vmatmul.msk.f32.gmra.mxu1 %vm2897_vm13, %v2867_v12  ;;  %4887 = vmatmul.msk.f32.gmra.mxu3 %vm2897_vm13, %v2879_v56  ;;  %v2651_v12 = vsel %vm326_vm0, %v5006_v4, %v11130_v43 }
 0x5bf   : > { %v2684_v31 = vsel %vm2653_vm8, %v2651_v12, %v11131_v44 }
 0x5c0   : > { %v2717_v32 = vsel %vm2686_vm7, %v2684_v31, %v11132_v63 }
 0x5c1   : > { %v2750_v28 = vsel %vm2719_vm9, %v2717_v32, %v11133_v19  ;;  %v8529_v59 = vld [vmem:[#allocation3 + $0x10] sm:$0x3] }
 0x5c2   : > { %v2783_v5 = vsel %vm2752_vm11, %v2750_v28, %v11134_v42  ;;  %v3277_v7 = vrot.slane %v8529_v59, 1 }
 0x5c3   : > { %v3011_v29 = vpop.f32.mrf.mxu1  ;;  %v2816_v15 = vsel %vm2785_vm10, %v2783_v5, %v11135_v46 }
 0x5c4   : > { %v3012_v61 = vadd.f32 %v8387_v53, %v3011_v29  ;;  %v2849_v16 = vsel %vm2818_vm12, %v2816_v15, %v11136_v23  ;;  %v3278_v47 = vsel %vm1665_vm4, %v3275_v34, %v3277_v7 }
 0x5c5   : > { %v2882_v50 = vsel %vm2851_vm14, %v2849_v16, %v2586_v48  ;;  %3462 = vrot.lane.b32.xlu0 %v3278_v47, %s5047_s21 }
 0x5c6   : > { %v3107_v35 = vmax.f32 %v3012_v61, 0.0  ;;  %4876 = vmatmul.msk.f32.gmra.mxu1 %vm2897_vm13, %v2868_v52  ;;  %4888 = vmatmul.msk.f32.gmra.mxu3 %vm2897_vm13, %v2880_v37  ;;  %v11141_v61 = vld [vmem:[#allocation178_spill] sm:$0xff]  ;;  %v2588_v37 = vpop.permute.xlu1 %2587 }
 0x5c7   : > { %v2784_v52 = vsel %vm2752_vm11, %v2751_v58, %v11141_v61  ;;  %vm4422_vm11 = vcmask 228352  }
 0x5c8   : > { %3140 = vst.msk [vmem:[#allocation3 + $0x19] sm:$0xff] %vm372_vm2, %v3107_v35  ;;  %v2817_v35 = vsel %vm2785_vm10, %v2784_v52, %v11142_v49  ;;  %vm4593_vm10 = vcmask 1043456  }
 0x5c9   : > { %v2850_v57 = vsel %vm2818_vm12, %v2817_v35, %v11143_v6  ;;  %vm4496_vm12 = vcmask 293888  }
 0x5ca   : > { %v2883_v14 = vsel %vm2851_vm14, %v2850_v57, %v2588_v37 }
 0x5cb   : > { %v3014_v62 = vpop.f32.mrf.mxu1 }
 0x5cc   : > { %v3015_v60 = vadd.f32 %v8387_v53, %v3014_v62 }
 0x5ce   : > { %v3108_v56 = vmax.f32 %v3015_v60, 0.0  ;;  %4889 = vmatmul.msk.f32.gmra.mxu3 %vm2897_vm13, %v2881_v27 }
 0x5cf   : > { %v8484_v3 = vld [vmem:[#allocation3 + $0x18] sm:$0xff] }
 0x5d0   : > { %3141 = vst.msk [vmem:[#allocation3 + $0x21] sm:$0xff] %vm372_vm2, %v3108_v56  ;;  %v3279_v39 = vrot.slane %v8484_v3, 1 }
 0x5d3   : > { %v3017_v17 = vpop.f32.mrf.mxu1 }
 0x5d4   : > { %v3018_v36 = vadd.f32 %v8387_v53, %v3017_v17 }
 0x5d6   : > { %v3109_v54 = vmax.f32 %v3018_v36, 0.0  ;;  %4890 = vmatmul.msk.f32.gmra.mxu3 %vm2897_vm13, %v2882_v50 }
 0x5d7   : > { %v8495_v24 = vld [vmem:[#allocation3 + $0x20] sm:$0xff]  ;;  %v8497_v41 = vld [vmem:[#allocation3 + $0x28] sm:$0x3] }
 0x5d8   : > { %3142 = vst.msk [vmem:[#allocation3 + $0x31] sm:$0xff] %vm372_vm2, %v3109_v54  ;;  %v3280_v29 = vrot.slane %v8495_v24, 1  ;;  %v3282_v11 = vrot.slane %v8497_v41, 1 }
 0x5da   : > { %v8514_v18 = vsel %vm1665_vm4, %v3280_v29, %v3282_v11  ;;  %v8517_v20 = vsel %vm1665_vm4, %v3279_v39, %v3280_v29 }
 0x5db   : > { %3466 = vrot.lane.b32.xlu2 %v8514_v18, %s5047_s21  ;;  %3464 = vrot.lane.b32.xlu1 %v8517_v20, %s5047_s21  ;;  %v3020_v26 = vpop.f32.mrf.mxu1 }
 0x5dc   : > { %v3021_v45 = vadd.f32 %v8387_v53, %v3020_v26 }
 0x5de   : > { %v3110_v30 = vmax.f32 %v3021_v45, 0.0  ;;  %4891 = vmatmul.msk.f32.gmra.mxu3 %vm2897_vm13, %v2883_v14 }
 0x5df   : > { %v8539_v40 = vld [vmem:[#allocation3 + $0x30] sm:$0xff] }
 0x5e0   : > { %3143 = vst.msk [vmem:[#allocation3 + $0x39] sm:$0xff] %vm372_vm2, %v3110_v30  ;;  %v3284_v34 = vrot.slane %v8539_v40, 1 }
 0x5e3   : > { %v3023_v55 = vpop.f32.mrf.mxu1 }
 0x5e4   : > { %v3024_v25 = vadd.f32 %v8387_v53, %v3023_v55 }
 0x5e6   : > { %v3111_v62 = vmax.f32 %v3024_v25, 0.0 }
 0x5e7   : > { %v8541_v51 = vld [vmem:[#allocation3 + $0x38] sm:$0xff]  ;;  %v8543_v22 = vld [vmem:[#allocation3 + $0x40] sm:$0x3] }
 0x5e8   : > { %3144 = vst.msk [vmem:[#allocation3 + $0x49] sm:$0xff] %vm372_vm2, %v3111_v62  ;;  %v3285_v60 = vrot.slane %v8541_v51, 1  ;;  %v3287_v27 = vrot.slane %v8543_v22, 1  ;;  %v3062_v4 = vpop.f32.mrf.mxu3 }
 0x5e9   : > { %v3063_v56 = vadd.f32 %v8387_v53, %v3062_v4 }
 0x5ea   : > { %v8550_v43 = vsel %vm1665_vm4, %v3285_v60, %v3287_v27  ;;  %v8553_v12 = vsel %vm1665_vm4, %v3284_v34, %v3285_v60 }
 0x5eb   : > { %v3026_v44 = vpop.f32.mrf.mxu1  ;;  %3470 = vrot.lane.b32.xlu1 %v8550_v43, %s5047_s21  ;;  %3468 = vrot.lane.b32.xlu0 %v8553_v12, %s5047_s21  ;;  %v3124_v63 = vmax.f32 %v3063_v56, 0.0 }
 0x5ec   : > { %v3027_v31 = vadd.f32 %v8387_v53, %v3026_v44 }
 0x5ed   : > { %3157 = vst.msk [vmem:[#allocation3 + $0xe1] sm:$0xff] %vm372_vm2, %v3124_v63 }
 0x5ee   : > { %v3112_v32 = vmax.f32 %v3027_v31, 0.0 }
 0x5ef   : > { %v8564_v42 = vld [vmem:[#allocation3 + $0x48] sm:$0xff] }
 0x5f0   : > { %3145 = vst.msk [vmem:[#allocation3 + $0x51] sm:$0xff] %vm372_vm2, %v3112_v32  ;;  %v3289_v15 = vrot.slane %v8564_v42, 1 }
 0x5f3   : > { %v3029_v19 = vpop.f32.mrf.mxu1 }
 0x5f4   : > { %v3030_v28 = vadd.f32 %v8387_v53, %v3029_v19 }
 0x5f6   : > { %v3113_v5 = vmax.f32 %v3030_v28, 0.0 }
 0x5f7   : > { %v8566_v48 = vld [vmem:[#allocation3 + $0x50] sm:$0xff]  ;;  %v8568_v46 = vld [vmem:[#allocation3 + $0x58] sm:$0x3] }
 0x5f8   : > { %3146 = vst.msk [vmem:[#allocation3 + $0x61] sm:$0xff] %vm372_vm2, %v3113_v5  ;;  %v3290_v17 = vrot.slane %v8566_v48, 1  ;;  %v3292_v23 = vrot.slane %v8568_v46, 1 }
 0x5f9   : > { %v3065_v16 = vpop.f32.mrf.mxu3 }
 0x5fa   : > { %v3066_v36 = vadd.f32 %v8387_v53, %v3065_v16  ;;  %v8576_v50 = vsel %vm1665_vm4, %v3289_v15, %v3290_v17  ;;  %v8579_v38 = vsel %vm1665_vm4, %v3290_v17, %v3292_v23 }
 0x5fb   : > { %3472 = vrot.lane.b32.xlu2 %v8576_v50, %s5047_s21  ;;  %3474 = vrot.lane.b32.xlu0 %v8579_v38, %s5047_s21  ;;  %v3032_v2 = vpop.f32.mrf.mxu1 }
 0x5fc   : > { %v3125_v9 = vmax.f32 %v3066_v36, 0.0  ;;  %v3033_v54 = vadd.f32 %v8387_v53, %v3032_v2 }
 0x5fe   : > { %3158 = vst.msk [vmem:[#allocation3 + $0xf1] sm:$0xff] %vm372_vm2, %v3125_v9  ;;  %v3114_v13 = vmax.f32 %v3033_v54, 0.0 }
 0x5ff   : > { %v8590_v39 = vld [vmem:[#allocation3 + $0x60] sm:$0xff] }
 0x600   : > { %3147 = vst.msk [vmem:[#allocation3 + $0x69] sm:$0xff] %vm372_vm2, %v3114_v13  ;;  %v3294_v49 = vrot.slane %v8590_v39, 1 }
 0x601   : > { %v3068_v21 = vpop.f32.mrf.mxu3 }
 0x602   : > { %v3069_v10 = vadd.f32 %v8387_v53, %v3068_v21 }
 0x603   : > { %v3035_v33 = vpop.f32.mrf.mxu1 }
 0x604   : > { %v3126_v29 = vmax.f32 %v3069_v10, 0.0  ;;  %v3036_v11 = vadd.f32 %v8387_v53, %v3035_v33 }
 0x606   : > { %3159 = vst.msk [vmem:[#allocation3 + $0xf9] sm:$0xff] %vm372_vm2, %v3126_v29  ;;  %v3115_v0 = vmax.f32 %v3036_v11, 0.0 }
 0x607   : > { %v8593_v58 = vld [vmem:[#allocation3 + $0x68] sm:$0xff]  ;;  %v8595_v61 = vld [vmem:[#allocation3 + $0x70] sm:$0x3] }
 0x608   : > { %3148 = vst.msk [vmem:[#allocation3 + $0x79] sm:$0xff] %vm372_vm2, %v3115_v0  ;;  %v3295_v52 = vrot.slane %v8593_v58, 1  ;;  %v3297_v37 = vrot.slane %v8595_v61, 1 }
 0x609   : > { %v3071_v35 = vpop.f32.mrf.mxu3 }
 0x60a   : > { %v3072_v26 = vadd.f32 %v8387_v53, %v3071_v35  ;;  %v8603_v6 = vsel %vm1665_vm4, %v3295_v52, %v3297_v37  ;;  %v8606_v57 = vsel %vm1665_vm4, %v3294_v49, %v3295_v52 }
 0x60b   : > { %11144 = vst [vmem:[#allocation110_spill] sm:$0xff] %v8603_v6  ;;  %3478 = vrot.lane.b32.xlu2 %v8603_v6, %s5047_s21  ;;  %3476 = vrot.lane.b32.xlu1 %v8606_v57, %s5047_s21  ;;  %v3038_v45 = vpop.f32.mrf.mxu1 }
 0x60c   : > { %v3127_v14 = vmax.f32 %v3072_v26, 0.0  ;;  %v3039_v30 = vadd.f32 %v8387_v53, %v3038_v45 }
 0x60e   : > { %3160 = vst.msk [vmem:[#allocation3 + $0x109] sm:$0xff] %vm372_vm2, %v3127_v14  ;;  %v3116_v7 = vmax.f32 %v3039_v30, 0.0 }
 0x60f   : > { %v8617_v27 = vld [vmem:[#allocation3 + $0x78] sm:$0xff] }
 0x610   : > { %3149 = vst.msk [vmem:[#allocation3 + $0x81] sm:$0xff] %vm372_vm2, %v3116_v7  ;;  %v3299_v63 = vrot.slane %v8617_v27, 1 }
 0x611   : > { %v3074_v47 = vpop.f32.mrf.mxu3 }
 0x612   : > { %v3075_v55 = vadd.f32 %v8387_v53, %v3074_v47 }
 0x613   : > { %v3041_v25 = vpop.f32.mrf.mxu1 }
 0x614   : > { %v3128_v62 = vmax.f32 %v3075_v55, 0.0  ;;  %v3042_v60 = vadd.f32 %v8387_v53, %v3041_v25 }
 0x616   : > { %3161 = vst.msk [vmem:[#allocation3 + $0x111] sm:$0xff] %vm372_vm2, %v3128_v62  ;;  %v3117_v34 = vmax.f32 %v3042_v60, 0.0 }
 0x617   : > { %v8620_v4 = vld [vmem:[#allocation3 + $0x80] sm:$0xff]  ;;  %v8622_v56 = vld [vmem:[#allocation3 + $0x88] sm:$0x3] }
 0x618   : > { %3150 = vst.msk [vmem:[#allocation3 + $0x91] sm:$0xff] %vm372_vm2, %v3117_v34  ;;  %v3300_v44 = vrot.slane %v8620_v4, 1  ;;  %v3302_v31 = vrot.slane %v8622_v56, 1 }
 0x619   : > { %v3077_v32 = vpop.f32.mrf.mxu3 }
 0x61a   : > { %v3078_v19 = vadd.f32 %v8387_v53, %v3077_v32  ;;  %v8630_v28 = vsel %vm1665_vm4, %v3300_v44, %v3302_v31  ;;  %v8633_v5 = vsel %vm1665_vm4, %v3299_v63, %v3300_v44 }
 0x61b   : > { %11145 = vst [vmem:[#allocation34_spill] sm:$0xff] %v8630_v28  ;;  %v3044_v15 = vpop.f32.mrf.mxu1  ;;  %3482 = vrot.lane.b32.xlu1 %v8630_v28, %s5047_s21  ;;  %3480 = vrot.lane.b32.xlu0 %v8633_v5, %s5047_s21 }
 0x61c   : > { %11146 = vst [vmem:[#allocation30_spill] sm:$0xff] %v8633_v5  ;;  %v3129_v17 = vmax.f32 %v3078_v19, 0.0  ;;  %v3045_v23 = vadd.f32 %v8387_v53, %v3044_v15 }
 0x61e   : > { %3162 = vst.msk [vmem:[#allocation3 + $0x121] sm:$0xff] %vm372_vm2, %v3129_v17  ;;  %v3118_v16 = vmax.f32 %v3045_v23, 0.0 }
 0x61f   : > { %v8644_v21 = vld [vmem:[#allocation3 + $0x90] sm:$0xff] }
 0x620   : > { %3151 = vst.msk [vmem:[#allocation3 + $0x99] sm:$0xff] %vm372_vm2, %v3118_v16  ;;  %v3304_v11 = vrot.slane %v8644_v21, 1 }
 0x621   : > { %v3080_v36 = vpop.f32.mrf.mxu3 }
 0x622   : > { %v3081_v2 = vadd.f32 %v8387_v53, %v3080_v36 }
 0x623   : > { %v3047_v9 = vpop.f32.mrf.mxu1 }
 0x624   : > { %v3130_v54 = vmax.f32 %v3081_v2, 0.0  ;;  %v3048_v13 = vadd.f32 %v8387_v53, %v3047_v9 }
 0x626   : > { %3163 = vst.msk [vmem:[#allocation3 + $0x129] sm:$0xff] %vm372_vm2, %v3130_v54  ;;  %v3119_v10 = vmax.f32 %v3048_v13, 0.0 }
 0x627   : > { %v8647_v33 = vld [vmem:[#allocation3 + $0x98] sm:$0xff]  ;;  %v8649_v29 = vld [vmem:[#allocation3 + $0xa0] sm:$0x3] }
 0x628   : > { %3152 = vst.msk [vmem:[#allocation3 + $0xa9] sm:$0xff] %vm372_vm2, %v3119_v10  ;;  %v3305_v0 = vrot.slane %v8647_v33, 1  ;;  %v3307_v52 = vrot.slane %v8649_v29, 1 }
 0x629   : > { %v3083_v37 = vpop.f32.mrf.mxu3 }
 0x62a   : > { %v3084_v49 = vadd.f32 %v8387_v53, %v3083_v37  ;;  %v8657_v35 = vsel %vm1665_vm4, %v3304_v11, %v3305_v0  ;;  %v8660_v26 = vsel %vm1665_vm4, %v3305_v0, %v3307_v52 }
 0x62b   : > { %11147 = vst [vmem:[#allocation85_spill] sm:$0xff] %v8657_v35  ;;  %3484 = vrot.lane.b32.xlu2 %v8657_v35, %s5047_s21  ;;  %3486 = vrot.lane.b32.xlu0 %v8660_v26, %s5047_s21  ;;  %v3050_v45 = vpop.f32.mrf.mxu1 }
 0x62c   : > { %11148 = vst [vmem:[#allocation25_spill] sm:$0xff] %v8660_v26  ;;  %v3131_v14 = vmax.f32 %v3084_v49, 0.0  ;;  %v3051_v30 = vadd.f32 %v8387_v53, %v3050_v45 }
 0x62e   : > { %3164 = vst.msk [vmem:[#allocation3 + $0x139] sm:$0xff] %vm372_vm2, %v3131_v14  ;;  %v3120_v7 = vmax.f32 %v3051_v30, 0.0 }
 0x62f   : > { %v8671_v34 = vld [vmem:[#allocation3 + $0xa8] sm:$0xff] }
 0x630   : > { %3153 = vst.msk [vmem:[#allocation3 + $0xb1] sm:$0xff] %vm372_vm2, %v3120_v7  ;;  %v3309_v15 = vrot.slane %v8671_v34, 1 }
 0x631   : > { %v3086_v47 = vpop.f32.mrf.mxu3 }
 0x632   : > { %v3087_v55 = vadd.f32 %v8387_v53, %v3086_v47 }
 0x633   : > { %v3053_v25 = vpop.f32.mrf.mxu1 }
 0x634   : > { %v3132_v62 = vmax.f32 %v3087_v55, 0.0  ;;  %v3054_v60 = vadd.f32 %v8387_v53, %v3053_v25 }
 0x636   : > { %3165 = vst.msk [vmem:[#allocation3 + $0x141] sm:$0xff] %vm372_vm2, %v3132_v62  ;;  %v3121_v44 = vmax.f32 %v3054_v60, 0.0 }
 0x637   : > { %v8674_v31 = vld [vmem:[#allocation3 + $0xb0] sm:$0xff]  ;;  %v8676_v63 = vld [vmem:[#allocation3 + $0xb8] sm:$0x3] }
 0x638   : > { %3154 = vst.msk [vmem:[#allocation3 + $0xc1] sm:$0xff] %vm372_vm2, %v3121_v44  ;;  %v3310_v32 = vrot.slane %v8674_v31, 1  ;;  %v3312_v19 = vrot.slane %v8676_v63, 1 }
 0x639   : > { %v3089_v17 = vpop.f32.mrf.mxu3 }
 0x63a   : > { %v3090_v23 = vadd.f32 %v8387_v53, %v3089_v17  ;;  %v8684_v16 = vsel %vm1665_vm4, %v3310_v32, %v3312_v19  ;;  %v8687_v36 = vsel %vm1665_vm4, %v3309_v15, %v3310_v32  ;;  %v8720_v19 = vld [vmem:[#allocation3 + $0xf8] sm:$0xff]  ;;  %v8722_v15 = vld [vmem:[#allocation3 + $0xe8] sm:$0x3]  ;;  %v8725_v17 = vld [vmem:[#allocation3 + $0xf0] sm:$0xff] }
 0x63b   : > { %11149 = vst [vmem:[#allocation126_spill] sm:$0xff] %v8684_v16  ;;  %3490 = vrot.lane.b32.xlu2 %v8684_v16, %s5047_s21  ;;  %3488 = vrot.lane.b32.xlu1 %v8687_v36, %s5047_s21  ;;  %v3056_v2 = vpop.f32.mrf.mxu1 }
 0x63c   : > { %11150 = vst [vmem:[#allocation35_spill] sm:$0xff] %v8687_v36  ;;  %v3133_v9 = vmax.f32 %v3090_v23, 0.0  ;;  %v3057_v54 = vadd.f32 %v8387_v53, %v3056_v2 }
 0x63d   : > { %v8811_v26 = vld [vmem:[#allocation3 + $0x148] sm:$0x3] }
 0x63e   : > { %3166 = vst.msk [vmem:[#allocation3 + $0x151] sm:$0xff] %vm372_vm2, %v3133_v9  ;;  %v3122_v13 = vmax.f32 %v3057_v54, 0.0  ;;  %v3325_v9 = vrot.slane %v8720_v19, 1 }
 0x63f   : > { %v8698_v49 = vld [vmem:[#allocation3 + $0xc0] sm:$0xff] }
 0x640   : > { %3155 = vst.msk [vmem:[#allocation3 + $0xc9] sm:$0xff] %vm372_vm2, %v3122_v13  ;;  %v3314_v55 = vrot.slane %v8698_v49, 1 }
 0x641   : > { %v3092_v10 = vpop.f32.mrf.mxu3 }
 0x642   : > { %v3093_v11 = vadd.f32 %v8387_v53, %v3092_v10  ;;  %v3322_v10 = vrot.slane %v8722_v15, 1 }
 0x643   : > { %v3059_v0 = vpop.f32.mrf.mxu1 }
 0x644   : > { %v3134_v52 = vmax.f32 %v3093_v11, 0.0  ;;  %v3060_v37 = vadd.f32 %v8387_v53, %v3059_v0  ;;  %v3324_v0 = vrot.slane %v8725_v17, 1 }
 0x646   : > { %3167 = vst.msk [vmem:[#allocation3 + $0x159] sm:$0xff] %vm372_vm2, %v3134_v52  ;;  %v3123_v45 = vmax.f32 %v3060_v37, 0.0 }
 0x647   : > { %v8701_v14 = vld [vmem:[#allocation3 + $0xc8] sm:$0xff]  ;;  %v8703_v30 = vld [vmem:[#allocation3 + $0xd0] sm:$0x3] }
 0x648   : > { %3156 = vst.msk [vmem:[#allocation3 + $0xd9] sm:$0xff] %vm372_vm2, %v3123_v45  ;;  %v3315_v7 = vrot.slane %v8701_v14, 1  ;;  %v3317_v47 = vrot.slane %v8703_v30, 1 }
 0x649   : > { %v3095_v25 = vpop.f32.mrf.mxu3 }
 0x64a   : > { %v3096_v62 = vadd.f32 %v8387_v53, %v3095_v25  ;;  %v8711_v60 = vsel %vm1665_vm4, %v3315_v7, %v3317_v47  ;;  %v8714_v44 = vsel %vm1665_vm4, %v3314_v55, %v3315_v7  ;;  %v8748_v7 = vsel %vm1665_vm4, %v3324_v0, %v3325_v9  ;;  %v8750_v47 = vld [vmem:[#allocation3 + $0x100] sm:$0x3]  ;;  %v8752_v55 = vld [vmem:[#allocation3 + $0x110] sm:$0xff] }
 0x64b   : > { %11151 = vst [vmem:[#allocation81_spill] sm:$0xff] %v8711_v60  ;;  %3494 = vrot.lane.b32.xlu1 %v8711_v60, %s5047_s21  ;;  %3492 = vrot.lane.b32.xlu0 %v8714_v44, %s5047_s21  ;;  %v8781_v60 = vld [vmem:[#allocation3 + $0x130] sm:$0x3] }
 0x64c   : > { %11152 = vst [vmem:[#allocation6_spill] sm:$0xff] %v8714_v44  ;;  %v3135_v32 = vmax.f32 %v3096_v62, 0.0  ;;  %v8756_v62 = vld [vmem:[#allocation3 + $0x118] sm:$0x3] }
 0x64d   : > { %11155 = vst [vmem:[#allocation43_spill] sm:$0xff] %v8748_v7  ;;  %v8813_v35 = vld [vmem:[#allocation3 + $0x158] sm:$0xff] }
 0x64e   : > { %3168 = vst.msk [vmem:[#allocation3 + $0x169] sm:$0xff] %vm372_vm2, %v3135_v32  ;;  %v8758_v32 = vld [vmem:[#allocation3 + $0x108] sm:$0xff] }
 0x64f   : > { %v8727_v23 = vld [vmem:[#allocation3 + $0xd8] sm:$0xff]  ;;  %v8729_v2 = vld [vmem:[#allocation3 + $0xe0] sm:$0xff] }
 0x650   : > { %v3319_v54 = vrot.slane %v8727_v23, 1  ;;  %v3320_v13 = vrot.slane %v8729_v2, 1 }
 0x651   : > { %v3098_v11 = vpop.f32.mrf.mxu3 }
 0x652   : > { %v3099_v52 = vadd.f32 %v8387_v53, %v3098_v11  ;;  %v8738_v37 = vsel %vm1665_vm4, %v3319_v54, %v3320_v13  ;;  %v8741_v45 = vsel %vm1665_vm4, %v3320_v13, %v3322_v10  ;;  %v3327_v54 = vrot.slane %v8750_v47, 1 }
 0x653   : > { %11153 = vst [vmem:[#allocation129_spill] sm:$0xff] %v8738_v37  ;;  %3496 = vrot.lane.b32.xlu2 %v8738_v37, %s5047_s21  ;;  %3498 = vrot.lane.b32.xlu0 %v8741_v45, %s5047_s21  ;;  %v3330_v13 = vrot.slane %v8752_v55, 1  ;;  %v3332_v10 = vrot.slane %v8756_v62, 1  ;;  %v3329_v11 = vrot.slane %v8758_v32, 1  ;;  %v8779_v37 = vld [vmem:[#allocation3 + $0x128] sm:$0xff] }
 0x654   : > { %11154 = vst [vmem:[#allocation159_spill] sm:$0xff] %v8741_v45  ;;  %v3136_v25 = vmax.f32 %v3099_v52, 0.0  ;;  %3500 = vrot.lane.b32.xlu1 %v8748_v7, %s5047_s21  ;;  %v8767_v45 = vsel %vm1665_vm4, %v3325_v9, %v3327_v54  ;;  %v8785_v9 = vld [vmem:[#allocation3 + $0x140] sm:$0xff] }
 0x655   : > { %11156 = vst [vmem:[#allocation86_spill] sm:$0xff] %v8767_v45  ;;  %v8770_v7 = vsel %vm1665_vm4, %v3329_v11, %v3330_v13  ;;  %v8787_v54 = vld [vmem:[#allocation3 + $0x120] sm:$0xff]  ;;  %v8792_v11 = vld [vmem:[#allocation3 + $0x138] sm:$0xff] }
 0x656   : > { %3169 = vst.msk [vmem:[#allocation3 + $0x171] sm:$0xff] %vm372_vm2, %v3136_v25  ;;  %v8775_v25 = vsel %vm1665_vm4, %v3330_v13, %v3332_v10  ;;  %v3335_v13 = vrot.slane %v8779_v37, 1  ;;  %v3337_v10 = vrot.slane %v8781_v60, 1  ;;  %v3339_v44 = vrot.slane %v8792_v11, 1 }
 0x657   : > { %11157 = vst [vmem:[#allocation112_spill] sm:$0xff] %v8770_v7 }
 0x658   : > { %11158 = vst [vmem:[#allocation40_spill] sm:$0xff] %v8775_v25 }
 0x659   : > { %v3101_v0 = vpop.f32.mrf.mxu3  ;;  %11159 = vst [vmem:[#allocation33_spill] sm:$0xff] %v8785_v9 }
 0x65a   : > { %v3102_v52 = vadd.f32 %v8387_v53, %v3101_v0 }
 0x65b   : > { %3502 = vrot.lane.b32.xlu2 %v8767_v45, %s5047_s21  ;;  %3504 = vrot.lane.b32.xlu0 %v8770_v7, %s5047_s21  ;;  %v3340_v7 = vrot.slane %v8785_v9, 1  ;;  %v3334_v45 = vrot.slane %v8787_v54, 1 }
 0x65c   : > { %v3137_v0 = vmax.f32 %v3102_v52, 0.0  ;;  %3506 = vrot.lane.b32.xlu1 %v8775_v25, %s5047_s21 }
 0x65d   : > { %v8799_v16 = vsel %vm1665_vm4, %v3334_v45, %v3335_v13  ;;  %v8809_v36 = vsel %vm1665_vm4, %v3339_v44, %v3340_v7  ;;  %v8817_v45 = vld [vmem:[#allocation3 + $0x160] sm:$0x3]  ;;  %v8841_v28 = vld [vmem:[#allocation3 + $0x178] sm:$0x3] }
 0x65e   : > { %3170 = vst.msk [vmem:[#allocation3 + $0x181] sm:$0xff] %vm372_vm2, %v3137_v0  ;;  %v8802_v0 = vsel %vm1665_vm4, %v3335_v13, %v3337_v10  ;;  %v8819_v13 = vld [vmem:[#allocation3 + $0x150] sm:$0xff]  ;;  %v3342_v10 = vrot.slane %v8811_v26, 1  ;;  %v3347_v44 = vrot.slane %v8817_v45, 1 }
 0x65f   : > { %11160 = vst [vmem:[#allocation150_spill] sm:$0xff] %v8799_v16 }
 0x660   : > { %11161 = vst [vmem:[#allocation65_spill] sm:$0xff] %v8802_v0 }
 0x661   : > { %v3104_v52 = vpop.f32.mrf.mxu3  ;;  %11162 = vst [vmem:[#allocation88_spill] sm:$0xff] %v8809_v36 }
 0x662   : > { %v3105_v25 = vadd.f32 %v8387_v53, %v3104_v52  ;;  %v3345_v52 = vrot.slane %v8813_v35, 1 }
 0x663   : > { %3508 = vrot.lane.b32.xlu2 %v8799_v16, %s5047_s21  ;;  %3510 = vrot.lane.b32.xlu0 %v8802_v0, %s5047_s21  ;;  %v3344_v0 = vrot.slane %v8819_v13, 1  ;;  %v8827_v16 = vsel %vm1665_vm4, %v3340_v7, %v3342_v10  ;;  %v8845_v7 = vld [vmem:[#allocation3 + $0x168] sm:$0xff]  ;;  %v3355_v10 = vrot.slane %v8299_v8, 2  ;;  %v3357_v8 = vrot.slane %v8529_v59, 2 }
 0x664   : > { %v3138_v53 = vmax.f32 %v3105_v25, 0.0  ;;  %3512 = vrot.lane.b32.xlu1 %v8809_v36, %s5047_s21  ;;  %11163 = vst [vmem:[#allocation96_spill] sm:$0xff] %v8827_v16  ;;  %v8835_v36 = vsel %vm1665_vm4, %v3345_v52, %v3347_v44  ;;  %v3349_v44 = vrot.slane %v8845_v7, 1  ;;  %v3367_v59 = vrot.slane %v8543_v22, 2 }
 0x665   : > { %v8830_v25 = vsel %vm1665_vm4, %v3344_v0, %v3345_v52  ;;  %11165 = vst [vmem:[#allocation117_spill] sm:$0xff] %v8835_v36  ;;  %v3354_v0 = vrot.slane %v8328_v1, 2  ;;  %v3352_v52 = vrot.slane %v8841_v28, 1  ;;  %v3360_v1 = vrot.slane %v8495_v24, 2 }
 0x666   : > { %3171 = vst.msk [vmem:[#allocation3 + $0x189] sm:$0xff] %vm372_vm2, %v3138_v53  ;;  %v8839_v53 = vld [vmem:[#allocation3 + $0x170] sm:$0xff] }
 0x667   : > { %11164 = vst [vmem:[#allocation10_spill] sm:$0xff] %v8830_v25 }
 0x66b   : > { %3514 = vrot.lane.b32.xlu2 %v8827_v16, %s5047_s21  ;;  %3516 = vrot.lane.b32.xlu0 %v8830_v25, %s5047_s21  ;;  %v3350_v16 = vrot.slane %v8839_v53, 1  ;;  %v3356_v25 = vsel %vm1746_vm6, %v3354_v0, %v3355_v10  ;;  %v3362_v0 = vrot.slane %v8497_v41, 2  ;;  %v3365_v41 = vrot.slane %v8541_v51, 2 }
 0x66c   : > { %3518 = vrot.lane.b32.xlu1 %v8835_v36, %s5047_s21  ;;  %v3359_v36 = vrot.slane %v8484_v3, 2 }
 0x66d   : > { %v8854_v5 = vsel %vm1665_vm4, %v3349_v44, %v3350_v16  ;;  %v8857_v6 = vsel %vm1665_vm4, %v3350_v16, %v3352_v52  ;;  %v3358_v44 = vsel %vm1746_vm6, %v3355_v10, %v3357_v8  ;;  %v8872_v52 = vpop.permute.xlu2 %3460  ;;  %v3369_v10 = vrot.slane %v8564_v42, 2 }
 0x66e   : > { %11166 = vst [vmem:[#allocation128_spill] sm:$0xff] %v8854_v5  ;;  %v8870_v16 = vsel %vm1746_vm6, %v3359_v36, %v3360_v1  ;;  %v3370_v36 = vrot.slane %v8566_v48, 2 }
 0x66f   : > { %11167 = vst [vmem:[#allocation140_spill] sm:$0xff] %v8857_v6 }
 0x670   : > { %11168 = vst [vmem:[#allocation42_spill] sm:$0xff] %v8872_v52 }
 0x673   : > { %3520 = vrot.lane.b32.xlu2 %v8854_v5, %s5047_s21  ;;  %3522 = vrot.lane.b32.xlu0 %v8857_v6, %s5047_s21  ;;  %v8876_v6 = vsel %vm1746_vm6, %v3360_v1, %v3362_v0  ;;  %v8891_v1 = vsel %vm1746_vm6, %v3365_v41, %v3367_v59  ;;  %v8896_v0 = vsel %vm1746_vm6, %v3369_v10, %v3370_v36  ;;  %v3374_v59 = vrot.slane %v8590_v39, 2  ;;  %s5057_s21 = smov 12  }
 0x674   : > { %3556 = vrot.lane.b32.xlu1 %v3356_v25, %s5049_s22  ;;  %v3364_v25 = vrot.slane %v8539_v40, 2  ;;  %11169 = vst [vmem:[#allocation144_spill] sm:$0xff] %v8896_v0 }
 0x675   : > { %v8902_v22 = vpop.permute.xlu2 %3466 }
 0x676   : > { %v8888_v8 = vsel %vm1746_vm6, %v3364_v25, %v3365_v41  ;;  %11170 = vst [vmem:[#allocation84_spill] sm:$0xff] %v8902_v22  ;;  %v3375_v25 = vrot.slane %v8593_v58, 2  ;;  %v3377_v41 = vrot.slane %v8595_v61, 2  ;;  %v3380_v61 = vrot.slane %v8620_v4, 2 }
 0x677   : > { %v3384_v22 = vrot.slane %v8644_v21, 2 }
 0x678   : > { %v8912_v10 = vsel %vm1746_vm6, %v3374_v59, %v3375_v25  ;;  %v3379_v59 = vrot.slane %v8617_v27, 2 }
 0x679   : > { %11171 = vst [vmem:[#allocation23_spill] sm:$0xff] %v8912_v10 }
 0x67b   : > { %3558 = vrot.lane.b32.xlu2 %v3358_v44, %s5049_s22  ;;  %3560 = vrot.lane.b32.xlu0 %v8870_v16, %s5049_s22  ;;  %v3372_v44 = vrot.slane %v8568_v46, 2 }
 0x67c   : > { %3562 = vrot.lane.b32.xlu1 %v8876_v6, %s5049_s22 }
 0x67d   : > { %v8909_v52 = vsel %vm1746_vm6, %v3370_v36, %v3372_v44  ;;  %v8923_v46 = vpop.permute.xlu2 %3472  ;;  %v3382_v36 = vrot.slane %v8622_v56, 2  ;;  %v3385_v44 = vrot.slane %v8647_v33, 2  ;;  %v8943_v56 = vpop.permute.xlu0 %3462 }
 0x67e   : > { %11173 = vst [vmem:[#allocation48_spill] sm:$0xff] %v8923_v46 }
 0x67f   : > { %v8939_v46 = vsel %vm1746_vm6, %v3384_v22, %v3385_v44  ;;  %11177 = vst [vmem:[#allocation101_spill] sm:$0xff] %v8943_v56  ;;  %v3389_v22 = vrot.slane %v8671_v34, 2 }
 0x680   : > { %11176 = vst [vmem:[#allocation89_spill] sm:$0xff] %v8939_v46 }
 0x683   : > { %3564 = vrot.lane.b32.xlu2 %v8888_v8, %s5049_s22  ;;  %3566 = vrot.lane.b32.xlu0 %v8891_v1, %s5049_s22 }
 0x684   : > { %3568 = vrot.lane.b32.xlu1 %v8896_v0, %s5049_s22  ;;  %v8917_v0 = vsel %vm1746_vm6, %v3375_v25, %v3377_v41  ;;  %v8931_v25 = vsel %vm1746_vm6, %v3379_v59, %v3380_v61  ;;  %v8934_v41 = vsel %vm1746_vm6, %v3380_v61, %v3382_v36  ;;  %v3387_v61 = vrot.slane %v8649_v29, 2 }
 0x685   : > { %11172 = vst [vmem:[#allocation131_spill] sm:$0xff] %v8917_v0  ;;  %v8949_v59 = vpop.permute.xlu2 %3478  ;;  %v3390_v36 = vrot.slane %v8674_v31, 2 }
 0x686   : > { %11174 = vst [vmem:[#allocation148_spill] sm:$0xff] %v8931_v25 }
 0x687   : > { %11175 = vst [vmem:[#allocation69_spill] sm:$0xff] %v8934_v41  ;;  %v8959_v56 = vsel %vm1746_vm6, %v3389_v22, %v3390_v36  ;;  %v3397_v22 = vrot.slane %v8703_v30, 2 }
 0x688   : > { %11179 = vst [vmem:[#allocation114_spill] sm:$0xff] %v8949_v59  ;;  %v3399_v59 = vrot.slane %v8727_v23, 2 }
 0x689   : > { %11181 = vst [vmem:[#allocation67_spill] sm:$0xff] %v8959_v56 }
 0x68b   : > { %3570 = vrot.lane.b32.xlu2 %v8909_v52, %s5049_s22  ;;  %3572 = vrot.lane.b32.xlu0 %v8912_v10, %s5049_s22  ;;  %v8956_v10 = vsel %vm1746_vm6, %v3385_v44, %v3387_v61  ;;  %v8974_v44 = vpop.permute.xlu0 %3468  ;;  %v3395_v61 = vrot.slane %v8701_v14, 2 }
 0x68c   : > { %3574 = vrot.lane.b32.xlu1 %v8917_v0, %s5049_s22  ;;  %v8947_v0 = vpop.permute.xlu1 %3464  ;;  %11180 = vst [vmem:[#allocation45_spill] sm:$0xff] %v8956_v10 }
 0x68d   : > { %11178 = vst [vmem:[#allocation20_spill] sm:$0xff] %v8947_v0 }
 0x68e   : > { %11185 = vst [vmem:[#allocation91_spill] sm:$0xff] %v8974_v44  ;;  %v3402_v44 = vrot.slane %v8722_v15, 2 }
 0x693   : > { %3576 = vrot.lane.b32.xlu2 %v8931_v25, %s5049_s22  ;;  %3578 = vrot.lane.b32.xlu0 %v8934_v41, %s5049_s22  ;;  %v3392_v25 = vrot.slane %v8676_v63, 2  ;;  %v8972_v63 = vpop.permute.xlu2 %3484 }
 0x694   : > { %3580 = vrot.lane.b32.xlu1 %v8939_v46, %s5049_s22  ;;  %v8970_v29 = vpop.permute.xlu1 %3470  ;;  %11184 = vst [vmem:[#allocation61_spill] sm:$0xff] %v8972_v63 }
 0x695   : > { %v8964_v0 = vsel %vm1746_vm6, %v3390_v36, %v3392_v25  ;;  %11183 = vst [vmem:[#allocation156_spill] sm:$0xff] %v8970_v29  ;;  %v3400_v25 = vrot.slane %v8729_v2, 2  ;;  %v3394_v36 = vrot.slane %v8698_v49, 2 }
 0x696   : > { %11182 = vst [vmem:[#allocation39_spill] sm:$0xff] %v8964_v0 }
 0x697   : > { %v8990_v63 = vsel %vm1746_vm6, %v3399_v59, %v3400_v25  ;;  %v3404_v59 = vrot.slane %v8725_v17, 2 }
 0x69b   : > { %3582 = vrot.lane.b32.xlu2 %v8956_v10, %s5049_s22  ;;  %3584 = vrot.lane.b32.xlu0 %v8959_v56, %s5049_s22  ;;  %v8982_v56 = vsel %vm1746_vm6, %v3394_v36, %v3395_v61  ;;  %v8998_v29 = vpop.permute.xlu2 %3490  ;;  %v9000_v36 = vpop.permute.xlu0 %3474 }
 0x69c   : > { %3586 = vrot.lane.b32.xlu1 %v8964_v0, %s5049_s22  ;;  %11186 = vst [vmem:[#allocation103_spill] sm:$0xff] %v8982_v56  ;;  %v8985_v0 = vsel %vm1746_vm6, %v3395_v61, %v3397_v22  ;;  %v8996_v30 = vpop.permute.xlu1 %3476  ;;  %v3405_v61 = vrot.slane %v8720_v19, 2  ;;  %v3407_v22 = vrot.slane %v8750_v47, 2 }
 0x69d   : > { %11187 = vst [vmem:[#allocation14_spill] sm:$0xff] %v8985_v0 }
 0x69e   : > { %11188 = vst [vmem:[#allocation118_spill] sm:$0xff] %v8996_v30  ;;  %v9015_v30 = vsel %vm1746_vm6, %v3405_v61, %v3407_v22  ;;  %v3414_v22 = vrot.slane %v8787_v54, 2 }
 0x69f   : > { %11189 = vst [vmem:[#allocation130_spill] sm:$0xff] %v8998_v29 }
 0x6a0   : > { %11190 = vst [vmem:[#allocation138_spill] sm:$0xff] %v9000_v36  ;;  %v3415_v36 = vrot.slane %v8779_v37, 2 }
 0x6a1   : > { %11191 = vst [vmem:[#allocation49_spill] sm:$0xff] %v9015_v30 }
 0x6a3   : > { %3588 = vrot.lane.b32.xlu2 %v8982_v56, %s5049_s22  ;;  %3590 = vrot.lane.b32.xlu0 %v8985_v0, %s5049_s22  ;;  %v9007_v56 = vsel %vm1746_vm6, %v3400_v25, %v3402_v44  ;;  %v9010_v0 = vsel %vm1746_vm6, %v3404_v59, %v3405_v61  ;;  %v9025_v44 = vpop.permute.xlu0 %3480  ;;  %v3410_v25 = vrot.slane %v8752_v55, 2  ;;  %v3412_v59 = vrot.slane %v8756_v62, 2 }
 0x6a4   : > { %3592 = vrot.lane.b32.xlu1 %v8990_v63, %s5049_s22  ;;  %v9021_v15 = vpop.permute.xlu1 %3482  ;;  %11194 = vst [vmem:[#allocation87_spill] sm:$0xff] %v9025_v44  ;;  %v3409_v61 = vrot.slane %v8758_v32, 2 }
 0x6a5   : > { %11192 = vst [vmem:[#allocation149_spill] sm:$0xff] %v9021_v15  ;;  %v9041_v15 = vsel %vm1746_vm6, %v3414_v22, %v3415_v36  ;;  %v3419_v22 = vrot.slane %v8792_v11, 2 }
 0x6a6   : > { %v9033_v29 = vsel %vm1746_vm6, %v3409_v61, %v3410_v25 }
 0x6a7   : > { %11195 = vst [vmem:[#allocation99_spill] sm:$0xff] %v9033_v29 }
 0x6ab   : > { %3594 = vrot.lane.b32.xlu2 %v9007_v56, %s5049_s22  ;;  %3596 = vrot.lane.b32.xlu0 %v9010_v0, %s5049_s22  ;;  %v9051_v61 = vpop.permute.xlu0 %3486 }
 0x6ac   : > { %3598 = vrot.lane.b32.xlu1 %v9015_v30, %s5049_s22  ;;  %v9036_v30 = vsel %vm1746_vm6, %v3410_v25, %v3412_v59  ;;  %11198 = vst [vmem:[#allocation133_spill] sm:$0xff] %v9051_v61  ;;  %v3417_v25 = vrot.slane %v8781_v60, 2  ;;  %v3420_v59 = vrot.slane %v8785_v9, 2  ;;  %v3430_v61 = vrot.slane %v8839_v53, 2 }
 0x6ad   : > { %v9023_v47 = vpop.permute.xlu2 %3496  ;;  %11196 = vst [vmem:[#allocation21_spill] sm:$0xff] %v9036_v30  ;;  %v9047_v62 = vpop.permute.xlu1 %3488 }
 0x6ae   : > { %11193 = vst [vmem:[#allocation70_spill] sm:$0xff] %v9023_v47  ;;  %v3422_v47 = vrot.slane %v8811_v26, 2 }
 0x6af   : > { %11197 = vst [vmem:[#allocation17_spill] sm:$0xff] %v9047_v62 }
 0x6b0   : > { %v9066_v62 = vsel %vm1746_vm6, %v3420_v59, %v3422_v47  ;;  %v3424_v47 = vrot.slane %v8819_v13, 2 }
 0x6b1   : > { %11200 = vst [vmem:[#allocation53_spill] sm:$0xff] %v9066_v62 }
 0x6b3   : > { %3600 = vrot.lane.b32.xlu2 %v9033_v29, %s5049_s22  ;;  %3602 = vrot.lane.b32.xlu0 %v9036_v30, %s5049_s22  ;;  %v9058_v29 = vsel %vm1746_vm6, %v3415_v36, %v3417_v25  ;;  %v9061_v30 = vsel %vm1746_vm6, %v3419_v22, %v3420_v59  ;;  %v3425_v25 = vrot.slane %v8813_v35, 2  ;;  %v3427_v22 = vrot.slane %v8817_v45, 2 }
 0x6b4   : > { %3604 = vrot.lane.b32.xlu1 %v9041_v15, %s5049_s22  ;;  %11199 = vst [vmem:[#allocation142_spill] sm:$0xff] %v9061_v30  ;;  %v3429_v59 = vrot.slane %v8845_v7, 2 }
 0x6b5   : > { %v9049_v44 = vpop.permute.xlu2 %3502 }
 0x6bb   : > { %3606 = vrot.lane.b32.xlu2 %v9058_v29, %s5049_s22  ;;  %3608 = vrot.lane.b32.xlu0 %v9061_v30, %s5049_s22  ;;  %v9084_v30 = vsel %vm1746_vm6, %v3424_v47, %v3425_v25 }
 0x6bc   : > { %3610 = vrot.lane.b32.xlu1 %v9066_v62, %s5049_s22  ;;  %11204 = vst [vmem:[#allocation104_spill] sm:$0xff] %v9084_v30  ;;  %v9087_v62 = vsel %vm1746_vm6, %v3425_v25, %v3427_v22  ;;  %v3432_v25 = vrot.slane %v8841_v28, 2 }
 0x6bd   : > { %v9072_v26 = vpop.permute.xlu1 %3494  ;;  %v9074_v60 = vpop.permute.xlu2 %3508  ;;  %11205 = vst [vmem:[#allocation19_spill] sm:$0xff] %v9087_v62 }
 0x6be   : > { %11201 = vst [vmem:[#allocation154_spill] sm:$0xff] %v9072_v26  ;;  %v9076_v36 = vpop.permute.xlu0 %3492  ;;  %v9106_v22 = vsel %vm1746_vm6, %v3430_v61, %v3432_v25 }
 0x6bf   : > { %11202 = vst [vmem:[#allocation73_spill] sm:$0xff] %v9074_v60  ;;  %v9092_v60 = vsel %vm1746_vm6, %v3429_v59, %v3430_v61 }
 0x6c0   : > { %11203 = vst [vmem:[#allocation92_spill] sm:$0xff] %v9076_v36 }
 0x6c1   : > { %11206 = vst [vmem:[#allocation116_spill] sm:$0xff] %v9092_v60 }
 0x6c2   : > { %11208 = vst [vmem:[#allocation145_spill] sm:$0xff] %v9106_v22 }
 0x6c3   : > { %3612 = vrot.lane.b32.xlu2 %v9084_v30, %s5049_s22  ;;  %3614 = vrot.lane.b32.xlu0 %v9087_v62, %s5049_s22 }
 0x6c4   : > { %3616 = vrot.lane.b32.xlu1 %v9092_v60, %s5049_s22 }
 0x6c5   : > { %v9098_v45 = vpop.permute.xlu2 %3514 }
 0x6c6   : > { %11207 = vst [vmem:[#allocation51_spill] sm:$0xff] %v9098_v45  ;;  %v9100_v26 = vpop.permute.xlu1 %3500  ;;  %v9102_v47 = vpop.permute.xlu0 %3498 }
 0x6cb   : > { %3618 = vrot.lane.b32.xlu2 %v9106_v22, %s5049_s22  ;;  %3652 = vrot.lane.b32.xlu0 %v8484_v3, %s5057_s21  ;;  %s5058_s22 = smov 20  }
 0x6cc   : > { %3654 = vrot.lane.b32.xlu1 %v8495_v24, %s5057_s21 }
 0x6cd   : > { %v9114_v59 = vpop.permute.xlu2 %3520 }
 0x6ce   : > { %11209 = vst [vmem:[#allocation44_spill] sm:$0xff] %v9114_v59  ;;  %v9116_v45 = vpop.permute.xlu1 %3506  ;;  %v9118_v60 = vpop.permute.xlu0 %3504 }
 0x6d3   : > { %3656 = vrot.lane.b32.xlu2 %v8539_v40, %s5057_s21  ;;  %3658 = vrot.lane.b32.xlu0 %v8541_v51, %s5057_s21 }
 0x6d4   : > { %3660 = vrot.lane.b32.xlu1 %v8564_v42, %s5057_s21 }
 0x6d5   : > { %v9126_v28 = vpop.permute.xlu2 %3558 }
 0x6d6   : > { %11210 = vst [vmem:[#allocation162_spill] sm:$0xff] %v9126_v28  ;;  %v9128_v3 = vpop.permute.xlu1 %3512  ;;  %v9130_v24 = vpop.permute.xlu0 %3510 }
 0x6d7   : > { %11211 = vst [vmem:[#allocation66_spill] sm:$0xff] %v9128_v3  ;;  %v9228_v3 = vld [vmem:[#allocation3 + $0x180] sm:$0xff] }
 0x6d8   : > { %11212 = vst [vmem:[#allocation94_spill] sm:$0xff] %v9130_v24  ;;  %v11243_v24 = vld [vmem:[#allocation30_spill] sm:$0xff] }
 0x6d9   : > { %11234 = vst [vmem:[#allocation95_spill] sm:$0xff] %v9228_v3 }
 0x6db   : > { %3662 = vrot.lane.b32.xlu2 %v8566_v48, %s5057_s21  ;;  %3664 = vrot.lane.b32.xlu0 %v8590_v39, %s5057_s21 }
 0x6dc   : > { %3666 = vrot.lane.b32.xlu1 %v8593_v58, %s5057_s21 }
 0x6dd   : > { %v9138_v40 = vpop.permute.xlu2 %3564 }
 0x6de   : > { %11213 = vst [vmem:[#allocation106_spill] sm:$0xff] %v9138_v40  ;;  %v9140_v51 = vpop.permute.xlu1 %3518  ;;  %v9142_v42 = vpop.permute.xlu0 %3516 }
 0x6df   : > { %11214 = vst [vmem:[#allocation15_spill] sm:$0xff] %v9140_v51 }
 0x6e0   : > { %11215 = vst [vmem:[#allocation121_spill] sm:$0xff] %v9142_v42 }
 0x6e3   : > { %3668 = vrot.lane.b32.xlu2 %v8617_v27, %s5057_s21  ;;  %3670 = vrot.lane.b32.xlu0 %v8620_v4, %s5057_s21 }
 0x6e4   : > { %3672 = vrot.lane.b32.xlu1 %v8644_v21, %s5057_s21 }
 0x6e5   : > { %v9150_v48 = vpop.permute.xlu2 %3570 }
 0x6e6   : > { %11216 = vst [vmem:[#allocation132_spill] sm:$0xff] %v9150_v48  ;;  %v9152_v39 = vpop.permute.xlu1 %3556  ;;  %v9154_v58 = vpop.permute.xlu0 %3522  ;;  %v9232_v48 = vld [vmem:[#allocation3 + $0x188] sm:$0xff] }
 0x6e7   : > { %11217 = vst [vmem:[#allocation141_spill] sm:$0xff] %v9152_v39 }
 0x6e8   : > { %11218 = vst [vmem:[#allocation54_spill] sm:$0xff] %v9154_v58 }
 0x6e9   : > { %11235 = vst [vmem:[#allocation107_spill] sm:$0xff] %v9232_v48 }
 0x6eb   : > { %3674 = vrot.lane.b32.xlu2 %v8647_v33, %s5057_s21  ;;  %3676 = vrot.lane.b32.xlu0 %v8671_v34, %s5057_s21 }
 0x6ec   : > { %3678 = vrot.lane.b32.xlu1 %v8674_v31, %s5057_s21 }
 0x6ed   : > { %v9162_v27 = vpop.permute.xlu2 %3576 }
 0x6ee   : > { %11219 = vst [vmem:[#allocation155_spill] sm:$0xff] %v9162_v27  ;;  %v9164_v4 = vpop.permute.xlu1 %3562  ;;  %v9166_v21 = vpop.permute.xlu0 %3560 }
 0x6ef   : > { %11220 = vst [vmem:[#allocation74_spill] sm:$0xff] %v9164_v4  ;;  %v11247_v4 = vld [vmem:[#allocation34_spill] sm:$0xff] }
 0x6f0   : > { %11221 = vst [vmem:[#allocation90_spill] sm:$0xff] %v9166_v21 }
 0x6f3   : > { %3680 = vrot.lane.b32.xlu2 %v8698_v49, %s5057_s21  ;;  %3682 = vrot.lane.b32.xlu0 %v8701_v14, %s5057_s21 }
 0x6f4   : > { %3684 = vrot.lane.b32.xlu1 %v8727_v23, %s5057_s21 }
 0x6f5   : > { %v9174_v33 = vpop.permute.xlu2 %3582 }
 0x6f6   : > { %v9176_v34 = vpop.permute.xlu1 %3568  ;;  %v9178_v31 = vpop.permute.xlu0 %3566 }
 0x6f7   : > { %11222 = vst [vmem:[#allocation102_spill] sm:$0xff] %v9176_v34 }
 0x6f8   : > { %11223 = vst [vmem:[#allocation12_spill] sm:$0xff] %v9178_v31 }
 0x6fb   : > { %3686 = vrot.lane.b32.xlu2 %v8729_v2, %s5057_s21  ;;  %3688 = vrot.lane.b32.xlu0 %v8725_v17, %s5057_s21 }
 0x6fc   : > { %3690 = vrot.lane.b32.xlu1 %v8720_v19, %s5057_s21 }
 0x6fd   : > { %v9186_v49 = vpop.permute.xlu2 %3588 }
 0x6fe   : > { %11224 = vst [vmem:[#allocation4_spill] sm:$0xff] %v9186_v49  ;;  %v9188_v61 = vpop.permute.xlu1 %3574  ;;  %v9190_v25 = vpop.permute.xlu0 %3572 }
 0x6ff   : > { %11225 = vst [vmem:[#allocation135_spill] sm:$0xff] %v9188_v61 }
 0x700   : > { %11226 = vst [vmem:[#allocation146_spill] sm:$0xff] %v9190_v25 }
 0x703   : > { %3692 = vrot.lane.b32.xlu2 %v8758_v32, %s5057_s21  ;;  %3694 = vrot.lane.b32.xlu0 %v8752_v55, %s5057_s21 }
 0x704   : > { %3696 = vrot.lane.b32.xlu1 %v8787_v54, %s5057_s21 }
 0x705   : > { %v9198_v58 = vpop.permute.xlu2 %3594 }
 0x706   : > { %v9200_v59 = vpop.permute.xlu1 %3580  ;;  %v9202_v51 = vpop.permute.xlu0 %3578 }
 0x707   : > { %11227 = vst [vmem:[#allocation26_spill] sm:$0xff] %v9200_v59 }
 0x708   : > { %11228 = vst [vmem:[#allocation120_spill] sm:$0xff] %v9202_v51 }
 0x70b   : > { %3698 = vrot.lane.b32.xlu2 %v8779_v37, %s5057_s21  ;;  %3700 = vrot.lane.b32.xlu0 %v8792_v11, %s5057_s21 }
 0x70c   : > { %3702 = vrot.lane.b32.xlu1 %v8785_v9, %s5057_s21 }
 0x70d   : > { %v9210_v27 = vpop.permute.xlu2 %3600 }
 0x70e   : > { %v9212_v61 = vpop.permute.xlu1 %3586  ;;  %v9214_v42 = vpop.permute.xlu0 %3584 }
 0x70f   : > { %11229 = vst [vmem:[#allocation37_spill] sm:$0xff] %v9212_v61  ;;  %v11280_v61 = vld [vmem:[#allocation117_spill] sm:$0xff] }
 0x710   : > { %11230 = vst [vmem:[#allocation68_spill] sm:$0xff] %v9214_v42 }
 0x713   : > { %3704 = vrot.lane.b32.xlu2 %v8819_v13, %s5057_s21  ;;  %3706 = vrot.lane.b32.xlu0 %v8813_v35, %s5057_s21 }
 0x714   : > { %3708 = vrot.lane.b32.xlu1 %v8845_v7, %s5057_s21 }
 0x715   : > { %v9222_v59 = vpop.permute.xlu2 %3606 }
 0x716   : > { %11231 = vst [vmem:[#allocation59_spill] sm:$0xff] %v9222_v59  ;;  %v9224_v51 = vpop.permute.xlu1 %3592  ;;  %v9226_v25 = vpop.permute.xlu0 %3590 }
 0x717   : > { %11232 = vst [vmem:[#allocation160_spill] sm:$0xff] %v9224_v51  ;;  %v11271_v51 = vld [vmem:[#allocation40_spill] sm:$0xff] }
 0x718   : > { %11233 = vst [vmem:[#allocation76_spill] sm:$0xff] %v9226_v25 }
 0x71b   : > { %3710 = vrot.lane.b32.xlu2 %v8839_v53, %s5057_s21  ;;  %3712 = vrot.lane.b32.xlu0 %v9228_v3, %s5057_s21 }
 0x71c   : > { %3714 = vrot.lane.b32.xlu1 %v9232_v48, %s5057_s21  ;;  %s10068_s21 = scalar_lea.vmem %s10398_s8, %s4928_s17 }
 0x71d   : > { %v9238_v35 = vpop.permute.xlu2 %3612 }
 0x71e   : > { %11236 = vst [vmem:[#allocation9_spill] sm:$0xff] %v9238_v35  ;;  %v9240_v13 = vpop.permute.xlu1 %3598  ;;  %v9242_v7 = vpop.permute.xlu0 %3596 }
 0x723   : > { %3748 = vrot.lane.b32.xlu2 %v8517_v20, %s5050_s23  ;;  %3750 = vrot.lane.b32.xlu0 %v8514_v18, %s5050_s23 }
 0x724   : > { %3752 = vrot.lane.b32.xlu1 %v8553_v12, %s5050_s23 }
 0x725   : > { %v9250_v53 = vpop.permute.xlu2 %3618 }
 0x726   : > { %11237 = vst [vmem:[#allocation119_spill] sm:$0xff] %v9250_v53  ;;  %v9252_v34 = vpop.permute.xlu1 %3604  ;;  %v9254_v59 = vpop.permute.xlu0 %3602  ;;  %v11242_v53 = vld [vmem:[#allocation110_spill] sm:$0xff] }
 0x727   : > { %11238 = vst [vmem:[#allocation56_spill] sm:$0xff] %v9252_v34 }
 0x72b   : > { %3754 = vrot.lane.b32.xlu2 %v8550_v43, %s5050_s23  ;;  %3756 = vrot.lane.b32.xlu0 %v8576_v50, %s5050_s23 }
 0x72c   : > { %3758 = vrot.lane.b32.xlu1 %v8579_v38, %s5050_s23 }
 0x72d   : > { %v9262_v20 = vpop.permute.xlu2 %3656 }
 0x72e   : > { %11239 = vst [vmem:[#allocation151_spill] sm:$0xff] %v9262_v20  ;;  %v9264_v18 = vpop.permute.xlu1 %3610  ;;  %v9266_v35 = vpop.permute.xlu0 %3608 }
 0x72f   : > { %11240 = vst [vmem:[#allocation167_spill] sm:$0xff] %v9264_v18  ;;  %v11248_v18 = vld [vmem:[#allocation85_spill] sm:$0xff] }
 0x730   : > { %11241 = vst [vmem:[#allocation172_spill] sm:$0xff] %v9266_v35  ;;  %v11249_v35 = vld [vmem:[#allocation25_spill] sm:$0xff] }
 0x733   : > { %3760 = vrot.lane.b32.xlu2 %v8606_v57, %s5050_s23  ;;  %3762 = vrot.lane.b32.xlu0 %v11242_v53, %s5050_s23 }
 0x734   : > { %3764 = vrot.lane.b32.xlu1 %v11243_v24, %s5050_s23 }
 0x735   : > { %v9274_v34 = vpop.permute.xlu2 %3662 }
 0x736   : > { %11244 = vst [vmem:[#allocation179_spill] sm:$0xff] %v9274_v34  ;;  %v9276_v31 = vpop.permute.xlu1 %3616  ;;  %v9278_v40 = vpop.permute.xlu0 %3614  ;;  %v11253_v34 = vld [vmem:[#allocation35_spill] sm:$0xff] }
 0x737   : > { %11245 = vst [vmem:[#allocation18_spill] sm:$0xff] %v9276_v31  ;;  %v11254_v31 = vld [vmem:[#allocation126_spill] sm:$0xff] }
 0x738   : > { %11246 = vst [vmem:[#allocation58_spill] sm:$0xff] %v9278_v40  ;;  %v11255_v40 = vld [vmem:[#allocation6_spill] sm:$0xff] }
 0x73b   : > { %3766 = vrot.lane.b32.xlu2 %v11247_v4, %s5050_s23  ;;  %3768 = vrot.lane.b32.xlu0 %v11248_v18, %s5050_s23 }
 0x73c   : > { %3770 = vrot.lane.b32.xlu1 %v11249_v35, %s5050_s23 }
 0x73d   : > { %v9286_v22 = vpop.permute.xlu2 %3668 }
 0x73e   : > { %11250 = vst [vmem:[#allocation72_spill] sm:$0xff] %v9286_v22  ;;  %v9288_v20 = vpop.permute.xlu1 %3654  ;;  %v9290_v21 = vpop.permute.xlu0 %3652  ;;  %v11259_v22 = vld [vmem:[#allocation81_spill] sm:$0xff] }
 0x73f   : > { %11251 = vst [vmem:[#allocation50_spill] sm:$0xff] %v9288_v20  ;;  %v11260_v20 = vld [vmem:[#allocation129_spill] sm:$0xff] }
 0x740   : > { %11252 = vst [vmem:[#allocation165_spill] sm:$0xff] %v9290_v21 }
 0x743   : > { %3772 = vrot.lane.b32.xlu2 %v11253_v34, %s5050_s23  ;;  %3774 = vrot.lane.b32.xlu0 %v11254_v31, %s5050_s23  ;;  %v11261_v34 = vld [vmem:[#allocation159_spill] sm:$0xff] }
 0x744   : > { %3776 = vrot.lane.b32.xlu1 %v11255_v40, %s5050_s23 }
 0x745   : > { %v9298_v28 = vpop.permute.xlu2 %3674 }
 0x746   : > { %11256 = vst [vmem:[#allocation71_spill] sm:$0xff] %v9298_v28  ;;  %v9300_v18 = vpop.permute.xlu1 %3660  ;;  %v9302_v35 = vpop.permute.xlu0 %3658  ;;  %v11265_v28 = vld [vmem:[#allocation43_spill] sm:$0xff] }
 0x747   : > { %11257 = vst [vmem:[#allocation97_spill] sm:$0xff] %v9300_v18  ;;  %v11266_v18 = vld [vmem:[#allocation86_spill] sm:$0xff] }
 0x748   : > { %11258 = vst [vmem:[#allocation22_spill] sm:$0xff] %v9302_v35  ;;  %v11267_v35 = vld [vmem:[#allocation112_spill] sm:$0xff] }
 0x74b   : > { %3778 = vrot.lane.b32.xlu2 %v11259_v22, %s5050_s23  ;;  %3780 = vrot.lane.b32.xlu0 %v11260_v20, %s5050_s23 }
 0x74c   : > { %3782 = vrot.lane.b32.xlu1 %v11261_v34, %s5050_s23 }
 0x74d   : > { %v9310_v4 = vpop.permute.xlu2 %3680 }
 0x74e   : > { %11262 = vst [vmem:[#allocation113_spill] sm:$0xff] %v9310_v4  ;;  %v9312_v31 = vpop.permute.xlu1 %3666  ;;  %v9314_v40 = vpop.permute.xlu0 %3664  ;;  %v11282_v4 = vld [vmem:[#allocation140_spill] sm:$0xff] }
 0x74f   : > { %11263 = vst [vmem:[#allocation123_spill] sm:$0xff] %v9312_v31  ;;  %v11272_v31 = vld [vmem:[#allocation150_spill] sm:$0xff] }
 0x750   : > { %11264 = vst [vmem:[#allocation134_spill] sm:$0xff] %v9314_v40  ;;  %v11273_v40 = vld [vmem:[#allocation65_spill] sm:$0xff] }
 0x753   : > { %3784 = vrot.lane.b32.xlu2 %v11265_v28, %s5050_s23  ;;  %3786 = vrot.lane.b32.xlu0 %v11266_v18, %s5050_s23 }
 0x754   : > { %3788 = vrot.lane.b32.xlu1 %v11267_v35, %s5050_s23 }
 0x755   : > { %v9322_v62 = vpop.permute.xlu2 %3686 }
 0x756   : > { %11268 = vst [vmem:[#allocation143_spill] sm:$0xff] %v9322_v62  ;;  %v9324_v21 = vpop.permute.xlu1 %3672  ;;  %v9326_v39 = vpop.permute.xlu0 %3670  ;;  %v11275_v62 = vld [vmem:[#allocation88_spill] sm:$0xff] }
 0x757   : > { %11269 = vst [vmem:[#allocation168_spill] sm:$0xff] %v9324_v21  ;;  %v11276_v21 = vld [vmem:[#allocation96_spill] sm:$0xff] }
 0x758   : > { %11270 = vst [vmem:[#allocation174_spill] sm:$0xff] %v9326_v39  ;;  %v11277_v39 = vld [vmem:[#allocation10_spill] sm:$0xff] }
 0x75b   : > { %3790 = vrot.lane.b32.xlu2 %v11271_v51, %s5050_s23  ;;  %3792 = vrot.lane.b32.xlu0 %v11272_v31, %s5050_s23 }
 0x75c   : > { %3794 = vrot.lane.b32.xlu1 %v11273_v40, %s5050_s23 }
 0x75d   : > { %v9334_v24 = vpop.permute.xlu2 %3692 }
 0x75e   : > { %v9336_v25 = vpop.permute.xlu1 %3678  ;;  %v9338_v30 = vpop.permute.xlu0 %3676 }
 0x75f   : > { %11274 = vst [vmem:[#allocation24_spill] sm:$0xff] %v9338_v30  ;;  %v9356_v30 = vld [vmem:[#allocation3 + $0x190] sm:$0x3] }
 0x760   : > { %11281 = vst [vmem:[#allocation52_spill] sm:$0xff] %v9356_v30 }
 0x763   : > { %3796 = vrot.lane.b32.xlu2 %v11275_v62, %s5050_s23  ;;  %3798 = vrot.lane.b32.xlu0 %v11276_v21, %s5050_s23 }
 0x764   : > { %3800 = vrot.lane.b32.xlu1 %v11277_v39, %s5050_s23  ;;  %v3438_v39 = vrot.slane %v9232_v48, 1 }
 0x765   : > { %v9346_v49 = vpop.permute.xlu2 %3698 }
 0x766   : > { %v9348_v36 = vpop.permute.xlu1 %3684  ;;  %v9350_v53 = vpop.permute.xlu0 %3682 }
 0x767   : > { %11278 = vst [vmem:[#allocation181_spill] sm:$0xff] %v9348_v36 }
 0x768   : > { %11279 = vst [vmem:[#allocation47_spill] sm:$0xff] %v9350_v53  ;;  %v3440_v53 = vrot.slane %v9356_v30, 1 }
 0x76a   : > { %v9370_v9 = vsel %vm1665_vm4, %v3438_v39, %v3440_v53  ;;  %v11291_v53 = vld [vmem:[#allocation144_spill] sm:$0xff] }
 0x76b   : > { %3802 = vrot.lane.b32.xlu2 %v11280_v61, %s5050_s23  ;;  %3804 = vrot.lane.b32.xlu0 %v8854_v5, %s5050_s23  ;;  %v3437_v61 = vrot.slane %v9228_v3, 1  ;;  %11285 = vst [vmem:[#allocation77_spill] sm:$0xff] %v9370_v9  ;;  %v11296_v3 = vld [vmem:[#allocation148_spill] sm:$0xff] }
 0x76c   : > { %3806 = vrot.lane.b32.xlu1 %v11282_v4, %s5050_s23 }
 0x76d   : > { %v9360_v21 = vpop.permute.xlu2 %3704  ;;  %v9373_v5 = vsel %vm1665_vm4, %v3437_v61, %v3438_v39 }
 0x76e   : > { %11283 = vst [vmem:[#allocation60_spill] sm:$0xff] %v9360_v21  ;;  %v9363_v42 = vpop.permute.xlu1 %3690  ;;  %v9365_v36 = vpop.permute.xlu0 %3688 }
 0x76f   : > { %11284 = vst [vmem:[#allocation161_spill] sm:$0xff] %v9365_v36 }
 0x770   : > { %11286 = vst [vmem:[#allocation93_spill] sm:$0xff] %v9373_v5 }
 0x773   : > { %3810 = vrot.lane.b32.xlu0 %v9370_v9, %s5050_s23  ;;  %3808 = vrot.lane.b32.xlu2 %v9373_v5, %s5050_s23  ;;  %s5059_s23 = smov 28  }
 0x774   : > { %3844 = vrot.lane.b32.xlu1 %v8870_v16, %s5058_s22 }
 0x775   : > { %v9381_v21 = vpop.permute.xlu2 %3710 }
 0x776   : > { %11287 = vst [vmem:[#allocation105_spill] sm:$0xff] %v9381_v21  ;;  %v9383_v30 = vpop.permute.xlu1 %3696  ;;  %v9385_v48 = vpop.permute.xlu0 %3694  ;;  %v11292_v21 = vld [vmem:[#allocation23_spill] sm:$0xff] }
 0x77b   : > { %3848 = vrot.lane.b32.xlu0 %v8888_v8, %s5058_s22  ;;  %3846 = vrot.lane.b32.xlu2 %v8876_v6, %s5058_s22 }
 0x77c   : > { %3850 = vrot.lane.b32.xlu1 %v8891_v1, %s5058_s22 }
 0x77d   : > { %v9393_v39 = vpop.permute.xlu2 %3748 }
 0x77e   : > { %11288 = vst [vmem:[#allocation11_spill] sm:$0xff] %v9393_v39  ;;  %v9395_v61 = vpop.permute.xlu1 %3702  ;;  %v9397_v16 = vpop.permute.xlu0 %3700 }
 0x77f   : > { %11289 = vst [vmem:[#allocation28_spill] sm:$0xff] %v9395_v61  ;;  %v11297_v61 = vld [vmem:[#allocation131_spill] sm:$0xff] }
 0x780   : > { %11290 = vst [vmem:[#allocation137_spill] sm:$0xff] %v9397_v16 }
 0x783   : > { %3854 = vrot.lane.b32.xlu0 %v8909_v52, %s5058_s22  ;;  %3852 = vrot.lane.b32.xlu2 %v11291_v53, %s5058_s22 }
 0x784   : > { %3856 = vrot.lane.b32.xlu1 %v11292_v21, %s5058_s22 }
 0x785   : > { %v9405_v9 = vpop.permute.xlu2 %3754 }
 0x786   : > { %11293 = vst [vmem:[#allocation152_spill] sm:$0xff] %v9405_v9  ;;  %v9407_v6 = vpop.permute.xlu1 %3708  ;;  %v9409_v5 = vpop.permute.xlu0 %3706 }
 0x787   : > { %11294 = vst [vmem:[#allocation166_spill] sm:$0xff] %v9407_v6  ;;  %v11301_v6 = vld [vmem:[#allocation67_spill] sm:$0xff] }
 0x788   : > { %11295 = vst [vmem:[#allocation171_spill] sm:$0xff] %v9409_v5 }
 0x78b   : > { %3860 = vrot.lane.b32.xlu0 %v11296_v3, %s5058_s22  ;;  %3858 = vrot.lane.b32.xlu2 %v11297_v61, %s5058_s22 }
 0x78c   : > { %3862 = vrot.lane.b32.xlu1 %v8934_v41, %s5058_s22 }
 0x78d   : > { %v9417_v16 = vpop.permute.xlu2 %3760 }
 0x78e   : > { %11298 = vst [vmem:[#allocation27_spill] sm:$0xff] %v9417_v16  ;;  %v9419_v4 = vpop.permute.xlu1 %3714  ;;  %v9421_v39 = vpop.permute.xlu0 %3712  ;;  %v11305_v16 = vld [vmem:[#allocation103_spill] sm:$0xff] }
 0x78f   : > { %11299 = vst [vmem:[#allocation38_spill] sm:$0xff] %v9419_v4  ;;  %v11306_v4 = vld [vmem:[#allocation39_spill] sm:$0xff] }
 0x790   : > { %11300 = vst [vmem:[#allocation46_spill] sm:$0xff] %v9421_v39  ;;  %v11307_v39 = vld [vmem:[#allocation14_spill] sm:$0xff] }
 0x793   : > { %3866 = vrot.lane.b32.xlu0 %v8956_v10, %s5058_s22  ;;  %3864 = vrot.lane.b32.xlu2 %v8939_v46, %s5058_s22 }
 0x794   : > { %3868 = vrot.lane.b32.xlu1 %v11301_v6, %s5058_s22 }
 0x795   : > { %v9429_v5 = vpop.permute.xlu2 %3766 }
 0x796   : > { %11302 = vst [vmem:[#allocation63_spill] sm:$0xff] %v9429_v5  ;;  %v9431_v9 = vpop.permute.xlu1 %3752  ;;  %v9433_v41 = vpop.permute.xlu0 %3750 }
 0x797   : > { %11303 = vst [vmem:[#allocation83_spill] sm:$0xff] %v9431_v9 }
 0x798   : > { %11304 = vst [vmem:[#allocation64_spill] sm:$0xff] %v9433_v41 }
 0x79b   : > { %3872 = vrot.lane.b32.xlu0 %v11305_v16, %s5058_s22  ;;  %3870 = vrot.lane.b32.xlu2 %v11306_v4, %s5058_s22 }
 0x79c   : > { %3874 = vrot.lane.b32.xlu1 %v11307_v39, %s5058_s22 }
 0x79d   : > { %v9441_v10 = vpop.permute.xlu2 %3772 }
 0x79e   : > { %11308 = vst [vmem:[#allocation164_spill] sm:$0xff] %v9441_v10  ;;  %v9443_v46 = vpop.permute.xlu1 %3758  ;;  %v9445_v6 = vpop.permute.xlu0 %3756  ;;  %v11313_v10 = vld [vmem:[#allocation49_spill] sm:$0xff] }
 0x79f   : > { %11309 = vst [vmem:[#allocation79_spill] sm:$0xff] %v9443_v46  ;;  %v11314_v46 = vld [vmem:[#allocation99_spill] sm:$0xff] }
 0x7a0   : > { %11310 = vst [vmem:[#allocation98_spill] sm:$0xff] %v9445_v6  ;;  %v11315_v6 = vld [vmem:[#allocation21_spill] sm:$0xff] }
 0x7a3   : > { %3878 = vrot.lane.b32.xlu0 %v9007_v56, %s5058_s22  ;;  %3876 = vrot.lane.b32.xlu2 %v8990_v63, %s5058_s22 }
 0x7a4   : > { %3880 = vrot.lane.b32.xlu1 %v9010_v0, %s5058_s22 }
 0x7a5   : > { %v9453_v5 = vpop.permute.xlu2 %3778 }
 0x7a6   : > { %v9455_v16 = vpop.permute.xlu1 %3764  ;;  %v9457_v4 = vpop.permute.xlu0 %3762 }
 0x7a7   : > { %11311 = vst [vmem:[#allocation109_spill] sm:$0xff] %v9455_v16 }
 0x7a8   : > { %11312 = vst [vmem:[#allocation8_spill] sm:$0xff] %v9457_v4 }
 0x7ab   : > { %3882 = vrot.lane.b32.xlu2 %v11313_v10, %s5058_s22  ;;  %3884 = vrot.lane.b32.xlu0 %v11314_v46, %s5058_s22 }
 0x7ac   : > { %3886 = vrot.lane.b32.xlu1 %v11315_v6, %s5058_s22 }
 0x7ad   : > { %v9465_v9 = vpop.permute.xlu2 %3784 }
 0x7ae   : > { %v9467_v41 = vpop.permute.xlu1 %3770  ;;  %v9469_v3 = vpop.permute.xlu0 %3768 }
 0x7af   : > { %11316 = vst [vmem:[#allocation122_spill] sm:$0xff] %v9467_v41 }
 0x7b0   : > { %11317 = vst [vmem:[#allocation139_spill] sm:$0xff] %v9469_v3 }
 0x7b3   : > { %3888 = vrot.lane.b32.xlu2 %v9041_v15, %s5058_s22  ;;  %3890 = vrot.lane.b32.xlu0 %v9058_v29, %s5058_s22 }
 0x7b4   : > { %3966 = vrot.lane.b32.xlu1 %v8701_v14, %s5051_s24 }
 0x7b5   : > { %v9477_v16 = vpop.permute.xlu2 %3790 }
 0x7b6   : > { %v9479_v4 = vpop.permute.xlu1 %3776  ;;  %v9481_v36 = vpop.permute.xlu0 %3774 }
 0x7bb   : > { %4062 = vrot.lane.b32.xlu2 %v11259_v22, %s5059_s23  ;;  %4158 = vrot.lane.b32.xlu0 %v11307_v39, %s5052_s25 }
 0x7bc   : > { %3968 = vrot.lane.b32.xlu1 %v8727_v23, %s5051_s24 }
 0x7bd   : > { %v9489_v41 = vpop.permute.xlu2 %3796 }
 0x7be   : > { %11318 = vst [vmem:[#allocation157_spill] sm:$0xff] %v9489_v41  ;;  %v9491_v3 = vpop.permute.xlu1 %3782  ;;  %v9493_v14 = vpop.permute.xlu0 %3780 }
 0x7c3   : > { %4064 = vrot.lane.b32.xlu2 %v11260_v20, %s5059_s23  ;;  %4160 = vrot.lane.b32.xlu0 %v8990_v63, %s5052_s25 }
 0x7c4   : > { %3970 = vrot.lane.b32.xlu1 %v8729_v2, %s5051_s24 }
 0x7c5   : > { %v9501_v22 = vpop.permute.xlu2 %3802 }
 0x7c6   : > { %11319 = vst [vmem:[#allocation169_spill] sm:$0xff] %v9501_v22  ;;  %v9503_v39 = vpop.permute.xlu1 %3788  ;;  %v3787_v23 = vpop.permute.xlu0 %3786 }
 0x7cb   : > { %4066 = vrot.lane.b32.xlu2 %v11261_v34, %s5059_s23  ;;  %4162 = vrot.lane.b32.xlu0 %v9007_v56, %s5052_s25 }
 0x7cc   : > { %3972 = vrot.lane.b32.xlu1 %v8725_v17, %s5051_s24 }
 0x7cd   : > { %v9511_v20 = vpop.permute.xlu2 %3808 }
 0x7ce   : > { %11320 = vst [vmem:[#allocation175_spill] sm:$0xff] %v9511_v20  ;;  %v9513_v63 = vpop.permute.xlu1 %3794  ;;  %v9515_v41 = vpop.permute.xlu0 %3792  ;;  %v9545_v20 = vld [vmem:[#allocation3 + $0x30] sm:$0xff] }
 0x7d3   : > { %4068 = vrot.lane.b32.xlu2 %v11265_v28, %s5059_s23  ;;  %4164 = vrot.lane.b32.xlu0 %v9010_v0, %s5052_s25 }
 0x7d4   : > { %3974 = vrot.lane.b32.xlu1 %v8720_v19, %s5051_s24 }
 0x7d5   : > { %v9523_v34 = vpop.permute.xlu2 %3846 }
 0x7d6   : > { %v9525_v56 = vpop.permute.xlu1 %3800  ;;  %v9527_v17 = vpop.permute.xlu0 %3798 }
 0x7d7   : > { %11321 = vst [vmem:[#allocation180_spill] sm:$0xff] %v9525_v56  ;;  %v4247_v56 = vsel %vm372_vm2, %v8729_v2, %v9102_v47 }
 0x7db   : > { %4070 = vrot.lane.b32.xlu2 %v11266_v18, %s5059_s23  ;;  %4166 = vrot.lane.b32.xlu0 %v11313_v10, %s5052_s25 }
 0x7dc   : > { %3976 = vrot.lane.b32.xlu1 %v8758_v32, %s5051_s24 }
 0x7dd   : > { %v9535_v28 = vpop.permute.xlu2 %3852 }
 0x7de   : > { %v9537_v0 = vpop.permute.xlu1 %3806  ;;  %v9539_v19 = vpop.permute.xlu0 %3804 }
 0x7df   : > { %11322 = vst [vmem:[#allocation13_spill] sm:$0xff] %v9537_v0 }
 0x7e0   : > { %11323 = vst [vmem:[#allocation62_spill] sm:$0xff] %v9539_v19 }
 0x7e3   : > { %4072 = vrot.lane.b32.xlu2 %v11267_v35, %s5059_s23  ;;  %4168 = vrot.lane.b32.xlu0 %v11314_v46, %s5052_s25 }
 0x7e4   : > { %3940 = vrot.lane.b32.xlu1 %v9545_v20, %s5051_s24 }
 0x7e5   : > { %v9549_v10 = vpop.permute.xlu2 %3858 }
 0x7e6   : > { %11324 = vst [vmem:[#allocation185_spill] sm:$0xff] %v9549_v10  ;;  %v9551_v18 = vpop.permute.xlu1 %3844  ;;  %v9553_v22 = vpop.permute.xlu0 %3810  ;;  %v4279_v10 = vsel %vm326_vm0, %v4247_v56, %v9198_v58  ;;  %v4250_v56 = vsel %vm372_vm2, %v8758_v32, %v9118_v60  ;;  %v4488_v32 = vld [vmem:[%s10396_s6 + $0x8] sm:$0xff] }
 0x7e7   : > { %11325 = vst [vmem:[#allocation55_spill] sm:$0xff] %v9553_v22  ;;  %v9571_v22 = vld [vmem:[#allocation3 + $0x38] sm:$0xff] }
 0x7eb   : > { %4036 = vrot.lane.b32.xlu2 %v8553_v12, %s5059_s23  ;;  %3978 = vrot.lane.b32.xlu0 %v8752_v55, %s5051_s24 }
 0x7ec   : > { %4132 = vrot.lane.b32.xlu1 %v8888_v8, %s5052_s25 }
 0x7ed   : > { %v9561_v46 = vpop.permute.xlu2 %3864 }
 0x7ee   : > { %11326 = vst [vmem:[#allocation75_spill] sm:$0xff] %v9561_v46  ;;  %v9563_v35 = vpop.permute.xlu1 %3850  ;;  %v9565_v0 = vpop.permute.xlu0 %3848 }
 0x7f3   : > { %4074 = vrot.lane.b32.xlu2 %v11271_v51, %s5059_s23  ;;  %4170 = vrot.lane.b32.xlu0 %v11315_v6, %s5052_s25 }
 0x7f4   : > { %3942 = vrot.lane.b32.xlu1 %v9571_v22, %s5051_s24 }
 0x7f5   : > { %v9575_v12 = vpop.permute.xlu2 %3870 }
 0x7f6   : > { %v9577_v8 = vpop.permute.xlu1 %3856  ;;  %v9579_v46 = vpop.permute.xlu0 %3854 }
 0x7fb   : > { %4038 = vrot.lane.b32.xlu2 %v8550_v43, %s5059_s23  ;;  %3980 = vrot.lane.b32.xlu0 %v8787_v54, %s5051_s24  ;;  %v4312_v43 = vsel %vm4292_vm3, %v4279_v10, %v9363_v42  ;;  %v9604_v54 = vld [vmem:[#allocation3 + $0x48] sm:$0xff]  ;;  %v4490_v42 = vld [vmem:[%s10396_s6 + $0x18] sm:$0xff]  ;;  %v4282_v10 = vsel %vm326_vm0, %v4250_v56, %v9210_v27  ;;  %v5013_v56 = vld [vmem:[#allocation3 + $0xf0] sm:$0xff] }
 0x7fc   : > { %4134 = vrot.lane.b32.xlu1 %v8891_v1, %s5052_s25  ;;  %v4344_v2 = vsel %vm2653_vm8, %v4312_v43, %v3787_v23  ;;  %v4489_v23 = vld [vmem:[%s10396_s6 + $0x10] sm:$0xff]  ;;  %v4315_v43 = vsel %vm4292_vm3, %v4282_v10, %v9383_v30 }
 0x7fd   : > { %v9587_v51 = vpop.permute.xlu2 %3876  ;;  %v4347_v60 = vsel %vm2653_vm8, %v4315_v43, %v9515_v41  ;;  %v9657_v41 = vld [vmem:[#allocation3 + $0x50] sm:$0xff] }
 0x7fe   : > { %v9589_v6 = vpop.permute.xlu1 %3862  ;;  %v9591_v19 = vpop.permute.xlu0 %3860 }
 0x803   : > { %4076 = vrot.lane.b32.xlu2 %v11272_v31, %s5059_s23  ;;  %4172 = vrot.lane.b32.xlu0 %v9041_v15, %s5052_s25  ;;  %v4491_v15 = vld [vmem:[%s10396_s6 + $0x20] sm:$0xf] }
 0x804   : > { %3944 = vrot.lane.b32.xlu1 %v9604_v54, %s5051_s24  ;;  %4940 = vmatpush.msk.msra.mxu2 %vm4593_vm10, %v4491_v15 }
 0x805   : > { %v3883_v1 = vpop.permute.xlu2 %3882  ;;  %4892 = vmatpush.msk.msrb.mxu0 %vm4593_vm10, %v4491_v15  ;;  %4941 = vmatpush.msk.msra.mxu3 %vm4593_vm10, %v4491_v15 }
 0x806   : > { %v9609_v47 = vpop.permute.xlu1 %3868  ;;  %v9612_v58 = vsel %vm4357_vm5, %v4344_v2, %v3883_v1  ;;  %v9614_v31 = vpop.permute.xlu0 %3866  ;;  %4942 = vmatpush.msra.mxu2 %v4490_v42 }
 0x807   : > { %4609 = vmatpush.msrb.mxu0 %v4490_v42  ;;  %4943 = vmatpush.msra.mxu3 %v4490_v42  ;;  %v5012_v42 = vld [vmem:[#allocation3 + $0xf8] sm:$0xff] }
 0x808   : > { %4944 = vmatpush.msra.mxu2 %v4489_v23 }
 0x809   : > { %4610 = vmatpush.msrb.mxu0 %v4489_v23  ;;  %4945 = vmatpush.msra.mxu3 %v4489_v23  ;;  %v4249_v23 = vsel %vm372_vm2, %v5012_v42, %v9049_v44 }
 0x80a   : > { %4946 = vmatpush.msra.mxu2 %v4488_v32 }
 0x80b   : > { %4040 = vrot.lane.b32.xlu2 %v8576_v50, %s5059_s23  ;;  %3982 = vrot.lane.b32.xlu0 %v8779_v37, %s5051_s24 }
 0x80c   : > { %4136 = vrot.lane.b32.xlu1 %v11291_v53, %s5052_s25  ;;  %v4487_v53 = vld [vmem:[%s10396_s6] sm:$0xff]  ;;  %4611 = vmatpush.msrb.mxu0 %v4488_v32 }
 0x80d   : > { %v3889_v27 = vpop.permute.xlu2 %3888  ;;  %4948 = vmatpush.msra.mxu2 %v4487_v53  ;;  %4947 = vmatpush.msra.mxu3 %v4488_v32 }
 0x80e   : > { %v9643_v50 = vpop.permute.xlu1 %3874  ;;  %v9646_v37 = vsel %vm4357_vm5, %v4347_v60, %v3889_v27  ;;  %v9648_v30 = vpop.permute.xlu0 %3872  ;;  %4612 = vmatpush.msrb.mxu0 %v4487_v53 }
 0x80f   : > { %4949 = vmatpush.msra.mxu3 %v4487_v53  ;;  %v9708_v53 = vld [vmem:[#allocation3 + $0x98] sm:$0xff] }
 0x813   : > { %4078 = vrot.lane.b32.xlu2 %v11273_v40, %s5059_s23  ;;  %4174 = vrot.lane.b32.xlu0 %v9058_v29, %s5052_s25  ;;  %v4248_v40 = vsel %vm372_vm2, %v5013_v56, %v9100_v26  ;;  %v4281_v29 = vsel %vm326_vm0, %v4249_v23, %v9240_v13 }
 0x814   : > { %3946 = vrot.lane.b32.xlu1 %v9657_v41, %s5051_s24  ;;  %v4280_v10 = vsel %vm326_vm0, %v4248_v40, %v9242_v7  ;;  %v4314_v26 = vsel %vm4292_vm3, %v4281_v29, %v9385_v48  ;;  %v11327_v48 = vld [vmem:[#allocation142_spill] sm:$0xff] }
 0x815   : > { %v4063_v2 = vpop.permute.xlu2 %4062  ;;  %v4313_v44 = vsel %vm4292_vm3, %v4280_v10, %v9334_v24  ;;  %v4251_v24 = vsel %vm372_vm2, %v8752_v55, %v9116_v45  ;;  %v11328_v55 = vld [vmem:[#allocation133_spill] sm:$0xff] }
 0x816   : > { %v9661_v1 = vpop.permute.xlu1 %3880  ;;  %v9663_v15 = vpop.permute.xlu0 %3878 }
 0x81b   : > { %4042 = vrot.lane.b32.xlu2 %v8579_v38, %s5059_s23  ;;  %3984 = vrot.lane.b32.xlu0 %v8792_v11, %s5051_s24  ;;  %v4346_v38 = vsel %vm2653_vm8, %v4314_v26, %v9477_v16  ;;  %v4345_v11 = vsel %vm2653_vm8, %v4313_v44, %v9503_v39  ;;  %v4283_v16 = vsel %vm326_vm0, %v4251_v24, %v9254_v59  ;;  %v9702_v39 = vld [vmem:[#allocation3 + $0x60] sm:$0xff] }
 0x81c   : > { %4138 = vrot.lane.b32.xlu1 %v8909_v52, %s5052_s25  ;;  %v4316_v60 = vsel %vm4292_vm3, %v4283_v16, %v9346_v49 }
 0x81d   : > { %v4065_v43 = vpop.permute.xlu2 %4064  ;;  %v4348_v45 = vsel %vm2653_vm8, %v4316_v60, %v9513_v63  ;;  %v11329_v63 = vld [vmem:[#allocation33_spill] sm:$0xff] }
 0x81e   : > { %v3887_v13 = vpop.permute.xlu1 %3886  ;;  %v3885_v32 = vpop.permute.xlu0 %3884 }
 0x81f   : > { %v9688_v7 = vsel %vm4357_vm5, %v4346_v38, %v3887_v13  ;;  %v9691_v52 = vsel %vm4357_vm5, %v4345_v11, %v3885_v32  ;;  %v11332_v32 = vld [vmem:[#allocation113_spill] sm:$0xff] }
 0x823   : > { %4080 = vrot.lane.b32.xlu2 %v11275_v62, %s5059_s23  ;;  %4176 = vrot.lane.b32.xlu0 %v11327_v48, %s5052_s25  ;;  %v4241_v62 = vsel %vm372_vm2, %v9708_v53, %v11328_v55  ;;  %v11334_v55 = vld [vmem:[#allocation53_spill] sm:$0xff] }
 0x824   : > { %3948 = vrot.lane.b32.xlu1 %v9702_v39, %s5051_s24  ;;  %v4273_v23 = vsel %vm326_vm0, %v4241_v62, %v9174_v33  ;;  %v9754_v62 = vld [vmem:[#allocation3 + $0x68] sm:$0xff] }
 0x825   : > { %v4067_v27 = vpop.permute.xlu2 %4066  ;;  %v4306_v49 = vsel %vm4292_vm3, %v4273_v23, %v9336_v25  ;;  %v9733_v25 = vld [vmem:[#allocation3 + $0xa8] sm:$0xff] }
 0x826   : > { %v3967_v42 = vpop.permute.xlu1 %3966  ;;  %v3891_v59 = vpop.permute.xlu0 %3890  ;;  %v4338_v40 = vsel %vm2653_vm8, %v4306_v49, %v9481_v36  ;;  %v11330_v36 = vld [vmem:[#allocation17_spill] sm:$0xff] }
 0x827   : > { %v9718_v56 = vsel %vm4357_vm5, %v4348_v45, %v3891_v59  ;;  %v4371_v29 = vsel %vm4357_vm5, %v4338_v40, %v9575_v12  ;;  %v4242_v12 = vsel %vm372_vm2, %v9733_v25, %v11330_v36  ;;  %v11336_v40 = vld [vmem:[#allocation37_spill] sm:$0xff] }
 0x828   : > { %v4403_v10 = vsel %vm2686_vm7, %v4371_v29, %v3967_v42  ;;  %v9758_v42 = vld [vmem:[#allocation3 + $0xb0] sm:$0xff] }
 0x829   : > { %v4436_v38 = vsel %vm4422_vm11, %v4403_v10, %v4063_v2  ;;  %v11333_v2 = vld [vmem:[#allocation96_spill] sm:$0xff] }
 0x82b   : > { %4044 = vrot.lane.b32.xlu2 %v8606_v57, %s5059_s23  ;;  %3986 = vrot.lane.b32.xlu0 %v11329_v63, %s5051_s24  ;;  %v11331_v57 = vld [vmem:[#allocation68_spill] sm:$0xff]  ;;  %v11337_v63 = vld [vmem:[#allocation47_spill] sm:$0xff] }
 0x82c   : > { %4140 = vrot.lane.b32.xlu1 %v11292_v21, %s5052_s25  ;;  %v4274_v11 = vsel %vm326_vm0, %v4242_v12, %v11331_v57 }
 0x82d   : > { %v4069_v33 = vpop.permute.xlu2 %4068  ;;  %v4307_v21 = vsel %vm4292_vm3, %v4274_v11, %v11332_v32  ;;  %v9783_v11 = vld [vmem:[#allocation3 + $0xc0] sm:$0xff] }
 0x82e   : > { %v3969_v44 = vpop.permute.xlu1 %3968  ;;  %v4159_v26 = vpop.permute.xlu0 %4158  ;;  %v4339_v24 = vsel %vm2653_vm8, %v4307_v21, %v9479_v4  ;;  %v11335_v4 = vld [vmem:[#allocation130_spill] sm:$0xff] }
 0x82f   : > { %v4468_v13 = vsel %vm2719_vm9, %v4436_v38, %v4159_v26  ;;  %v4372_v16 = vsel %vm4357_vm5, %v4339_v24, %v9648_v30  ;;  %v4243_v30 = vsel %vm372_vm2, %v9758_v42, %v11335_v4  ;;  %v9779_v38 = vld [vmem:[#allocation3 + $0x150] sm:$0xff] }
 0x830   : > { %4906 = vmatmul.msk.f32.vlgmr.msra.gmra.mxu2 %vm4496_vm12, %v4468_v13  ;;  %v4404_v60 = vsel %vm2686_vm7, %v4372_v16, %v3969_v44  ;;  %v4275_v29 = vsel %vm326_vm0, %v4243_v30, %v11336_v40  ;;  %v5021_v40 = vld [vmem:[#allocation3 + $0xc8] sm:$0xff] }
 0x831   : > { %v4437_v49 = vsel %vm4422_vm11, %v4404_v60, %v4065_v43  ;;  %v4308_v36 = vsel %vm4292_vm3, %v4275_v29, %v11337_v63  ;;  %v11338_v43 = vld [vmem:[#allocation110_spill] sm:$0xff]  ;;  %v11341_v60 = vld [vmem:[#allocation181_spill] sm:$0xff] }
 0x832   : > { %v4340_v12 = vsel %vm2653_vm8, %v4308_v36, %v9453_v5  ;;  %v11339_v5 = vld [vmem:[#allocation92_spill] sm:$0xff]  ;;  %v11344_v29 = vld [vmem:[#allocation154_spill] sm:$0xff] }
 0x833   : > { %4082 = vrot.lane.b32.xlu2 %v11333_v2, %s5059_s23  ;;  %4178 = vrot.lane.b32.xlu0 %v11334_v55, %s5052_s25  ;;  %v4373_v44 = vsel %vm4357_vm5, %v4340_v12, %v9643_v50  ;;  %v4244_v50 = vsel %vm372_vm2, %v9783_v11, %v11339_v5  ;;  %v11345_v36 = vld [vmem:[#allocation76_spill] sm:$0xff] }
 0x834   : > { %3950 = vrot.lane.b32.xlu1 %v9754_v62, %s5051_s24 }
 0x835   : > { %v4071_v45 = vpop.permute.xlu2 %4070 }
 0x836   : > { %v3971_v59 = vpop.permute.xlu1 %3970  ;;  %v4161_v23 = vpop.permute.xlu0 %4160 }
 0x837   : > { %v4469_v10 = vsel %vm2719_vm9, %v4437_v49, %v4161_v23  ;;  %v4405_v26 = vsel %vm2686_vm7, %v4373_v44, %v3971_v59  ;;  %v11343_v23 = vld [vmem:[#allocation104_spill] sm:$0xff]  ;;  %v11346_v44 = vld [vmem:[#allocation143_spill] sm:$0xff] }
 0x838   : > { %4907 = vmatmul.msk.f32.gmra.mxu2 %vm4496_vm12, %v4469_v10  ;;  %v4438_v21 = vsel %vm4422_vm11, %v4405_v26, %v4067_v27  ;;  %v11342_v27 = vld [vmem:[#allocation10_spill] sm:$0xff]  ;;  %v4245_v10 = vsel %vm372_vm2, %v5021_v40, %v11344_v29  ;;  %v9842_v29 = vld [vmem:[#allocation3 + $0x158] sm:$0xff] }
 0x839   : > { %v4277_v12 = vsel %vm326_vm0, %v4245_v10, %v11345_v36  ;;  %v11352_v10 = vld [vmem:[#allocation117_spill] sm:$0xff] }
 0x83a   : > { %v4310_v26 = vsel %vm4292_vm3, %v4277_v12, %v11346_v44 }
 0x83b   : > { %3892 = vrot.lane.b32.xlu2 %v11327_v48, %s5058_s22  ;;  %4046 = vrot.lane.b32.xlu0 %v11338_v43, %s5059_s23  ;;  %v11340_v48 = vld [vmem:[#allocation4_spill] sm:$0xff]  ;;  %v4342_v43 = vsel %vm2653_vm8, %v4310_v26, %v9491_v3 }
 0x83c   : > { %3988 = vrot.lane.b32.xlu1 %v9779_v38, %s5051_s24  ;;  %v4276_v24 = vsel %vm326_vm0, %v4244_v50, %v11340_v48  ;;  %v4375_v5 = vsel %vm4357_vm5, %v4342_v43, %v9663_v15  ;;  %v11348_v48 = vld [vmem:[#allocation70_spill] sm:$0xff]  ;;  %v11355_v43 = vld [vmem:[#allocation165_spill] sm:$0xff] }
 0x83d   : > { %v4073_v57 = vpop.permute.xlu2 %4072  ;;  %v4309_v2 = vsel %vm4292_vm3, %v4276_v24, %v11341_v60  ;;  %v11349_v60 = vld [vmem:[#allocation160_spill] sm:$0xff] }
 0x83e   : > { %v3973_v13 = vpop.permute.xlu1 %3972  ;;  %v4163_v32 = vpop.permute.xlu0 %4162  ;;  %v4341_v4 = vsel %vm2653_vm8, %v4309_v2, %v9493_v14 }
 0x83f   : > { %v4470_v16 = vsel %vm2719_vm9, %v4438_v21, %v4163_v32  ;;  %v4374_v30 = vsel %vm4357_vm5, %v4341_v4, %v9587_v51  ;;  %v5023_v21 = vld [vmem:[#allocation3 + $0xd8] sm:$0xff] }
 0x840   : > { %4908 = vmatmul.msk.f32.gmra.mxu2 %vm4496_vm12, %v4470_v16  ;;  %v4406_v59 = vsel %vm2686_vm7, %v4374_v30, %v3973_v13  ;;  %v9820_v13 = vld [vmem:[#allocation3 + $0x78] sm:$0xff]  ;;  %v4246_v3 = vsel %vm372_vm2, %v5023_v21, %v11348_v48 }
 0x841   : > { %v4439_v51 = vsel %vm4422_vm11, %v4406_v59, %v4069_v33  ;;  %v11347_v33 = vld [vmem:[#allocation30_spill] sm:$0xff]  ;;  %v4278_v2 = vsel %vm326_vm0, %v4246_v3, %v11349_v60  ;;  %v11350_v30 = vld [vmem:[#allocation161_spill] sm:$0xff] }
 0x842   : > { %v9866_v3 = vld [vmem:[#allocation3 + $0x80] sm:$0xff] }
 0x843   : > { %4142 = vrot.lane.b32.xlu2 %v11297_v61, %s5052_s25  ;;  %4084 = vrot.lane.b32.xlu0 %v11342_v27, %s5059_s23 }
 0x844   : > { %4180 = vrot.lane.b32.xlu1 %v11343_v23, %s5052_s25 }
 0x845   : > { %v4037_v49 = vpop.permute.xlu2 %4036 }
 0x846   : > { %v3975_v14 = vpop.permute.xlu1 %3974  ;;  %v4165_v63 = vpop.permute.xlu0 %4164 }
 0x847   : > { %v4471_v61 = vsel %vm2719_vm9, %v4439_v51, %v4165_v63  ;;  %v4407_v50 = vsel %vm2686_vm7, %v4375_v5, %v3975_v14  ;;  %v5025_v63 = vld [vmem:[#allocation3] sm:$0xff] }
 0x848   : > { %4909 = vmatmul.msk.f32.gmra.mxu2 %vm4496_vm12, %v4471_v61  ;;  %v4440_v16 = vsel %vm4422_vm11, %v4407_v50, %v4071_v45  ;;  %v11351_v45 = vld [vmem:[#allocation148_spill] sm:$0xff]  ;;  %v11353_v51 = vld [vmem:[#allocation42_spill] sm:$0xff]  ;;  %v11354_v61 = vld [vmem:[#allocation141_spill] sm:$0xff] }
 0x849   : > { %v11356_v50 = vld [vmem:[#allocation11_spill] sm:$0xff] }
 0x84b   : > { %3952 = vrot.lane.b32.xlu2 %v9820_v13, %s5051_s24  ;;  %3894 = vrot.lane.b32.xlu0 %v11334_v55, %s5058_s22  ;;  %v4311_v55 = vsel %vm4292_vm3, %v4278_v2, %v11350_v30  ;;  %v9879_v30 = vld [vmem:[#allocation3 + $0x168] sm:$0xff] }
 0x84c   : > { %4048 = vrot.lane.b32.xlu1 %v11347_v33, %s5059_s23  ;;  %v4343_v59 = vsel %vm2653_vm8, %v4311_v55, %v9465_v9  ;;  %v4228_v9 = vsel %vm372_vm2, %v5025_v63, %v11353_v51  ;;  %v5028_v55 = vld [vmem:[#allocation3 + $0x8] sm:$0xff] }
 0x84d   : > { %v4075_v32 = vpop.permute.xlu2 %4074  ;;  %v4376_v27 = vsel %vm4357_vm5, %v4343_v59, %v9661_v1  ;;  %v4260_v44 = vsel %vm326_vm0, %v4228_v9, %v11354_v61  ;;  %v11360_v59 = vld [vmem:[#allocation101_spill] sm:$0xff]  ;;  %v11362_v9 = vld [vmem:[#allocation50_spill] sm:$0xff] }
 0x84e   : > { %v3977_v24 = vpop.permute.xlu1 %3976  ;;  %v4167_v15 = vpop.permute.xlu0 %4166  ;;  %v4293_v5 = vsel %vm4292_vm3, %v4260_v44, %v11355_v43  ;;  %v9903_v43 = vld [vmem:[#allocation3 + $0x90] sm:$0xff] }
 0x84f   : > { %v4472_v4 = vsel %vm2719_vm9, %v4440_v16, %v4167_v15  ;;  %v4408_v40 = vsel %vm2686_vm7, %v4376_v27, %v3977_v24  ;;  %v4325_v33 = vsel %vm2653_vm8, %v4293_v5, %v11356_v50  ;;  %v4229_v27 = vsel %vm372_vm2, %v5028_v55, %v11360_v59  ;;  %v11368_v55 = vld [vmem:[#allocation90_spill] sm:$0xff] }
 0x850   : > { %4910 = vmatmul.msk.f32.gmra.mxu2 %vm4496_vm12, %v4472_v4  ;;  %v4441_v12 = vsel %vm4422_vm11, %v4408_v40, %v4073_v57  ;;  %v4358_v21 = vsel %vm4357_vm5, %v4325_v33, %v9551_v18  ;;  %v11357_v57 = vld [vmem:[#allocation19_spill] sm:$0xff]  ;;  %v11358_v4 = vld [vmem:[#allocation34_spill] sm:$0xff] }
 0x853   : > { %3990 = vrot.lane.b32.xlu2 %v9842_v29, %s5051_s24  ;;  %4144 = vrot.lane.b32.xlu0 %v11351_v45, %s5052_s25 }
 0x854   : > { %4086 = vrot.lane.b32.xlu1 %v11352_v10, %s5059_s23  ;;  %v11361_v10 = vld [vmem:[#allocation162_spill] sm:$0xff] }
 0x855   : > { %v4039_v14 = vpop.permute.xlu2 %4038  ;;  %v4261_v63 = vsel %vm326_vm0, %v4229_v27, %v11361_v10  ;;  %v11369_v27 = vld [vmem:[#allocation151_spill] sm:$0xff] }
 0x856   : > { %v3941_v36 = vpop.permute.xlu1 %3940  ;;  %v4169_v1 = vpop.permute.xlu0 %4168 }
 0x857   : > { %v4473_v26 = vsel %vm2719_vm9, %v4441_v12, %v4169_v1  ;;  %v4390_v48 = vsel %vm2686_vm7, %v4358_v21, %v3941_v36  ;;  %v4294_v36 = vsel %vm4292_vm3, %v4261_v63, %v11362_v9  ;;  %v11363_v1 = vld [vmem:[#allocation64_spill] sm:$0xff]  ;;  %v11373_v9 = vld [vmem:[#allocation145_spill] sm:$0xff] }
 0x858   : > { %4911 = vmatmul.msk.f32.gmra.mxu2 %vm4496_vm12, %v4473_v26  ;;  %v4423_v16 = vsel %vm4422_vm11, %v4390_v48, %v4037_v49  ;;  %v4326_v12 = vsel %vm2653_vm8, %v4294_v36, %v11363_v1  ;;  %v11365_v26 = vld [vmem:[#allocation116_spill] sm:$0xff] }
 0x859   : > { %v4359_v61 = vsel %vm4357_vm5, %v4326_v12, %v9523_v34 }
 0x85b   : > { %4182 = vrot.lane.b32.xlu2 %v11357_v57, %s5052_s25  ;;  %3954 = vrot.lane.b32.xlu0 %v9866_v3, %s5051_s24 }
 0x85c   : > { %3896 = vrot.lane.b32.xlu1 %v11343_v23, %s5058_s22  ;;  %v11359_v23 = vld [vmem:[#allocation69_spill] sm:$0xff] }
 0x85d   : > { %v4077_v24 = vpop.permute.xlu2 %4076 }
 0x85e   : > { %v4133_v15 = vpop.permute.xlu1 %4132  ;;  %v3979_v60 = vpop.permute.xlu0 %3978 }
 0x85f   : > { %v4455_v18 = vsel %vm2719_vm9, %v4423_v16, %v4133_v15  ;;  %v4409_v2 = vsel %vm2686_vm7, %v9612_v58, %v3979_v60  ;;  %v11366_v15 = vld [vmem:[#allocation85_spill] sm:$0xff]  ;;  %v9916_v16 = vld [vmem:[#allocation3 + $0x170] sm:$0xff] }
 0x860   : > { %4893 = vmatmul.msk.f32.vlgmr.msrb.gmra.mxu0 %vm4496_vm12, %v4455_v18  ;;  %v4442_v58 = vsel %vm4422_vm11, %v4409_v2, %v4075_v32  ;;  %v11364_v32 = vld [vmem:[#allocation128_spill] sm:$0xff] }
 0x861   : > { %v11367_v18 = vld [vmem:[#allocation20_spill] sm:$0xff] }
 0x863   : > { %4050 = vrot.lane.b32.xlu2 %v11358_v4, %s5059_s23  ;;  %3992 = vrot.lane.b32.xlu0 %v9879_v30, %s5051_s24 }
 0x864   : > { %4146 = vrot.lane.b32.xlu1 %v11359_v23, %s5052_s25 }
 0x865   : > { %v4041_v49 = vpop.permute.xlu2 %4040 }
 0x866   : > { %v3943_v40 = vpop.permute.xlu1 %3942  ;;  %v4171_v45 = vpop.permute.xlu0 %4170 }
 0x867   : > { %v4474_v51 = vsel %vm2719_vm9, %v4442_v58, %v4171_v45  ;;  %v4391_v44 = vsel %vm2686_vm7, %v4359_v61, %v3943_v40  ;;  %v11370_v45 = vld [vmem:[#allocation83_spill] sm:$0xff] }
 0x868   : > { %4912 = vmatmul.msk.f32.gmra.mxu2 %vm4496_vm12, %v4474_v51  ;;  %v4424_v21 = vsel %vm4422_vm11, %v4391_v44, %v4039_v14  ;;  %v5031_v14 = vld [vmem:[#allocation3 + $0x18] sm:$0xff]  ;;  %v11372_v51 = vld [vmem:[#allocation140_spill] sm:$0xff] }
 0x869   : > { %v4230_v2 = vsel %vm372_vm2, %v5031_v14, %v11367_v18  ;;  %v11376_v14 = vld [vmem:[#allocation74_spill] sm:$0xff] }
 0x86a   : > { %v11377_v18 = vld [vmem:[#allocation22_spill] sm:$0xff] }
 0x86b   : > { %4088 = vrot.lane.b32.xlu2 %v11364_v32, %s5059_s23  ;;  %4184 = vrot.lane.b32.xlu0 %v11365_v26, %s5052_s25  ;;  %v11374_v32 = vld [vmem:[#allocation25_spill] sm:$0xff] }
 0x86c   : > { %3956 = vrot.lane.b32.xlu1 %v9903_v43, %s5051_s24 }
 0x86d   : > { %v4079_v5 = vpop.permute.xlu2 %4078 }
 0x86e   : > { %v4135_v50 = vpop.permute.xlu1 %4134  ;;  %v3981_v33 = vpop.permute.xlu0 %3980 }
 0x86f   : > { %v4456_v34 = vsel %vm2719_vm9, %v4424_v21, %v4135_v50  ;;  %v4410_v48 = vsel %vm2686_vm7, %v9691_v52, %v3981_v33  ;;  %v5032_v33 = vld [vmem:[#allocation3 + $0x20] sm:$0xff]  ;;  %v11375_v21 = vld [vmem:[#allocation84_spill] sm:$0xff] }
 0x870   : > { %4894 = vmatmul.msk.f32.gmra.mxu0 %vm4496_vm12, %v4456_v34  ;;  %v4443_v52 = vsel %vm4422_vm11, %v4410_v48, %v4077_v24  ;;  %v11371_v24 = vld [vmem:[#allocation89_spill] sm:$0xff] }
 0x873   : > { %3898 = vrot.lane.b32.xlu2 %v11357_v57, %s5058_s22  ;;  %4052 = vrot.lane.b32.xlu0 %v11366_v15, %s5059_s23  ;;  %v4262_v57 = vsel %vm326_vm0, %v4230_v2, %v11368_v55  ;;  %v11378_v2 = vld [vmem:[#allocation152_spill] sm:$0xff]  ;;  %v11380_v55 = vld [vmem:[#allocation45_spill] sm:$0xff] }
 0x874   : > { %3994 = vrot.lane.b32.xlu1 %v9916_v16, %s5051_s24  ;;  %v4295_v40 = vsel %vm4292_vm3, %v4262_v57, %v11369_v27  ;;  %v11381_v57 = vld [vmem:[#allocation93_spill] sm:$0xff]  ;;  %v11382_v27 = vld [vmem:[#allocation107_spill] sm:$0xff] }
 0x875   : > { %v4043_v60 = vpop.permute.xlu2 %4042  ;;  %v4327_v58 = vsel %vm2653_vm8, %v4295_v40, %v11370_v45  ;;  %v3443_v40 = vrot.slane %v11382_v27, 2 }
 0x876   : > { %v3945_v4 = vpop.permute.xlu1 %3944  ;;  %v4173_v23 = vpop.permute.xlu0 %4172  ;;  %v4360_v10 = vsel %vm4357_vm5, %v4327_v58, %v9565_v0 }
 0x877   : > { %v4475_v59 = vsel %vm2719_vm9, %v4443_v52, %v4173_v23  ;;  %v4392_v63 = vsel %vm2686_vm7, %v4360_v10, %v3945_v4 }
 0x878   : > { %4913 = vmatmul.msk.f32.gmra.mxu2 %vm4496_vm12, %v4475_v59  ;;  %v4425_v61 = vsel %vm4422_vm11, %v4392_v63, %v4041_v49  ;;  %v4231_v49 = vsel %vm372_vm2, %v5032_v33, %v11375_v21  ;;  %v11385_v21 = vld [vmem:[#allocation97_spill] sm:$0xff] }
 0x87b   : > { %4148 = vrot.lane.b32.xlu2 %v11371_v24, %s5052_s25  ;;  %4090 = vrot.lane.b32.xlu0 %v11372_v51, %s5059_s23 }
 0x87c   : > { %4186 = vrot.lane.b32.xlu1 %v11373_v9, %s5052_s25 }
 0x87d   : > { %v4081_v36 = vpop.permute.xlu2 %4080 }
 0x87e   : > { %v4137_v1 = vpop.permute.xlu1 %4136  ;;  %v3983_v12 = vpop.permute.xlu0 %3982 }
 0x87f   : > { %v4457_v44 = vsel %vm2719_vm9, %v4425_v61, %v4137_v1  ;;  %v4411_v0 = vsel %vm2686_vm7, %v9688_v7, %v3983_v12  ;;  %v4263_v7 = vsel %vm326_vm0, %v4231_v49, %v11376_v14  ;;  %v11383_v1 = vld [vmem:[#allocation91_spill] sm:$0xff] }
 0x880   : > { %4895 = vmatmul.msk.f32.gmra.mxu0 %vm4496_vm12, %v4457_v44  ;;  %v4444_v15 = vsel %vm4422_vm11, %v4411_v0, %v4079_v5  ;;  %v11379_v5 = vld [vmem:[#allocation95_spill] sm:$0xff]  ;;  %v4232_v12 = vsel %vm372_vm2, %v9545_v20, %v11383_v1 }
 0x881   : > { %v3442_v63 = vrot.slane %v11379_v5, 2 }
 0x883   : > { %3958 = vrot.lane.b32.xlu2 %v9708_v53, %s5051_s24  ;;  %3900 = vrot.lane.b32.xlu0 %v11365_v26, %s5058_s22  ;;  %v4296_v26 = vsel %vm4292_vm3, %v4263_v7, %v11377_v18  ;;  %v3444_v24 = vsel %vm1746_vm6, %v3442_v63, %v3443_v40  ;;  %v11389_v18 = vld [vmem:[#allocation52_spill] sm:$0xff] }
 0x884   : > { %4054 = vrot.lane.b32.xlu1 %v11374_v32, %s5059_s23  ;;  %v4328_v4 = vsel %vm2653_vm8, %v4296_v26, %v11378_v2  ;;  %v11384_v32 = vld [vmem:[#allocation106_spill] sm:$0xff]  ;;  %v3445_v26 = vrot.slane %v11389_v18, 2 }
 0x885   : > { %v4045_v50 = vpop.permute.xlu2 %4044  ;;  %v4361_v23 = vsel %vm4357_vm5, %v4328_v4, %v9563_v35 }
 0x886   : > { %v3947_v34 = vpop.permute.xlu1 %3946  ;;  %v4175_v48 = vpop.permute.xlu0 %4174  ;;  %v3446_v2 = vsel %vm1746_vm6, %v3443_v40, %v3445_v26  ;;  %v11392_v40 = vld [vmem:[#allocation12_spill] sm:$0xff] }
 0x887   : > { %v4476_v53 = vsel %vm2719_vm9, %v4444_v15, %v4175_v48  ;;  %v4393_v52 = vsel %vm2686_vm7, %v4361_v23, %v3947_v34  ;;  %v11388_v48 = vld [vmem:[#allocation67_spill] sm:$0xff]  ;;  %v11390_v23 = vld [vmem:[#allocation77_spill] sm:$0xff] }
 0x888   : > { %4914 = vmatmul.msk.f32.gmra.mxu2 %vm4496_vm12, %v4476_v53  ;;  %v4426_v10 = vsel %vm4422_vm11, %v4393_v52, %v4043_v60 }
 0x88b   : > { %3996 = vrot.lane.b32.xlu2 %v11379_v5, %s5051_s24  ;;  %4150 = vrot.lane.b32.xlu0 %v11380_v55, %s5052_s25 }
 0x88c   : > { %4092 = vrot.lane.b32.xlu1 %v11381_v57, %s5059_s23 }
 0x88d   : > { %v4083_v59 = vpop.permute.xlu2 %4082 }
 0x88e   : > { %v4139_v45 = vpop.permute.xlu1 %4138  ;;  %v3985_v58 = vpop.permute.xlu0 %3984 }
 0x88f   : > { %v4458_v35 = vsel %vm2719_vm9, %v4426_v10, %v4139_v45  ;;  %v4412_v51 = vsel %vm2686_vm7, %v9646_v37, %v3985_v58  ;;  %v4264_v37 = vsel %vm326_vm0, %v4232_v12, %v11384_v32  ;;  %v11393_v58 = vld [vmem:[#allocation179_spill] sm:$0xff] }
 0x890   : > { %4896 = vmatmul.msk.f32.gmra.mxu0 %vm4496_vm12, %v4458_v35  ;;  %v4445_v0 = vsel %vm4422_vm11, %v4412_v51, %v4081_v36  ;;  %v11387_v36 = vld [vmem:[#allocation35_spill] sm:$0xff]  ;;  %v11395_v35 = vld [vmem:[#allocation126_spill] sm:$0xff] }
 0x891   : > { %v11394_v10 = vld [vmem:[#allocation79_spill] sm:$0xff] }
 0x893   : > { %4188 = vrot.lane.b32.xlu2 %v3444_v24, %s5052_s25  ;;  %3960 = vrot.lane.b32.xlu0 %v9733_v25, %s5051_s24  ;;  %v4297_v25 = vsel %vm4292_vm3, %v4264_v37, %v11385_v21  ;;  %v10049_v37 = vld [vmem:[%s10397_s7] ss:$0 sm:$0xff]  ;;  %v11397_v21 = vld [vmem:[#allocation56_spill] sm:$0xff] }
 0x894   : > { %3902 = vrot.lane.b32.xlu1 %v11373_v9, %s5058_s22  ;;  %v11386_v9 = vld [vmem:[#allocation98_spill] sm:$0xff] }
 0x895   : > { %v9984_v60 = vpop.permute.xlu2 %3892  ;;  %v4329_v49 = vsel %vm2653_vm8, %v4297_v25, %v11386_v9  ;;  %v3225_v9 = vld [vmem:[#allocation3 + $0x1a8] sm:$0x3] }
 0x896   : > { %v3949_v61 = vpop.permute.xlu1 %3948  ;;  %v4177_v44 = vpop.permute.xlu0 %4176  ;;  %v4362_v20 = vsel %vm4357_vm5, %v4329_v49, %v9535_v28  ;;  %v11398_v49 = vld [vmem:[#allocation137_spill] sm:$0xff]  ;;  %v3453_v18 = vrot.slane %v3225_v9, 1 }
 0x897   : > { %v4477_v33 = vsel %vm2719_vm9, %v4445_v0, %v4177_v44  ;;  %v4394_v34 = vsel %vm2686_vm7, %v4362_v20, %v3949_v61  ;;  %v11396_v44 = vld [vmem:[#allocation73_spill] sm:$0xff] }
 0x898   : > { %4915 = vmatmul.msk.f32.gmra.mxu2 %vm4496_vm12, %v4477_v33  ;;  %v4427_v53 = vsel %vm4422_vm11, %v4394_v34, %v4045_v50  ;;  %v3224_v33 = vld [vmem:[#allocation3 + $0x1a0] sm:$0xff]  ;;  %v11399_v34 = vld [vmem:[#allocation157_spill] sm:$0xff] }
 0x89b   : > { %4056 = vrot.lane.b32.xlu2 %v11387_v36, %s5059_s23  ;;  %3998 = vrot.lane.b32.xlu0 %v11382_v27, %s5051_s24  ;;  %v11391_v27 = vld [vmem:[#allocation156_spill] sm:$0xff] }
 0x89c   : > { %4152 = vrot.lane.b32.xlu1 %v11388_v48, %s5052_s25 }
 0x89d   : > { %v4143_v15 = vpop.permute.xlu2 %4142 }
 0x89e   : > { %v4141_v14 = vpop.permute.xlu1 %4140  ;;  %v3987_v7 = vpop.permute.xlu0 %3986 }
 0x89f   : > { %v4459_v28 = vsel %vm2719_vm9, %v4427_v53, %v4141_v14  ;;  %v4413_v4 = vsel %vm2686_vm7, %v9718_v56, %v3987_v7  ;;  %v4233_v56 = vsel %vm372_vm2, %v9571_v22, %v11391_v27  ;;  %v11400_v14 = vld [vmem:[#allocation39_spill] sm:$0xff]  ;;  %v3451_v53 = vrot.slane %v3224_v33, 1 }
 0x8a0   : > { %4897 = vmatmul.msk.f32.gmra.mxu0 %vm4496_vm12, %v4459_v28  ;;  %v4446_v55 = vsel %vm4422_vm11, %v4413_v4, %v4083_v59  ;;  %v4265_v45 = vsel %vm326_vm0, %v4233_v56, %v11392_v40 }
 0x8a1   : > { %v3454_v40 = vsel %vm1665_vm4, %v3451_v53, %v3453_v18 }
 0x8a3   : > { %4094 = vrot.lane.b32.xlu2 %v11390_v23, %s5059_s23  ;;  %4190 = vrot.lane.b32.xlu0 %v3446_v2, %s5052_s25 }
 0x8a4   : > { %3962 = vrot.lane.b32.xlu1 %v9758_v42, %s5051_s24  ;;  %v4298_v42 = vsel %vm4292_vm3, %v4265_v45, %v11393_v58 }
 0x8a5   : > { %v10019_v50 = vpop.permute.xlu2 %3952  ;;  %v4330_v59 = vsel %vm2653_vm8, %v4298_v42, %v11394_v10  ;;  %v3458_v42 = vrot.slane %v3225_v9, 2  ;;  %v11406_v9 = vld [vmem:[#allocation134_spill] sm:$0xff] }
 0x8a6   : > { %v3951_v52 = vpop.permute.xlu1 %3950  ;;  %v4179_v5 = vpop.permute.xlu0 %4178  ;;  %v4363_v63 = vsel %vm4357_vm5, %v4330_v59, %v9579_v46  ;;  %v3223_v46 = vld [vmem:[#allocation3 + $0x198] sm:$0xff] }
 0x8a7   : > { %v4478_v57 = vsel %vm2719_vm9, %v4446_v55, %v4179_v5  ;;  %v4395_v51 = vsel %vm2686_vm7, %v4363_v63, %v3951_v52  ;;  %v3450_v7 = vrot.slane %v3223_v46, 1  ;;  %v3455_v28 = vrot.slane %v3223_v46, 2 }
 0x8a8   : > { %4916 = vmatmul.msk.f32.gmra.mxu2 %vm4496_vm12, %v4478_v57 }
 0x8a9   : > { %v3452_v56 = vsel %vm1665_vm4, %v3450_v7, %v3451_v53  ;;  %v11408_v7 = vld [vmem:[#allocation6_spill] sm:$0xff] }
 0x8ab   : > { %3904 = vrot.lane.b32.xlu2 %v3444_v24, %s5058_s22  ;;  %3906 = vrot.lane.b32.xlu0 %v3446_v2, %s5058_s22  ;;  %v5033_v24 = vld [vmem:[#allocation3 + $0x120] sm:$0xff]  ;;  %v3456_v2 = vrot.slane %v3224_v33, 2 }
 0x8ac   : > { %4058 = vrot.lane.b32.xlu1 %v11395_v35, %s5059_s23  ;;  %v4252_v0 = vsel %vm372_vm2, %v5033_v24, %v11396_v44  ;;  %v11403_v44 = vld [vmem:[#allocation59_spill] sm:$0xff] }
 0x8ad   : > { %v10039_v22 = vpop.permute.xlu2 %3990  ;;  %v4284_v25 = vsel %vm326_vm0, %v4252_v0, %v11397_v21  ;;  %v11405_v21 = vld [vmem:[#allocation28_spill] sm:$0xff] }
 0x8ae   : > { %v3989_v1 = vpop.permute.xlu1 %3988  ;;  %v4047_v12 = vpop.permute.xlu0 %4046  ;;  %v4317_v20 = vsel %vm4292_vm3, %v4284_v25, %v11398_v49 }
 0x8af   : > { %v4428_v61 = vsel %vm4422_vm11, %v4395_v51, %v4047_v12  ;;  %v4349_v36 = vsel %vm2653_vm8, %v4317_v20, %v11399_v34  ;;  %v5034_v51 = vld [vmem:[#allocation3 + $0x128] sm:$0xff] }
 0x8b0   : > { %v4460_v32 = vsel %vm2719_vm9, %v4428_v61, %v4143_v15  ;;  %v4382_v26 = vsel %vm4357_vm5, %v4349_v36, %v9984_v60  ;;  %v3457_v60 = vsel %vm1746_vm6, %v3455_v28, %v3456_v2  ;;  %v11402_v61 = vld [vmem:[#allocation48_spill] sm:$0xff] }
 0x8b1   : > { %4898 = vmatmul.msk.f32.gmra.mxu0 %vm4496_vm12, %v4460_v32  ;;  %v4414_v23 = vsel %vm2686_vm7, %v4382_v26, %v3989_v1  ;;  %v11401_v1 = vld [vmem:[#allocation94_spill] sm:$0xff]  ;;  %v4234_v24 = vsel %vm372_vm2, %v9604_v54, %v11402_v61  ;;  %v3459_v32 = vsel %vm1746_vm6, %v3456_v2, %v3458_v42  ;;  %v11407_v54 = vld [vmem:[#allocation27_spill] sm:$0xff] }
 0x8b2   : > { %v4253_v12 = vsel %vm372_vm2, %v5034_v51, %v11401_v1 }
 0x8b3   : > { %v4653_v48 = vpop.f32.mrf.mxu2  ;;  %4000 = vrot.lane.b32.xlu2 %v3223_v46, %s5051_s24  ;;  %4002 = vrot.lane.b32.xlu0 %v3224_v33, %s5051_s24  ;;  %v4285_v0 = vsel %vm326_vm0, %v4253_v12, %v11403_v44  ;;  %v11404_v46 = vld [vmem:[#allocation102_spill] sm:$0xff] }
 0x8b4   : > { %v4654_v15 = vadd.f32 %v10049_v37, %v4653_v48  ;;  %4154 = vrot.lane.b32.xlu1 %v11400_v14, %s5052_s25  ;;  %v4266_v33 = vsel %vm326_vm0, %v4234_v24, %v11404_v46  ;;  %v4318_v25 = vsel %vm4292_vm3, %v4285_v0, %v11405_v21  ;;  %v5035_v24 = vld [vmem:[#allocation3 + $0x138] sm:$0xff]  ;;  %v11415_v44 = vld [vmem:[#allocation66_spill] sm:$0xff] }
 0x8b5   : > { %v4183_v4 = vpop.permute.xlu2 %4182  ;;  %v4299_v49 = vsel %vm4292_vm3, %v4266_v33, %v11406_v9  ;;  %v4350_v20 = vsel %vm2653_vm8, %v4318_v25, %v9527_v17  ;;  %v4254_v0 = vsel %vm372_vm2, %v5035_v24, %v11415_v44  ;;  %v11416_v25 = vld [vmem:[#allocation172_spill] sm:$0xff]  ;;  %v11426_v24 = vld [vmem:[#allocation169_spill] sm:$0xff] }
 0x8b6   : > { %v4723_v52 = vmax.f32 %v4654_v15, 0.0  ;;  %v4181_v5 = vpop.permute.xlu1 %4180  ;;  %v4085_v55 = vpop.permute.xlu0 %4084  ;;  %v4331_v34 = vsel %vm2653_vm8, %v4299_v49, %v11407_v54  ;;  %v4286_v9 = vsel %vm326_vm0, %v4254_v0, %v11416_v25 }
 0x8b7   : > { %v4447_v57 = vsel %vm4422_vm11, %v4414_v23, %v4085_v55  ;;  %v4364_v15 = vsel %vm4357_vm5, %v4331_v34, %v9577_v8  ;;  %v11418_v34 = vld [vmem:[#allocation180_spill] sm:$0xff] }
 0x8b8   : > { %4755 = vst.msk [vmem:[%s10068_s21 + $0x68] sm:$0xff] %vm372_vm2, %v4723_v52  ;;  %v4479_v27 = vsel %vm2719_vm9, %v4447_v57, %v4181_v5  ;;  %v4396_v17 = vsel %vm2686_vm7, %v4364_v15, %v10019_v50  ;;  %v11409_v5 = vld [vmem:[#allocation103_spill] sm:$0xff]  ;;  %v11410_v57 = vld [vmem:[#allocation138_spill] sm:$0xff] }
 0x8b9   : > { %4917 = vmatmul.msk.f32.gmra.mxu2 %vm4496_vm12, %v4479_v27  ;;  %v4235_v27 = vsel %vm372_vm2, %v9657_v41, %v11410_v57  ;;  %v11421_v57 = vld [vmem:[#allocation72_spill] sm:$0xff] }
 0x8bb   : > { %v4656_v45 = vpop.f32.mrf.mxu2  ;;  %4096 = vrot.lane.b32.xlu2 %v3452_v56, %s5059_s23  ;;  %4098 = vrot.lane.b32.xlu0 %v3454_v40, %s5059_s23 }
 0x8bc   : > { %v4657_v58 = vadd.f32 %v10049_v37, %v4656_v45  ;;  %4192 = vrot.lane.b32.xlu1 %v3457_v60, %s5052_s25  ;;  %v11411_v45 = vld [vmem:[#allocation132_spill] sm:$0xff] }
 0x8bd   : > { %v4051_v10 = vpop.permute.xlu2 %4050 }
 0x8be   : > { %v4724_v59 = vmax.f32 %v4657_v58, 0.0  ;;  %v4049_v35 = vpop.permute.xlu1 %4048  ;;  %v3895_v63 = vpop.permute.xlu0 %3894  ;;  %v4267_v58 = vsel %vm326_vm0, %v4235_v27, %v11411_v45  ;;  %v11422_v27 = vld [vmem:[#allocation109_spill] sm:$0xff] }
 0x8bf   : > { %v4383_v36 = vsel %vm4357_vm5, %v4350_v20, %v3895_v63  ;;  %v4429_v18 = vsel %vm4422_vm11, %v4396_v17, %v4049_v35  ;;  %v11414_v63 = vld [vmem:[#allocation185_spill] sm:$0xff]  ;;  %v11417_v20 = vld [vmem:[#allocation60_spill] sm:$0xff] }
 0x8c0   : > { %4756 = vst.msk [vmem:[%s10068_s21 + $0x70] sm:$0xff] %vm372_vm2, %v4724_v59  ;;  %v4415_v2 = vsel %vm2686_vm7, %v4383_v36, %v10039_v22  ;;  %v11413_v59 = vld [vmem:[#allocation8_spill] sm:$0xff]  ;;  %v4319_v54 = vsel %vm4292_vm3, %v4286_v9, %v11417_v20 }
 0x8c1   : > { %v4351_v36 = vsel %vm2653_vm8, %v4319_v54, %v11418_v34 }
 0x8c3   : > { %v4659_v48 = vpop.f32.mrf.mxu2  ;;  %4194 = vrot.lane.b32.xlu2 %v3459_v32, %s5052_s25  ;;  %3964 = vrot.lane.b32.xlu0 %v9783_v11, %s5051_s24 }
 0x8c4   : > { %v4660_v14 = vadd.f32 %v10049_v37, %v4659_v48  ;;  %4060 = vrot.lane.b32.xlu1 %v11408_v7, %s5059_s23 }
 0x8c5   : > { %v4089_v53 = vpop.permute.xlu2 %4088 }
 0x8c6   : > { %v4725_v26 = vmax.f32 %v4660_v14, 0.0  ;;  %v4087_v28 = vpop.permute.xlu1 %4086  ;;  %v4145_v11 = vpop.permute.xlu0 %4144 }
 0x8c7   : > { %v4448_v23 = vsel %vm4422_vm11, %v4415_v2, %v4087_v28  ;;  %v4461_v8 = vsel %vm2719_vm9, %v4429_v18, %v4145_v11 }
 0x8c8   : > { %4757 = vst.msk [vmem:[%s10068_s21 + $0x78] sm:$0xff] %vm372_vm2, %v4725_v26  ;;  %4899 = vmatmul.msk.f32.gmra.mxu0 %vm4496_vm12, %v4461_v8  ;;  %v4480_v50 = vsel %vm2719_vm9, %v4448_v23, %v4183_v4  ;;  %v11412_v4 = vld [vmem:[#allocation123_spill] sm:$0xff] }
 0x8c9   : > { %4918 = vmatmul.msk.f32.gmra.mxu2 %vm4496_vm12, %v4480_v50  ;;  %v4300_v42 = vsel %vm4292_vm3, %v4267_v58, %v11412_v4  ;;  %v11419_v50 = vld [vmem:[#allocation118_spill] sm:$0xff] }
 0x8ca   : > { %v4332_v35 = vsel %vm2653_vm8, %v4300_v42, %v11413_v59  ;;  %v5036_v42 = vld [vmem:[#allocation3 + $0x140] sm:$0xff]  ;;  %v11423_v59 = vld [vmem:[#allocation51_spill] sm:$0xff] }
 0x8cb   : > { %v4662_v52 = vpop.f32.mrf.mxu2  ;;  %4156 = vrot.lane.b32.xlu2 %v11409_v5, %s5052_s25  ;;  %v4365_v51 = vsel %vm4357_vm5, %v4332_v35, %v11414_v63  ;;  %v11420_v5 = vld [vmem:[#allocation146_spill] sm:$0xff]  ;;  %v4255_v35 = vsel %vm372_vm2, %v5036_v42, %v11423_v59 }
 0x8cc   : > { %v4663_v22 = vadd.f32 %v10049_v37, %v4662_v52  ;;  %v4236_v52 = vsel %vm372_vm2, %v9702_v39, %v11419_v50  ;;  %v11433_v50 = vld [vmem:[#allocation62_spill] sm:$0xff] }
 0x8cd   : > { %v3899_v55 = vpop.permute.xlu2 %3898 }
 0x8ce   : > { %v4726_v56 = vmax.f32 %v4663_v22, 0.0  ;;  %v3897_v40 = vpop.permute.xlu1 %3896  ;;  %v3955_v60 = vpop.permute.xlu0 %3954  ;;  %v4268_v22 = vsel %vm326_vm0, %v4236_v52, %v11420_v5 }
 0x8cf   : > { %v4397_v41 = vsel %vm2686_vm7, %v4365_v51, %v3955_v60  ;;  %v4384_v48 = vsel %vm4357_vm5, %v4351_v36, %v3897_v40  ;;  %v11424_v51 = vld [vmem:[#allocation167_spill] sm:$0xff] }
 0x8d0   : > { %4758 = vst.msk [vmem:[%s10068_s21 + $0x80] sm:$0xff] %vm372_vm2, %v4726_v56  ;;  %v4430_v21 = vsel %vm4422_vm11, %v4397_v41, %v4051_v10  ;;  %v4287_v41 = vsel %vm326_vm0, %v4255_v35, %v11424_v51  ;;  %v11435_v51 = vld [vmem:[#allocation87_spill] sm:$0xff] }
 0x8d3   : > { %v4665_v1 = vpop.f32.mrf.mxu2 }
 0x8d4   : > { %v4666_v12 = vadd.f32 %v10049_v37, %v4665_v1 }
 0x8d5   : > { %v4149_v61 = vpop.permute.xlu2 %4148 }
 0x8d6   : > { %v4727_v32 = vmax.f32 %v4666_v12, 0.0  ;;  %v4147_v46 = vpop.permute.xlu1 %4146  ;;  %v3993_v33 = vpop.permute.xlu0 %3992 }
 0x8d7   : > { %v4462_v49 = vsel %vm2719_vm9, %v4430_v21, %v4147_v46  ;;  %v4416_v10 = vsel %vm2686_vm7, %v4384_v48, %v3993_v33  ;;  %v11427_v48 = vld [vmem:[#allocation121_spill] sm:$0xff] }
 0x8d8   : > { %4759 = vst.msk [vmem:[%s10068_s21 + $0x88] sm:$0xff] %vm372_vm2, %v4727_v32  ;;  %4900 = vmatmul.msk.f32.gmra.mxu0 %vm4496_vm12, %v4462_v49  ;;  %v4449_v2 = vsel %vm4422_vm11, %v4416_v10, %v4089_v53  ;;  %v4301_v53 = vsel %vm4292_vm3, %v4268_v22, %v11421_v57  ;;  %v4256_v10 = vsel %vm372_vm2, %v9779_v38, %v11427_v48  ;;  %v11434_v38 = vld [vmem:[#allocation63_spill] sm:$0xff] }
 0x8d9   : > { %v4333_v56 = vsel %vm2653_vm8, %v4301_v53, %v11422_v27 }
 0x8da   : > { %v4366_v40 = vsel %vm4357_vm5, %v4333_v56, %v9591_v19  ;;  %v11425_v19 = vld [vmem:[#allocation171_spill] sm:$0xff] }
 0x8db   : > { %v4668_v15 = vpop.f32.mrf.mxu2  ;;  %v4320_v1 = vsel %vm4292_vm3, %v4287_v41, %v11425_v19 }
 0x8dc   : > { %v4669_v14 = vadd.f32 %v10049_v37, %v4668_v15  ;;  %v4352_v44 = vsel %vm2653_vm8, %v4320_v1, %v11426_v24  ;;  %v11428_v15 = vld [vmem:[#allocation114_spill] sm:$0xff]  ;;  %v11436_v1 = vld [vmem:[#allocation155_spill] sm:$0xff] }
 0x8dd   : > { %v4614_v7 = vpop.f32.mrf.mxu0  ;;  %v3959_v11 = vpop.permute.xlu2 %3958  ;;  %v4385_v0 = vsel %vm4357_vm5, %v4352_v44, %v3899_v55  ;;  %v11437_v44 = vld [vmem:[#allocation168_spill] sm:$0xff] }
 0x8de   : > { %v4728_v17 = vmax.f32 %v4669_v14, 0.0  ;;  %v4615_v18 = vadd.f32 %v10049_v37, %v4614_v7  ;;  %v3957_v26 = vpop.permute.xlu1 %3956  ;;  %v4185_v28 = vpop.permute.xlu0 %4184  ;;  %v4237_v14 = vsel %vm372_vm2, %v9754_v62, %v11428_v15  ;;  %v11429_v7 = vld [vmem:[#allocation9_spill] sm:$0xff] }
 0x8df   : > { %v4481_v23 = vsel %vm2719_vm9, %v4449_v2, %v4185_v28  ;;  %v4398_v60 = vsel %vm2686_vm7, %v4366_v40, %v3957_v26  ;;  %v11431_v28 = vld [vmem:[#allocation166_spill] sm:$0xff] }
 0x8e0   : > { %4760 = vst.msk [vmem:[%s10068_s21 + $0x90] sm:$0xff] %vm372_vm2, %v4728_v17  ;;  %v4710_v8 = vmax.f32 %v4615_v18, 0.0  ;;  %4919 = vmatmul.msk.f32.gmra.mxu2 %vm4496_vm12, %v4481_v23  ;;  %v4288_v17 = vsel %vm326_vm0, %v4256_v10, %v11429_v7  ;;  %v11430_v18 = vld [vmem:[#allocation135_spill] sm:$0xff]  ;;  %v11432_v23 = vld [vmem:[#allocation174_spill] sm:$0xff]  ;;  %v11442_v7 = vld [vmem:[#allocation105_spill] sm:$0xff] }
 0x8e1   : > { %v4269_v26 = vsel %vm326_vm0, %v4237_v14, %v11430_v18  ;;  %v4321_v2 = vsel %vm4292_vm3, %v4288_v17, %v11431_v28  ;;  %v11441_v10 = vld [vmem:[#allocation58_spill] sm:$0xff] }
 0x8e2   : > { %4742 = vst.msk [vmem:[%s10068_s21] sm:$0xff] %vm372_vm2, %v4710_v8  ;;  %v4302_v8 = vsel %vm4292_vm3, %v4269_v26, %v11432_v23  ;;  %v4353_v52 = vsel %vm2653_vm8, %v4321_v2, %v11433_v50 }
 0x8e3   : > { %v4334_v5 = vsel %vm2653_vm8, %v4302_v8, %v11434_v38 }
 0x8e4   : > { %v4367_v57 = vsel %vm4357_vm5, %v4334_v5, %v9589_v6 }
 0x8e5   : > { %v3997_v63 = vpop.permute.xlu2 %3996  ;;  %v4399_v27 = vsel %vm2686_vm7, %v4367_v57, %v3959_v11 }
 0x8e6   : > { %v3995_v45 = vpop.permute.xlu1 %3994  ;;  %v4053_v58 = vpop.permute.xlu0 %4052 }
 0x8e7   : > { %v4431_v39 = vsel %vm4422_vm11, %v4398_v60, %v4053_v58  ;;  %v4417_v46 = vsel %vm2686_vm7, %v4385_v0, %v3995_v45  ;;  %v11438_v0 = vld [vmem:[#allocation139_spill] sm:$0xff] }
 0x8e8   : > { %v4463_v4 = vsel %vm2719_vm9, %v4431_v39, %v4149_v61 }
 0x8e9   : > { %4901 = vmatmul.msk.f32.gmra.mxu0 %vm4496_vm12, %v4463_v4 }
 0x8eb   : > { %v4671_v12 = vpop.f32.mrf.mxu2 }
 0x8ec   : > { %v4672_v61 = vadd.f32 %v10049_v37, %v4671_v12 }
 0x8ed   : > { %v4617_v32 = vpop.f32.mrf.mxu0  ;;  %v4189_v55 = vpop.permute.xlu2 %4188 }
 0x8ee   : > { %v4729_v33 = vmax.f32 %v4672_v61, 0.0  ;;  %v4618_v21 = vadd.f32 %v10049_v37, %v4617_v32  ;;  %v4187_v25 = vpop.permute.xlu1 %4186  ;;  %v4091_v9 = vpop.permute.xlu0 %4090 }
 0x8ef   : > { %v4450_v49 = vsel %vm4422_vm11, %v4417_v46, %v4091_v9  ;;  %v11439_v46 = vld [vmem:[#allocation75_spill] sm:$0xff] }
 0x8f0   : > { %4761 = vst.msk [vmem:[%s10068_s21 + $0x98] sm:$0xff] %vm372_vm2, %v4729_v33  ;;  %v4711_v20 = vmax.f32 %v4618_v21, 0.0  ;;  %v4482_v54 = vsel %vm2719_vm9, %v4450_v49, %v4187_v25  ;;  %v11440_v49 = vld [vmem:[#allocation15_spill] sm:$0xff] }
 0x8f1   : > { %4920 = vmatmul.msk.f32.gmra.mxu2 %vm4496_vm12, %v4482_v54 }
 0x8f2   : > { %4743 = vst.msk [vmem:[%s10068_s21 + $0x8] sm:$0xff] %vm372_vm2, %v4711_v20  ;;  %v4257_v20 = vsel %vm372_vm2, %v9842_v29, %v11440_v49  ;;  %v11443_v29 = vld [vmem:[#allocation13_spill] sm:$0xff] }
 0x8f3   : > { %v4289_v15 = vsel %vm326_vm0, %v4257_v20, %v11441_v10 }
 0x8f4   : > { %v4322_v17 = vsel %vm4292_vm3, %v4289_v15, %v11442_v7 }
 0x8f5   : > { %v4057_v56 = vpop.permute.xlu2 %4056  ;;  %v4354_v26 = vsel %vm2653_vm8, %v4322_v17, %v11443_v29 }
 0x8f6   : > { %v4055_v34 = vpop.permute.xlu1 %4054  ;;  %v3901_v36 = vpop.permute.xlu0 %3900 }
 0x8f7   : > { %v4386_v62 = vsel %vm4357_vm5, %v4353_v52, %v3901_v36  ;;  %v4432_v60 = vsel %vm4422_vm11, %v4399_v27, %v4055_v34 }
 0x8f8   : > { %v4418_v4 = vsel %vm2686_vm7, %v4386_v62, %v3997_v63  ;;  %v4238_v63 = vsel %vm372_vm2, %v9820_v13, %v11435_v51 }
 0x8f9   : > { %v4270_v12 = vsel %vm326_vm0, %v4238_v63, %v11436_v1 }
 0x8fa   : > { %v4303_v61 = vsel %vm4292_vm3, %v4270_v12, %v11437_v44  ;;  %v11448_v12 = vld [vmem:[#allocation44_spill] sm:$0xff]  ;;  %v11449_v44 = vld [vmem:[#allocation18_spill] sm:$0xff] }
 0x8fb   : > { %v4674_v22 = vpop.f32.mrf.mxu2  ;;  %v4335_v32 = vsel %vm2653_vm8, %v4303_v61, %v11438_v0  ;;  %v11450_v0 = vld [vmem:[#allocation54_spill] sm:$0xff] }
 0x8fc   : > { %v4675_v53 = vadd.f32 %v10049_v37, %v4674_v22  ;;  %v4368_v33 = vsel %vm4357_vm5, %v4335_v32, %v11439_v46  ;;  %v11451_v32 = vld [vmem:[#allocation46_spill] sm:$0xff] }
 0x8fd   : > { %v4620_v40 = vpop.f32.mrf.mxu0  ;;  %v4095_v24 = vpop.permute.xlu2 %4094 }
 0x8fe   : > { %v4730_v45 = vmax.f32 %v4675_v53, 0.0  ;;  %v4621_v58 = vadd.f32 %v10049_v37, %v4620_v40  ;;  %v4093_v39 = vpop.permute.xlu1 %4092  ;;  %v4151_v42 = vpop.permute.xlu0 %4150 }
 0x8ff   : > { %v4451_v59 = vsel %vm4422_vm11, %v4418_v4, %v4093_v39  ;;  %v4464_v6 = vsel %vm2719_vm9, %v4432_v60, %v4151_v42  ;;  %v11444_v60 = vld [vmem:[#allocation149_spill] sm:$0xff]  ;;  %v11445_v39 = vld [vmem:[#allocation120_spill] sm:$0xff]  ;;  %v11446_v42 = vld [vmem:[#allocation71_spill] sm:$0xff] }
 0x900   : > { %4762 = vst.msk [vmem:[%s10068_s21 + $0xa0] sm:$0xff] %vm372_vm2, %v4730_v45  ;;  %v4712_v35 = vmax.f32 %v4621_v58, 0.0  ;;  %4902 = vmatmul.msk.f32.gmra.mxu0 %vm4496_vm12, %v4464_v6  ;;  %v4483_v11 = vsel %vm2719_vm9, %v4451_v59, %v4189_v55  ;;  %v4239_v45 = vsel %vm372_vm2, %v9866_v3, %v11444_v60  ;;  %v11447_v6 = vld [vmem:[#allocation122_spill] sm:$0xff] }
 0x901   : > { %4921 = vmatmul.msk.f32.gmra.mxu2 %vm4496_vm12, %v4483_v11  ;;  %v4271_v4 = vsel %vm326_vm0, %v4239_v45, %v11445_v39 }
 0x902   : > { %4744 = vst.msk [vmem:[%s10068_s21 + $0x10] sm:$0xff] %vm372_vm2, %v4712_v35  ;;  %v4304_v59 = vsel %vm4292_vm3, %v4271_v4, %v11446_v42 }
 0x903   : > { %v4336_v35 = vsel %vm2653_vm8, %v4304_v59, %v11447_v6 }
 0x904   : > { %v4369_v11 = vsel %vm4357_vm5, %v4336_v35, %v9614_v31  ;;  %v4259_v31 = vsel %vm372_vm2, %v9916_v16, %v11450_v0 }
 0x905   : > { %v3905_v28 = vpop.permute.xlu2 %3904 }
 0x906   : > { %v3903_v41 = vpop.permute.xlu1 %3902  ;;  %v3961_v19 = vpop.permute.xlu0 %3960 }
 0x907   : > { %v4400_v21 = vsel %vm2686_vm7, %v4368_v33, %v3961_v19  ;;  %v4387_v2 = vsel %vm4357_vm5, %v4354_v26, %v3903_v41  ;;  %v11452_v33 = vld [vmem:[#allocation119_spill] sm:$0xff] }
 0x908   : > { %v4433_v48 = vsel %vm4422_vm11, %v4400_v21, %v4057_v56  ;;  %v4291_v21 = vsel %vm326_vm0, %v4259_v31, %v11452_v33 }
 0x90b   : > { %v4677_v25 = vpop.f32.mrf.mxu2 }
 0x90c   : > { %v4678_v13 = vadd.f32 %v10049_v37, %v4677_v25  ;;  %v11453_v25 = vld [vmem:[#allocation175_spill] sm:$0xff] }
 0x90d   : > { %v4623_v9 = vpop.f32.mrf.mxu0  ;;  %v4001_v5 = vpop.permute.xlu2 %4000 }
 0x90e   : > { %v4731_v54 = vmax.f32 %v4678_v13, 0.0  ;;  %v4624_v55 = vadd.f32 %v10049_v37, %v4623_v9  ;;  %v4153_v34 = vpop.permute.xlu1 %4152  ;;  %v3999_v36 = vpop.permute.xlu0 %3998 }
 0x90f   : > { %v4465_v14 = vsel %vm2719_vm9, %v4433_v48, %v4153_v34  ;;  %v4419_v23 = vsel %vm2686_vm7, %v4387_v2, %v3999_v36 }
 0x910   : > { %4763 = vst.msk [vmem:[%s10068_s21 + $0xa8] sm:$0xff] %vm372_vm2, %v4731_v54  ;;  %v4713_v18 = vmax.f32 %v4624_v55, 0.0  ;;  %4903 = vmatmul.msk.f32.gmra.mxu0 %vm4496_vm12, %v4465_v14  ;;  %v4452_v52 = vsel %vm4422_vm11, %v4419_v23, %v4095_v24  ;;  %v4258_v24 = vsel %vm372_vm2, %v9879_v30, %v11448_v12  ;;  %v11454_v30 = vld [vmem:[#allocation38_spill] sm:$0xff]  ;;  %v11455_v55 = vld [vmem:[#allocation55_spill] sm:$0xff] }
 0x911   : > { %v4290_v61 = vsel %vm326_vm0, %v4258_v24, %v11449_v44  ;;  %v4324_v49 = vsel %vm4292_vm3, %v4291_v21, %v11454_v30 }
 0x912   : > { %4745 = vst.msk [vmem:[%s10068_s21 + $0x18] sm:$0xff] %vm372_vm2, %v4713_v18  ;;  %v4323_v46 = vsel %vm4292_vm3, %v4290_v61, %v11451_v32  ;;  %v4356_v16 = vsel %vm2653_vm8, %v4324_v49, %v11455_v55 }
 0x913   : > { %v4355_v13 = vsel %vm2653_vm8, %v4323_v46, %v11453_v25 }
 0x914   : > { %v4388_v20 = vsel %vm4357_vm5, %v4355_v13, %v3905_v28 }
 0x915   : > { %v4097_v3 = vpop.permute.xlu2 %4096  ;;  %v4420_v34 = vsel %vm2686_vm7, %v4388_v20, %v4001_v5  ;;  %v11458_v5 = vld [vmem:[#allocation24_spill] sm:$0xff] }
 0x916   : > { %v3963_v8 = vpop.permute.xlu1 %3962  ;;  %v4191_v50 = vpop.permute.xlu0 %4190  ;;  %v4453_v36 = vsel %vm4422_vm11, %v4420_v34, %v4097_v3 }
 0x917   : > { %v4484_v38 = vsel %vm2719_vm9, %v4452_v52, %v4191_v50  ;;  %v4401_v51 = vsel %vm2686_vm7, %v4369_v11, %v3963_v8  ;;  %v11456_v8 = vld [vmem:[#allocation61_spill] sm:$0xff]  ;;  %v11457_v52 = vld [vmem:[#allocation26_spill] sm:$0xff] }
 0x918   : > { %4922 = vmatmul.msk.f32.gmra.mxu2 %vm4496_vm12, %v4484_v38  ;;  %v4240_v50 = vsel %vm372_vm2, %v9903_v43, %v11456_v8 }
 0x919   : > { %v4272_v38 = vsel %vm326_vm0, %v4240_v50, %v11457_v52 }
 0x91b   : > { %v4680_v62 = vpop.f32.mrf.mxu2 }
 0x91c   : > { %v4681_v22 = vadd.f32 %v10049_v37, %v4680_v62  ;;  %v4305_v62 = vsel %vm4292_vm3, %v4272_v38, %v11458_v5 }
 0x91d   : > { %v4626_v57 = vpop.f32.mrf.mxu0  ;;  %v4195_v7 = vpop.permute.xlu2 %4194 }
 0x91e   : > { %v4732_v53 = vmax.f32 %v4681_v22, 0.0  ;;  %v4627_v27 = vadd.f32 %v10049_v37, %v4626_v57  ;;  %v4059_v56 = vpop.permute.xlu1 %4058  ;;  %v3907_v40 = vpop.permute.xlu0 %3906  ;;  %v11459_v22 = vld [vmem:[#allocation164_spill] sm:$0xff] }
 0x91f   : > { %v4434_v63 = vsel %vm4422_vm11, %v4401_v51, %v4059_v56  ;;  %v4389_v48 = vsel %vm4357_vm5, %v4356_v16, %v3907_v40  ;;  %v4337_v57 = vsel %vm2653_vm8, %v4305_v62, %v11459_v22 }
 0x920   : > { %4764 = vst.msk [vmem:[%s10068_s21 + $0xb0] sm:$0xff] %vm372_vm2, %v4732_v53  ;;  %v4714_v58 = vmax.f32 %v4627_v27, 0.0  ;;  %v4370_v27 = vsel %vm4357_vm5, %v4337_v57, %v9609_v47 }
 0x922   : > { %4746 = vst.msk [vmem:[%s10068_s21 + $0x20] sm:$0xff] %vm372_vm2, %v4714_v58 }
 0x925   : > { %v4157_v40 = vpop.permute.xlu2 %4156 }
 0x926   : > { %v4155_v41 = vpop.permute.xlu1 %4154  ;;  %v4003_v19 = vpop.permute.xlu0 %4002 }
 0x927   : > { %v4466_v1 = vsel %vm2719_vm9, %v4434_v63, %v4155_v41  ;;  %v4421_v17 = vsel %vm2686_vm7, %v4389_v48, %v4003_v19 }
 0x928   : > { %4904 = vmatmul.msk.f32.gmra.mxu0 %vm4496_vm12, %v4466_v1 }
 0x92b   : > { %v4683_v9 = vpop.f32.mrf.mxu2 }
 0x92c   : > { %v4684_v54 = vadd.f32 %v10049_v37, %v4683_v9 }
 0x92e   : > { %v4733_v10 = vmax.f32 %v4684_v54, 0.0  ;;  %v4193_v15 = vpop.permute.xlu1 %4192  ;;  %v4629_v14 = vpop.f32.mrf.mxu0 }
 0x92f   : > { %v4630_v18 = vadd.f32 %v10049_v37, %v4629_v14  ;;  %v4099_v29 = vpop.permute.xlu0 %4098  ;;  %v4485_v26 = vsel %vm2719_vm9, %v4453_v36, %v4193_v15 }
 0x930   : > { %4765 = vst.msk [vmem:[%s10068_s21 + $0xb8] sm:$0xff] %vm372_vm2, %v4733_v10  ;;  %v4454_v28 = vsel %vm4422_vm11, %v4421_v17, %v4099_v29  ;;  %4923 = vmatmul.msk.f32.gmra.mxu2 %vm4496_vm12, %v4485_v26 }
 0x931   : > { %v4715_v2 = vmax.f32 %v4630_v18, 0.0  ;;  %v4486_v23 = vsel %vm2719_vm9, %v4454_v28, %v4195_v7 }
 0x932   : > { %4924 = vmatmul.msk.f32.vlgmr.msra.gmra.mxu3 %vm4496_vm12, %v4486_v23 }
 0x933   : > { %4747 = vst.msk [vmem:[%s10068_s21 + $0x28] sm:$0xff] %vm372_vm2, %v4715_v2 }
 0x936   : > { %v4061_v53 = vpop.permute.xlu1 %4060 }
 0x937   : > { %v3965_v56 = vpop.permute.xlu0 %3964 }
 0x938   : > { %v4402_v43 = vsel %vm2686_vm7, %v4370_v27, %v3965_v56 }
 0x939   : > { %v4435_v60 = vsel %vm4422_vm11, %v4402_v43, %v4061_v53 }
 0x93a   : > { %v4467_v45 = vsel %vm2719_vm9, %v4435_v60, %v4157_v40 }
 0x93b   : > { %4905 = vmatmul.msk.f32.gmra.mxu0 %vm4496_vm12, %v4467_v45 }
 0x93c   : > { %v4686_v58 = vpop.f32.mrf.mxu2 }
 0x93d   : > { %v4687_v39 = vadd.f32 %v10049_v37, %v4686_v58 }
 0x93f   : > { %v4734_v4 = vmax.f32 %v4687_v39, 0.0 }
 0x941   : > { %4766 = vst.msk [vmem:[%s10068_s21 + $0xc0] sm:$0xff] %vm372_vm2, %v4734_v4 }
 0x945   : > { %v4632_v42 = vpop.f32.mrf.mxu0 }
 0x946   : > { %v4633_v47 = vadd.f32 %v10049_v37, %v4632_v42 }
 0x948   : > { %v4716_v59 = vmax.f32 %v4633_v47, 0.0 }
 0x94a   : > { %4748 = vst.msk [vmem:[%s10068_s21 + $0x30] sm:$0xff] %vm372_vm2, %v4716_v59 }
 0x94c   : > { %v4689_v6 = vpop.f32.mrf.mxu2 }
 0x94d   : > { %v4690_v35 = vadd.f32 %v10049_v37, %v4689_v6 }
 0x94f   : > { %v4735_v11 = vmax.f32 %v4690_v35, 0.0 }
 0x951   : > { %4767 = vst.msk [vmem:[%s10068_s21 + $0xc8] sm:$0xff] %vm372_vm2, %v4735_v11 }
 0x955   : > { %v4635_v51 = vpop.f32.mrf.mxu0 }
 0x956   : > { %v4636_v3 = vadd.f32 %v10049_v37, %v4635_v51 }
 0x958   : > { %v4717_v63 = vmax.f32 %v4636_v3, 0.0 }
 0x95a   : > { %4749 = vst.msk [vmem:[%s10068_s21 + $0x38] sm:$0xff] %vm372_vm2, %v4717_v63 }
 0x963   : > { %v4692_v41 = vpop.f32.mrf.mxu2 }
 0x964   : > { %v4693_v19 = vadd.f32 %v10049_v37, %v4692_v41 }
 0x966   : > { %v4736_v1 = vmax.f32 %v4693_v19, 0.0  ;;  %v4638_v12 = vpop.f32.mrf.mxu0 }
 0x967   : > { %v4639_v24 = vadd.f32 %v10049_v37, %v4638_v12 }
 0x968   : > { %4768 = vst.msk [vmem:[%s10068_s21 + $0xd0] sm:$0xff] %vm372_vm2, %v4736_v1 }
 0x969   : > { %v4718_v44 = vmax.f32 %v4639_v24, 0.0 }
 0x96b   : > { %4750 = vst.msk [vmem:[%s10068_s21 + $0x40] sm:$0xff] %vm372_vm2, %v4718_v44 }
 0x974   : > { %v4695_v61 = vpop.f32.mrf.mxu2 }
 0x975   : > { %v4696_v0 = vadd.f32 %v10049_v37, %v4695_v61 }
 0x977   : > { %v4737_v31 = vmax.f32 %v4696_v0, 0.0 }
 0x979   : > { %4769 = vst.msk [vmem:[%s10068_s21 + $0xd8] sm:$0xff] %vm372_vm2, %v4737_v31 }
 0x97d   : > { %v4641_v32 = vpop.f32.mrf.mxu0 }
 0x97e   : > { %v4642_v46 = vadd.f32 %v10049_v37, %v4641_v32 }
 0x980   : > { %v4719_v33 = vmax.f32 %v4642_v46, 0.0 }
 0x982   : > { %4751 = vst.msk [vmem:[%s10068_s21 + $0x48] sm:$0xff] %vm372_vm2, %v4719_v33 }
 0x984   : > { %v4698_v21 = vpop.f32.mrf.mxu2 }
 0x985   : > { %v4699_v25 = vadd.f32 %v10049_v37, %v4698_v21 }
 0x987   : > { %v4738_v13 = vmax.f32 %v4699_v25, 0.0 }
 0x989   : > { %4770 = vst.msk [vmem:[%s10068_s21 + $0xe0] sm:$0xff] %vm372_vm2, %v4738_v13 }
 0x98d   : > { %v4644_v9 = vpop.f32.mrf.mxu0 }
 0x98e   : > { %v4645_v30 = vadd.f32 %v10049_v37, %v4644_v9 }
 0x990   : > { %v4720_v49 = vmax.f32 %v4645_v30, 0.0 }
 0x992   : > { %4752 = vst.msk [vmem:[%s10068_s21 + $0x50] sm:$0xff] %vm372_vm2, %v4720_v49 }
 0x99b   : > { %v4701_v20 = vpop.f32.mrf.mxu2 }
 0x99c   : > { %v4702_v54 = vadd.f32 %v10049_v37, %v4701_v20 }
 0x99e   : > { %v4739_v55 = vmax.f32 %v4702_v54, 0.0 }
 0x9a0   : > { %4771 = vst.msk [vmem:[%s10068_s21 + $0xe8] sm:$0xff] %vm372_vm2, %v4739_v55 }
 0x9a5   : > { %v4647_v16 = vpop.f32.mrf.mxu0 }
 0x9a6   : > { %v4648_v34 = vadd.f32 %v10049_v37, %v4647_v16 }
 0x9a8   : > { %v4721_v36 = vmax.f32 %v4648_v34, 0.0 }
 0x9aa   : > { %4753 = vst.msk [vmem:[%s10068_s21 + $0x58] sm:$0xff] %vm372_vm2, %v4721_v36 }
 0x9b3   : > { %v4704_v48 = vpop.f32.mrf.mxu2 }
 0x9b4   : > { %v4705_v10 = vadd.f32 %v10049_v37, %v4704_v48 }
 0x9b5   : > { %v4707_v15 = vpop.f32.mrf.mxu3 }
 0x9b6   : > { %v4740_v14 = vmax.f32 %v4705_v10, 0.0  ;;  %v4708_v7 = vadd.f32 %v10049_v37, %v4707_v15 }
 0x9b8   : > { %4772 = vst.msk [vmem:[%s10068_s21 + $0xf0] sm:$0xff] %vm372_vm2, %v4740_v14  ;;  %v4741_v17 = vmax.f32 %v4708_v7, 0.0  ;;  %v4650_v18 = vpop.f32.mrf.mxu0 }
 0x9b9   : > { %v4651_v29 = vadd.f32 %v10049_v37, %v4650_v18 }
 0x9ba   : > { %4773 = vst.msk [vmem:[%s10068_s21 + $0xf8] sm:$0xff] %vm372_vm2, %v4741_v17 }
 0x9bb   : > { %v4722_v26 = vmax.f32 %v4651_v29, 0.0 }
 0x9bd   : > { %4754 = vst.msk [vmem:[%s10068_s21 + $0x60] sm:$0xff] %vm372_vm2, %v4722_v26 }
 0x9be PF: > { %s18_s27 = sadd.s32 1, %s5043_s27  }
 0x9bf   : > { %p15_p4 = scmp.ge.s32.totalorder %s18_s27, 4  }
 0x9c1   :  { %17 = sbr.rel (!%p15_p4) target bundleno = 1 (0x1), region = 96 }

</bundles_post_ra>
